<compile_context>
chip_gen: v7x
topology: tpu7x:2x2x1
jax: 0.10.0
libtpu: 0.0.40
codegen_flags: <defaults>
</compile_context>

<pallas_src>
import functools

import jax
import jax.numpy as jnp
from jax import lax
from jax.experimental import pallas as pl
from jax.experimental.pallas import tpu as pltpu


# ----------------------------------------------------------------------------
# helpers traced inside kernels
# ----------------------------------------------------------------------------
def _entmax15(z, axis=-1, n_bisect=10, n_newton=3):
    """entmax with alpha=1.5 along `axis`.

    Solves sum_i max(z_i/2 - tau, 0)^2 == 1 via bisection bracketing followed
    by Newton refinement (monotone from the low end of the bracket since f is
    convex and decreasing), then recomputes p from the final tau.  -inf
    entries (causal mask) map exactly to 0.
    TODO(synk): exact sort-based entmax15 has no clean Mosaic lowering; this
    solve agrees to float32 precision.
    """
    m = jnp.max(z, axis=axis, keepdims=True)
    z = (z - m) * 0.5                       # tau* lies in [-1, 0)
    lo = jnp.full(m.shape, -1.0, jnp.float32)
    hi = jnp.zeros(m.shape, jnp.float32)

    for _ in range(n_bisect):               # unrolled: full scheduler visibility
        tau = 0.5 * (lo + hi)
        r = jnp.maximum(z - tau, 0.0)
        ge = jnp.sum(r * r, axis=axis, keepdims=True) >= 1.0
        lo = jnp.where(ge, tau, lo)
        hi = jnp.where(ge, hi, tau)

    tau = lo                                # f(lo) >= 1 -> Newton stays below tau*
    for _ in range(n_newton):
        r = jnp.maximum(z - tau, 0.0)
        f = jnp.sum(r * r, axis=axis, keepdims=True)
        d = jnp.sum(r, axis=axis, keepdims=True)
        tau = tau + (f - 1.0) * pl.reciprocal(2.0 * d + 1e-12, approx=True)

    p = jnp.maximum(z - tau, 0.0)
    p = p * p
    return p * pl.reciprocal(jnp.sum(p, axis=axis, keepdims=True) + 1e-30,
                             approx=True)


def _layer_norm(x, gamma, beta, eps=1e-5):
    mu = jnp.mean(x, axis=-1, keepdims=True)
    xc = x - mu
    var = jnp.mean(xc * xc, axis=-1, keepdims=True)
    return xc * lax.rsqrt(var + eps) * gamma + beta


def _vmem_full():
    return pl.BlockSpec(memory_space=pltpu.MemorySpace.VMEM)


# ----------------------------------------------------------------------------
# Kernel 1: LocalVariableSelection (causal conv per variable + entmax gating)
#   grid = (batch,), input read from HBM exactly once, shifts built in VMEM,
#   scores in (V, T) layout so tokens ride the lane axis during the entmax.
# ----------------------------------------------------------------------------
def _local_var_selection_kernel(xt_ref, convw_ref, convb_ref, linw_ref, linb_ref,
                                noise_ref, weighted_ref, weights_ref, *, kernel_size):
    xt = xt_ref[0]                      # (V, T)  tokens on the lane axis
    cw = convw_ref[...]                 # (V, K, D)
    cb = convb_ref[...]                 # (V, D)
    lw = linw_ref[...]                  # (1, D)
    lb = linb_ref[0, 0]                 # scalar bias of the scoring linear
    noise = noise_ref[0]                # (V, T)

    V, T = xt.shape
    K = kernel_size

    # Causal shifts: xs[j][v, t] = x[v, t - (K-1-j)], zero before t=0.  Built
    # in-kernel (no K duplicated HBM copies) with a tiny shift-matrix matmul.
    src = lax.broadcasted_iota(jnp.int32, (T, T), 0)
    dst = lax.broadcasted_iota(jnp.int32, (T, T), 1)
    xs = []
    for j in range(K):
        s = K - 1 - j
        if s == 0:
            xs.append(xt)
        else:
            shift = (src == dst - s).astype(jnp.float32)        # (T, T)
            xs.append(jnp.dot(xt, shift, preferred_element_type=jnp.float32))

    # score[v, t] = lb + <cb[v], lw> + sum_j xs[j][v, t] * <cw[v, j], lw>
    cwl = jnp.sum(cw * lw[None, :, :], axis=-1)                 # (V, K)
    cbl = jnp.sum(cb * lw, axis=-1, keepdims=True)              # (V, 1)
    scores = cbl + lb
    for j in range(K):
        scores = scores + xs[j] * cwl[:, j:j + 1]
    scores = jnp.clip(scores, -10.0, 10.0) + noise              # clamp, THEN noise (torch order)

    w = _entmax15(scores, axis=0)                               # entmax over variables
    weights_ref[0] = w

    # weighted[t, :] = sum_v w[v, t] * (cb[v, :] + sum_j xs[j][v, t] * cw[v, j, :])
    acc = lax.dot_general(w, cb, (((0,), (0,)), ((), ())),
                          preferred_element_type=jnp.float32)   # (T, D)
    for j in range(K):
        acc = acc + lax.dot_general(w * xs[j], cw[:, j, :],
                                    (((0,), (0,)), ((), ())),
                                    preferred_element_type=jnp.float32)
    weighted_ref[0] = acc


def local_var_selection(x, sel, noise, kernel_size):
    B, T, V = x.shape
    D = sel['convw'].shape[2]
    # layout plumbing in the wrapper: tokens onto the lane axis
    xt = jnp.transpose(x, (0, 2, 1))            # (B, V, T)
    nt = jnp.transpose(noise, (0, 2, 1))        # (B, V, T)

    kernel = functools.partial(_local_var_selection_kernel, kernel_size=kernel_size)
    weighted, weights_t = pl.pallas_call(
        kernel,
        out_shape=(jax.ShapeDtypeStruct((B, T, D), jnp.float32),
                   jax.ShapeDtypeStruct((B, V, T), jnp.float32)),
        grid_spec=pltpu.PrefetchScalarGridSpec(
            num_scalar_prefetch=0,
            grid=(B,),
            in_specs=[
                pl.BlockSpec((1, V, T), lambda b: (b, 0, 0)),   # x (one seq / step)
                _vmem_full(),                                   # conv weights
                _vmem_full(),                                   # conv biases
                _vmem_full(),                                   # scoring linear w
                _vmem_full(),                                   # scoring linear b
                pl.BlockSpec((1, V, T), lambda b: (b, 0, 0)),   # noise
            ],
            out_specs=(
                pl.BlockSpec((1, T, D), lambda b: (b, 0, 0)),
                pl.BlockSpec((1, V, T), lambda b: (b, 0, 0)),
            ),
        ),
        compiler_params=pltpu.CompilerParams(dimension_semantics=("parallel",)),
    )(xt, sel['convw'], sel['convb'], sel['linw'], sel['linb'], nt)
    return weighted, jnp.transpose(weights_t, (0, 2, 1))


# ----------------------------------------------------------------------------
# Kernel 2: fused InterFormerBlock stack + per-quantile projection
#   grid = (B // Bt, num_layers); residual stream carried in VMEM scratch.
# ----------------------------------------------------------------------------
def _block_stack_kernel(x_ref, wattn_ref, battn_ref, wo_ref, bo_ref, ln1_ref,
                        wff1_ref, bff1_ref, wff2_ref, bff2_ref, ln2_ref,
                        projw_ref, projb_ref,
                        attn_ref, out_ref, xs_ref,
                        *, num_heads, t_real, resident):
    l = pl.program_id(1)
    n_layers = pl.num_programs(1)
    li = l if resident else 0            # resident: index the stacked weights by layer

    @pl.when(l == 0)
    def _():
        xs_ref[...] = x_ref[...]
        out_ref[...] = jnp.zeros(out_ref.shape, out_ref.dtype)

    x = xs_ref[...]                      # (Bt, T, D) f32 residual stream
    Bt, T, D = x.shape
    H = num_heads
    dk = D // H
    N = Bt * T
    xf = x.reshape(N, D)

    # ---- sparse multi-head attention ---------------------------------------
    qkv = (jnp.dot(xf.astype(jnp.bfloat16), wattn_ref[li],
                   preferred_element_type=jnp.float32) + battn_ref[li])   # (N, 3D)
    q = qkv[:, 0:D] * (1.0 / (dk ** 0.5))       # scale folded into q once
    k = qkv[:, D:2 * D]
    v = qkv[:, 2 * D:3 * D]

    # one batched MXU dot over all heads & sequences (no concat of score slabs)
    q_h = jnp.stack([q[:, h * dk:(h + 1) * dk].reshape(Bt, T, dk) for h in range(H)],
                    axis=0).reshape(H * Bt, T, dk)
    k_h = jnp.stack([k[:, h * dk:(h + 1) * dk].reshape(Bt, T, dk) for h in range(H)],
                    axis=0).reshape(H * Bt, T, dk)
    s = lax.dot_general(q_h, k_h, (((2,), (2,)), ((0,), (0,))),
                        preferred_element_type=jnp.float32)               # (H*Bt, T, T)

    row = lax.broadcasted_iota(jnp.int32, (1, T, T), 1)
    col = lax.broadcasted_iota(jnp.int32, (1, T, T), 2)
    s = jnp.where(col > row, -jnp.inf, s)       # strict upper triangle masked

    w_all = _entmax15(s)                        # ONE batched entmax pass
    # torch: weights.mean(dim=heads) and V.mean(dim=heads), THEN matmul
    w_avg = jnp.mean(w_all.reshape(H, Bt, T, T), axis=0)                   # (Bt, T, T)

    v_comb = v[:, 0:dk]
    for h in range(1, H):
        v_comb = v_comb + v[:, h * dk:(h + 1) * dk]
    v_comb = (v_comb * (1.0 / H)).reshape(Bt, T, dk)                       # (Bt, T, dk)

    attn_ref[...] = w_avg.reshape(Bt, 1, T, T).astype(attn_ref.dtype)      # bf16 log

    o = lax.dot_general(w_avg, v_comb, (((2,), (1,)), ((0,), (0,))),
                        preferred_element_type=jnp.float32)                # (Bt, T, dk)
    attn_out = (jnp.dot(o.reshape(N, dk).astype(jnp.bfloat16), wo_ref[li],
                        preferred_element_type=jnp.float32) + bo_ref[li])  # (N, D)

    ln1 = ln1_ref[li]
    x1 = _layer_norm(xf + attn_out, ln1[0:1, :], ln1[1:2, :])              # (N, D)

    # ---- feed-forward --------------------------------------------------------
    h1 = jnp.maximum(jnp.dot(x1.astype(jnp.bfloat16), wff1_ref[li],
                             preferred_element_type=jnp.float32) + bff1_ref[li], 0.0)
    ff = (jnp.dot(h1.astype(jnp.bfloat16), wff2_ref[li],
                  preferred_element_type=jnp.float32) + bff2_ref[li])
    ln2 = ln2_ref[li]
    x2 = _layer_norm(ff + x1, ln2[0:1, :], ln2[1:2, :])                    # (N, D)

    xs_ref[...] = x2.reshape(Bt, T, D)

    # ---- fused per-quantile projection of the last (real) hidden state ------
    @pl.when(l == n_layers - 1)
    def _():
        last = x2.reshape(Bt, T, D)[:, t_real - 1, :]                      # (Bt, D)
        out_ref[...] = (jnp.dot(last.astype(jnp.bfloat16), projw_ref[...],
                                preferred_element_type=jnp.float32)
                        + projb_ref[...]).reshape(out_ref.shape)


def interformer_blocks(x_pad, params, *, num_heads, t_real):
    B, T, D = x_pad.shape
    L = int(params['w_attn'].shape[0])
    d_ff = int(params['wff1'].shape[2])
    dk = D // num_heads
    qh = int(params['proj_w'].shape[1])

    # ---- batch tile: raise matmul M = Bt*T toward the MXU row count ---------
    bt_target = max(1, 256 // T)
    Bt = 1
    for cand in range(min(B, bt_target), 0, -1):
        if B % cand == 0:
            Bt = cand
            break
    # NOTE: on multi-TensorCore chips one may prefer keeping B//Bt >= n_cores.

    # ---- resident vs per-layer-streamed weights ------------------------------
    w_big = (params['w_attn'].size + params['wo'].size + params['wff1'].size
             + params['wff2'].size + params['proj_w'].size) * 2            # bf16
    w_small = (params['b_attn'].size + params['bo'].size + params['ln1'].size
               + params['bff1'].size + params['bff2'].size + params['ln2'].size
               + params['proj_b'].size) * 4
    wbytes = int(w_big + w_small)
    try:
        vmem_cap = int(pltpu.get_tpu_info().vmem_capacity_bytes)
    except Exception:
        vmem_cap = 64 * 1024 * 1024     # conservative (v7x-sized) fallback
    resident = wbytes <= int(0.3 * vmem_cap)   # full weight stack lives in VMEM

    bf = lambda a: a.astype(jnp.bfloat16)      # big matmul operands -> bf16 (f32 accum)
    kernel = functools.partial(_block_stack_kernel, num_heads=num_heads,
                               t_real=t_real, resident=resident)

    if resident:
        per_layer_specs = [_vmem_full() for _ in range(10)]
    else:
        stream = lambda shape: pl.BlockSpec(shape, lambda b, l: (l, 0, 0))
        stream3 = lambda shape: pl.BlockSpec(shape, lambda b, l: (l, 0, 0),
                                             pipeline_mode=pl.Buffered(3))
        per_layer_specs = [
            stream3((1, D, 3 * D)),    # w_qkv
            stream((1, 1, 3 * D)),     # b_qkv
            stream((1, dk, D)),        # w_o
            stream((1, 1, D)),         # b_o
            stream((1, 2, D)),         # ln1 gamma/beta
            stream3((1, D, d_ff)),     # w_ff1
            stream((1, 1, d_ff)),      # b_ff1
            stream3((1, d_ff, D)),     # w_ff2
            stream((1, 1, D)),         # b_ff2
            stream((1, 2, D)),         # ln2 gamma/beta
        ]

    grid_spec = pltpu.PrefetchScalarGridSpec(
        num_scalar_prefetch=0,
        grid=(B // Bt, L),
        in_specs=([pl.BlockSpec((Bt, T, D), lambda b, l: (b, 0, 0))]        # x
                  + per_layer_specs
                  + [_vmem_full(), _vmem_full()]),                          # proj_w / proj_b
        out_specs=(
            pl.BlockSpec((Bt, 1, T, T), lambda b, l: (b, l, 0, 0)),         # attn logs (bf16)
            pl.BlockSpec((Bt, 1, qh), lambda b, l: (b, 0, 0)),              # quantile head
        ),
        scratch_shapes=[pltpu.VMEM((Bt, T, D), jnp.float32)],
    )

    # VMEM budget derived from actual tile sizes (+100% headroom), capped near
    # the physical capacity of the current generation.
    act = (3 * Bt * T * D * 4
           + Bt * T * 3 * D * 4
           + 3 * Bt * num_heads * T * T * 4
           + Bt * T * d_ff * 4
           + 4 * Bt * T * T * 4)
    weight_live = wbytes if resident else 3 * max(1, wbytes // max(1, L))
    vmem_limit = int(min(max(2 * (act + weight_live), 32 * 2 ** 20),
                         max(32 * 2 ** 20, int(0.85 * vmem_cap))))

    attn, out = pl.pallas_call(
        kernel,
        out_shape=(jax.ShapeDtypeStruct((B, L, T, T), jnp.bfloat16),
                   jax.ShapeDtypeStruct((B, 1, qh), jnp.float32)),
        grid_spec=grid_spec,
        compiler_params=pltpu.CompilerParams(
            dimension_semantics=("parallel", "arbitrary"),
            vmem_limit_bytes=vmem_limit),
    )(x_pad, bf(params['w_attn']), params['b_attn'],
      bf(params['wo']), params['bo'], params['ln1'],
      bf(params['wff1']), params['bff1'], bf(params['wff2']), params['bff2'],
      params['ln2'], bf(params['proj_w']), params['proj_b'])
    return out, attn


# ----------------------------------------------------------------------------
# Full forward (glue)
# ----------------------------------------------------------------------------
@functools.partial(jax.jit,
                   static_argnames=("num_heads", "kernel_size", "horizon", "n_quantiles"))
def interformer_forward(params, x_cond, x_pred, noise_cond, noise_pred,
                        *, num_heads, kernel_size, horizon, n_quantiles):
    xc, v_cond = local_var_selection(x_cond, params['sel_cond'], noise_cond, kernel_size)
    xp, v_pred = local_var_selection(x_pred, params['sel_pred'], noise_pred, kernel_size)
    x = jnp.concatenate([xc, xp], axis=1)              # (B, T, D)
    B, T, D = x.shape

    # Pad T up to a multiple of 8 (exact under the causal mask; layout plumbing).
    t_pad = max(8, ((T + 7) // 8) * 8)
    if t_pad != T:
        x = jnp.pad(x, ((0, 0), (0, t_pad - T), (0, 0)))

    out_raw, attn_all = interformer_blocks(x, params, num_heads=num_heads, t_real=T)

    out = out_raw.reshape(B, n_quantiles, horizon)
    attention_logs = [attn_all[:, l, :T, :T].astype(jnp.float32)
                      for l in range(attn_all.shape[1])]
    return out, v_cond, v_pred, attention_logs


# ----------------------------------------------------------------------------
# Deterministic parameter init (synthetic; matches torch module's shapes)
# ----------------------------------------------------------------------------
def _u(key, shape, scale):
    return jax.random.uniform(key, shape, jnp.float32, -scale, scale)


def init_params(key, num_vars_cond, num_vars_pred, d_model, kernel_size,
                num_heads, d_ff, num_layers, horizon, quantiles):
    keys = iter(jax.random.split(key, 64))
    dk = d_model // num_heads
    nq = len(quantiles)
    L = num_layers

    def selector(num_vars):
        s = 1.0 / (kernel_size ** 0.5)
        return {
            'convw': _u(next(keys), (num_vars, kernel_size, d_model), s),
            'convb': _u(next(keys), (num_vars, d_model), s),
            'linw': _u(next(keys), (1, d_model), 1.0 / d_model ** 0.5),
            'linb': _u(next(keys), (1, 1), 1.0 / d_model ** 0.5),
        }

    s_d = 1.0 / d_model ** 0.5
    s_dk = 1.0 / dk ** 0.5
    s_ff = 1.0 / d_ff ** 0.5
    ln_init = jnp.concatenate([jnp.ones((L, 1, d_model), jnp.float32),
                               jnp.zeros((L, 1, d_model), jnp.float32)], axis=1)

    params = {
        'sel_cond': selector(num_vars_cond),
        'sel_pred': selector(num_vars_pred),
        'w_attn': _u(next(keys), (L, d_model, 3 * d_model), s_d),   # W_Q|W_K|W_V stacked per layer
        'b_attn': _u(next(keys), (L, 1, 3 * d_model), s_d),
        'wo': _u(next(keys), (L, dk, d_model), s_dk),
        'bo': _u(next(keys), (L, 1, d_model), s_dk),
        'ln1': ln_init,
        'wff1': _u(next(keys), (L, d_model, d_ff), s_d),
        'bff1': _u(next(keys), (L, 1, d_ff), s_d),
        'wff2': _u(next(keys), (L, d_ff, d_model), s_ff),
        'bff2': _u(next(keys), (L, 1, d_model), s_ff),
        'ln2': ln_init,
        'proj_w': _u(next(keys), (d_model, nq * horizon), s_d),     # per-quantile heads, flattened
        'proj_b': _u(next(keys), (1, nq * horizon), s_d),
    }
    return params


# ----------------------------------------------------------------------------
if __name__ == "__main__":
    B = 2
    T_cond, T_pred = 8, 4
    num_vars_cond, num_vars_pred = 3, 2
    d_model = 32
    kernel_size = 3
    num_heads = 4
    d_ff = 64
    num_layers = 2
    horizon = 4
    quantiles = (0.1, 0.5, 0.9)

    root = jax.random.PRNGKey(0)
    k_par, k_xc, k_xp, k_nc, k_np = jax.random.split(root, 5)

    params = init_params(k_par, num_vars_cond, num_vars_pred, d_model, kernel_size,
                         num_heads, d_ff, num_layers, horizon, quantiles)

    x_cond = jax.random.normal(k_xc, (B, T_cond, num_vars_cond), jnp.float32)
    x_pred = jax.random.normal(k_xp, (B, T_pred, num_vars_pred), jnp.float32)

    # eps * randn_like(scores) noise from LocalVariableSelection.forward
    eps = 1e-4
    noise_cond = eps * jax.random.normal(k_nc, (B, T_cond, num_vars_cond), jnp.float32)
    noise_pred = eps * jax.random.normal(k_np, (B, T_pred, num_vars_pred), jnp.float32)

    out, v_cond, v_pred, attn_logs = interformer_forward(
        params, x_cond, x_pred, noise_cond, noise_pred,
        num_heads=num_heads, kernel_size=kernel_size,
        horizon=horizon, n_quantiles=len(quantiles))

    jax.block_until_ready(out)
    jax.block_until_ready(v_cond)
    jax.block_until_ready(v_pred)
    for a in attn_logs:
        jax.block_until_ready(a)

    T_total = T_cond + T_pred
    assert out.shape == (B, len(quantiles), horizon)
    assert v_cond.shape == (B, T_cond, num_vars_cond)
    assert v_pred.shape == (B, T_pred, num_vars_pred)
    assert len(attn_logs) == num_layers
    assert all(a.shape == (B, T_total, T_total) for a in attn_logs)
    assert bool(jnp.all(jnp.isfinite(out)))
    assert bool(jnp.all(jnp.isfinite(v_cond))) and bool(jnp.all(jnp.isfinite(v_pred)))
    print("KERNEL_OK")
</pallas_src>

<mosaic_0001>
module attributes {stable_mosaic.version = 11 : i64} {
  func.func @_local_var_selection_kernel(%arg0: i32, %arg1: memref<1x2x4xf32, #tpu.memory_space<vmem>>, %arg2: memref<2x3x32xf32, #tpu.memory_space<vmem>>, %arg3: memref<2x32xf32, #tpu.memory_space<vmem>>, %arg4: memref<1x32xf32, #tpu.memory_space<vmem>>, %arg5: memref<1x1xf32, #tpu.memory_space<vmem>>, %arg6: memref<1x2x4xf32, #tpu.memory_space<vmem>>, %arg7: memref<1x4x32xf32, #tpu.memory_space<vmem>>, %arg8: memref<1x2x4xf32, #tpu.memory_space<vmem>>) attributes {dimension_semantics = [#tpu.dimension_semantics<parallel>], iteration_bounds = array<i64: 2>, scalar_prefetch = 0 : i64, scratch_operands = 0 : i64, tpu.core_type = #tpu.core_type<tc>, window_params = [{transform_indices = @transform_0, window_bounds = array<i64: 1, 2, 4>}, {pipeline_mode = #tpu.pipeline_mode<synchronous>, transform_indices = @transform_1, window_bounds = array<i64: 2, 3, 32>}, {pipeline_mode = #tpu.pipeline_mode<synchronous>, transform_indices = @transform_2, window_bounds = array<i64: 2, 32>}, {pipeline_mode = #tpu.pipeline_mode<synchronous>, transform_indices = @transform_3, window_bounds = array<i64: 1, 32>}, {pipeline_mode = #tpu.pipeline_mode<synchronous>, transform_indices = @transform_4, window_bounds = array<i64: 1, 1>}, {transform_indices = @transform_5, window_bounds = array<i64: 1, 2, 4>}, {transform_indices = @transform_6, window_bounds = array<i64: 1, 4, 32>}, {transform_indices = @transform_7, window_bounds = array<i64: 1, 2, 4>}]} {
    %c0 = arith.constant 0 : index
    %c0_0 = arith.constant 0 : index
    %c0_1 = arith.constant 0 : index
    %0 = vector.load %arg1[%c0, %c0_0, %c0_1] : memref<1x2x4xf32, #tpu.memory_space<vmem>>, vector<1x2x4xf32>
    %1 = vector.shape_cast %0 : vector<1x2x4xf32> to vector<2x4xf32>
    %c0_2 = arith.constant 0 : index
    %c0_3 = arith.constant 0 : index
    %c0_4 = arith.constant 0 : index
    %2 = vector.load %arg2[%c0_2, %c0_3, %c0_4] : memref<2x3x32xf32, #tpu.memory_space<vmem>>, vector<2x3x32xf32>
    %c0_5 = arith.constant 0 : index
    %c0_6 = arith.constant 0 : index
    %3 = vector.load %arg3[%c0_5, %c0_6] : memref<2x32xf32, #tpu.memory_space<vmem>>, vector<2x32xf32>
    %c0_7 = arith.constant 0 : index
    %c0_8 = arith.constant 0 : index
    %4 = vector.load %arg4[%c0_7, %c0_8] : memref<1x32xf32, #tpu.memory_space<vmem>>, vector<1x32xf32>
    %c0_9 = arith.constant 0 : index
    %c0_10 = arith.constant 0 : index
    %5 = vector.load %arg5[%c0_9, %c0_10] : memref<1x1xf32, #tpu.memory_space<vmem>>, vector<1x1xf32>
    %6 = vector.extract %5[0, 0] : f32 from vector<1x1xf32>
    %c0_11 = arith.constant 0 : index
    %c0_12 = arith.constant 0 : index
    %c0_13 = arith.constant 0 : index
    %7 = vector.load %arg6[%c0_11, %c0_12, %c0_13] : memref<1x2x4xf32, #tpu.memory_space<vmem>>, vector<1x2x4xf32>
    %8 = vector.shape_cast %7 : vector<1x2x4xf32> to vector<2x4xf32>
    %9 = tpu.iota {dimensions = array<i32: 0>} : vector<4x4xi32>
    %10 = tpu.iota {dimensions = array<i32: 1>} : vector<4x4xi32>
    %c2_i32 = arith.constant 2 : i32
    %11 = vector.broadcast %c2_i32 : i32 to vector<4x4xi32>
    %12 = arith.subi %10, %11 : vector<4x4xi32>
    %13 = arith.cmpi eq, %9, %12 : vector<4x4xi32>
    %14 = arith.extui %13 : vector<4x4xi1> to vector<4x4xi32>
    %15 = arith.sitofp %14 : vector<4x4xi32> to vector<4x4xf32>
    %cst = arith.constant dense<0.000000e+00> : vector<2x4xf32>
    %16 = tpu.matmul %1, %15, %cst {dimension_numbers = #tpu.dot_dimension_numbers<[1], [0], [0], [1], [0, 0, 1, 1], [], []>} : vector<2x4xf32>, vector<4x4xf32>, vector<2x4xf32> -> vector<2x4xf32>
    %c1_i32 = arith.constant 1 : i32
    %17 = vector.broadcast %c1_i32 : i32 to vector<4x4xi32>
    %18 = arith.subi %10, %17 : vector<4x4xi32>
    %19 = arith.cmpi eq, %9, %18 : vector<4x4xi32>
    %20 = arith.extui %19 : vector<4x4xi1> to vector<4x4xi32>
    %21 = arith.sitofp %20 : vector<4x4xi32> to vector<4x4xf32>
    %cst_14 = arith.constant dense<0.000000e+00> : vector<2x4xf32>
    %22 = tpu.matmul %1, %21, %cst_14 {dimension_numbers = #tpu.dot_dimension_numbers<[1], [0], [0], [1], [0, 0, 1, 1], [], []>} : vector<2x4xf32>, vector<4x4xf32>, vector<2x4xf32> -> vector<2x4xf32>
    %23 = vector.shape_cast %4 : vector<1x32xf32> to vector<1x1x32xf32>
    %24 = vector.broadcast %23 : vector<1x1x32xf32> to vector<2x3x32xf32>
    %25 = arith.mulf %2, %24 : vector<2x3x32xf32>
    %cst_15 = arith.constant dense<0.000000e+00> : vector<2x3xf32>
    %26 = vector.multi_reduction <add>, %25, %cst_15 [2] : vector<2x3x32xf32> to vector<2x3xf32>
    %27 = vector.broadcast %4 : vector<1x32xf32> to vector<2x32xf32>
    %28 = arith.mulf %3, %27 : vector<2x32xf32>
    %cst_16 = arith.constant dense<0.000000e+00> : vector<2xf32>
    %29 = vector.multi_reduction <add>, %28, %cst_16 [1] : vector<2x32xf32> to vector<2xf32>
    %30 = vector.shape_cast %29 : vector<2xf32> to vector<2x1xf32>
    %31 = vector.broadcast %6 : f32 to vector<2x1xf32>
    %32 = arith.addf %30, %31 : vector<2x1xf32>
    %33 = vector.extract_strided_slice %26 {offsets = [0, 0], sizes = [2, 1], strides = [1, 1]} : vector<2x3xf32> to vector<2x1xf32>
    %34 = vector.broadcast %33 : vector<2x1xf32> to vector<2x4xf32>
    %35 = arith.mulf %16, %34 : vector<2x4xf32>
    %36 = vector.broadcast %32 : vector<2x1xf32> to vector<2x4xf32>
    %37 = arith.addf %36, %35 : vector<2x4xf32>
    %38 = vector.extract_strided_slice %26 {offsets = [0, 1], sizes = [2, 1], strides = [1, 1]} : vector<2x3xf32> to vector<2x1xf32>
    %39 = vector.broadcast %38 : vector<2x1xf32> to vector<2x4xf32>
    %40 = arith.mulf %22, %39 : vector<2x4xf32>
    %41 = arith.addf %37, %40 : vector<2x4xf32>
    %42 = vector.extract_strided_slice %26 {offsets = [0, 2], sizes = [2, 1], strides = [1, 1]} : vector<2x3xf32> to vector<2x1xf32>
    %43 = vector.broadcast %42 : vector<2x1xf32> to vector<2x4xf32>
    %44 = arith.mulf %1, %43 : vector<2x4xf32>
    %45 = arith.addf %41, %44 : vector<2x4xf32>
    %cst_17 = arith.constant -1.000000e+01 : f32
    %cst_18 = arith.constant 1.000000e+01 : f32
    %46 = vector.broadcast %cst_17 : f32 to vector<2x4xf32>
    %47 = arith.maximumf %46, %45 : vector<2x4xf32>
    %48 = vector.broadcast %cst_18 : f32 to vector<2x4xf32>
    %49 = arith.minimumf %48, %47 : vector<2x4xf32>
    %50 = arith.addf %49, %8 : vector<2x4xf32>
    %cst_19 = arith.constant dense<0xFF800000> : vector<4xf32>
    %51 = vector.multi_reduction <maximumf>, %50, %cst_19 [0] : vector<2x4xf32> to vector<4xf32>
    %52 = vector.shape_cast %51 : vector<4xf32> to vector<1x4xf32>
    %53 = vector.broadcast %52 : vector<1x4xf32> to vector<2x4xf32>
    %54 = arith.subf %50, %53 : vector<2x4xf32>
    %cst_20 = arith.constant 5.000000e-01 : f32
    %55 = vector.broadcast %cst_20 : f32 to vector<2x4xf32>
    %56 = arith.mulf %54, %55 : vector<2x4xf32>
    %cst_21 = arith.constant -1.000000e+00 : f32
    %57 = vector.broadcast %cst_21 : f32 to vector<1x4xf32>
    %cst_22 = arith.constant 0.000000e+00 : f32
    %58 = vector.broadcast %cst_22 : f32 to vector<1x4xf32>
    %59 = arith.addf %57, %58 : vector<1x4xf32>
    %cst_23 = arith.constant 5.000000e-01 : f32
    %60 = vector.broadcast %cst_23 : f32 to vector<1x4xf32>
    %61 = arith.mulf %60, %59 : vector<1x4xf32>
    %62 = vector.broadcast %61 : vector<1x4xf32> to vector<2x4xf32>
    %63 = arith.subf %56, %62 : vector<2x4xf32>
    %cst_24 = arith.constant 0.000000e+00 : f32
    %64 = vector.broadcast %cst_24 : f32 to vector<2x4xf32>
    %65 = arith.maximumf %63, %64 : vector<2x4xf32>
    %66 = arith.mulf %65, %65 : vector<2x4xf32>
    %cst_25 = arith.constant dense<0.000000e+00> : vector<4xf32>
    %67 = vector.multi_reduction <add>, %66, %cst_25 [0] : vector<2x4xf32> to vector<4xf32>
    %68 = vector.shape_cast %67 : vector<4xf32> to vector<1x4xf32>
    %cst_26 = arith.constant 1.000000e+00 : f32
    %69 = vector.broadcast %cst_26 : f32 to vector<1x4xf32>
    %70 = arith.cmpf oge, %68, %69 : vector<1x4xf32>
    %71 = arith.select %70, %61, %57 : vector<1x4xi1>, vector<1x4xf32>
    %72 = arith.select %70, %58, %61 : vector<1x4xi1>, vector<1x4xf32>
    %73 = arith.addf %71, %72 : vector<1x4xf32>
    %cst_27 = arith.constant 5.000000e-01 : f32
    %74 = vector.broadcast %cst_27 : f32 to vector<1x4xf32>
    %75 = arith.mulf %74, %73 : vector<1x4xf32>
    %76 = vector.broadcast %75 : vector<1x4xf32> to vector<2x4xf32>
    %77 = arith.subf %56, %76 : vector<2x4xf32>
    %cst_28 = arith.constant 0.000000e+00 : f32
    %78 = vector.broadcast %cst_28 : f32 to vector<2x4xf32>
    %79 = arith.maximumf %77, %78 : vector<2x4xf32>
    %80 = arith.mulf %79, %79 : vector<2x4xf32>
    %cst_29 = arith.constant dense<0.000000e+00> : vector<4xf32>
    %81 = vector.multi_reduction <add>, %80, %cst_29 [0] : vector<2x4xf32> to vector<4xf32>
    %82 = vector.shape_cast %81 : vector<4xf32> to vector<1x4xf32>
    %cst_30 = arith.constant 1.000000e+00 : f32
    %83 = vector.broadcast %cst_30 : f32 to vector<1x4xf32>
    %84 = arith.cmpf oge, %82, %83 : vector<1x4xf32>
    %85 = arith.select %84, %75, %71 : vector<1x4xi1>, vector<1x4xf32>
    %86 = arith.select %84, %72, %75 : vector<1x4xi1>, vector<1x4xf32>
    %87 = arith.addf %85, %86 : vector<1x4xf32>
    %cst_31 = arith.constant 5.000000e-01 : f32
    %88 = vector.broadcast %cst_31 : f32 to vector<1x4xf32>
    %89 = arith.mulf %88, %87 : vector<1x4xf32>
    %90 = vector.broadcast %89 : vector<1x4xf32> to vector<2x4xf32>
    %91 = arith.subf %56, %90 : vector<2x4xf32>
    %cst_32 = arith.constant 0.000000e+00 : f32
    %92 = vector.broadcast %cst_32 : f32 to vector<2x4xf32>
    %93 = arith.maximumf %91, %92 : vector<2x4xf32>
    %94 = arith.mulf %93, %93 : vector<2x4xf32>
    %cst_33 = arith.constant dense<0.000000e+00> : vector<4xf32>
    %95 = vector.multi_reduction <add>, %94, %cst_33 [0] : vector<2x4xf32> to vector<4xf32>
    %96 = vector.shape_cast %95 : vector<4xf32> to vector<1x4xf32>
    %cst_34 = arith.constant 1.000000e+00 : f32
    %97 = vector.broadcast %cst_34 : f32 to vector<1x4xf32>
    %98 = arith.cmpf oge, %96, %97 : vector<1x4xf32>
    %99 = arith.select %98, %89, %85 : vector<1x4xi1>, vector<1x4xf32>
    %100 = arith.select %98, %86, %89 : vector<1x4xi1>, vector<1x4xf32>
    %101 = arith.addf %99, %100 : vector<1x4xf32>
    %cst_35 = arith.constant 5.000000e-01 : f32
    %102 = vector.broadcast %cst_35 : f32 to vector<1x4xf32>
    %103 = arith.mulf %102, %101 : vector<1x4xf32>
    %104 = vector.broadcast %103 : vector<1x4xf32> to vector<2x4xf32>
    %105 = arith.subf %56, %104 : vector<2x4xf32>
    %cst_36 = arith.constant 0.000000e+00 : f32
    %106 = vector.broadcast %cst_36 : f32 to vector<2x4xf32>
    %107 = arith.maximumf %105, %106 : vector<2x4xf32>
    %108 = arith.mulf %107, %107 : vector<2x4xf32>
    %cst_37 = arith.constant dense<0.000000e+00> : vector<4xf32>
    %109 = vector.multi_reduction <add>, %108, %cst_37 [0] : vector<2x4xf32> to vector<4xf32>
    %110 = vector.shape_cast %109 : vector<4xf32> to vector<1x4xf32>
    %cst_38 = arith.constant 1.000000e+00 : f32
    %111 = vector.broadcast %cst_38 : f32 to vector<1x4xf32>
    %112 = arith.cmpf oge, %110, %111 : vector<1x4xf32>
    %113 = arith.select %112, %103, %99 : vector<1x4xi1>, vector<1x4xf32>
    %114 = arith.select %112, %100, %103 : vector<1x4xi1>, vector<1x4xf32>
    %115 = arith.addf %113, %114 : vector<1x4xf32>
    %cst_39 = arith.constant 5.000000e-01 : f32
    %116 = vector.broadcast %cst_39 : f32 to vector<1x4xf32>
    %117 = arith.mulf %116, %115 : vector<1x4xf32>
    %118 = vector.broadcast %117 : vector<1x4xf32> to vector<2x4xf32>
    %119 = arith.subf %56, %118 : vector<2x4xf32>
    %cst_40 = arith.constant 0.000000e+00 : f32
    %120 = vector.broadcast %cst_40 : f32 to vector<2x4xf32>
    %121 = arith.maximumf %119, %120 : vector<2x4xf32>
    %122 = arith.mulf %121, %121 : vector<2x4xf32>
    %cst_41 = arith.constant dense<0.000000e+00> : vector<4xf32>
    %123 = vector.multi_reduction <add>, %122, %cst_41 [0] : vector<2x4xf32> to vector<4xf32>
    %124 = vector.shape_cast %123 : vector<4xf32> to vector<1x4xf32>
    %cst_42 = arith.constant 1.000000e+00 : f32
    %125 = vector.broadcast %cst_42 : f32 to vector<1x4xf32>
    %126 = arith.cmpf oge, %124, %125 : vector<1x4xf32>
    %127 = arith.select %126, %117, %113 : vector<1x4xi1>, vector<1x4xf32>
    %128 = arith.select %126, %114, %117 : vector<1x4xi1>, vector<1x4xf32>
    %129 = arith.addf %127, %128 : vector<1x4xf32>
    %cst_43 = arith.constant 5.000000e-01 : f32
    %130 = vector.broadcast %cst_43 : f32 to vector<1x4xf32>
    %131 = arith.mulf %130, %129 : vector<1x4xf32>
    %132 = vector.broadcast %131 : vector<1x4xf32> to vector<2x4xf32>
    %133 = arith.subf %56, %132 : vector<2x4xf32>
    %cst_44 = arith.constant 0.000000e+00 : f32
    %134 = vector.broadcast %cst_44 : f32 to vector<2x4xf32>
    %135 = arith.maximumf %133, %134 : vector<2x4xf32>
    %136 = arith.mulf %135, %135 : vector<2x4xf32>
    %cst_45 = arith.constant dense<0.000000e+00> : vector<4xf32>
    %137 = vector.multi_reduction <add>, %136, %cst_45 [0] : vector<2x4xf32> to vector<4xf32>
    %138 = vector.shape_cast %137 : vector<4xf32> to vector<1x4xf32>
    %cst_46 = arith.constant 1.000000e+00 : f32
    %139 = vector.broadcast %cst_46 : f32 to vector<1x4xf32>
    %140 = arith.cmpf oge, %138, %139 : vector<1x4xf32>
    %141 = arith.select %140, %131, %127 : vector<1x4xi1>, vector<1x4xf32>
    %142 = arith.select %140, %128, %131 : vector<1x4xi1>, vector<1x4xf32>
    %143 = arith.addf %141, %142 : vector<1x4xf32>
    %cst_47 = arith.constant 5.000000e-01 : f32
    %144 = vector.broadcast %cst_47 : f32 to vector<1x4xf32>
    %145 = arith.mulf %144, %143 : vector<1x4xf32>
    %146 = vector.broadcast %145 : vector<1x4xf32> to vector<2x4xf32>
    %147 = arith.subf %56, %146 : vector<2x4xf32>
    %cst_48 = arith.constant 0.000000e+00 : f32
    %148 = vector.broadcast %cst_48 : f32 to vector<2x4xf32>
    %149 = arith.maximumf %147, %148 : vector<2x4xf32>
    %150 = arith.mulf %149, %149 : vector<2x4xf32>
    %cst_49 = arith.constant dense<0.000000e+00> : vector<4xf32>
    %151 = vector.multi_reduction <add>, %150, %cst_49 [0] : vector<2x4xf32> to vector<4xf32>
    %152 = vector.shape_cast %151 : vector<4xf32> to vector<1x4xf32>
    %cst_50 = arith.constant 1.000000e+00 : f32
    %153 = vector.broadcast %cst_50 : f32 to vector<1x4xf32>
    %154 = arith.cmpf oge, %152, %153 : vector<1x4xf32>
    %155 = arith.select %154, %145, %141 : vector<1x4xi1>, vector<1x4xf32>
    %156 = arith.select %154, %142, %145 : vector<1x4xi1>, vector<1x4xf32>
    %157 = arith.addf %155, %156 : vector<1x4xf32>
    %cst_51 = arith.constant 5.000000e-01 : f32
    %158 = vector.broadcast %cst_51 : f32 to vector<1x4xf32>
    %159 = arith.mulf %158, %157 : vector<1x4xf32>
    %160 = vector.broadcast %159 : vector<1x4xf32> to vector<2x4xf32>
    %161 = arith.subf %56, %160 : vector<2x4xf32>
    %cst_52 = arith.constant 0.000000e+00 : f32
    %162 = vector.broadcast %cst_52 : f32 to vector<2x4xf32>
    %163 = arith.maximumf %161, %162 : vector<2x4xf32>
    %164 = arith.mulf %163, %163 : vector<2x4xf32>
    %cst_53 = arith.constant dense<0.000000e+00> : vector<4xf32>
    %165 = vector.multi_reduction <add>, %164, %cst_53 [0] : vector<2x4xf32> to vector<4xf32>
    %166 = vector.shape_cast %165 : vector<4xf32> to vector<1x4xf32>
    %cst_54 = arith.constant 1.000000e+00 : f32
    %167 = vector.broadcast %cst_54 : f32 to vector<1x4xf32>
    %168 = arith.cmpf oge, %166, %167 : vector<1x4xf32>
    %169 = arith.select %168, %159, %155 : vector<1x4xi1>, vector<1x4xf32>
    %170 = arith.select %168, %156, %159 : vector<1x4xi1>, vector<1x4xf32>
    %171 = arith.addf %169, %170 : vector<1x4xf32>
    %cst_55 = arith.constant 5.000000e-01 : f32
    %172 = vector.broadcast %cst_55 : f32 to vector<1x4xf32>
    %173 = arith.mulf %172, %171 : vector<1x4xf32>
    %174 = vector.broadcast %173 : vector<1x4xf32> to vector<2x4xf32>
    %175 = arith.subf %56, %174 : vector<2x4xf32>
    %cst_56 = arith.constant 0.000000e+00 : f32
    %176 = vector.broadcast %cst_56 : f32 to vector<2x4xf32>
    %177 = arith.maximumf %175, %176 : vector<2x4xf32>
    %178 = arith.mulf %177, %177 : vector<2x4xf32>
    %cst_57 = arith.constant dense<0.000000e+00> : vector<4xf32>
    %179 = vector.multi_reduction <add>, %178, %cst_57 [0] : vector<2x4xf32> to vector<4xf32>
    %180 = vector.shape_cast %179 : vector<4xf32> to vector<1x4xf32>
    %cst_58 = arith.constant 1.000000e+00 : f32
    %181 = vector.broadcast %cst_58 : f32 to vector<1x4xf32>
    %182 = arith.cmpf oge, %180, %181 : vector<1x4xf32>
    %183 = arith.select %182, %173, %169 : vector<1x4xi1>, vector<1x4xf32>
    %184 = arith.select %182, %170, %173 : vector<1x4xi1>, vector<1x4xf32>
    %185 = arith.addf %183, %184 : vector<1x4xf32>
    %cst_59 = arith.constant 5.000000e-01 : f32
    %186 = vector.broadcast %cst_59 : f32 to vector<1x4xf32>
    %187 = arith.mulf %186, %185 : vector<1x4xf32>
    %188 = vector.broadcast %187 : vector<1x4xf32> to vector<2x4xf32>
    %189 = arith.subf %56, %188 : vector<2x4xf32>
    %cst_60 = arith.constant 0.000000e+00 : f32
    %190 = vector.broadcast %cst_60 : f32 to vector<2x4xf32>
    %191 = arith.maximumf %189, %190 : vector<2x4xf32>
    %192 = arith.mulf %191, %191 : vector<2x4xf32>
    %cst_61 = arith.constant dense<0.000000e+00> : vector<4xf32>
    %193 = vector.multi_reduction <add>, %192, %cst_61 [0] : vector<2x4xf32> to vector<4xf32>
    %194 = vector.shape_cast %193 : vector<4xf32> to vector<1x4xf32>
    %cst_62 = arith.constant 1.000000e+00 : f32
    %195 = vector.broadcast %cst_62 : f32 to vector<1x4xf32>
    %196 = arith.cmpf oge, %194, %195 : vector<1x4xf32>
    %197 = arith.select %196, %187, %183 : vector<1x4xi1>, vector<1x4xf32>
    %198 = vector.broadcast %197 : vector<1x4xf32> to vector<2x4xf32>
    %199 = arith.subf %56, %198 : vector<2x4xf32>
    %cst_63 = arith.constant 0.000000e+00 : f32
    %200 = vector.broadcast %cst_63 : f32 to vector<2x4xf32>
    %201 = arith.maximumf %199, %200 : vector<2x4xf32>
    %202 = arith.mulf %201, %201 : vector<2x4xf32>
    %cst_64 = arith.constant dense<0.000000e+00> : vector<4xf32>
    %203 = vector.multi_reduction <add>, %202, %cst_64 [0] : vector<2x4xf32> to vector<4xf32>
    %204 = vector.shape_cast %203 : vector<4xf32> to vector<1x4xf32>
    %cst_65 = arith.constant dense<0.000000e+00> : vector<4xf32>
    %205 = vector.multi_reduction <add>, %201, %cst_65 [0] : vector<2x4xf32> to vector<4xf32>
    %206 = vector.shape_cast %205 : vector<4xf32> to vector<1x4xf32>
    %cst_66 = arith.constant 1.000000e+00 : f32
    %207 = vector.broadcast %cst_66 : f32 to vector<1x4xf32>
    %208 = arith.subf %204, %207 : vector<1x4xf32>
    %cst_67 = arith.constant 2.000000e+00 : f32
    %209 = vector.broadcast %cst_67 : f32 to vector<1x4xf32>
    %210 = arith.mulf %209, %206 : vector<1x4xf32>
    %cst_68 = arith.constant 9.99999996E-13 : f32
    %211 = vector.broadcast %cst_68 : f32 to vector<1x4xf32>
    %212 = arith.addf %210, %211 : vector<1x4xf32>
    %213 = tpu.reciprocal %212 {approx = true} : vector<1x4xf32> -> vector<1x4xf32>
    %214 = arith.mulf %208, %213 : vector<1x4xf32>
    %215 = arith.addf %197, %214 : vector<1x4xf32>
    %216 = vector.broadcast %215 : vector<1x4xf32> to vector<2x4xf32>
    %217 = arith.subf %56, %216 : vector<2x4xf32>
    %cst_69 = arith.constant 0.000000e+00 : f32
    %218 = vector.broadcast %cst_69 : f32 to vector<2x4xf32>
    %219 = arith.maximumf %217, %218 : vector<2x4xf32>
    %220 = arith.mulf %219, %219 : vector<2x4xf32>
    %cst_70 = arith.constant dense<0.000000e+00> : vector<4xf32>
    %221 = vector.multi_reduction <add>, %220, %cst_70 [0] : vector<2x4xf32> to vector<4xf32>
    %222 = vector.shape_cast %221 : vector<4xf32> to vector<1x4xf32>
    %cst_71 = arith.constant dense<0.000000e+00> : vector<4xf32>
    %223 = vector.multi_reduction <add>, %219, %cst_71 [0] : vector<2x4xf32> to vector<4xf32>
    %224 = vector.shape_cast %223 : vector<4xf32> to vector<1x4xf32>
    %cst_72 = arith.constant 1.000000e+00 : f32
    %225 = vector.broadcast %cst_72 : f32 to vector<1x4xf32>
    %226 = arith.subf %222, %225 : vector<1x4xf32>
    %cst_73 = arith.constant 2.000000e+00 : f32
    %227 = vector.broadcast %cst_73 : f32 to vector<1x4xf32>
    %228 = arith.mulf %227, %224 : vector<1x4xf32>
    %cst_74 = arith.constant 9.99999996E-13 : f32
    %229 = vector.broadcast %cst_74 : f32 to vector<1x4xf32>
    %230 = arith.addf %228, %229 : vector<1x4xf32>
    %231 = tpu.reciprocal %230 {approx = true} : vector<1x4xf32> -> vector<1x4xf32>
    %232 = arith.mulf %226, %231 : vector<1x4xf32>
    %233 = arith.addf %215, %232 : vector<1x4xf32>
    %234 = vector.broadcast %233 : vector<1x4xf32> to vector<2x4xf32>
    %235 = arith.subf %56, %234 : vector<2x4xf32>
    %cst_75 = arith.constant 0.000000e+00 : f32
    %236 = vector.broadcast %cst_75 : f32 to vector<2x4xf32>
    %237 = arith.maximumf %235, %236 : vector<2x4xf32>
    %238 = arith.mulf %237, %237 : vector<2x4xf32>
    %cst_76 = arith.constant dense<0.000000e+00> : vector<4xf32>
    %239 = vector.multi_reduction <add>, %238, %cst_76 [0] : vector<2x4xf32> to vector<4xf32>
    %240 = vector.shape_cast %239 : vector<4xf32> to vector<1x4xf32>
    %cst_77 = arith.constant dense<0.000000e+00> : vector<4xf32>
    %241 = vector.multi_reduction <add>, %237, %cst_77 [0] : vector<2x4xf32> to vector<4xf32>
    %242 = vector.shape_cast %241 : vector<4xf32> to vector<1x4xf32>
    %cst_78 = arith.constant 1.000000e+00 : f32
    %243 = vector.broadcast %cst_78 : f32 to vector<1x4xf32>
    %244 = arith.subf %240, %243 : vector<1x4xf32>
    %cst_79 = arith.constant 2.000000e+00 : f32
    %245 = vector.broadcast %cst_79 : f32 to vector<1x4xf32>
    %246 = arith.mulf %245, %242 : vector<1x4xf32>
    %cst_80 = arith.constant 9.99999996E-13 : f32
    %247 = vector.broadcast %cst_80 : f32 to vector<1x4xf32>
    %248 = arith.addf %246, %247 : vector<1x4xf32>
    %249 = tpu.reciprocal %248 {approx = true} : vector<1x4xf32> -> vector<1x4xf32>
    %250 = arith.mulf %244, %249 : vector<1x4xf32>
    %251 = arith.addf %233, %250 : vector<1x4xf32>
    %252 = vector.broadcast %251 : vector<1x4xf32> to vector<2x4xf32>
    %253 = arith.subf %56, %252 : vector<2x4xf32>
    %cst_81 = arith.constant 0.000000e+00 : f32
    %254 = vector.broadcast %cst_81 : f32 to vector<2x4xf32>
    %255 = arith.maximumf %253, %254 : vector<2x4xf32>
    %256 = arith.mulf %255, %255 : vector<2x4xf32>
    %cst_82 = arith.constant dense<0.000000e+00> : vector<4xf32>
    %257 = vector.multi_reduction <add>, %256, %cst_82 [0] : vector<2x4xf32> to vector<4xf32>
    %258 = vector.shape_cast %257 : vector<4xf32> to vector<1x4xf32>
    %cst_83 = arith.constant 1.000000e-30 : f32
    %259 = vector.broadcast %cst_83 : f32 to vector<1x4xf32>
    %260 = arith.addf %258, %259 : vector<1x4xf32>
    %261 = tpu.reciprocal %260 {approx = true} : vector<1x4xf32> -> vector<1x4xf32>
    %262 = vector.broadcast %261 : vector<1x4xf32> to vector<2x4xf32>
    %263 = arith.mulf %256, %262 : vector<2x4xf32>
    %c0_84 = arith.constant 0 : index
    %c0_85 = arith.constant 0 : index
    %c0_86 = arith.constant 0 : index
    %264 = vector.load %arg8[%c0_84, %c0_85, %c0_86] : memref<1x2x4xf32, #tpu.memory_space<vmem>>, vector<1x2x4xf32>
    %265 = vector.shape_cast %264 : vector<1x2x4xf32> to vector<2x4xf32>
    %266 = vector.shape_cast %263 : vector<2x4xf32> to vector<1x2x4xf32>
    tpu.vector_store %arg8[%c0_84, %c0_85, %c0_86], %266 {strides = array<i32>} : memref<1x2x4xf32, #tpu.memory_space<vmem>>, vector<1x2x4xf32>,
    %cst_87 = arith.constant dense<0.000000e+00> : vector<4x32xf32>
    %267 = tpu.matmul %263, %3, %cst_87 {dimension_numbers = #tpu.dot_dimension_numbers<[0], [0], [1], [1], [0, 1, 1, 1], [], []>} : vector<2x4xf32>, vector<2x32xf32>, vector<4x32xf32> -> vector<4x32xf32>
    %268 = arith.mulf %263, %16 : vector<2x4xf32>
    %269 = vector.extract_strided_slice %2 {offsets = [0, 0, 0], sizes = [2, 1, 32], strides = [1, 1, 1]} : vector<2x3x32xf32> to vector<2x1x32xf32>
    %270 = vector.shape_cast %269 : vector<2x1x32xf32> to vector<2x32xf32>
    %cst_88 = arith.constant dense<0.000000e+00> : vector<4x32xf32>
    %271 = tpu.matmul %268, %270, %cst_88 {dimension_numbers = #tpu.dot_dimension_numbers<[0], [0], [1], [1], [0, 1, 1, 1], [], []>} : vector<2x4xf32>, vector<2x32xf32>, vector<4x32xf32> -> vector<4x32xf32>
    %272 = arith.addf %267, %271 : vector<4x32xf32>
    %273 = arith.mulf %263, %22 : vector<2x4xf32>
    %274 = vector.extract_strided_slice %2 {offsets = [0, 1, 0], sizes = [2, 1, 32], strides = [1, 1, 1]} : vector<2x3x32xf32> to vector<2x1x32xf32>
    %275 = vector.shape_cast %274 : vector<2x1x32xf32> to vector<2x32xf32>
    %cst_89 = arith.constant dense<0.000000e+00> : vector<4x32xf32>
    %276 = tpu.matmul %273, %275, %cst_89 {dimension_numbers = #tpu.dot_dimension_numbers<[0], [0], [1], [1], [0, 1, 1, 1], [], []>} : vector<2x4xf32>, vector<2x32xf32>, vector<4x32xf32> -> vector<4x32xf32>
    %277 = arith.addf %272, %276 : vector<4x32xf32>
    %278 = arith.mulf %263, %1 : vector<2x4xf32>
    %279 = vector.extract_strided_slice %2 {offsets = [0, 2, 0], sizes = [2, 1, 32], strides = [1, 1, 1]} : vector<2x3x32xf32> to vector<2x1x32xf32>
    %280 = vector.shape_cast %279 : vector<2x1x32xf32> to vector<2x32xf32>
    %cst_90 = arith.constant dense<0.000000e+00> : vector<4x32xf32>
    %281 = tpu.matmul %278, %280, %cst_90 {dimension_numbers = #tpu.dot_dimension_numbers<[0], [0], [1], [1], [0, 1, 1, 1], [], []>} : vector<2x4xf32>, vector<2x32xf32>, vector<4x32xf32> -> vector<4x32xf32>
    %282 = arith.addf %277, %281 : vector<4x32xf32>
    %c0_91 = arith.constant 0 : index
    %c0_92 = arith.constant 0 : index
    %c0_93 = arith.constant 0 : index
    %283 = vector.load %arg7[%c0_91, %c0_92, %c0_93] : memref<1x4x32xf32, #tpu.memory_space<vmem>>, vector<1x4x32xf32>
    %284 = vector.shape_cast %283 : vector<1x4x32xf32> to vector<4x32xf32>
    %285 = vector.shape_cast %282 : vector<4x32xf32> to vector<1x4x32xf32>
    tpu.vector_store %arg7[%c0_91, %c0_92, %c0_93], %285 {strides = array<i32>} : memref<1x4x32xf32, #tpu.memory_space<vmem>>, vector<1x4x32xf32>,
    return
  }
  func.func @transform_0(%arg0: i32) -> (i32, i32, i32) {
    %c0_i32 = arith.constant 0 : i32
    %c0_i32_0 = arith.constant 0 : i32
    %c0_i32_1 = arith.constant 0 : i32
    return %arg0, %c0_i32, %c0_i32_0 : i32, i32, i32
  }
  func.func @transform_1(%arg0: i32) -> (i32, i32, i32) {
    %c0_i32 = arith.constant 0 : i32
    %c0_i32_0 = arith.constant 0 : i32
    %c0_i32_1 = arith.constant 0 : i32
    %c0_i32_2 = arith.constant 0 : i32
    return %c0_i32, %c0_i32_0, %c0_i32_1 : i32, i32, i32
  }
  func.func @transform_2(%arg0: i32) -> (i32, i32) {
    %c0_i32 = arith.constant 0 : i32
    %c0_i32_0 = arith.constant 0 : i32
    %c0_i32_1 = arith.constant 0 : i32
    return %c0_i32, %c0_i32_0 : i32, i32
  }
  func.func @transform_3(%arg0: i32) -> (i32, i32) {
    %c0_i32 = arith.constant 0 : i32
    %c0_i32_0 = arith.constant 0 : i32
    %c0_i32_1 = arith.constant 0 : i32
    return %c0_i32, %c0_i32_0 : i32, i32
  }
  func.func @transform_4(%arg0: i32) -> (i32, i32) {
    %c0_i32 = arith.constant 0 : i32
    %c0_i32_0 = arith.constant 0 : i32
    %c0_i32_1 = arith.constant 0 : i32
    return %c0_i32, %c0_i32_0 : i32, i32
  }
  func.func @transform_5(%arg0: i32) -> (i32, i32, i32) {
    %c0_i32 = arith.constant 0 : i32
    %c0_i32_0 = arith.constant 0 : i32
    %c0_i32_1 = arith.constant 0 : i32
    return %arg0, %c0_i32, %c0_i32_0 : i32, i32, i32
  }
  func.func @transform_6(%arg0: i32) -> (i32, i32, i32) {
    %c0_i32 = arith.constant 0 : i32
    %c0_i32_0 = arith.constant 0 : i32
    %c0_i32_1 = arith.constant 0 : i32
    return %arg0, %c0_i32, %c0_i32_0 : i32, i32, i32
  }
  func.func @transform_7(%arg0: i32) -> (i32, i32, i32) {
    %c0_i32 = arith.constant 0 : i32
    %c0_i32_0 = arith.constant 0 : i32
    %c0_i32_1 = arith.constant 0 : i32
    return %arg0, %c0_i32, %c0_i32_0 : i32, i32, i32
  }
}

module attributes {stable_mosaic.version = 11 : i64} {
  func.func @_local_var_selection_kernel(%arg0: i32, %arg1: memref<1x3x8xf32, #tpu.memory_space<vmem>>, %arg2: memref<3x3x32xf32, #tpu.memory_space<vmem>>, %arg3: memref<3x32xf32, #tpu.memory_space<vmem>>, %arg4: memref<1x32xf32, #tpu.memory_space<vmem>>, %arg5: memref<1x1xf32, #tpu.memory_space<vmem>>, %arg6: memref<1x3x8xf32, #tpu.memory_space<vmem>>, %arg7: memref<1x8x32xf32, #tpu.memory_space<vmem>>, %arg8: memref<1x3x8xf32, #tpu.memory_space<vmem>>) attributes {dimension_semantics = [#tpu.dimension_semantics<parallel>], iteration_bounds = array<i64: 2>, scalar_prefetch = 0 : i64, scratch_operands = 0 : i64, tpu.core_type = #tpu.core_type<tc>, window_params = [{transform_indices = @transform_0, window_bounds = array<i64: 1, 3, 8>}, {pipeline_mode = #tpu.pipeline_mode<synchronous>, transform_indices = @transform_1, window_bounds = array<i64: 3, 3, 32>}, {pipeline_mode = #tpu.pipeline_mode<synchronous>, transform_indices = @transform_2, window_bounds = array<i64: 3, 32>}, {pipeline_mode = #tpu.pipeline_mode<synchronous>, transform_indices = @transform_3, window_bounds = array<i64: 1, 32>}, {pipeline_mode = #tpu.pipeline_mode<synchronous>, transform_indices = @transform_4, window_bounds = array<i64: 1, 1>}, {transform_indices = @transform_5, window_bounds = array<i64: 1, 3, 8>}, {transform_indices = @transform_6, window_bounds = array<i64: 1, 8, 32>}, {transform_indices = @transform_7, window_bounds = array<i64: 1, 3, 8>}]} {
    %c0 = arith.constant 0 : index
    %c0_0 = arith.constant 0 : index
    %c0_1 = arith.constant 0 : index
    %0 = vector.load %arg1[%c0, %c0_0, %c0_1] : memref<1x3x8xf32, #tpu.memory_space<vmem>>, vector<1x3x8xf32>
    %1 = vector.shape_cast %0 : vector<1x3x8xf32> to vector<3x8xf32>
    %c0_2 = arith.constant 0 : index
    %c0_3 = arith.constant 0 : index
    %c0_4 = arith.constant 0 : index
    %2 = vector.load %arg2[%c0_2, %c0_3, %c0_4] : memref<3x3x32xf32, #tpu.memory_space<vmem>>, vector<3x3x32xf32>
    %c0_5 = arith.constant 0 : index
    %c0_6 = arith.constant 0 : index
    %3 = vector.load %arg3[%c0_5, %c0_6] : memref<3x32xf32, #tpu.memory_space<vmem>>, vector<3x32xf32>
    %c0_7 = arith.constant 0 : index
    %c0_8 = arith.constant 0 : index
    %4 = vector.load %arg4[%c0_7, %c0_8] : memref<1x32xf32, #tpu.memory_space<vmem>>, vector<1x32xf32>
    %c0_9 = arith.constant 0 : index
    %c0_10 = arith.constant 0 : index
    %5 = vector.load %arg5[%c0_9, %c0_10] : memref<1x1xf32, #tpu.memory_space<vmem>>, vector<1x1xf32>
    %6 = vector.extract %5[0, 0] : f32 from vector<1x1xf32>
    %c0_11 = arith.constant 0 : index
    %c0_12 = arith.constant 0 : index
    %c0_13 = arith.constant 0 : index
    %7 = vector.load %arg6[%c0_11, %c0_12, %c0_13] : memref<1x3x8xf32, #tpu.memory_space<vmem>>, vector<1x3x8xf32>
    %8 = vector.shape_cast %7 : vector<1x3x8xf32> to vector<3x8xf32>
    %9 = tpu.iota {dimensions = array<i32: 0>} : vector<8x8xi32>
    %10 = tpu.iota {dimensions = array<i32: 1>} : vector<8x8xi32>
    %c2_i32 = arith.constant 2 : i32
    %11 = vector.broadcast %c2_i32 : i32 to vector<8x8xi32>
    %12 = arith.subi %10, %11 : vector<8x8xi32>
    %13 = arith.cmpi eq, %9, %12 : vector<8x8xi32>
    %14 = arith.extui %13 : vector<8x8xi1> to vector<8x8xi32>
    %15 = arith.sitofp %14 : vector<8x8xi32> to vector<8x8xf32>
    %cst = arith.constant dense<0.000000e+00> : vector<3x8xf32>
    %16 = tpu.matmul %1, %15, %cst {dimension_numbers = #tpu.dot_dimension_numbers<[1], [0], [0], [1], [0, 0, 1, 1], [], []>} : vector<3x8xf32>, vector<8x8xf32>, vector<3x8xf32> -> vector<3x8xf32>
    %c1_i32 = arith.constant 1 : i32
    %17 = vector.broadcast %c1_i32 : i32 to vector<8x8xi32>
    %18 = arith.subi %10, %17 : vector<8x8xi32>
    %19 = arith.cmpi eq, %9, %18 : vector<8x8xi32>
    %20 = arith.extui %19 : vector<8x8xi1> to vector<8x8xi32>
    %21 = arith.sitofp %20 : vector<8x8xi32> to vector<8x8xf32>
    %cst_14 = arith.constant dense<0.000000e+00> : vector<3x8xf32>
    %22 = tpu.matmul %1, %21, %cst_14 {dimension_numbers = #tpu.dot_dimension_numbers<[1], [0], [0], [1], [0, 0, 1, 1], [], []>} : vector<3x8xf32>, vector<8x8xf32>, vector<3x8xf32> -> vector<3x8xf32>
    %23 = vector.shape_cast %4 : vector<1x32xf32> to vector<1x1x32xf32>
    %24 = vector.broadcast %23 : vector<1x1x32xf32> to vector<3x3x32xf32>
    %25 = arith.mulf %2, %24 : vector<3x3x32xf32>
    %cst_15 = arith.constant dense<0.000000e+00> : vector<3x3xf32>
    %26 = vector.multi_reduction <add>, %25, %cst_15 [2] : vector<3x3x32xf32> to vector<3x3xf32>
    %27 = vector.broadcast %4 : vector<1x32xf32> to vector<3x32xf32>
    %28 = arith.mulf %3, %27 : vector<3x32xf32>
    %cst_16 = arith.constant dense<0.000000e+00> : vector<3xf32>
    %29 = vector.multi_reduction <add>, %28, %cst_16 [1] : vector<3x32xf32> to vector<3xf32>
    %30 = vector.shape_cast %29 : vector<3xf32> to vector<3x1xf32>
    %31 = vector.broadcast %6 : f32 to vector<3x1xf32>
    %32 = arith.addf %30, %31 : vector<3x1xf32>
    %33 = vector.extract_strided_slice %26 {offsets = [0, 0], sizes = [3, 1], strides = [1, 1]} : vector<3x3xf32> to vector<3x1xf32>
    %34 = vector.broadcast %33 : vector<3x1xf32> to vector<3x8xf32>
    %35 = arith.mulf %16, %34 : vector<3x8xf32>
    %36 = vector.broadcast %32 : vector<3x1xf32> to vector<3x8xf32>
    %37 = arith.addf %36, %35 : vector<3x8xf32>
    %38 = vector.extract_strided_slice %26 {offsets = [0, 1], sizes = [3, 1], strides = [1, 1]} : vector<3x3xf32> to vector<3x1xf32>
    %39 = vector.broadcast %38 : vector<3x1xf32> to vector<3x8xf32>
    %40 = arith.mulf %22, %39 : vector<3x8xf32>
    %41 = arith.addf %37, %40 : vector<3x8xf32>
    %42 = vector.extract_strided_slice %26 {offsets = [0, 2], sizes = [3, 1], strides = [1, 1]} : vector<3x3xf32> to vector<3x1xf32>
    %43 = vector.broadcast %42 : vector<3x1xf32> to vector<3x8xf32>
    %44 = arith.mulf %1, %43 : vector<3x8xf32>
    %45 = arith.addf %41, %44 : vector<3x8xf32>
    %cst_17 = arith.constant -1.000000e+01 : f32
    %cst_18 = arith.constant 1.000000e+01 : f32
    %46 = vector.broadcast %cst_17 : f32 to vector<3x8xf32>
    %47 = arith.maximumf %46, %45 : vector<3x8xf32>
    %48 = vector.broadcast %cst_18 : f32 to vector<3x8xf32>
    %49 = arith.minimumf %48, %47 : vector<3x8xf32>
    %50 = arith.addf %49, %8 : vector<3x8xf32>
    %cst_19 = arith.constant dense<0xFF800000> : vector<8xf32>
    %51 = vector.multi_reduction <maximumf>, %50, %cst_19 [0] : vector<3x8xf32> to vector<8xf32>
    %52 = vector.shape_cast %51 : vector<8xf32> to vector<1x8xf32>
    %53 = vector.broadcast %52 : vector<1x8xf32> to vector<3x8xf32>
    %54 = arith.subf %50, %53 : vector<3x8xf32>
    %cst_20 = arith.constant 5.000000e-01 : f32
    %55 = vector.broadcast %cst_20 : f32 to vector<3x8xf32>
    %56 = arith.mulf %54, %55 : vector<3x8xf32>
    %cst_21 = arith.constant -1.000000e+00 : f32
    %57 = vector.broadcast %cst_21 : f32 to vector<1x8xf32>
    %cst_22 = arith.constant 0.000000e+00 : f32
    %58 = vector.broadcast %cst_22 : f32 to vector<1x8xf32>
    %59 = arith.addf %57, %58 : vector<1x8xf32>
    %cst_23 = arith.constant 5.000000e-01 : f32
    %60 = vector.broadcast %cst_23 : f32 to vector<1x8xf32>
    %61 = arith.mulf %60, %59 : vector<1x8xf32>
    %62 = vector.broadcast %61 : vector<1x8xf32> to vector<3x8xf32>
    %63 = arith.subf %56, %62 : vector<3x8xf32>
    %cst_24 = arith.constant 0.000000e+00 : f32
    %64 = vector.broadcast %cst_24 : f32 to vector<3x8xf32>
    %65 = arith.maximumf %63, %64 : vector<3x8xf32>
    %66 = arith.mulf %65, %65 : vector<3x8xf32>
    %cst_25 = arith.constant dense<0.000000e+00> : vector<8xf32>
    %67 = vector.multi_reduction <add>, %66, %cst_25 [0] : vector<3x8xf32> to vector<8xf32>
    %68 = vector.shape_cast %67 : vector<8xf32> to vector<1x8xf32>
    %cst_26 = arith.constant 1.000000e+00 : f32
    %69 = vector.broadcast %cst_26 : f32 to vector<1x8xf32>
    %70 = arith.cmpf oge, %68, %69 : vector<1x8xf32>
    %71 = arith.select %70, %61, %57 : vector<1x8xi1>, vector<1x8xf32>
    %72 = arith.select %70, %58, %61 : vector<1x8xi1>, vector<1x8xf32>
    %73 = arith.addf %71, %72 : vector<1x8xf32>
    %cst_27 = arith.constant 5.000000e-01 : f32
    %74 = vector.broadcast %cst_27 : f32 to vector<1x8xf32>
    %75 = arith.mulf %74, %73 : vector<1x8xf32>
    %76 = vector.broadcast %75 : vector<1x8xf32> to vector<3x8xf32>
    %77 = arith.subf %56, %76 : vector<3x8xf32>
    %cst_28 = arith.constant 0.000000e+00 : f32
    %78 = vector.broadcast %cst_28 : f32 to vector<3x8xf32>
    %79 = arith.maximumf %77, %78 : vector<3x8xf32>
    %80 = arith.mulf %79, %79 : vector<3x8xf32>
    %cst_29 = arith.constant dense<0.000000e+00> : vector<8xf32>
    %81 = vector.multi_reduction <add>, %80, %cst_29 [0] : vector<3x8xf32> to vector<8xf32>
    %82 = vector.shape_cast %81 : vector<8xf32> to vector<1x8xf32>
    %cst_30 = arith.constant 1.000000e+00 : f32
    %83 = vector.broadcast %cst_30 : f32 to vector<1x8xf32>
    %84 = arith.cmpf oge, %82, %83 : vector<1x8xf32>
    %85 = arith.select %84, %75, %71 : vector<1x8xi1>, vector<1x8xf32>
    %86 = arith.select %84, %72, %75 : vector<1x8xi1>, vector<1x8xf32>
    %87 = arith.addf %85, %86 : vector<1x8xf32>
    %cst_31 = arith.constant 5.000000e-01 : f32
    %88 = vector.broadcast %cst_31 : f32 to vector<1x8xf32>
    %89 = arith.mulf %88, %87 : vector<1x8xf32>
    %90 = vector.broadcast %89 : vector<1x8xf32> to vector<3x8xf32>
    %91 = arith.subf %56, %90 : vector<3x8xf32>
    %cst_32 = arith.constant 0.000000e+00 : f32
    %92 = vector.broadcast %cst_32 : f32 to vector<3x8xf32>
    %93 = arith.maximumf %91, %92 : vector<3x8xf32>
    %94 = arith.mulf %93, %93 : vector<3x8xf32>
    %cst_33 = arith.constant dense<0.000000e+00> : vector<8xf32>
    %95 = vector.multi_reduction <add>, %94, %cst_33 [0] : vector<3x8xf32> to vector<8xf32>
    %96 = vector.shape_cast %95 : vector<8xf32> to vector<1x8xf32>
    %cst_34 = arith.constant 1.000000e+00 : f32
    %97 = vector.broadcast %cst_34 : f32 to vector<1x8xf32>
    %98 = arith.cmpf oge, %96, %97 : vector<1x8xf32>
    %99 = arith.select %98, %89, %85 : vector<1x8xi1>, vector<1x8xf32>
    %100 = arith.select %98, %86, %89 : vector<1x8xi1>, vector<1x8xf32>
    %101 = arith.addf %99, %100 : vector<1x8xf32>
    %cst_35 = arith.constant 5.000000e-01 : f32
    %102 = vector.broadcast %cst_35 : f32 to vector<1x8xf32>
    %103 = arith.mulf %102, %101 : vector<1x8xf32>
    %104 = vector.broadcast %103 : vector<1x8xf32> to vector<3x8xf32>
    %105 = arith.subf %56, %104 : vector<3x8xf32>
    %cst_36 = arith.constant 0.000000e+00 : f32
    %106 = vector.broadcast %cst_36 : f32 to vector<3x8xf32>
    %107 = arith.maximumf %105, %106 : vector<3x8xf32>
    %108 = arith.mulf %107, %107 : vector<3x8xf32>
    %cst_37 = arith.constant dense<0.000000e+00> : vector<8xf32>
    %109 = vector.multi_reduction <add>, %108, %cst_37 [0] : vector<3x8xf32> to vector<8xf32>
    %110 = vector.shape_cast %109 : vector<8xf32> to vector<1x8xf32>
    %cst_38 = arith.constant 1.000000e+00 : f32
    %111 = vector.broadcast %cst_38 : f32 to vector<1x8xf32>
    %112 = arith.cmpf oge, %110, %111 : vector<1x8xf32>
    %113 = arith.select %112, %103, %99 : vector<1x8xi1>, vector<1x8xf32>
    %114 = arith.select %112, %100, %103 : vector<1x8xi1>, vector<1x8xf32>
    %115 = arith.addf %113, %114 : vector<1x8xf32>
    %cst_39 = arith.constant 5.000000e-01 : f32
    %116 = vector.broadcast %cst_39 : f32 to vector<1x8xf32>
    %117 = arith.mulf %116, %115 : vector<1x8xf32>
    %118 = vector.broadcast %117 : vector<1x8xf32> to vector<3x8xf32>
    %119 = arith.subf %56, %118 : vector<3x8xf32>
    %cst_40 = arith.constant 0.000000e+00 : f32
    %120 = vector.broadcast %cst_40 : f32 to vector<3x8xf32>
    %121 = arith.maximumf %119, %120 : vector<3x8xf32>
    %122 = arith.mulf %121, %121 : vector<3x8xf32>
    %cst_41 = arith.constant dense<0.000000e+00> : vector<8xf32>
    %123 = vector.multi_reduction <add>, %122, %cst_41 [0] : vector<3x8xf32> to vector<8xf32>
    %124 = vector.shape_cast %123 : vector<8xf32> to vector<1x8xf32>
    %cst_42 = arith.constant 1.000000e+00 : f32
    %125 = vector.broadcast %cst_42 : f32 to vector<1x8xf32>
    %126 = arith.cmpf oge, %124, %125 : vector<1x8xf32>
    %127 = arith.select %126, %117, %113 : vector<1x8xi1>, vector<1x8xf32>
    %128 = arith.select %126, %114, %117 : vector<1x8xi1>, vector<1x8xf32>
    %129 = arith.addf %127, %128 : vector<1x8xf32>
    %cst_43 = arith.constant 5.000000e-01 : f32
    %130 = vector.broadcast %cst_43 : f32 to vector<1x8xf32>
    %131 = arith.mulf %130, %129 : vector<1x8xf32>
    %132 = vector.broadcast %131 : vector<1x8xf32> to vector<3x8xf32>
    %133 = arith.subf %56, %132 : vector<3x8xf32>
    %cst_44 = arith.constant 0.000000e+00 : f32
    %134 = vector.broadcast %cst_44 : f32 to vector<3x8xf32>
    %135 = arith.maximumf %133, %134 : vector<3x8xf32>
    %136 = arith.mulf %135, %135 : vector<3x8xf32>
    %cst_45 = arith.constant dense<0.000000e+00> : vector<8xf32>
    %137 = vector.multi_reduction <add>, %136, %cst_45 [0] : vector<3x8xf32> to vector<8xf32>
    %138 = vector.shape_cast %137 : vector<8xf32> to vector<1x8xf32>
    %cst_46 = arith.constant 1.000000e+00 : f32
    %139 = vector.broadcast %cst_46 : f32 to vector<1x8xf32>
    %140 = arith.cmpf oge, %138, %139 : vector<1x8xf32>
    %141 = arith.select %140, %131, %127 : vector<1x8xi1>, vector<1x8xf32>
    %142 = arith.select %140, %128, %131 : vector<1x8xi1>, vector<1x8xf32>
    %143 = arith.addf %141, %142 : vector<1x8xf32>
    %cst_47 = arith.constant 5.000000e-01 : f32
    %144 = vector.broadcast %cst_47 : f32 to vector<1x8xf32>
    %145 = arith.mulf %144, %143 : vector<1x8xf32>
    %146 = vector.broadcast %145 : vector<1x8xf32> to vector<3x8xf32>
    %147 = arith.subf %56, %146 : vector<3x8xf32>
    %cst_48 = arith.constant 0.000000e+00 : f32
    %148 = vector.broadcast %cst_48 : f32 to vector<3x8xf32>
    %149 = arith.maximumf %147, %148 : vector<3x8xf32>
    %150 = arith.mulf %149, %149 : vector<3x8xf32>
    %cst_49 = arith.constant dense<0.000000e+00> : vector<8xf32>
    %151 = vector.multi_reduction <add>, %150, %cst_49 [0] : vector<3x8xf32> to vector<8xf32>
    %152 = vector.shape_cast %151 : vector<8xf32> to vector<1x8xf32>
    %cst_50 = arith.constant 1.000000e+00 : f32
    %153 = vector.broadcast %cst_50 : f32 to vector<1x8xf32>
    %154 = arith.cmpf oge, %152, %153 : vector<1x8xf32>
    %155 = arith.select %154, %145, %141 : vector<1x8xi1>, vector<1x8xf32>
    %156 = arith.select %154, %142, %145 : vector<1x8xi1>, vector<1x8xf32>
    %157 = arith.addf %155, %156 : vector<1x8xf32>
    %cst_51 = arith.constant 5.000000e-01 : f32
    %158 = vector.broadcast %cst_51 : f32 to vector<1x8xf32>
    %159 = arith.mulf %158, %157 : vector<1x8xf32>
    %160 = vector.broadcast %159 : vector<1x8xf32> to vector<3x8xf32>
    %161 = arith.subf %56, %160 : vector<3x8xf32>
    %cst_52 = arith.constant 0.000000e+00 : f32
    %162 = vector.broadcast %cst_52 : f32 to vector<3x8xf32>
    %163 = arith.maximumf %161, %162 : vector<3x8xf32>
    %164 = arith.mulf %163, %163 : vector<3x8xf32>
    %cst_53 = arith.constant dense<0.000000e+00> : vector<8xf32>
    %165 = vector.multi_reduction <add>, %164, %cst_53 [0] : vector<3x8xf32> to vector<8xf32>
    %166 = vector.shape_cast %165 : vector<8xf32> to vector<1x8xf32>
    %cst_54 = arith.constant 1.000000e+00 : f32
    %167 = vector.broadcast %cst_54 : f32 to vector<1x8xf32>
    %168 = arith.cmpf oge, %166, %167 : vector<1x8xf32>
    %169 = arith.select %168, %159, %155 : vector<1x8xi1>, vector<1x8xf32>
    %170 = arith.select %168, %156, %159 : vector<1x8xi1>, vector<1x8xf32>
    %171 = arith.addf %169, %170 : vector<1x8xf32>
    %cst_55 = arith.constant 5.000000e-01 : f32
    %172 = vector.broadcast %cst_55 : f32 to vector<1x8xf32>
    %173 = arith.mulf %172, %171 : vector<1x8xf32>
    %174 = vector.broadcast %173 : vector<1x8xf32> to vector<3x8xf32>
    %175 = arith.subf %56, %174 : vector<3x8xf32>
    %cst_56 = arith.constant 0.000000e+00 : f32
    %176 = vector.broadcast %cst_56 : f32 to vector<3x8xf32>
    %177 = arith.maximumf %175, %176 : vector<3x8xf32>
    %178 = arith.mulf %177, %177 : vector<3x8xf32>
    %cst_57 = arith.constant dense<0.000000e+00> : vector<8xf32>
    %179 = vector.multi_reduction <add>, %178, %cst_57 [0] : vector<3x8xf32> to vector<8xf32>
    %180 = vector.shape_cast %179 : vector<8xf32> to vector<1x8xf32>
    %cst_58 = arith.constant 1.000000e+00 : f32
    %181 = vector.broadcast %cst_58 : f32 to vector<1x8xf32>
    %182 = arith.cmpf oge, %180, %181 : vector<1x8xf32>
    %183 = arith.select %182, %173, %169 : vector<1x8xi1>, vector<1x8xf32>
    %184 = arith.select %182, %170, %173 : vector<1x8xi1>, vector<1x8xf32>
    %185 = arith.addf %183, %184 : vector<1x8xf32>
    %cst_59 = arith.constant 5.000000e-01 : f32
    %186 = vector.broadcast %cst_59 : f32 to vector<1x8xf32>
    %187 = arith.mulf %186, %185 : vector<1x8xf32>
    %188 = vector.broadcast %187 : vector<1x8xf32> to vector<3x8xf32>
    %189 = arith.subf %56, %188 : vector<3x8xf32>
    %cst_60 = arith.constant 0.000000e+00 : f32
    %190 = vector.broadcast %cst_60 : f32 to vector<3x8xf32>
    %191 = arith.maximumf %189, %190 : vector<3x8xf32>
    %192 = arith.mulf %191, %191 : vector<3x8xf32>
    %cst_61 = arith.constant dense<0.000000e+00> : vector<8xf32>
    %193 = vector.multi_reduction <add>, %192, %cst_61 [0] : vector<3x8xf32> to vector<8xf32>
    %194 = vector.shape_cast %193 : vector<8xf32> to vector<1x8xf32>
    %cst_62 = arith.constant 1.000000e+00 : f32
    %195 = vector.broadcast %cst_62 : f32 to vector<1x8xf32>
    %196 = arith.cmpf oge, %194, %195 : vector<1x8xf32>
    %197 = arith.select %196, %187, %183 : vector<1x8xi1>, vector<1x8xf32>
    %198 = vector.broadcast %197 : vector<1x8xf32> to vector<3x8xf32>
    %199 = arith.subf %56, %198 : vector<3x8xf32>
    %cst_63 = arith.constant 0.000000e+00 : f32
    %200 = vector.broadcast %cst_63 : f32 to vector<3x8xf32>
    %201 = arith.maximumf %199, %200 : vector<3x8xf32>
    %202 = arith.mulf %201, %201 : vector<3x8xf32>
    %cst_64 = arith.constant dense<0.000000e+00> : vector<8xf32>
    %203 = vector.multi_reduction <add>, %202, %cst_64 [0] : vector<3x8xf32> to vector<8xf32>
    %204 = vector.shape_cast %203 : vector<8xf32> to vector<1x8xf32>
    %cst_65 = arith.constant dense<0.000000e+00> : vector<8xf32>
    %205 = vector.multi_reduction <add>, %201, %cst_65 [0] : vector<3x8xf32> to vector<8xf32>
    %206 = vector.shape_cast %205 : vector<8xf32> to vector<1x8xf32>
    %cst_66 = arith.constant 1.000000e+00 : f32
    %207 = vector.broadcast %cst_66 : f32 to vector<1x8xf32>
    %208 = arith.subf %204, %207 : vector<1x8xf32>
    %cst_67 = arith.constant 2.000000e+00 : f32
    %209 = vector.broadcast %cst_67 : f32 to vector<1x8xf32>
    %210 = arith.mulf %209, %206 : vector<1x8xf32>
    %cst_68 = arith.constant 9.99999996E-13 : f32
    %211 = vector.broadcast %cst_68 : f32 to vector<1x8xf32>
    %212 = arith.addf %210, %211 : vector<1x8xf32>
    %213 = tpu.reciprocal %212 {approx = true} : vector<1x8xf32> -> vector<1x8xf32>
    %214 = arith.mulf %208, %213 : vector<1x8xf32>
    %215 = arith.addf %197, %214 : vector<1x8xf32>
    %216 = vector.broadcast %215 : vector<1x8xf32> to vector<3x8xf32>
    %217 = arith.subf %56, %216 : vector<3x8xf32>
    %cst_69 = arith.constant 0.000000e+00 : f32
    %218 = vector.broadcast %cst_69 : f32 to vector<3x8xf32>
    %219 = arith.maximumf %217, %218 : vector<3x8xf32>
    %220 = arith.mulf %219, %219 : vector<3x8xf32>
    %cst_70 = arith.constant dense<0.000000e+00> : vector<8xf32>
    %221 = vector.multi_reduction <add>, %220, %cst_70 [0] : vector<3x8xf32> to vector<8xf32>
    %222 = vector.shape_cast %221 : vector<8xf32> to vector<1x8xf32>
    %cst_71 = arith.constant dense<0.000000e+00> : vector<8xf32>
    %223 = vector.multi_reduction <add>, %219, %cst_71 [0] : vector<3x8xf32> to vector<8xf32>
    %224 = vector.shape_cast %223 : vector<8xf32> to vector<1x8xf32>
    %cst_72 = arith.constant 1.000000e+00 : f32
    %225 = vector.broadcast %cst_72 : f32 to vector<1x8xf32>
    %226 = arith.subf %222, %225 : vector<1x8xf32>
    %cst_73 = arith.constant 2.000000e+00 : f32
    %227 = vector.broadcast %cst_73 : f32 to vector<1x8xf32>
    %228 = arith.mulf %227, %224 : vector<1x8xf32>
    %cst_74 = arith.constant 9.99999996E-13 : f32
    %229 = vector.broadcast %cst_74 : f32 to vector<1x8xf32>
    %230 = arith.addf %228, %229 : vector<1x8xf32>
    %231 = tpu.reciprocal %230 {approx = true} : vector<1x8xf32> -> vector<1x8xf32>
    %232 = arith.mulf %226, %231 : vector<1x8xf32>
    %233 = arith.addf %215, %232 : vector<1x8xf32>
    %234 = vector.broadcast %233 : vector<1x8xf32> to vector<3x8xf32>
    %235 = arith.subf %56, %234 : vector<3x8xf32>
    %cst_75 = arith.constant 0.000000e+00 : f32
    %236 = vector.broadcast %cst_75 : f32 to vector<3x8xf32>
    %237 = arith.maximumf %235, %236 : vector<3x8xf32>
    %238 = arith.mulf %237, %237 : vector<3x8xf32>
    %cst_76 = arith.constant dense<0.000000e+00> : vector<8xf32>
    %239 = vector.multi_reduction <add>, %238, %cst_76 [0] : vector<3x8xf32> to vector<8xf32>
    %240 = vector.shape_cast %239 : vector<8xf32> to vector<1x8xf32>
    %cst_77 = arith.constant dense<0.000000e+00> : vector<8xf32>
    %241 = vector.multi_reduction <add>, %237, %cst_77 [0] : vector<3x8xf32> to vector<8xf32>
    %242 = vector.shape_cast %241 : vector<8xf32> to vector<1x8xf32>
    %cst_78 = arith.constant 1.000000e+00 : f32
    %243 = vector.broadcast %cst_78 : f32 to vector<1x8xf32>
    %244 = arith.subf %240, %243 : vector<1x8xf32>
    %cst_79 = arith.constant 2.000000e+00 : f32
    %245 = vector.broadcast %cst_79 : f32 to vector<1x8xf32>
    %246 = arith.mulf %245, %242 : vector<1x8xf32>
    %cst_80 = arith.constant 9.99999996E-13 : f32
    %247 = vector.broadcast %cst_80 : f32 to vector<1x8xf32>
    %248 = arith.addf %246, %247 : vector<1x8xf32>
    %249 = tpu.reciprocal %248 {approx = true} : vector<1x8xf32> -> vector<1x8xf32>
    %250 = arith.mulf %244, %249 : vector<1x8xf32>
    %251 = arith.addf %233, %250 : vector<1x8xf32>
    %252 = vector.broadcast %251 : vector<1x8xf32> to vector<3x8xf32>
    %253 = arith.subf %56, %252 : vector<3x8xf32>
    %cst_81 = arith.constant 0.000000e+00 : f32
    %254 = vector.broadcast %cst_81 : f32 to vector<3x8xf32>
    %255 = arith.maximumf %253, %254 : vector<3x8xf32>
    %256 = arith.mulf %255, %255 : vector<3x8xf32>
    %cst_82 = arith.constant dense<0.000000e+00> : vector<8xf32>
    %257 = vector.multi_reduction <add>, %256, %cst_82 [0] : vector<3x8xf32> to vector<8xf32>
    %258 = vector.shape_cast %257 : vector<8xf32> to vector<1x8xf32>
    %cst_83 = arith.constant 1.000000e-30 : f32
    %259 = vector.broadcast %cst_83 : f32 to vector<1x8xf32>
    %260 = arith.addf %258, %259 : vector<1x8xf32>
    %261 = tpu.reciprocal %260 {approx = true} : vector<1x8xf32> -> vector<1x8xf32>
    %262 = vector.broadcast %261 : vector<1x8xf32> to vector<3x8xf32>
    %263 = arith.mulf %256, %262 : vector<3x8xf32>
    %c0_84 = arith.constant 0 : index
    %c0_85 = arith.constant 0 : index
    %c0_86 = arith.constant 0 : index
    %264 = vector.load %arg8[%c0_84, %c0_85, %c0_86] : memref<1x3x8xf32, #tpu.memory_space<vmem>>, vector<1x3x8xf32>
    %265 = vector.shape_cast %264 : vector<1x3x8xf32> to vector<3x8xf32>
    %266 = vector.shape_cast %263 : vector<3x8xf32> to vector<1x3x8xf32>
    tpu.vector_store %arg8[%c0_84, %c0_85, %c0_86], %266 {strides = array<i32>} : memref<1x3x8xf32, #tpu.memory_space<vmem>>, vector<1x3x8xf32>,
    %cst_87 = arith.constant dense<0.000000e+00> : vector<8x32xf32>
    %267 = tpu.matmul %263, %3, %cst_87 {dimension_numbers = #tpu.dot_dimension_numbers<[0], [0], [1], [1], [0, 1, 1, 1], [], []>} : vector<3x8xf32>, vector<3x32xf32>, vector<8x32xf32> -> vector<8x32xf32>
    %268 = arith.mulf %263, %16 : vector<3x8xf32>
    %269 = vector.extract_strided_slice %2 {offsets = [0, 0, 0], sizes = [3, 1, 32], strides = [1, 1, 1]} : vector<3x3x32xf32> to vector<3x1x32xf32>
    %270 = vector.shape_cast %269 : vector<3x1x32xf32> to vector<3x32xf32>
    %cst_88 = arith.constant dense<0.000000e+00> : vector<8x32xf32>
    %271 = tpu.matmul %268, %270, %cst_88 {dimension_numbers = #tpu.dot_dimension_numbers<[0], [0], [1], [1], [0, 1, 1, 1], [], []>} : vector<3x8xf32>, vector<3x32xf32>, vector<8x32xf32> -> vector<8x32xf32>
    %272 = arith.addf %267, %271 : vector<8x32xf32>
    %273 = arith.mulf %263, %22 : vector<3x8xf32>
    %274 = vector.extract_strided_slice %2 {offsets = [0, 1, 0], sizes = [3, 1, 32], strides = [1, 1, 1]} : vector<3x3x32xf32> to vector<3x1x32xf32>
    %275 = vector.shape_cast %274 : vector<3x1x32xf32> to vector<3x32xf32>
    %cst_89 = arith.constant dense<0.000000e+00> : vector<8x32xf32>
    %276 = tpu.matmul %273, %275, %cst_89 {dimension_numbers = #tpu.dot_dimension_numbers<[0], [0], [1], [1], [0, 1, 1, 1], [], []>} : vector<3x8xf32>, vector<3x32xf32>, vector<8x32xf32> -> vector<8x32xf32>
    %277 = arith.addf %272, %276 : vector<8x32xf32>
    %278 = arith.mulf %263, %1 : vector<3x8xf32>
    %279 = vector.extract_strided_slice %2 {offsets = [0, 2, 0], sizes = [3, 1, 32], strides = [1, 1, 1]} : vector<3x3x32xf32> to vector<3x1x32xf32>
    %280 = vector.shape_cast %279 : vector<3x1x32xf32> to vector<3x32xf32>
    %cst_90 = arith.constant dense<0.000000e+00> : vector<8x32xf32>
    %281 = tpu.matmul %278, %280, %cst_90 {dimension_numbers = #tpu.dot_dimension_numbers<[0], [0], [1], [1], [0, 1, 1, 1], [], []>} : vector<3x8xf32>, vector<3x32xf32>, vector<8x32xf32> -> vector<8x32xf32>
    %282 = arith.addf %277, %281 : vector<8x32xf32>
    %c0_91 = arith.constant 0 : index
    %c0_92 = arith.constant 0 : index
    %c0_93 = arith.constant 0 : index
    %283 = vector.load %arg7[%c0_91, %c0_92, %c0_93] : memref<1x8x32xf32, #tpu.memory_space<vmem>>, vector<1x8x32xf32>
    %284 = vector.shape_cast %283 : vector<1x8x32xf32> to vector<8x32xf32>
    %285 = vector.shape_cast %282 : vector<8x32xf32> to vector<1x8x32xf32>
    tpu.vector_store %arg7[%c0_91, %c0_92, %c0_93], %285 {strides = array<i32>} : memref<1x8x32xf32, #tpu.memory_space<vmem>>, vector<1x8x32xf32>,
    return
  }
  func.func @transform_0(%arg0: i32) -> (i32, i32, i32) {
    %c0_i32 = arith.constant 0 : i32
    %c0_i32_0 = arith.constant 0 : i32
    %c0_i32_1 = arith.constant 0 : i32
    return %arg0, %c0_i32, %c0_i32_0 : i32, i32, i32
  }
  func.func @transform_1(%arg0: i32) -> (i32, i32, i32) {
    %c0_i32 = arith.constant 0 : i32
    %c0_i32_0 = arith.constant 0 : i32
    %c0_i32_1 = arith.constant 0 : i32
    %c0_i32_2 = arith.constant 0 : i32
    return %c0_i32, %c0_i32_0, %c0_i32_1 : i32, i32, i32
  }
  func.func @transform_2(%arg0: i32) -> (i32, i32) {
    %c0_i32 = arith.constant 0 : i32
    %c0_i32_0 = arith.constant 0 : i32
    %c0_i32_1 = arith.constant 0 : i32
    return %c0_i32, %c0_i32_0 : i32, i32
  }
  func.func @transform_3(%arg0: i32) -> (i32, i32) {
    %c0_i32 = arith.constant 0 : i32
    %c0_i32_0 = arith.constant 0 : i32
    %c0_i32_1 = arith.constant 0 : i32
    return %c0_i32, %c0_i32_0 : i32, i32
  }
  func.func @transform_4(%arg0: i32) -> (i32, i32) {
    %c0_i32 = arith.constant 0 : i32
    %c0_i32_0 = arith.constant 0 : i32
    %c0_i32_1 = arith.constant 0 : i32
    return %c0_i32, %c0_i32_0 : i32, i32
  }
  func.func @transform_5(%arg0: i32) -> (i32, i32, i32) {
    %c0_i32 = arith.constant 0 : i32
    %c0_i32_0 = arith.constant 0 : i32
    %c0_i32_1 = arith.constant 0 : i32
    return %arg0, %c0_i32, %c0_i32_0 : i32, i32, i32
  }
  func.func @transform_6(%arg0: i32) -> (i32, i32, i32) {
    %c0_i32 = arith.constant 0 : i32
    %c0_i32_0 = arith.constant 0 : i32
    %c0_i32_1 = arith.constant 0 : i32
    return %arg0, %c0_i32, %c0_i32_0 : i32, i32, i32
  }
  func.func @transform_7(%arg0: i32) -> (i32, i32, i32) {
    %c0_i32 = arith.constant 0 : i32
    %c0_i32_0 = arith.constant 0 : i32
    %c0_i32_1 = arith.constant 0 : i32
    return %arg0, %c0_i32, %c0_i32_0 : i32, i32, i32
  }
}

module attributes {stable_mosaic.version = 11 : i64} {
  func.func @_block_stack_kernel(%arg0: i32, %arg1: i32, %arg2: memref<2x16x32xf32, #tpu.memory_space<vmem>>, %arg3: memref<2x32x96xbf16, #tpu.memory_space<vmem>>, %arg4: memref<2x1x96xf32, #tpu.memory_space<vmem>>, %arg5: memref<2x8x32xbf16, #tpu.memory_space<vmem>>, %arg6: memref<2x1x32xf32, #tpu.memory_space<vmem>>, %arg7: memref<2x2x32xf32, #tpu.memory_space<vmem>>, %arg8: memref<2x32x64xbf16, #tpu.memory_space<vmem>>, %arg9: memref<2x1x64xf32, #tpu.memory_space<vmem>>, %arg10: memref<2x64x32xbf16, #tpu.memory_space<vmem>>, %arg11: memref<2x1x32xf32, #tpu.memory_space<vmem>>, %arg12: memref<2x2x32xf32, #tpu.memory_space<vmem>>, %arg13: memref<32x12xbf16, #tpu.memory_space<vmem>>, %arg14: memref<1x12xf32, #tpu.memory_space<vmem>>, %arg15: memref<2x1x16x16xbf16, #tpu.memory_space<vmem>>, %arg16: memref<2x1x12xf32, #tpu.memory_space<vmem>>, %arg17: memref<2x16x32xf32, #tpu.memory_space<vmem>>) attributes {dimension_semantics = [#tpu.dimension_semantics<parallel>, #tpu.dimension_semantics<arbitrary>], iteration_bounds = array<i64: 1, 2>, scalar_prefetch = 0 : i64, scratch_operands = 1 : i64, tpu.core_type = #tpu.core_type<tc>, window_params = [{transform_indices = @transform_0, window_bounds = array<i64: 2, 16, 32>}, {pipeline_mode = #tpu.pipeline_mode<synchronous>, transform_indices = @transform_1, window_bounds = array<i64: 2, 32, 96>}, {pipeline_mode = #tpu.pipeline_mode<synchronous>, transform_indices = @transform_2, window_bounds = array<i64: 2, 1, 96>}, {pipeline_mode = #tpu.pipeline_mode<synchronous>, transform_indices = @transform_3, window_bounds = array<i64: 2, 8, 32>}, {pipeline_mode = #tpu.pipeline_mode<synchronous>, transform_indices = @transform_4, window_bounds = array<i64: 2, 1, 32>}, {pipeline_mode = #tpu.pipeline_mode<synchronous>, transform_indices = @transform_5, window_bounds = array<i64: 2, 2, 32>}, {pipeline_mode = #tpu.pipeline_mode<synchronous>, transform_indices = @transform_6, window_bounds = array<i64: 2, 32, 64>}, {pipeline_mode = #tpu.pipeline_mode<synchronous>, transform_indices = @transform_7, window_bounds = array<i64: 2, 1, 64>}, {pipeline_mode = #tpu.pipeline_mode<synchronous>, transform_indices = @transform_8, window_bounds = array<i64: 2, 64, 32>}, {pipeline_mode = #tpu.pipeline_mode<synchronous>, transform_indices = @transform_9, window_bounds = array<i64: 2, 1, 32>}, {pipeline_mode = #tpu.pipeline_mode<synchronous>, transform_indices = @transform_10, window_bounds = array<i64: 2, 2, 32>}, {pipeline_mode = #tpu.pipeline_mode<synchronous>, transform_indices = @transform_11, window_bounds = array<i64: 32, 12>}, {pipeline_mode = #tpu.pipeline_mode<synchronous>, transform_indices = @transform_12, window_bounds = array<i64: 1, 12>}, {transform_indices = @transform_13, window_bounds = array<i64: 2, 1, 16, 16>}, {transform_indices = @transform_14, window_bounds = array<i64: 2, 1, 12>}]} {
    %c0_i32 = arith.constant 0 : i32
    %0 = arith.cmpi eq, %arg1, %c0_i32 : i32
    %1 = arith.extui %0 : i1 to i32
    %c0_i32_0 = arith.constant 0 : i32
    %2 = arith.cmpi ne, %1, %c0_i32_0 : i32
    scf.if %2 {
      %c0_117 = arith.constant 0 : index
      %c0_118 = arith.constant 0 : index
      %c0_119 = arith.constant 0 : index
      %377 = vector.load %arg2[%c0_117, %c0_118, %c0_119] : memref<2x16x32xf32, #tpu.memory_space<vmem>>, vector<2x16x32xf32>
      %c0_120 = arith.constant 0 : index
      %c0_121 = arith.constant 0 : index
      %c0_122 = arith.constant 0 : index
      %378 = vector.load %arg17[%c0_120, %c0_121, %c0_122] : memref<2x16x32xf32, #tpu.memory_space<vmem>>, vector<2x16x32xf32>
      tpu.vector_store %arg17[%c0_120, %c0_121, %c0_122], %377 {strides = array<i32>} : memref<2x16x32xf32, #tpu.memory_space<vmem>>, vector<2x16x32xf32>,
      %cst_123 = arith.constant 0.000000e+00 : f32
      %379 = vector.broadcast %cst_123 : f32 to vector<2x1x12xf32>
      %c0_124 = arith.constant 0 : index
      %c0_125 = arith.constant 0 : index
      %c0_126 = arith.constant 0 : index
      %380 = vector.load %arg16[%c0_124, %c0_125, %c0_126] : memref<2x1x12xf32, #tpu.memory_space<vmem>>, vector<2x1x12xf32>
      tpu.vector_store %arg16[%c0_124, %c0_125, %c0_126], %379 {strides = array<i32>} : memref<2x1x12xf32, #tpu.memory_space<vmem>>, vector<2x1x12xf32>,
    } else {
    }
    %c0 = arith.constant 0 : index
    %c0_1 = arith.constant 0 : index
    %c0_2 = arith.constant 0 : index
    %3 = vector.load %arg17[%c0, %c0_1, %c0_2] : memref<2x16x32xf32, #tpu.memory_space<vmem>>, vector<2x16x32xf32>
    %4 = vector.shape_cast %3 : vector<2x16x32xf32> to vector<32x32xf32>
    %5 = arith.truncf %4 : vector<32x32xf32> to vector<32x32xbf16>
    %6 = arith.index_cast %arg1 : i32 to index
    %c0_3 = arith.constant 0 : index
    %c0_4 = arith.constant 0 : index
    %7 = vector.load %arg3[%6, %c0_3, %c0_4] : memref<2x32x96xbf16, #tpu.memory_space<vmem>>, vector<1x32x96xbf16>
    %8 = vector.shape_cast %7 : vector<1x32x96xbf16> to vector<32x96xbf16>
    %cst = arith.constant dense<0.000000e+00> : vector<32x96xf32>
    %9 = tpu.matmul %5, %8, %cst {dimension_numbers = #tpu.dot_dimension_numbers<[1], [0], [0], [1], [0, 0, 1, 1], [], []>} : vector<32x32xbf16>, vector<32x96xbf16>, vector<32x96xf32> -> vector<32x96xf32>
    %10 = arith.index_cast %arg1 : i32 to index
    %c0_5 = arith.constant 0 : index
    %c0_6 = arith.constant 0 : index
    %11 = vector.load %arg4[%10, %c0_5, %c0_6] : memref<2x1x96xf32, #tpu.memory_space<vmem>>, vector<1x1x96xf32>
    %12 = vector.shape_cast %11 : vector<1x1x96xf32> to vector<1x96xf32>
    %13 = vector.broadcast %12 : vector<1x96xf32> to vector<32x96xf32>
    %14 = arith.addf %9, %13 : vector<32x96xf32>
    %15 = vector.extract_strided_slice %14 {offsets = [0, 0], sizes = [32, 32], strides = [1, 1]} : vector<32x96xf32> to vector<32x32xf32>
    %cst_7 = arith.constant 0.353553385 : f32
    %16 = vector.broadcast %cst_7 : f32 to vector<32x32xf32>
    %17 = arith.mulf %15, %16 : vector<32x32xf32>
    %18 = vector.extract_strided_slice %14 {offsets = [0, 32], sizes = [32, 32], strides = [1, 1]} : vector<32x96xf32> to vector<32x32xf32>
    %19 = vector.extract_strided_slice %14 {offsets = [0, 64], sizes = [32, 32], strides = [1, 1]} : vector<32x96xf32> to vector<32x32xf32>
    %20 = vector.extract_strided_slice %17 {offsets = [0, 0], sizes = [32, 8], strides = [1, 1]} : vector<32x32xf32> to vector<32x8xf32>
    %21 = vector.shape_cast %20 : vector<32x8xf32> to vector<2x16x8xf32>
    %22 = vector.extract_strided_slice %17 {offsets = [0, 8], sizes = [32, 8], strides = [1, 1]} : vector<32x32xf32> to vector<32x8xf32>
    %23 = vector.shape_cast %22 : vector<32x8xf32> to vector<2x16x8xf32>
    %24 = vector.extract_strided_slice %17 {offsets = [0, 16], sizes = [32, 8], strides = [1, 1]} : vector<32x32xf32> to vector<32x8xf32>
    %25 = vector.shape_cast %24 : vector<32x8xf32> to vector<2x16x8xf32>
    %26 = vector.extract_strided_slice %17 {offsets = [0, 24], sizes = [32, 8], strides = [1, 1]} : vector<32x32xf32> to vector<32x8xf32>
    %27 = vector.shape_cast %26 : vector<32x8xf32> to vector<2x16x8xf32>
    %28 = vector.shape_cast %21 : vector<2x16x8xf32> to vector<1x2x16x8xf32>
    %29 = vector.shape_cast %23 : vector<2x16x8xf32> to vector<1x2x16x8xf32>
    %30 = vector.shape_cast %25 : vector<2x16x8xf32> to vector<1x2x16x8xf32>
    %31 = vector.shape_cast %27 : vector<2x16x8xf32> to vector<1x2x16x8xf32>
    %32 = tpu.concatenate %28, %29, %30, %31 in 0 : vector<1x2x16x8xf32>, vector<1x2x16x8xf32>, vector<1x2x16x8xf32>, vector<1x2x16x8xf32> -> vector<4x2x16x8xf32>
    %33 = vector.shape_cast %32 : vector<4x2x16x8xf32> to vector<8x16x8xf32>
    %34 = vector.extract_strided_slice %18 {offsets = [0, 0], sizes = [32, 8], strides = [1, 1]} : vector<32x32xf32> to vector<32x8xf32>
    %35 = vector.shape_cast %34 : vector<32x8xf32> to vector<2x16x8xf32>
    %36 = vector.extract_strided_slice %18 {offsets = [0, 8], sizes = [32, 8], strides = [1, 1]} : vector<32x32xf32> to vector<32x8xf32>
    %37 = vector.shape_cast %36 : vector<32x8xf32> to vector<2x16x8xf32>
    %38 = vector.extract_strided_slice %18 {offsets = [0, 16], sizes = [32, 8], strides = [1, 1]} : vector<32x32xf32> to vector<32x8xf32>
    %39 = vector.shape_cast %38 : vector<32x8xf32> to vector<2x16x8xf32>
    %40 = vector.extract_strided_slice %18 {offsets = [0, 24], sizes = [32, 8], strides = [1, 1]} : vector<32x32xf32> to vector<32x8xf32>
    %41 = vector.shape_cast %40 : vector<32x8xf32> to vector<2x16x8xf32>
    %42 = vector.shape_cast %35 : vector<2x16x8xf32> to vector<1x2x16x8xf32>
    %43 = vector.shape_cast %37 : vector<2x16x8xf32> to vector<1x2x16x8xf32>
    %44 = vector.shape_cast %39 : vector<2x16x8xf32> to vector<1x2x16x8xf32>
    %45 = vector.shape_cast %41 : vector<2x16x8xf32> to vector<1x2x16x8xf32>
    %46 = tpu.concatenate %42, %43, %44, %45 in 0 : vector<1x2x16x8xf32>, vector<1x2x16x8xf32>, vector<1x2x16x8xf32>, vector<1x2x16x8xf32> -> vector<4x2x16x8xf32>
    %47 = vector.shape_cast %46 : vector<4x2x16x8xf32> to vector<8x16x8xf32>
    %cst_8 = arith.constant dense<0.000000e+00> : vector<8x16x16xf32>
    %48 = tpu.matmul %33, %47, %cst_8 {dimension_numbers = #tpu.dot_dimension_numbers<[2], [2], [1], [1], [0, 0, 0, 1, 1, 1], [0], [0]>} : vector<8x16x8xf32>, vector<8x16x8xf32>, vector<8x16x16xf32> -> vector<8x16x16xf32>
    %49 = tpu.iota {dimensions = array<i32: 1>} : vector<1x16x16xi32>
    %50 = tpu.iota {dimensions = array<i32: 2>} : vector<1x16x16xi32>
    %51 = arith.cmpi sgt, %50, %49 : vector<1x16x16xi32>
    %cst_9 = arith.constant 0xFF800000 : f32
    %52 = vector.shape_cast %51 : vector<1x16x16xi1> to vector<1x16x16xi1>
    %53 = vector.broadcast %52 : vector<1x16x16xi1> to vector<8x16x16xi1>
    %54 = vector.broadcast %cst_9 : f32 to vector<8x16x16xf32>
    %55 = arith.select %53, %54, %48 : vector<8x16x16xi1>, vector<8x16x16xf32>
    %cst_10 = arith.constant dense<0xFF800000> : vector<8x16xf32>
    %56 = vector.multi_reduction <maximumf>, %55, %cst_10 [2] : vector<8x16x16xf32> to vector<8x16xf32>
    %57 = vector.shape_cast %56 : vector<8x16xf32> to vector<8x16x1xf32>
    %58 = vector.broadcast %57 : vector<8x16x1xf32> to vector<8x16x16xf32>
    %59 = arith.subf %55, %58 : vector<8x16x16xf32>
    %cst_11 = arith.constant 5.000000e-01 : f32
    %60 = vector.broadcast %cst_11 : f32 to vector<8x16x16xf32>
    %61 = arith.mulf %59, %60 : vector<8x16x16xf32>
    %cst_12 = arith.constant -1.000000e+00 : f32
    %62 = vector.broadcast %cst_12 : f32 to vector<8x16x1xf32>
    %cst_13 = arith.constant 0.000000e+00 : f32
    %63 = vector.broadcast %cst_13 : f32 to vector<8x16x1xf32>
    %64 = arith.addf %62, %63 : vector<8x16x1xf32>
    %cst_14 = arith.constant 5.000000e-01 : f32
    %65 = vector.broadcast %cst_14 : f32 to vector<8x16x1xf32>
    %66 = arith.mulf %65, %64 : vector<8x16x1xf32>
    %67 = vector.broadcast %66 : vector<8x16x1xf32> to vector<8x16x16xf32>
    %68 = arith.subf %61, %67 : vector<8x16x16xf32>
    %cst_15 = arith.constant 0.000000e+00 : f32
    %69 = vector.broadcast %cst_15 : f32 to vector<8x16x16xf32>
    %70 = arith.maximumf %68, %69 : vector<8x16x16xf32>
    %71 = arith.mulf %70, %70 : vector<8x16x16xf32>
    %cst_16 = arith.constant dense<0.000000e+00> : vector<8x16xf32>
    %72 = vector.multi_reduction <add>, %71, %cst_16 [2] : vector<8x16x16xf32> to vector<8x16xf32>
    %73 = vector.shape_cast %72 : vector<8x16xf32> to vector<8x16x1xf32>
    %cst_17 = arith.constant 1.000000e+00 : f32
    %74 = vector.broadcast %cst_17 : f32 to vector<8x16x1xf32>
    %75 = arith.cmpf oge, %73, %74 : vector<8x16x1xf32>
    %76 = arith.select %75, %66, %62 : vector<8x16x1xi1>, vector<8x16x1xf32>
    %77 = arith.select %75, %63, %66 : vector<8x16x1xi1>, vector<8x16x1xf32>
    %78 = arith.addf %76, %77 : vector<8x16x1xf32>
    %cst_18 = arith.constant 5.000000e-01 : f32
    %79 = vector.broadcast %cst_18 : f32 to vector<8x16x1xf32>
    %80 = arith.mulf %79, %78 : vector<8x16x1xf32>
    %81 = vector.broadcast %80 : vector<8x16x1xf32> to vector<8x16x16xf32>
    %82 = arith.subf %61, %81 : vector<8x16x16xf32>
    %cst_19 = arith.constant 0.000000e+00 : f32
    %83 = vector.broadcast %cst_19 : f32 to vector<8x16x16xf32>
    %84 = arith.maximumf %82, %83 : vector<8x16x16xf32>
    %85 = arith.mulf %84, %84 : vector<8x16x16xf32>
    %cst_20 = arith.constant dense<0.000000e+00> : vector<8x16xf32>
    %86 = vector.multi_reduction <add>, %85, %cst_20 [2] : vector<8x16x16xf32> to vector<8x16xf32>
    %87 = vector.shape_cast %86 : vector<8x16xf32> to vector<8x16x1xf32>
    %cst_21 = arith.constant 1.000000e+00 : f32
    %88 = vector.broadcast %cst_21 : f32 to vector<8x16x1xf32>
    %89 = arith.cmpf oge, %87, %88 : vector<8x16x1xf32>
    %90 = arith.select %89, %80, %76 : vector<8x16x1xi1>, vector<8x16x1xf32>
    %91 = arith.select %89, %77, %80 : vector<8x16x1xi1>, vector<8x16x1xf32>
    %92 = arith.addf %90, %91 : vector<8x16x1xf32>
    %cst_22 = arith.constant 5.000000e-01 : f32
    %93 = vector.broadcast %cst_22 : f32 to vector<8x16x1xf32>
    %94 = arith.mulf %93, %92 : vector<8x16x1xf32>
    %95 = vector.broadcast %94 : vector<8x16x1xf32> to vector<8x16x16xf32>
    %96 = arith.subf %61, %95 : vector<8x16x16xf32>
    %cst_23 = arith.constant 0.000000e+00 : f32
    %97 = vector.broadcast %cst_23 : f32 to vector<8x16x16xf32>
    %98 = arith.maximumf %96, %97 : vector<8x16x16xf32>
    %99 = arith.mulf %98, %98 : vector<8x16x16xf32>
    %cst_24 = arith.constant dense<0.000000e+00> : vector<8x16xf32>
    %100 = vector.multi_reduction <add>, %99, %cst_24 [2] : vector<8x16x16xf32> to vector<8x16xf32>
    %101 = vector.shape_cast %100 : vector<8x16xf32> to vector<8x16x1xf32>
    %cst_25 = arith.constant 1.000000e+00 : f32
    %102 = vector.broadcast %cst_25 : f32 to vector<8x16x1xf32>
    %103 = arith.cmpf oge, %101, %102 : vector<8x16x1xf32>
    %104 = arith.select %103, %94, %90 : vector<8x16x1xi1>, vector<8x16x1xf32>
    %105 = arith.select %103, %91, %94 : vector<8x16x1xi1>, vector<8x16x1xf32>
    %106 = arith.addf %104, %105 : vector<8x16x1xf32>
    %cst_26 = arith.constant 5.000000e-01 : f32
    %107 = vector.broadcast %cst_26 : f32 to vector<8x16x1xf32>
    %108 = arith.mulf %107, %106 : vector<8x16x1xf32>
    %109 = vector.broadcast %108 : vector<8x16x1xf32> to vector<8x16x16xf32>
    %110 = arith.subf %61, %109 : vector<8x16x16xf32>
    %cst_27 = arith.constant 0.000000e+00 : f32
    %111 = vector.broadcast %cst_27 : f32 to vector<8x16x16xf32>
    %112 = arith.maximumf %110, %111 : vector<8x16x16xf32>
    %113 = arith.mulf %112, %112 : vector<8x16x16xf32>
    %cst_28 = arith.constant dense<0.000000e+00> : vector<8x16xf32>
    %114 = vector.multi_reduction <add>, %113, %cst_28 [2] : vector<8x16x16xf32> to vector<8x16xf32>
    %115 = vector.shape_cast %114 : vector<8x16xf32> to vector<8x16x1xf32>
    %cst_29 = arith.constant 1.000000e+00 : f32
    %116 = vector.broadcast %cst_29 : f32 to vector<8x16x1xf32>
    %117 = arith.cmpf oge, %115, %116 : vector<8x16x1xf32>
    %118 = arith.select %117, %108, %104 : vector<8x16x1xi1>, vector<8x16x1xf32>
    %119 = arith.select %117, %105, %108 : vector<8x16x1xi1>, vector<8x16x1xf32>
    %120 = arith.addf %118, %119 : vector<8x16x1xf32>
    %cst_30 = arith.constant 5.000000e-01 : f32
    %121 = vector.broadcast %cst_30 : f32 to vector<8x16x1xf32>
    %122 = arith.mulf %121, %120 : vector<8x16x1xf32>
    %123 = vector.broadcast %122 : vector<8x16x1xf32> to vector<8x16x16xf32>
    %124 = arith.subf %61, %123 : vector<8x16x16xf32>
    %cst_31 = arith.constant 0.000000e+00 : f32
    %125 = vector.broadcast %cst_31 : f32 to vector<8x16x16xf32>
    %126 = arith.maximumf %124, %125 : vector<8x16x16xf32>
    %127 = arith.mulf %126, %126 : vector<8x16x16xf32>
    %cst_32 = arith.constant dense<0.000000e+00> : vector<8x16xf32>
    %128 = vector.multi_reduction <add>, %127, %cst_32 [2] : vector<8x16x16xf32> to vector<8x16xf32>
    %129 = vector.shape_cast %128 : vector<8x16xf32> to vector<8x16x1xf32>
    %cst_33 = arith.constant 1.000000e+00 : f32
    %130 = vector.broadcast %cst_33 : f32 to vector<8x16x1xf32>
    %131 = arith.cmpf oge, %129, %130 : vector<8x16x1xf32>
    %132 = arith.select %131, %122, %118 : vector<8x16x1xi1>, vector<8x16x1xf32>
    %133 = arith.select %131, %119, %122 : vector<8x16x1xi1>, vector<8x16x1xf32>
    %134 = arith.addf %132, %133 : vector<8x16x1xf32>
    %cst_34 = arith.constant 5.000000e-01 : f32
    %135 = vector.broadcast %cst_34 : f32 to vector<8x16x1xf32>
    %136 = arith.mulf %135, %134 : vector<8x16x1xf32>
    %137 = vector.broadcast %136 : vector<8x16x1xf32> to vector<8x16x16xf32>
    %138 = arith.subf %61, %137 : vector<8x16x16xf32>
    %cst_35 = arith.constant 0.000000e+00 : f32
    %139 = vector.broadcast %cst_35 : f32 to vector<8x16x16xf32>
    %140 = arith.maximumf %138, %139 : vector<8x16x16xf32>
    %141 = arith.mulf %140, %140 : vector<8x16x16xf32>
    %cst_36 = arith.constant dense<0.000000e+00> : vector<8x16xf32>
    %142 = vector.multi_reduction <add>, %141, %cst_36 [2] : vector<8x16x16xf32> to vector<8x16xf32>
    %143 = vector.shape_cast %142 : vector<8x16xf32> to vector<8x16x1xf32>
    %cst_37 = arith.constant 1.000000e+00 : f32
    %144 = vector.broadcast %cst_37 : f32 to vector<8x16x1xf32>
    %145 = arith.cmpf oge, %143, %144 : vector<8x16x1xf32>
    %146 = arith.select %145, %136, %132 : vector<8x16x1xi1>, vector<8x16x1xf32>
    %147 = arith.select %145, %133, %136 : vector<8x16x1xi1>, vector<8x16x1xf32>
    %148 = arith.addf %146, %147 : vector<8x16x1xf32>
    %cst_38 = arith.constant 5.000000e-01 : f32
    %149 = vector.broadcast %cst_38 : f32 to vector<8x16x1xf32>
    %150 = arith.mulf %149, %148 : vector<8x16x1xf32>
    %151 = vector.broadcast %150 : vector<8x16x1xf32> to vector<8x16x16xf32>
    %152 = arith.subf %61, %151 : vector<8x16x16xf32>
    %cst_39 = arith.constant 0.000000e+00 : f32
    %153 = vector.broadcast %cst_39 : f32 to vector<8x16x16xf32>
    %154 = arith.maximumf %152, %153 : vector<8x16x16xf32>
    %155 = arith.mulf %154, %154 : vector<8x16x16xf32>
    %cst_40 = arith.constant dense<0.000000e+00> : vector<8x16xf32>
    %156 = vector.multi_reduction <add>, %155, %cst_40 [2] : vector<8x16x16xf32> to vector<8x16xf32>
    %157 = vector.shape_cast %156 : vector<8x16xf32> to vector<8x16x1xf32>
    %cst_41 = arith.constant 1.000000e+00 : f32
    %158 = vector.broadcast %cst_41 : f32 to vector<8x16x1xf32>
    %159 = arith.cmpf oge, %157, %158 : vector<8x16x1xf32>
    %160 = arith.select %159, %150, %146 : vector<8x16x1xi1>, vector<8x16x1xf32>
    %161 = arith.select %159, %147, %150 : vector<8x16x1xi1>, vector<8x16x1xf32>
    %162 = arith.addf %160, %161 : vector<8x16x1xf32>
    %cst_42 = arith.constant 5.000000e-01 : f32
    %163 = vector.broadcast %cst_42 : f32 to vector<8x16x1xf32>
    %164 = arith.mulf %163, %162 : vector<8x16x1xf32>
    %165 = vector.broadcast %164 : vector<8x16x1xf32> to vector<8x16x16xf32>
    %166 = arith.subf %61, %165 : vector<8x16x16xf32>
    %cst_43 = arith.constant 0.000000e+00 : f32
    %167 = vector.broadcast %cst_43 : f32 to vector<8x16x16xf32>
    %168 = arith.maximumf %166, %167 : vector<8x16x16xf32>
    %169 = arith.mulf %168, %168 : vector<8x16x16xf32>
    %cst_44 = arith.constant dense<0.000000e+00> : vector<8x16xf32>
    %170 = vector.multi_reduction <add>, %169, %cst_44 [2] : vector<8x16x16xf32> to vector<8x16xf32>
    %171 = vector.shape_cast %170 : vector<8x16xf32> to vector<8x16x1xf32>
    %cst_45 = arith.constant 1.000000e+00 : f32
    %172 = vector.broadcast %cst_45 : f32 to vector<8x16x1xf32>
    %173 = arith.cmpf oge, %171, %172 : vector<8x16x1xf32>
    %174 = arith.select %173, %164, %160 : vector<8x16x1xi1>, vector<8x16x1xf32>
    %175 = arith.select %173, %161, %164 : vector<8x16x1xi1>, vector<8x16x1xf32>
    %176 = arith.addf %174, %175 : vector<8x16x1xf32>
    %cst_46 = arith.constant 5.000000e-01 : f32
    %177 = vector.broadcast %cst_46 : f32 to vector<8x16x1xf32>
    %178 = arith.mulf %177, %176 : vector<8x16x1xf32>
    %179 = vector.broadcast %178 : vector<8x16x1xf32> to vector<8x16x16xf32>
    %180 = arith.subf %61, %179 : vector<8x16x16xf32>
    %cst_47 = arith.constant 0.000000e+00 : f32
    %181 = vector.broadcast %cst_47 : f32 to vector<8x16x16xf32>
    %182 = arith.maximumf %180, %181 : vector<8x16x16xf32>
    %183 = arith.mulf %182, %182 : vector<8x16x16xf32>
    %cst_48 = arith.constant dense<0.000000e+00> : vector<8x16xf32>
    %184 = vector.multi_reduction <add>, %183, %cst_48 [2] : vector<8x16x16xf32> to vector<8x16xf32>
    %185 = vector.shape_cast %184 : vector<8x16xf32> to vector<8x16x1xf32>
    %cst_49 = arith.constant 1.000000e+00 : f32
    %186 = vector.broadcast %cst_49 : f32 to vector<8x16x1xf32>
    %187 = arith.cmpf oge, %185, %186 : vector<8x16x1xf32>
    %188 = arith.select %187, %178, %174 : vector<8x16x1xi1>, vector<8x16x1xf32>
    %189 = arith.select %187, %175, %178 : vector<8x16x1xi1>, vector<8x16x1xf32>
    %190 = arith.addf %188, %189 : vector<8x16x1xf32>
    %cst_50 = arith.constant 5.000000e-01 : f32
    %191 = vector.broadcast %cst_50 : f32 to vector<8x16x1xf32>
    %192 = arith.mulf %191, %190 : vector<8x16x1xf32>
    %193 = vector.broadcast %192 : vector<8x16x1xf32> to vector<8x16x16xf32>
    %194 = arith.subf %61, %193 : vector<8x16x16xf32>
    %cst_51 = arith.constant 0.000000e+00 : f32
    %195 = vector.broadcast %cst_51 : f32 to vector<8x16x16xf32>
    %196 = arith.maximumf %194, %195 : vector<8x16x16xf32>
    %197 = arith.mulf %196, %196 : vector<8x16x16xf32>
    %cst_52 = arith.constant dense<0.000000e+00> : vector<8x16xf32>
    %198 = vector.multi_reduction <add>, %197, %cst_52 [2] : vector<8x16x16xf32> to vector<8x16xf32>
    %199 = vector.shape_cast %198 : vector<8x16xf32> to vector<8x16x1xf32>
    %cst_53 = arith.constant 1.000000e+00 : f32
    %200 = vector.broadcast %cst_53 : f32 to vector<8x16x1xf32>
    %201 = arith.cmpf oge, %199, %200 : vector<8x16x1xf32>
    %202 = arith.select %201, %192, %188 : vector<8x16x1xi1>, vector<8x16x1xf32>
    %203 = vector.broadcast %202 : vector<8x16x1xf32> to vector<8x16x16xf32>
    %204 = arith.subf %61, %203 : vector<8x16x16xf32>
    %cst_54 = arith.constant 0.000000e+00 : f32
    %205 = vector.broadcast %cst_54 : f32 to vector<8x16x16xf32>
    %206 = arith.maximumf %204, %205 : vector<8x16x16xf32>
    %207 = arith.mulf %206, %206 : vector<8x16x16xf32>
    %cst_55 = arith.constant dense<0.000000e+00> : vector<8x16xf32>
    %208 = vector.multi_reduction <add>, %207, %cst_55 [2] : vector<8x16x16xf32> to vector<8x16xf32>
    %209 = vector.shape_cast %208 : vector<8x16xf32> to vector<8x16x1xf32>
    %cst_56 = arith.constant dense<0.000000e+00> : vector<8x16xf32>
    %210 = vector.multi_reduction <add>, %206, %cst_56 [2] : vector<8x16x16xf32> to vector<8x16xf32>
    %211 = vector.shape_cast %210 : vector<8x16xf32> to vector<8x16x1xf32>
    %cst_57 = arith.constant 1.000000e+00 : f32
    %212 = vector.broadcast %cst_57 : f32 to vector<8x16x1xf32>
    %213 = arith.subf %209, %212 : vector<8x16x1xf32>
    %cst_58 = arith.constant 2.000000e+00 : f32
    %214 = vector.broadcast %cst_58 : f32 to vector<8x16x1xf32>
    %215 = arith.mulf %214, %211 : vector<8x16x1xf32>
    %cst_59 = arith.constant 9.99999996E-13 : f32
    %216 = vector.broadcast %cst_59 : f32 to vector<8x16x1xf32>
    %217 = arith.addf %215, %216 : vector<8x16x1xf32>
    %218 = tpu.reciprocal %217 {approx = true} : vector<8x16x1xf32> -> vector<8x16x1xf32>
    %219 = arith.mulf %213, %218 : vector<8x16x1xf32>
    %220 = arith.addf %202, %219 : vector<8x16x1xf32>
    %221 = vector.broadcast %220 : vector<8x16x1xf32> to vector<8x16x16xf32>
    %222 = arith.subf %61, %221 : vector<8x16x16xf32>
    %cst_60 = arith.constant 0.000000e+00 : f32
    %223 = vector.broadcast %cst_60 : f32 to vector<8x16x16xf32>
    %224 = arith.maximumf %222, %223 : vector<8x16x16xf32>
    %225 = arith.mulf %224, %224 : vector<8x16x16xf32>
    %cst_61 = arith.constant dense<0.000000e+00> : vector<8x16xf32>
    %226 = vector.multi_reduction <add>, %225, %cst_61 [2] : vector<8x16x16xf32> to vector<8x16xf32>
    %227 = vector.shape_cast %226 : vector<8x16xf32> to vector<8x16x1xf32>
    %cst_62 = arith.constant dense<0.000000e+00> : vector<8x16xf32>
    %228 = vector.multi_reduction <add>, %224, %cst_62 [2] : vector<8x16x16xf32> to vector<8x16xf32>
    %229 = vector.shape_cast %228 : vector<8x16xf32> to vector<8x16x1xf32>
    %cst_63 = arith.constant 1.000000e+00 : f32
    %230 = vector.broadcast %cst_63 : f32 to vector<8x16x1xf32>
    %231 = arith.subf %227, %230 : vector<8x16x1xf32>
    %cst_64 = arith.constant 2.000000e+00 : f32
    %232 = vector.broadcast %cst_64 : f32 to vector<8x16x1xf32>
    %233 = arith.mulf %232, %229 : vector<8x16x1xf32>
    %cst_65 = arith.constant 9.99999996E-13 : f32
    %234 = vector.broadcast %cst_65 : f32 to vector<8x16x1xf32>
    %235 = arith.addf %233, %234 : vector<8x16x1xf32>
    %236 = tpu.reciprocal %235 {approx = true} : vector<8x16x1xf32> -> vector<8x16x1xf32>
    %237 = arith.mulf %231, %236 : vector<8x16x1xf32>
    %238 = arith.addf %220, %237 : vector<8x16x1xf32>
    %239 = vector.broadcast %238 : vector<8x16x1xf32> to vector<8x16x16xf32>
    %240 = arith.subf %61, %239 : vector<8x16x16xf32>
    %cst_66 = arith.constant 0.000000e+00 : f32
    %241 = vector.broadcast %cst_66 : f32 to vector<8x16x16xf32>
    %242 = arith.maximumf %240, %241 : vector<8x16x16xf32>
    %243 = arith.mulf %242, %242 : vector<8x16x16xf32>
    %cst_67 = arith.constant dense<0.000000e+00> : vector<8x16xf32>
    %244 = vector.multi_reduction <add>, %243, %cst_67 [2] : vector<8x16x16xf32> to vector<8x16xf32>
    %245 = vector.shape_cast %244 : vector<8x16xf32> to vector<8x16x1xf32>
    %cst_68 = arith.constant dense<0.000000e+00> : vector<8x16xf32>
    %246 = vector.multi_reduction <add>, %242, %cst_68 [2] : vector<8x16x16xf32> to vector<8x16xf32>
    %247 = vector.shape_cast %246 : vector<8x16xf32> to vector<8x16x1xf32>
    %cst_69 = arith.constant 1.000000e+00 : f32
    %248 = vector.broadcast %cst_69 : f32 to vector<8x16x1xf32>
    %249 = arith.subf %245, %248 : vector<8x16x1xf32>
    %cst_70 = arith.constant 2.000000e+00 : f32
    %250 = vector.broadcast %cst_70 : f32 to vector<8x16x1xf32>
    %251 = arith.mulf %250, %247 : vector<8x16x1xf32>
    %cst_71 = arith.constant 9.99999996E-13 : f32
    %252 = vector.broadcast %cst_71 : f32 to vector<8x16x1xf32>
    %253 = arith.addf %251, %252 : vector<8x16x1xf32>
    %254 = tpu.reciprocal %253 {approx = true} : vector<8x16x1xf32> -> vector<8x16x1xf32>
    %255 = arith.mulf %249, %254 : vector<8x16x1xf32>
    %256 = arith.addf %238, %255 : vector<8x16x1xf32>
    %257 = vector.broadcast %256 : vector<8x16x1xf32> to vector<8x16x16xf32>
    %258 = arith.subf %61, %257 : vector<8x16x16xf32>
    %cst_72 = arith.constant 0.000000e+00 : f32
    %259 = vector.broadcast %cst_72 : f32 to vector<8x16x16xf32>
    %260 = arith.maximumf %258, %259 : vector<8x16x16xf32>
    %261 = arith.mulf %260, %260 : vector<8x16x16xf32>
    %cst_73 = arith.constant dense<0.000000e+00> : vector<8x16xf32>
    %262 = vector.multi_reduction <add>, %261, %cst_73 [2] : vector<8x16x16xf32> to vector<8x16xf32>
    %263 = vector.shape_cast %262 : vector<8x16xf32> to vector<8x16x1xf32>
    %cst_74 = arith.constant 1.000000e-30 : f32
    %264 = vector.broadcast %cst_74 : f32 to vector<8x16x1xf32>
    %265 = arith.addf %263, %264 : vector<8x16x1xf32>
    %266 = tpu.reciprocal %265 {approx = true} : vector<8x16x1xf32> -> vector<8x16x1xf32>
    %267 = vector.broadcast %266 : vector<8x16x1xf32> to vector<8x16x16xf32>
    %268 = arith.mulf %261, %267 : vector<8x16x16xf32>
    %269 = vector.shape_cast %268 : vector<8x16x16xf32> to vector<4x2x16x16xf32>
    %cst_75 = arith.constant dense<0.000000e+00> : vector<2x16x16xf32>
    %270 = vector.multi_reduction <add>, %269, %cst_75 [0] : vector<4x2x16x16xf32> to vector<2x16x16xf32>
    %cst_76 = arith.constant 4.000000e+00 : f32
    %271 = vector.broadcast %cst_76 : f32 to vector<2x16x16xf32>
    %272 = arith.divf %270, %271 : vector<2x16x16xf32>
    %273 = vector.extract_strided_slice %19 {offsets = [0, 0], sizes = [32, 8], strides = [1, 1]} : vector<32x32xf32> to vector<32x8xf32>
    %274 = vector.extract_strided_slice %19 {offsets = [0, 8], sizes = [32, 8], strides = [1, 1]} : vector<32x32xf32> to vector<32x8xf32>
    %275 = arith.addf %273, %274 : vector<32x8xf32>
    %276 = vector.extract_strided_slice %19 {offsets = [0, 16], sizes = [32, 8], strides = [1, 1]} : vector<32x32xf32> to vector<32x8xf32>
    %277 = arith.addf %275, %276 : vector<32x8xf32>
    %278 = vector.extract_strided_slice %19 {offsets = [0, 24], sizes = [32, 8], strides = [1, 1]} : vector<32x32xf32> to vector<32x8xf32>
    %279 = arith.addf %277, %278 : vector<32x8xf32>
    %cst_77 = arith.constant 2.500000e-01 : f32
    %280 = vector.broadcast %cst_77 : f32 to vector<32x8xf32>
    %281 = arith.mulf %279, %280 : vector<32x8xf32>
    %282 = vector.shape_cast %281 : vector<32x8xf32> to vector<2x16x8xf32>
    %283 = vector.shape_cast %272 : vector<2x16x16xf32> to vector<2x1x16x16xf32>
    %284 = arith.truncf %283 : vector<2x1x16x16xf32> to vector<2x1x16x16xbf16>
    %c0_78 = arith.constant 0 : index
    %c0_79 = arith.constant 0 : index
    %c0_80 = arith.constant 0 : index
    %c0_81 = arith.constant 0 : index
    %285 = vector.load %arg15[%c0_78, %c0_79, %c0_80, %c0_81] : memref<2x1x16x16xbf16, #tpu.memory_space<vmem>>, vector<2x1x16x16xbf16>
    tpu.vector_store %arg15[%c0_78, %c0_79, %c0_80, %c0_81], %284 {strides = array<i32>} : memref<2x1x16x16xbf16, #tpu.memory_space<vmem>>, vector<2x1x16x16xbf16>,
    %cst_82 = arith.constant dense<0.000000e+00> : vector<2x16x8xf32>
    %286 = tpu.matmul %272, %282, %cst_82 {dimension_numbers = #tpu.dot_dimension_numbers<[2], [1], [1], [2], [0, 0, 0, 1, 1, 2], [0], [0]>} : vector<2x16x16xf32>, vector<2x16x8xf32>, vector<2x16x8xf32> -> vector<2x16x8xf32>
    %287 = vector.shape_cast %286 : vector<2x16x8xf32> to vector<32x8xf32>
    %288 = arith.truncf %287 : vector<32x8xf32> to vector<32x8xbf16>
    %289 = arith.index_cast %arg1 : i32 to index
    %c0_83 = arith.constant 0 : index
    %c0_84 = arith.constant 0 : index
    %290 = vector.load %arg5[%289, %c0_83, %c0_84] : memref<2x8x32xbf16, #tpu.memory_space<vmem>>, vector<1x8x32xbf16>
    %291 = vector.shape_cast %290 : vector<1x8x32xbf16> to vector<8x32xbf16>
    %cst_85 = arith.constant dense<0.000000e+00> : vector<32x32xf32>
    %292 = tpu.matmul %288, %291, %cst_85 {dimension_numbers = #tpu.dot_dimension_numbers<[1], [0], [0], [1], [0, 0, 1, 1], [], []>} : vector<32x8xbf16>, vector<8x32xbf16>, vector<32x32xf32> -> vector<32x32xf32>
    %293 = arith.index_cast %arg1 : i32 to index
    %c0_86 = arith.constant 0 : index
    %c0_87 = arith.constant 0 : index
    %294 = vector.load %arg6[%293, %c0_86, %c0_87] : memref<2x1x32xf32, #tpu.memory_space<vmem>>, vector<1x1x32xf32>
    %295 = vector.shape_cast %294 : vector<1x1x32xf32> to vector<1x32xf32>
    %296 = vector.broadcast %295 : vector<1x32xf32> to vector<32x32xf32>
    %297 = arith.addf %292, %296 : vector<32x32xf32>
    %298 = arith.index_cast %arg1 : i32 to index
    %c0_88 = arith.constant 0 : index
    %c0_89 = arith.constant 0 : index
    %299 = vector.load %arg7[%298, %c0_88, %c0_89] : memref<2x2x32xf32, #tpu.memory_space<vmem>>, vector<1x2x32xf32>
    %300 = vector.shape_cast %299 : vector<1x2x32xf32> to vector<2x32xf32>
    %301 = arith.addf %4, %297 : vector<32x32xf32>
    %302 = vector.extract_strided_slice %300 {offsets = [0, 0], sizes = [1, 32], strides = [1, 1]} : vector<2x32xf32> to vector<1x32xf32>
    %303 = vector.extract_strided_slice %300 {offsets = [1, 0], sizes = [1, 32], strides = [1, 1]} : vector<2x32xf32> to vector<1x32xf32>
    %cst_90 = arith.constant dense<0.000000e+00> : vector<32xf32>
    %304 = vector.multi_reduction <add>, %301, %cst_90 [1] : vector<32x32xf32> to vector<32xf32>
    %305 = vector.shape_cast %304 : vector<32xf32> to vector<32x1xf32>
    %cst_91 = arith.constant 3.200000e+01 : f32
    %306 = vector.broadcast %cst_91 : f32 to vector<32x1xf32>
    %307 = arith.divf %305, %306 : vector<32x1xf32>
    %308 = vector.broadcast %307 : vector<32x1xf32> to vector<32x32xf32>
    %309 = arith.subf %301, %308 : vector<32x32xf32>
    %310 = arith.mulf %309, %309 : vector<32x32xf32>
    %cst_92 = arith.constant dense<0.000000e+00> : vector<32xf32>
    %311 = vector.multi_reduction <add>, %310, %cst_92 [1] : vector<32x32xf32> to vector<32xf32>
    %312 = vector.shape_cast %311 : vector<32xf32> to vector<32x1xf32>
    %cst_93 = arith.constant 3.200000e+01 : f32
    %313 = vector.broadcast %cst_93 : f32 to vector<32x1xf32>
    %314 = arith.divf %312, %313 : vector<32x1xf32>
    %cst_94 = arith.constant 9.99999974E-6 : f32
    %315 = vector.broadcast %cst_94 : f32 to vector<32x1xf32>
    %316 = arith.addf %314, %315 : vector<32x1xf32>
    %317 = math.rsqrt %316 : vector<32x1xf32>
    %318 = vector.broadcast %317 : vector<32x1xf32> to vector<32x32xf32>
    %319 = arith.mulf %309, %318 : vector<32x32xf32>
    %320 = vector.broadcast %302 : vector<1x32xf32> to vector<32x32xf32>
    %321 = arith.mulf %319, %320 : vector<32x32xf32>
    %322 = vector.broadcast %303 : vector<1x32xf32> to vector<32x32xf32>
    %323 = arith.addf %321, %322 : vector<32x32xf32>
    %324 = arith.truncf %323 : vector<32x32xf32> to vector<32x32xbf16>
    %325 = arith.index_cast %arg1 : i32 to index
    %c0_95 = arith.constant 0 : index
    %c0_96 = arith.constant 0 : index
    %326 = vector.load %arg8[%325, %c0_95, %c0_96] : memref<2x32x64xbf16, #tpu.memory_space<vmem>>, vector<1x32x64xbf16>
    %327 = vector.shape_cast %326 : vector<1x32x64xbf16> to vector<32x64xbf16>
    %cst_97 = arith.constant dense<0.000000e+00> : vector<32x64xf32>
    %328 = tpu.matmul %324, %327, %cst_97 {dimension_numbers = #tpu.dot_dimension_numbers<[1], [0], [0], [1], [0, 0, 1, 1], [], []>} : vector<32x32xbf16>, vector<32x64xbf16>, vector<32x64xf32> -> vector<32x64xf32>
    %329 = arith.index_cast %arg1 : i32 to index
    %c0_98 = arith.constant 0 : index
    %c0_99 = arith.constant 0 : index
    %330 = vector.load %arg9[%329, %c0_98, %c0_99] : memref<2x1x64xf32, #tpu.memory_space<vmem>>, vector<1x1x64xf32>
    %331 = vector.shape_cast %330 : vector<1x1x64xf32> to vector<1x64xf32>
    %332 = vector.broadcast %331 : vector<1x64xf32> to vector<32x64xf32>
    %333 = arith.addf %328, %332 : vector<32x64xf32>
    %cst_100 = arith.constant 0.000000e+00 : f32
    %334 = vector.broadcast %cst_100 : f32 to vector<32x64xf32>
    %335 = arith.maximumf %333, %334 : vector<32x64xf32>
    %336 = arith.truncf %335 : vector<32x64xf32> to vector<32x64xbf16>
    %337 = arith.index_cast %arg1 : i32 to index
    %c0_101 = arith.constant 0 : index
    %c0_102 = arith.constant 0 : index
    %338 = vector.load %arg10[%337, %c0_101, %c0_102] : memref<2x64x32xbf16, #tpu.memory_space<vmem>>, vector<1x64x32xbf16>
    %339 = vector.shape_cast %338 : vector<1x64x32xbf16> to vector<64x32xbf16>
    %cst_103 = arith.constant dense<0.000000e+00> : vector<32x32xf32>
    %340 = tpu.matmul %336, %339, %cst_103 {dimension_numbers = #tpu.dot_dimension_numbers<[1], [0], [0], [1], [0, 0, 1, 1], [], []>} : vector<32x64xbf16>, vector<64x32xbf16>, vector<32x32xf32> -> vector<32x32xf32>
    %341 = arith.index_cast %arg1 : i32 to index
    %c0_104 = arith.constant 0 : index
    %c0_105 = arith.constant 0 : index
    %342 = vector.load %arg11[%341, %c0_104, %c0_105] : memref<2x1x32xf32, #tpu.memory_space<vmem>>, vector<1x1x32xf32>
    %343 = vector.shape_cast %342 : vector<1x1x32xf32> to vector<1x32xf32>
    %344 = vector.broadcast %343 : vector<1x32xf32> to vector<32x32xf32>
    %345 = arith.addf %340, %344 : vector<32x32xf32>
    %346 = arith.index_cast %arg1 : i32 to index
    %c0_106 = arith.constant 0 : index
    %c0_107 = arith.constant 0 : index
    %347 = vector.load %arg12[%346, %c0_106, %c0_107] : memref<2x2x32xf32, #tpu.memory_space<vmem>>, vector<1x2x32xf32>
    %348 = vector.shape_cast %347 : vector<1x2x32xf32> to vector<2x32xf32>
    %349 = arith.addf %345, %323 : vector<32x32xf32>
    %350 = vector.extract_strided_slice %348 {offsets = [0, 0], sizes = [1, 32], strides = [1, 1]} : vector<2x32xf32> to vector<1x32xf32>
    %351 = vector.extract_strided_slice %348 {offsets = [1, 0], sizes = [1, 32], strides = [1, 1]} : vector<2x32xf32> to vector<1x32xf32>
    %cst_108 = arith.constant dense<0.000000e+00> : vector<32xf32>
    %352 = vector.multi_reduction <add>, %349, %cst_108 [1] : vector<32x32xf32> to vector<32xf32>
    %353 = vector.shape_cast %352 : vector<32xf32> to vector<32x1xf32>
    %cst_109 = arith.constant 3.200000e+01 : f32
    %354 = vector.broadcast %cst_109 : f32 to vector<32x1xf32>
    %355 = arith.divf %353, %354 : vector<32x1xf32>
    %356 = vector.broadcast %355 : vector<32x1xf32> to vector<32x32xf32>
    %357 = arith.subf %349, %356 : vector<32x32xf32>
    %358 = arith.mulf %357, %357 : vector<32x32xf32>
    %cst_110 = arith.constant dense<0.000000e+00> : vector<32xf32>
    %359 = vector.multi_reduction <add>, %358, %cst_110 [1] : vector<32x32xf32> to vector<32xf32>
    %360 = vector.shape_cast %359 : vector<32xf32> to vector<32x1xf32>
    %cst_111 = arith.constant 3.200000e+01 : f32
    %361 = vector.broadcast %cst_111 : f32 to vector<32x1xf32>
    %362 = arith.divf %360, %361 : vector<32x1xf32>
    %cst_112 = arith.constant 9.99999974E-6 : f32
    %363 = vector.broadcast %cst_112 : f32 to vector<32x1xf32>
    %364 = arith.addf %362, %363 : vector<32x1xf32>
    %365 = math.rsqrt %364 : vector<32x1xf32>
    %366 = vector.broadcast %365 : vector<32x1xf32> to vector<32x32xf32>
    %367 = arith.mulf %357, %366 : vector<32x32xf32>
    %368 = vector.broadcast %350 : vector<1x32xf32> to vector<32x32xf32>
    %369 = arith.mulf %367, %368 : vector<32x32xf32>
    %370 = vector.broadcast %351 : vector<1x32xf32> to vector<32x32xf32>
    %371 = arith.addf %369, %370 : vector<32x32xf32>
    %372 = vector.shape_cast %371 : vector<32x32xf32> to vector<2x16x32xf32>
    %c0_113 = arith.constant 0 : index
    %c0_114 = arith.constant 0 : index
    %c0_115 = arith.constant 0 : index
    %373 = vector.load %arg17[%c0_113, %c0_114, %c0_115] : memref<2x16x32xf32, #tpu.memory_space<vmem>>, vector<2x16x32xf32>
    tpu.vector_store %arg17[%c0_113, %c0_114, %c0_115], %372 {strides = array<i32>} : memref<2x16x32xf32, #tpu.memory_space<vmem>>, vector<2x16x32xf32>,
    %c1_i32 = arith.constant 1 : i32
    %374 = arith.cmpi eq, %arg1, %c1_i32 : i32
    %375 = arith.extui %374 : i1 to i32
    %c0_i32_116 = arith.constant 0 : i32
    %376 = arith.cmpi ne, %375, %c0_i32_116 : i32
    scf.if %376 {
      %377 = vector.shape_cast %371 : vector<32x32xf32> to vector<2x16x32xf32>
      %378 = vector.extract_strided_slice %377 {offsets = [0, 11, 0], sizes = [2, 1, 32], strides = [1, 1, 1]} : vector<2x16x32xf32> to vector<2x1x32xf32>
      %379 = vector.shape_cast %378 : vector<2x1x32xf32> to vector<2x32xf32>
      %380 = arith.truncf %379 : vector<2x32xf32> to vector<2x32xbf16>
      %c0_117 = arith.constant 0 : index
      %c0_118 = arith.constant 0 : index
      %381 = vector.load %arg13[%c0_117, %c0_118] : memref<32x12xbf16, #tpu.memory_space<vmem>>, vector<32x12xbf16>
      %cst_119 = arith.constant dense<0.000000e+00> : vector<2x12xf32>
      %382 = tpu.matmul %380, %381, %cst_119 {dimension_numbers = #tpu.dot_dimension_numbers<[1], [0], [0], [1], [0, 0, 1, 1], [], []>} : vector<2x32xbf16>, vector<32x12xbf16>, vector<2x12xf32> -> vector<2x12xf32>
      %c0_120 = arith.constant 0 : index
      %c0_121 = arith.constant 0 : index
      %383 = vector.load %arg14[%c0_120, %c0_121] : memref<1x12xf32, #tpu.memory_space<vmem>>, vector<1x12xf32>
      %384 = vector.broadcast %383 : vector<1x12xf32> to vector<2x12xf32>
      %385 = arith.addf %382, %384 : vector<2x12xf32>
      %386 = vector.shape_cast %385 : vector<2x12xf32> to vector<2x1x12xf32>
      %c0_122 = arith.constant 0 : index
      %c0_123 = arith.constant 0 : index
      %c0_124 = arith.constant 0 : index
      %387 = vector.load %arg16[%c0_122, %c0_123, %c0_124] : memref<2x1x12xf32, #tpu.memory_space<vmem>>, vector<2x1x12xf32>
      tpu.vector_store %arg16[%c0_122, %c0_123, %c0_124], %386 {strides = array<i32>} : memref<2x1x12xf32, #tpu.memory_space<vmem>>, vector<2x1x12xf32>,
    } else {
    }
    return
  }
  func.func @transform_0(%arg0: i32, %arg1: i32) -> (i32, i32, i32) {
    %c0_i32 = arith.constant 0 : i32
    %c0_i32_0 = arith.constant 0 : i32
    %c0_i32_1 = arith.constant 0 : i32
    return %arg0, %c0_i32, %c0_i32_0 : i32, i32, i32
  }
  func.func @transform_1(%arg0: i32, %arg1: i32) -> (i32, i32, i32) {
    %c0_i32 = arith.constant 0 : i32
    %c0_i32_0 = arith.constant 0 : i32
    %c0_i32_1 = arith.constant 0 : i32
    %c0_i32_2 = arith.constant 0 : i32
    return %c0_i32, %c0_i32_0, %c0_i32_1 : i32, i32, i32
  }
  func.func @transform_2(%arg0: i32, %arg1: i32) -> (i32, i32, i32) {
    %c0_i32 = arith.constant 0 : i32
    %c0_i32_0 = arith.constant 0 : i32
    %c0_i32_1 = arith.constant 0 : i32
    %c0_i32_2 = arith.constant 0 : i32
    return %c0_i32, %c0_i32_0, %c0_i32_1 : i32, i32, i32
  }
  func.func @transform_3(%arg0: i32, %arg1: i32) -> (i32, i32, i32) {
    %c0_i32 = arith.constant 0 : i32
    %c0_i32_0 = arith.constant 0 : i32
    %c0_i32_1 = arith.constant 0 : i32
    %c0_i32_2 = arith.constant 0 : i32
    return %c0_i32, %c0_i32_0, %c0_i32_1 : i32, i32, i32
  }
  func.func @transform_4(%arg0: i32, %arg1: i32) -> (i32, i32, i32) {
    %c0_i32 = arith.constant 0 : i32
    %c0_i32_0 = arith.constant 0 : i32
    %c0_i32_1 = arith.constant 0 : i32
    %c0_i32_2 = arith.constant 0 : i32
    return %c0_i32, %c0_i32_0, %c0_i32_1 : i32, i32, i32
  }
  func.func @transform_5(%arg0: i32, %arg1: i32) -> (i32, i32, i32) {
    %c0_i32 = arith.constant 0 : i32
    %c0_i32_0 = arith.constant 0 : i32
    %c0_i32_1 = arith.constant 0 : i32
    %c0_i32_2 = arith.constant 0 : i32
    return %c0_i32, %c0_i32_0, %c0_i32_1 : i32, i32, i32
  }
  func.func @transform_6(%arg0: i32, %arg1: i32) -> (i32, i32, i32) {
    %c0_i32 = arith.constant 0 : i32
    %c0_i32_0 = arith.constant 0 : i32
    %c0_i32_1 = arith.constant 0 : i32
    %c0_i32_2 = arith.constant 0 : i32
    return %c0_i32, %c0_i32_0, %c0_i32_1 : i32, i32, i32
  }
  func.func @transform_7(%arg0: i32, %arg1: i32) -> (i32, i32, i32) {
    %c0_i32 = arith.constant 0 : i32
    %c0_i32_0 = arith.constant 0 : i32
    %c0_i32_1 = arith.constant 0 : i32
    %c0_i32_2 = arith.constant 0 : i32
    return %c0_i32, %c0_i32_0, %c0_i32_1 : i32, i32, i32
  }
  func.func @transform_8(%arg0: i32, %arg1: i32) -> (i32, i32, i32) {
    %c0_i32 = arith.constant 0 : i32
    %c0_i32_0 = arith.constant 0 : i32
    %c0_i32_1 = arith.constant 0 : i32
    %c0_i32_2 = arith.constant 0 : i32
    return %c0_i32, %c0_i32_0, %c0_i32_1 : i32, i32, i32
  }
  func.func @transform_9(%arg0: i32, %arg1: i32) -> (i32, i32, i32) {
    %c0_i32 = arith.constant 0 : i32
    %c0_i32_0 = arith.constant 0 : i32
    %c0_i32_1 = arith.constant 0 : i32
    %c0_i32_2 = arith.constant 0 : i32
    return %c0_i32, %c0_i32_0, %c0_i32_1 : i32, i32, i32
  }
  func.func @transform_10(%arg0: i32, %arg1: i32) -> (i32, i32, i32) {
    %c0_i32 = arith.constant 0 : i32
    %c0_i32_0 = arith.constant 0 : i32
    %c0_i32_1 = arith.constant 0 : i32
    %c0_i32_2 = arith.constant 0 : i32
    return %c0_i32, %c0_i32_0, %c0_i32_1 : i32, i32, i32
  }
  func.func @transform_11(%arg0: i32, %arg1: i32) -> (i32, i32) {
    %c0_i32 = arith.constant 0 : i32
    %c0_i32_0 = arith.constant 0 : i32
    %c0_i32_1 = arith.constant 0 : i32
    return %c0_i32, %c0_i32_0 : i32, i32
  }
  func.func @transform_12(%arg0: i32, %arg1: i32) -> (i32, i32) {
    %c0_i32 = arith.constant 0 : i32
    %c0_i32_0 = arith.constant 0 : i32
    %c0_i32_1 = arith.constant 0 : i32
    return %c0_i32, %c0_i32_0 : i32, i32
  }
  func.func @transform_13(%arg0: i32, %arg1: i32) -> (i32, i32, i32, i32) {
    %c0_i32 = arith.constant 0 : i32
    %c0_i32_0 = arith.constant 0 : i32
    %c0_i32_1 = arith.constant 0 : i32
    return %arg0, %arg1, %c0_i32, %c0_i32_0 : i32, i32, i32, i32
  }
  func.func @transform_14(%arg0: i32, %arg1: i32) -> (i32, i32, i32) {
    %c0_i32 = arith.constant 0 : i32
    %c0_i32_0 = arith.constant 0 : i32
    %c0_i32_1 = arith.constant 0 : i32
    return %arg0, %c0_i32, %c0_i32_0 : i32, i32, i32
  }
}

</mosaic_0001>

<bundles_post_ra>
// kernel: interformer_forward.4
= control target key start
LH: loop header
LB: loop body
LE: loop exit
PB: predicated region body
PF: predicated region fallthrough
CT: control target
= control target key end

     0   :  { %s1824_s0 = inlined_call_operand.vmem [shape: f32[2,2,4], index: 0, kind: input, shape index: {}]   ;;  %s1825_s1 = inlined_call_operand.vmem [shape: f32[2,3,32], index: 1, kind: input, shape index: {}]   ;;  %s1826_s2 = inlined_call_operand.vmem [shape: f32[2,32], index: 2, kind: input, shape index: {}]   ;;  %s1827_s3 = inlined_call_operand.vmem [shape: f32[1,32], index: 3, kind: input, shape index: {}]   ;;  %s1828_s4 = inlined_call_operand.<no memory space> [shape: f32[1,1], index: 4, kind: input, shape index: {}]   ;;  %s1829_s5 = inlined_call_operand.vmem [shape: f32[2,2,4], index: 5, kind: input, shape index: {}]   ;;  %s1830_s6 = inlined_call_operand.vmem [shape: f32[2,4,32], index: 6, kind: output, shape index: {0}]   ;;  %s1831_s7 = inlined_call_operand.hbm [shape: f32[2,2,4], index: 7, kind: output, shape index: {1}]  }
   0x1   :  { %v13_v0 = vstv %s1828_s4 }
   0x2   :  { %14 = vst [vmem:[#allocation2] sm:$0x1] %v13_v0 }
   0x3   :  { %15 = vsyncpa [#allocation4], 0 }
   0x4   :  { %17 = vsyncpa [#allocation4 + $0x1], 0  ;;  %s1592_s26 = smov 0   ;;  %s1594_s27 = smov 0  }
   0x5   :  { %s1596_s28 = smov 0   ;;  %s1598_s29 = smov 0  }
   0x6 LB: > { %s1613_s4 = sadd.s32 4294967295, %s1542_s29   ;;  %s1346_s30 = sadd.s32 4294967294, %s1542_s29   ;;  %s1542_s29 = sphi %s1598_s29, %s1837_s29   ;;  %s1538_s28 = sphi %s1596_s28, %s1836_s28   ;;  %s1534_s27 = sphi %s1594_s27, %s1835_s27   ;;  %s1530_s26 = sphi %s1592_s26, %s1834_s26  }
   0x7   : > { %s1617_s8 = sadd.s32 1, %s1542_s29   ;;  %s192_s9 = sadd.s32 1, %s1538_s28 }
   0x8   : > { %s189_s10 = ssub.s32 %s1542_s29, %s1617_s8  ;;  %p202_p0 = scmp.ne.s32.totalorder %s1538_s28, %s1534_s27 }
   0x9   : > { %p190_p1 = scmp.eq.s32.totalorder %s189_s10, 0  ;;  %p203_p2 = scmp.eq.s32.totalorder %s1613_s4, 1 }
   0xa   : > { %p208_p3 = scmp.ne.s32.totalorder %s1534_s27, %s1530_s26  ;;  %p209_p4 = scmp.eq.s32.totalorder %s1346_s30, 1 }
   0xb   : > { %s1628_s11 = scalar_select %p190_p1, %s1538_s28, %s192_s9  }
   0xc   : > { %p1630_p5 = por %p203_p2, %p202_p0  ;;  %p1634_p6 = por %p209_p4, %p208_p3 }
   0xd   : > { %p1349_p7 = scmp.ge.s32.totalorder %s1542_s29, 1  ;;  %p253_p8 = scmp.lt.s32.totalorder %s1542_s29, 3 }
   0xf   : > { %p254_p9 = pnand %p1349_p7, %p253_p8 }
  0x10   : > { %v312_v1 = vlaneseq (!%p254_p9)  ;;  %p292_p10 = scmp.lt.s32.totalorder (!%p254_p9), %s1613_s4, 1  ;;  %v1644_v2 = vld [vmem:[%s1825_s1] sm:$0x7] (!%p254_p9)  ;;  %v1544_v3 = vmov (!%p254_p9), 0.0   ;;  %vm1545_vm0 = vmmov (!%p254_p9), 0   ;;  %vm483_vm1 = vcmask (!%p254_p9), 256000  }
  0x11   : > { %257 = sbr.rel (%p254_p9) target bundleno = 1020 (0x3fc), region = 44  ;;  %1392 = vmatprep.subr.mxu1 (!%p254_p9), %v1544_v3  ;;  %1394 = vmatprep.mubr.msk.f32.mxu1 (!%p254_p9), %vm1545_vm0, %v1544_v3  ;;  %v1362_v4 = vld [vmem:[%s1827_s3] ss:$0 sm:$0xff] (!%p254_p9)  ;;  %v1659_v8 = vld [vmem:[%s1825_s1 + $0x4] sm:$0x7] (!%p254_p9)  ;;  %vm491_vm2 = vcmask (!%p254_p9), 254976  }
  0x12   : > { %v313_v5 = vshrl.u32 (!%p254_p9), %v312_v1, 7  ;;  %v315_v6 = vand.u32 (!%p254_p9), 127, %v312_v1  ;;  %v481_v7 = vmul.f32 (!%p254_p9), %v1362_v4, %v1644_v2  ;;  %1407 = vmatprep.subr.mxu0 (!%p254_p9), %v1544_v3  ;;  %1409 = vmatprep.mubr.msk.f32.mxu0 (!%p254_p9), %vm1545_vm0, %v1544_v3  ;;  %v482_v9 = vmul.f32 (!%p254_p9), %v1362_v4, %v1659_v8  ;;  %v1668_v10 = vld [vmem:[%s1826_s2] sm:$0x3] (!%p254_p9)  ;;  %s289_s16 = sand.u32 (!%p254_p9), 1, %s1534_s27   ;;  %s1377_s20 = sshll.u32 (!%p254_p9), %s1613_s4, 5 }
  0x13   : > { %v309_v11 = vld [vmem:[#allocation2] sm:$0x1] (!%p254_p9)  ;;  %v490_v15 = vmul.f32 (!%p254_p9), %v1362_v4, %v1668_v10  ;;  %vm324_vm3 = vcmask (!%p254_p9), 1043456   ;;  %vm320_vm5 = vcmask (!%p254_p9), 31744   ;;  %vm507_vm7 = vcmask (!%p254_p9), 1041409   ;;  %s1746_s17 = sshll.u32 (!%p254_p9), %s289_s16, 1  ;;  %s1782_s24 = scalar_lea.hbm (!%p254_p9), %s1831_s7, %s1377_s20 }
  0x14   : > { %v1354_v12 = vadd.s32 (!%p254_p9), 4294967294, %v315_v6  ;;  %v1358_v13 = vadd.s32 (!%p254_p9), 4294967295, %v315_v6  ;;  %v484_v14 = vsel (!%p254_p9), %vm483_vm1, %v481_v7, 0.0  ;;  %1427 = vpush (!%p254_p9), %v309_v11  ;;  %v487_v20 = vsel (!%p254_p9), %vm483_vm1, %v482_v9, 0.0  ;;  %s291_s19 = scalar_lea.vmem (!%p254_p9), [#allocation3], %s1746_s17  ;;  %s1235_s25 = scalar_lea.sflag (!%p254_p9), [#allocation4], %s289_s16 }
  0x15   : > { %485 = vadd.xlane.f32.xlu0 (!%p254_p9), %v484_v14  ;;  %v492_v17 = vsel (!%p254_p9), %vm491_vm2, %v490_v15, 0.0  ;;  %v499_v22 = vsub.s32 (!%p254_p9), 0, %v313_v5  ;;  %v514_v24 = vsub.s32 (!%p254_p9), 1, %v313_v5  ;;  %v528_v25 = vsub.s32 (!%p254_p9), 2, %v313_v5  ;;  %s1251_s21 = sshll.u32 (!%p254_p9), %s291_s19, 4  ;;  %s1252_s21 = int_to_ptr.vmem [resolvable:$true] %s1251_s21 }
  0x16   : > { %vm317_vm4 = vcmp.eq.s32.totalorder (!%p254_p9), %v313_v5, %v1354_v12  ;;  %vm399_vm6 = vcmp.eq.s32.totalorder (!%p254_p9), %v313_v5, %v1358_v13  ;;  %493 = vadd.xlane.f32.xlu1 (!%p254_p9), %v492_v17  ;;  %vm543_vm8 = vcmask (!%p254_p9), 25600   ;;  %v1546_v9 = vmov (!%p254_p9), -1.0  }
  0x17   : > { %v1355_v18 = vsel (!%p254_p9), %vm317_vm4, 1.0, %v1544_v3  ;;  %v1359_v19 = vsel (!%p254_p9), %vm399_vm6, 1.0, %v1544_v3  ;;  %v1547_v12 = vmov (!%p254_p9), -0.5   ;;  %vm824_vm4 = vcmask (!%p254_p9), 1041408  }
  0x18   : > { %s1653_s18 = scalar_select %p292_p10, %s1613_s4, 1  ;;  %1393 = vmatpush3.msk.msra.mxu1 %vm324_vm3, %v1355_v18  ;;  %1408 = vmatpush3.msk.msra.mxu0 %vm824_vm4, %v1668_v10 }
  0x19   : > { %1397 = vmatprep.subr.mxu1 %v1544_v3  ;;  %488 = vadd.xlane.f32.xlu0 %v487_v20 }
  0x1a   : > { %s1351_s23 = sshll.u32 %s1653_s18, 1  ;;  %1412 = vmatprep.subr.mxu0 %v1544_v3 }
  0x1b   : > { %s295_s30 = scalar_lea.vmem %s1824_s0, %s1351_s23  ;;  %s299_s15 = scalar_lea.vmem %s1829_s5, %s1351_s23 }
  0x1c   : > { %v1678_v16 = vld [vmem:[%s295_s30] sm:$0x3]  ;;  %s1480_s30 = scalar_lea.vmem %s1252_s21, 32 }
  0x1d   : > { %1395 = vmatmul.mubr.msk.f32.vlgmr.msra.gmra.mrb[0].mxu1 %vm320_vm5, %v1678_v16  ;;  %v311_v48 = vld [vmem:[%s299_s15] sm:$0x3]  ;;  %p1481_p11 = scmp.ne.s32.totalorder %s1252_s21, %s1480_s30 }
  0x1e   : > { %1398 = vmatpush3.msk.msra.mxu1 %vm324_vm3, %v1359_v19  ;;  %1399 = vmatprep.mubr.msk.f32.mxu1 %vm1545_vm0, %v1544_v3 }
  0x1f   : > { %1402 = vmatprep.subr.mxu1 %v1544_v3  ;;  %p1482_p12 = pnand %p1481_p11, %p1630_p5 }
  0x21   : > { %1400 = vmatmul.mubr.msk.f32.vlgmr.msra.gmra.mrb[2].mxu1 %vm320_vm5, %v1678_v16  ;;  %vm820_vm5 = vcmask 15360   ;;  %p1483_p13 = pneg %p1482_p12 }
  0x22   : > { %1404 = vmatprep.mubr.msk.f32.mxu1 %vm1545_vm0, %v1544_v3 }
  0x45   : > { %s1428_s9 = spop %1427 }
  0x46   : > { %v495_v28 = vstv %s1428_s9  ;;  %s1548_s9 = smov [#allocation3]  }
  0x47   : > { %s1484_s10 = sshll.u32 %s1548_s9, 4  ;;  %s1485_s10 = int_to_ptr.vmem [resolvable:$false] %s1484_s10 }
  0x48   : > { %s1486_s14 = scalar_lea.vmem %s1485_s10, 64  ;;  %p1487_p0 = scmp.lt.s32.totalorder %s1252_s21, %s1485_s10 }
  0x49   : > { %p1488_p1 = scmp.lt.s32.totalorder %s1486_s14, %s1480_s30 }
  0x4b   : > { %p1489_p2 = por %p1488_p1, %p1487_p0 }
  0x4d   : > { %p1490_p3 = pnand %p1489_p2, %p1483_p13 }
  0xa2   : > { %v486_v21 = vpop.xlane.xlu0 %485 }
  0xa3   : > { %v500_v26 = vrot.slane %v486_v21, %v499_v22  ;;  %v494_v29 = vpop.xlane.xlu1 %493  ;;  %v515_v30 = vrot.slane %v486_v21, %v514_v24  ;;  %v529_v31 = vrot.slane %v486_v21, %v528_v25 }
  0xa4   : > { %v496_v36 = vadd.f32 %v495_v28, %v494_v29 }
  0xa6   : > { %v489_v23 = vpop.xlane.xlu0 %488 }
  0xa7   : > { %v504_v27 = vrot.slane %v489_v23, %v499_v22  ;;  %v519_v32 = vrot.slane %v489_v23, %v514_v24  ;;  %v533_v33 = vrot.slane %v489_v23, %v528_v25 }
  0xa9   : > { %v508_v35 = vsel %vm507_vm7, %v504_v27, %v500_v26  ;;  %v536_v39 = vsel %vm507_vm7, %v533_v33, %v529_v31  ;;  %v522_v41 = vsel %vm507_vm7, %v519_v32, %v515_v30 }
  0xaa   : > { %v538_v46 = vmul.f32 %v536_v39, %v1678_v16 }
  0xf0   : > { %v1691_v34 = vpop.f32.mrb[0].mxu1 }
  0xf1   : > { %v510_v37 = vmul.f32 %v508_v35, %v1691_v34  ;;  %v1396_v38 = vpop.f32.mrb[1].mxu1 }
  0xf3   : > { %v511_v42 = vadd.f32 %v510_v37, %v496_v36 }
  0xf4   : > { %v1696_v40 = vpop.f32.mrb[2].mxu1 }
  0xf5   : > { %v524_v43 = vmul.f32 %v522_v41, %v1696_v40  ;;  %v1401_v44 = vpop.f32.mrb[3].mxu1 }
  0xf7   : > { %v525_v45 = vadd.f32 %v524_v43, %v511_v42 }
  0xf9   : > { %v539_v47 = vadd.f32 %v538_v46, %v525_v45 }
  0xfb   : > { %v1363_v49 = vclamps-f32 %v539_v47, 10.0 }
  0xfd   : > { %v542_v50 = vadd.f32 %v1363_v49, %v311_v48 }
  0xff   : > { %v544_v51 = vsel %vm543_vm8, %v542_v50, -inf }
 0x100   : > { %v545_v52 = vrot.slane %v544_v51, 4 }
 0x102   : > { %v546_v53 = vmax.f32 %v544_v51, %v545_v52 }
 0x104   : > { %v547_v54 = vrot.slane %v546_v53, 2 }
 0x106   : > { %v548_v55 = vmax.f32 %v546_v53, %v547_v54 }
 0x108   : > { %v549_v56 = vrot.slane %v548_v55, 1 }
 0x10a   : > { %v550_v57 = vmax.f32 %v548_v55, %v549_v56 }
 0x10c   : > { %v551_v58 = vsub.f32 %v542_v50, %v550_v57 }
 0x10e   : > { %v1707_v59 = vmul.f32 0.5, %v551_v58 }
 0x110   : > { %v1364_v60 = vadd.f32 0.5, %v1707_v59 }
 0x112   : > { %v554_v61 = vmax.f32 %v1364_v60, 0.0 }
 0x114   : > { %v555_v62 = vmul.f32 %v554_v61, %v554_v61 }
 0x116   : > { %v556_v63 = vsel %vm543_vm8, %v555_v62, 0.0 }
 0x117   : > { %v557_v0 = vrot.slane %v556_v63, 4 }
 0x119   : > { %v558_v1 = vadd.f32 %v557_v0, %v556_v63 }
 0x11b   : > { %v559_v4 = vrot.slane %v558_v1, 2 }
 0x11d   : > { %v560_v5 = vadd.f32 %v559_v4, %v558_v1 }
 0x11f   : > { %v561_v6 = vrot.slane %v560_v5, 1 }
 0x121   : > { %v562_v7 = vadd.f32 %v561_v6, %v560_v5 }
 0x123   : > { %vm563_vm9 = vcmp.ge.f32.partialorder %v562_v7, 1.0 }
 0x124   : > { %v564_v11 = vsel %vm563_vm9, -0.5, %v1546_v9  ;;  %v565_v13 = vsel %vm563_vm9, 0.0, %v1547_v12 }
 0x125   : > { %v566_v14 = vadd.f32 %v565_v13, %v564_v11 }
 0x127   : > { %v567_v15 = vmul.f32 0.5, %v566_v14 }
 0x129   : > { %v568_v17 = vsub.f32 %v1707_v59, %v567_v15 }
 0x12b   : > { %v569_v18 = vmax.f32 %v568_v17, 0.0 }
 0x12d   : > { %v570_v19 = vmul.f32 %v569_v18, %v569_v18 }
 0x12f   : > { %v571_v20 = vsel %vm543_vm8, %v570_v19, 0.0 }
 0x130   : > { %v572_v21 = vrot.slane %v571_v20, 4 }
 0x132   : > { %v573_v22 = vadd.f32 %v572_v21, %v571_v20 }
 0x134   : > { %v574_v23 = vrot.slane %v573_v22, 2 }
 0x136   : > { %v575_v24 = vadd.f32 %v574_v23, %v573_v22 }
 0x138   : > { %v576_v25 = vrot.slane %v575_v24, 1 }
 0x13a   : > { %v577_v26 = vadd.f32 %v576_v25, %v575_v24 }
 0x13c   : > { %vm578_vm10 = vcmp.ge.f32.partialorder %v577_v26, 1.0 }
 0x13d   : > { %v579_v27 = vsel %vm578_vm10, %v567_v15, %v564_v11  ;;  %v580_v28 = vsel %vm578_vm10, %v565_v13, %v567_v15 }
 0x13e   : > { %v581_v29 = vadd.f32 %v580_v28, %v579_v27 }
 0x140   : > { %v582_v30 = vmul.f32 0.5, %v581_v29 }
 0x142   : > { %v583_v31 = vsub.f32 %v1707_v59, %v582_v30 }
 0x144   : > { %v584_v32 = vmax.f32 %v583_v31, 0.0 }
 0x146   : > { %v585_v33 = vmul.f32 %v584_v32, %v584_v32 }
 0x148   : > { %v586_v35 = vsel %vm543_vm8, %v585_v33, 0.0 }
 0x149   : > { %v587_v36 = vrot.slane %v586_v35, 4 }
 0x14b   : > { %v588_v37 = vadd.f32 %v587_v36, %v586_v35 }
 0x14d   : > { %v589_v38 = vrot.slane %v588_v37, 2 }
 0x14f   : > { %v590_v39 = vadd.f32 %v589_v38, %v588_v37 }
 0x151   : > { %v591_v41 = vrot.slane %v590_v39, 1 }
 0x153   : > { %v592_v42 = vadd.f32 %v591_v41, %v590_v39 }
 0x155   : > { %vm593_vm11 = vcmp.ge.f32.partialorder %v592_v42, 1.0 }
 0x156   : > { %v594_v43 = vsel %vm593_vm11, %v582_v30, %v579_v27  ;;  %v595_v44 = vsel %vm593_vm11, %v580_v28, %v582_v30 }
 0x157   : > { %v596_v45 = vadd.f32 %v595_v44, %v594_v43 }
 0x159   : > { %v597_v46 = vmul.f32 0.5, %v596_v45 }
 0x15b   : > { %v598_v47 = vsub.f32 %v1707_v59, %v597_v46 }
 0x15d   : > { %v599_v48 = vmax.f32 %v598_v47, 0.0 }
 0x15f   : > { %v600_v49 = vmul.f32 %v599_v48, %v599_v48 }
 0x161   : > { %v601_v50 = vsel %vm543_vm8, %v600_v49, 0.0 }
 0x162   : > { %v602_v51 = vrot.slane %v601_v50, 4 }
 0x164   : > { %v603_v52 = vadd.f32 %v602_v51, %v601_v50 }
 0x166   : > { %v604_v53 = vrot.slane %v603_v52, 2 }
 0x168   : > { %v605_v54 = vadd.f32 %v604_v53, %v603_v52 }
 0x16a   : > { %v606_v55 = vrot.slane %v605_v54, 1 }
 0x16c   : > { %v607_v56 = vadd.f32 %v606_v55, %v605_v54 }
 0x16e   : > { %vm608_vm12 = vcmp.ge.f32.partialorder %v607_v56, 1.0 }
 0x16f   : > { %v609_v57 = vsel %vm608_vm12, %v597_v46, %v594_v43  ;;  %v610_v58 = vsel %vm608_vm12, %v595_v44, %v597_v46 }
 0x170   : > { %v611_v60 = vadd.f32 %v610_v58, %v609_v57 }
 0x172   : > { %v612_v61 = vmul.f32 0.5, %v611_v60 }
 0x174   : > { %v613_v62 = vsub.f32 %v1707_v59, %v612_v61 }
 0x176   : > { %v614_v63 = vmax.f32 %v613_v62, 0.0 }
 0x178   : > { %v615_v0 = vmul.f32 %v614_v63, %v614_v63 }
 0x17a   : > { %v616_v1 = vsel %vm543_vm8, %v615_v0, 0.0 }
 0x17b   : > { %v617_v4 = vrot.slane %v616_v1, 4 }
 0x17d   : > { %v618_v5 = vadd.f32 %v617_v4, %v616_v1 }
 0x17f   : > { %v619_v6 = vrot.slane %v618_v5, 2 }
 0x181   : > { %v620_v7 = vadd.f32 %v619_v6, %v618_v5 }
 0x183   : > { %v621_v9 = vrot.slane %v620_v7, 1 }
 0x185   : > { %v622_v11 = vadd.f32 %v621_v9, %v620_v7 }
 0x187   : > { %vm623_vm13 = vcmp.ge.f32.partialorder %v622_v11, 1.0 }
 0x188   : > { %v624_v12 = vsel %vm623_vm13, %v612_v61, %v609_v57  ;;  %v625_v13 = vsel %vm623_vm13, %v610_v58, %v612_v61 }
 0x189   : > { %v626_v14 = vadd.f32 %v625_v13, %v624_v12 }
 0x18b   : > { %v627_v15 = vmul.f32 0.5, %v626_v14 }
 0x18d   : > { %v628_v17 = vsub.f32 %v1707_v59, %v627_v15 }
 0x18f   : > { %v629_v18 = vmax.f32 %v628_v17, 0.0 }
 0x191   : > { %v630_v19 = vmul.f32 %v629_v18, %v629_v18 }
 0x193   : > { %v631_v20 = vsel %vm543_vm8, %v630_v19, 0.0 }
 0x194   : > { %v632_v21 = vrot.slane %v631_v20, 4 }
 0x196   : > { %v633_v22 = vadd.f32 %v632_v21, %v631_v20 }
 0x198   : > { %v634_v23 = vrot.slane %v633_v22, 2 }
 0x19a   : > { %v635_v24 = vadd.f32 %v634_v23, %v633_v22 }
 0x19c   : > { %v636_v25 = vrot.slane %v635_v24, 1 }
 0x19e   : > { %v637_v26 = vadd.f32 %v636_v25, %v635_v24 }
 0x1a0   : > { %vm638_vm14 = vcmp.ge.f32.partialorder %v637_v26, 1.0 }
 0x1a1   : > { %v639_v27 = vsel %vm638_vm14, %v627_v15, %v624_v12  ;;  %v640_v28 = vsel %vm638_vm14, %v625_v13, %v627_v15 }
 0x1a2   : > { %v641_v29 = vadd.f32 %v640_v28, %v639_v27 }
 0x1a4   : > { %v642_v30 = vmul.f32 0.5, %v641_v29 }
 0x1a6   : > { %v643_v31 = vsub.f32 %v1707_v59, %v642_v30 }
 0x1a8   : > { %v644_v32 = vmax.f32 %v643_v31, 0.0 }
 0x1aa   : > { %v645_v33 = vmul.f32 %v644_v32, %v644_v32 }
 0x1ac   : > { %v646_v35 = vsel %vm543_vm8, %v645_v33, 0.0 }
 0x1ad   : > { %v647_v36 = vrot.slane %v646_v35, 4 }
 0x1af   : > { %v648_v37 = vadd.f32 %v647_v36, %v646_v35 }
 0x1b1   : > { %v649_v38 = vrot.slane %v648_v37, 2 }
 0x1b3   : > { %v650_v39 = vadd.f32 %v649_v38, %v648_v37 }
 0x1b5   : > { %v651_v41 = vrot.slane %v650_v39, 1 }
 0x1b7   : > { %v652_v42 = vadd.f32 %v651_v41, %v650_v39 }
 0x1b9   : > { %vm653_vm15 = vcmp.ge.f32.partialorder %v652_v42, 1.0 }
 0x1ba   : > { %v654_v43 = vsel %vm653_vm15, %v642_v30, %v639_v27  ;;  %v655_v44 = vsel %vm653_vm15, %v640_v28, %v642_v30 }
 0x1bb   : > { %v656_v45 = vadd.f32 %v655_v44, %v654_v43 }
 0x1bd   : > { %v657_v46 = vmul.f32 0.5, %v656_v45 }
 0x1bf   : > { %v658_v47 = vsub.f32 %v1707_v59, %v657_v46 }
 0x1c1   : > { %v659_v48 = vmax.f32 %v658_v47, 0.0 }
 0x1c3   : > { %v660_v49 = vmul.f32 %v659_v48, %v659_v48 }
 0x1c5   : > { %v661_v50 = vsel %vm543_vm8, %v660_v49, 0.0 }
 0x1c6   : > { %v662_v51 = vrot.slane %v661_v50, 4 }
 0x1c8   : > { %v663_v52 = vadd.f32 %v662_v51, %v661_v50 }
 0x1ca   : > { %v664_v53 = vrot.slane %v663_v52, 2 }
 0x1cc   : > { %v665_v54 = vadd.f32 %v664_v53, %v663_v52 }
 0x1ce   : > { %v666_v55 = vrot.slane %v665_v54, 1 }
 0x1d0   : > { %v667_v56 = vadd.f32 %v666_v55, %v665_v54 }
 0x1d2   : > { %vm668_vm1 = vcmp.ge.f32.partialorder %v667_v56, 1.0 }
 0x1d3   : > { %v669_v57 = vsel %vm668_vm1, %v657_v46, %v654_v43  ;;  %v670_v58 = vsel %vm668_vm1, %v655_v44, %v657_v46 }
 0x1d4   : > { %v671_v60 = vadd.f32 %v670_v58, %v669_v57 }
 0x1d6   : > { %v672_v61 = vmul.f32 0.5, %v671_v60 }
 0x1d8   : > { %v673_v62 = vsub.f32 %v1707_v59, %v672_v61 }
 0x1da   : > { %v674_v63 = vmax.f32 %v673_v62, 0.0 }
 0x1dc   : > { %v675_v0 = vmul.f32 %v674_v63, %v674_v63 }
 0x1de   : > { %v676_v1 = vsel %vm543_vm8, %v675_v0, 0.0 }
 0x1df   : > { %v677_v4 = vrot.slane %v676_v1, 4 }
 0x1e1   : > { %v678_v5 = vadd.f32 %v677_v4, %v676_v1 }
 0x1e3   : > { %v679_v6 = vrot.slane %v678_v5, 2 }
 0x1e5   : > { %v680_v7 = vadd.f32 %v679_v6, %v678_v5 }
 0x1e7   : > { %v681_v9 = vrot.slane %v680_v7, 1 }
 0x1e9   : > { %v682_v11 = vadd.f32 %v681_v9, %v680_v7 }
 0x1eb   : > { %vm683_vm2 = vcmp.ge.f32.partialorder %v682_v11, 1.0 }
 0x1ec   : > { %v684_v12 = vsel %vm683_vm2, %v672_v61, %v669_v57  ;;  %v685_v13 = vsel %vm683_vm2, %v670_v58, %v672_v61 }
 0x1ed   : > { %v686_v14 = vadd.f32 %v685_v13, %v684_v12 }
 0x1ef   : > { %v687_v15 = vmul.f32 0.5, %v686_v14 }
 0x1f1   : > { %v688_v17 = vsub.f32 %v1707_v59, %v687_v15 }
 0x1f3   : > { %v689_v18 = vmax.f32 %v688_v17, 0.0 }
 0x1f5   : > { %v690_v19 = vmul.f32 %v689_v18, %v689_v18 }
 0x1f7   : > { %v691_v20 = vsel %vm543_vm8, %v690_v19, 0.0 }
 0x1f8   : > { %v692_v21 = vrot.slane %v691_v20, 4 }
 0x1fa   : > { %v693_v22 = vadd.f32 %v692_v21, %v691_v20 }
 0x1fc   : > { %v694_v23 = vrot.slane %v693_v22, 2 }
 0x1fe   : > { %v695_v24 = vadd.f32 %v694_v23, %v693_v22 }
 0x200   : > { %v696_v25 = vrot.slane %v695_v24, 1 }
 0x202   : > { %v697_v26 = vadd.f32 %v696_v25, %v695_v24 }
 0x204   : > { %vm698_vm3 = vcmp.ge.f32.partialorder %v697_v26, 1.0 }
 0x205   : > { %v699_v27 = vsel %vm698_vm3, %v687_v15, %v684_v12 }
 0x206   : > { %v700_v28 = vsub.f32 %v1707_v59, %v699_v27 }
 0x208   : > { %v701_v29 = vmax.f32 %v700_v28, 0.0 }
 0x20a   : > { %v702_v30 = vmul.f32 %v701_v29, %v701_v29  ;;  %v710_v31 = vsel %vm543_vm8, %v701_v29, 0.0 }
 0x20b   : > { %v711_v32 = vrot.slane %v710_v31, 4 }
 0x20c   : > { %v703_v33 = vsel %vm543_vm8, %v702_v30, 0.0 }
 0x20d   : > { %v704_v35 = vrot.slane %v703_v33, 4  ;;  %v712_v36 = vadd.f32 %v711_v32, %v710_v31 }
 0x20f   : > { %v713_v37 = vrot.slane %v712_v36, 2  ;;  %v705_v38 = vadd.f32 %v704_v35, %v703_v33 }
 0x211   : > { %v714_v39 = vadd.f32 %v713_v37, %v712_v36  ;;  %v706_v42 = vrot.slane %v705_v38, 2 }
 0x213   : > { %v715_v41 = vrot.slane %v714_v39, 1  ;;  %v707_v45 = vadd.f32 %v706_v42, %v705_v38 }
 0x215   : > { %v716_v43 = vadd.f32 %v715_v41, %v714_v39  ;;  %v708_v47 = vrot.slane %v707_v45, 1 }
 0x217   : > { %v718_v44 = vmul.f32 2.0, %v716_v43  ;;  %v709_v48 = vadd.f32 %v708_v47, %v707_v45 }
 0x219   : > { %v719_v46 = vadd.f32 1e-12, %v718_v44  ;;  %v1365_v49 = vadd.f32 -1.0, %v709_v48 }
 0x21b   : > { %1472 = vrcp.f32 %v719_v46 }
 0x225   : > { %v1473_v50 = vpop.eup %1472 }
 0x226   : > { %v721_v51 = vmul.f32 %v1473_v50, %v1365_v49 }
 0x228   : > { %v722_v52 = vadd.f32 %v721_v51, %v699_v27 }
 0x22a   : > { %v723_v53 = vsub.f32 %v1707_v59, %v722_v52 }
 0x22c   : > { %v724_v54 = vmax.f32 %v723_v53, 0.0 }
 0x22e   : > { %v725_v55 = vmul.f32 %v724_v54, %v724_v54  ;;  %v733_v56 = vsel %vm543_vm8, %v724_v54, 0.0 }
 0x22f   : > { %v734_v57 = vrot.slane %v733_v56, 4 }
 0x230   : > { %v726_v58 = vsel %vm543_vm8, %v725_v55, 0.0 }
 0x231   : > { %v727_v60 = vrot.slane %v726_v58, 4  ;;  %v735_v61 = vadd.f32 %v734_v57, %v733_v56  ;;  %v818_v57 = vrot.slane %v1659_v8, 7 }
 0x233   : > { %v736_v10 = vrot.slane %v735_v61, 2  ;;  %v728_v62 = vadd.f32 %v727_v60, %v726_v58  ;;  %v819_v58 = vsel %vm507_vm7, %v818_v57, %v1644_v2 }
 0x234   : > { %1403 = vmatpush3.msk.msra.mxu1 %vm824_vm4, %v819_v58 }
 0x235   : > { %v737_v63 = vadd.f32 %v736_v10, %v735_v61  ;;  %v729_v1 = vrot.slane %v728_v62, 2  ;;  %v1150_v10 = vrot.slane %v1659_v8, 1 }
 0x237   : > { %v738_v0 = vrot.slane %v737_v63, 1  ;;  %v730_v6 = vadd.f32 %v729_v1, %v728_v62 }
 0x239   : > { %v739_v4 = vadd.f32 %v738_v0, %v737_v63  ;;  %v731_v9 = vrot.slane %v730_v6, 1 }
 0x23b   : > { %v741_v5 = vmul.f32 2.0, %v739_v4  ;;  %v732_v11 = vadd.f32 %v731_v9, %v730_v6 }
 0x23d   : > { %v742_v7 = vadd.f32 1e-12, %v741_v5  ;;  %v1366_v12 = vadd.f32 -1.0, %v732_v11 }
 0x23f   : > { %1474 = vrcp.f32 %v742_v7 }
 0x249   : > { %v1475_v13 = vpop.eup %1474 }
 0x24a   : > { %v744_v14 = vmul.f32 %v1475_v13, %v1366_v12 }
 0x24c   : > { %v745_v15 = vadd.f32 %v744_v14, %v722_v52 }
 0x24e   : > { %v746_v17 = vsub.f32 %v1707_v59, %v745_v15 }
 0x250   : > { %v747_v18 = vmax.f32 %v746_v17, 0.0 }
 0x252   : > { %v748_v19 = vmul.f32 %v747_v18, %v747_v18  ;;  %v756_v20 = vsel %vm543_vm8, %v747_v18, 0.0 }
 0x253   : > { %v757_v21 = vrot.slane %v756_v20, 4 }
 0x254   : > { %v749_v22 = vsel %vm543_vm8, %v748_v19, 0.0 }
 0x255   : > { %v750_v23 = vrot.slane %v749_v22, 4  ;;  %v758_v24 = vadd.f32 %v757_v21, %v756_v20 }
 0x257   : > { %v759_v25 = vrot.slane %v758_v24, 2  ;;  %v751_v26 = vadd.f32 %v750_v23, %v749_v22 }
 0x259   : > { %v760_v27 = vadd.f32 %v759_v25, %v758_v24  ;;  %v752_v29 = vrot.slane %v751_v26, 2 }
 0x25b   : > { %v761_v28 = vrot.slane %v760_v27, 1  ;;  %v753_v32 = vadd.f32 %v752_v29, %v751_v26 }
 0x25d   : > { %v762_v30 = vadd.f32 %v761_v28, %v760_v27  ;;  %v754_v35 = vrot.slane %v753_v32, 1 }
 0x25f   : > { %v764_v31 = vmul.f32 2.0, %v762_v30  ;;  %v755_v36 = vadd.f32 %v754_v35, %v753_v32 }
 0x261   : > { %v765_v33 = vadd.f32 1e-12, %v764_v31  ;;  %v1367_v37 = vadd.f32 -1.0, %v755_v36 }
 0x263   : > { %1476 = vrcp.f32 %v765_v33 }
 0x26d   : > { %v1477_v38 = vpop.eup %1476 }
 0x26e   : > { %v767_v39 = vmul.f32 %v1477_v38, %v1367_v37 }
 0x270   : > { %v768_v41 = vadd.f32 %v767_v39, %v745_v15 }
 0x272   : > { %v769_v42 = vsub.f32 %v1707_v59, %v768_v41 }
 0x274   : > { %v770_v43 = vmax.f32 %v769_v42, 0.0 }
 0x276   : > { %v771_v44 = vmul.f32 %v770_v43, %v770_v43 }
 0x278   : > { %v772_v45 = vsel %vm543_vm8, %v771_v44, 0.0 }
 0x279   : > { %v773_v46 = vrot.slane %v772_v45, 4 }
 0x27b   : > { %v774_v47 = vadd.f32 %v773_v46, %v772_v45 }
 0x27d   : > { %v775_v48 = vrot.slane %v774_v47, 2 }
 0x27f   : > { %v776_v49 = vadd.f32 %v775_v48, %v774_v47 }
 0x281   : > { %v777_v50 = vrot.slane %v776_v49, 1 }
 0x283   : > { %v778_v51 = vadd.f32 %v777_v50, %v776_v49 }
 0x285   : > { %v779_v52 = vadd.f32 1e-30, %v778_v51 }
 0x287   : > { %1478 = vrcp.f32 %v779_v52 }
 0x291   : > { %v1479_v53 = vpop.eup %1478 }
 0x292   : > { %v781_v59 = vmul.f32 %v1479_v53, %v771_v44 }
 0x294   : > { %897 = vxpose.xlu1.b32.start.end [1/1] (short) (narrow) %v781_v59, 8  ;;  %v1005_v54 = vmul.f32 %v781_v59, %v1696_v40  ;;  %782 = vst.msk [vmem:[%s291_s19] sm:$0x3] %vm543_vm8, %v781_v59  ;;  %v1116_v55 = vmul.f32 %v781_v59, %v1678_v16  ;;  %v783_v56 = vmul.f32 %v781_v59, %v1691_v34  ;;  %v1038_v40 = vrot.slane %v1644_v2, 1 }
 0x295   : > { %v1149_v34 = vrot.slane %v1644_v2, 2 }
 0x296   : > { %1006 = vxpose.xlu0.b32.start.end [1/1] (short) (narrow) %v1005_v54, 8  ;;  %v1039_v60 = vsel %vm507_vm7, %v1659_v8, %v1038_v40 }
 0x297   : > { %v1151_v63 = vsel %vm507_vm7, %v1150_v10, %v1149_v34 }
 0x298   : > { %1117 = vxpose.xlu1.b32.start.end [1/1] (short) (narrow) %v1116_v55, 8 }
 0x29a   : > { %784 = vxpose.xlu0.b32.start.end [1/1] (short) (narrow) %v783_v56, 8 }
 0x314   : > { %v913_v61 = vpop.trf.xlu1 }
 0x315   : > { %1410 = vmatmul.mubr.msk.f32.vlgmr.msra.gmra.mrb[0].mxu0 %vm820_vm5, %v913_v61 }
 0x316   : > { %1413 = vmatpush3.msk.msra.mxu0 %vm824_vm4, %v1039_v60  ;;  %1414 = vmatprep.mubr.msk.f32.mxu0 %vm1545_vm0, %v1544_v3  ;;  %v1022_v16 = vpop.trf.xlu0 }
 0x317   : > { %1417 = vmatprep.subr.mxu0 %v1544_v3 }
 0x318   : > { %v1133_v0 = vpop.trf.xlu1 }
 0x31a   : > { %v800_v62 = vpop.trf.xlu0 }
 0x31b   : > { %1405 = vmatmul.mubr.msk.f32.vlgmr.msra.gmra.mrb[4].mxu1 %vm820_vm5, %v800_v62 }
 0x31d   : > { %1415 = vmatmul.mubr.msk.f32.vlgmr.msra.gmra.mrb[0].mxu0 %vm820_vm5, %v1022_v16 }
 0x31e   : > { %1418 = vmatpush3.msk.msra.mxu0 %vm824_vm4, %v1151_v63  ;;  %1419 = vmatprep.mubr.msk.f32.mxu0 %vm1545_vm0, %v1544_v3 }
 0x325   : > { %1420 = vmatmul.mubr.msk.f32.vlgmr.msra.gmra.mrb[0].mxu0 %vm820_vm5, %v1133_v0 }
 0x326   : > { %1493 = shalt.err (!%p1490_p3)
}
 0x327   : > { %s1494_s4 = scalar_lea.hbm %s1782_s24, 32  ;;  %s1498_s17 = scalar_lea.hbm %s1831_s7, 64 }
 0x328   : > { %p1495_p4 = scmp.ne.s32.totalorder %s1782_s24, %s1494_s4  ;;  %p1499_p9 = scmp.lt.u32.totalorder %s1782_s24, %s1831_s7 }
 0x329   : > { %p1500_p10 = scmp.lt.u32.totalorder %s1498_s17, %s1494_s4  ;;  %p1502_p12 = scmp.lt.u32.totalorder %s1494_s4, %s1782_s24 }
 0x32a   : > { %p1496_p7 = pnand %p1495_p4, %p1630_p5 }
 0x32b   : > { %p1501_p11 = por %p1500_p10, %p1499_p9 }
 0x32c   : > { %p1497_p8 = pneg %p1496_p7 }
 0x32d   : > { %p1503_p13 = por %p1502_p12, %p1501_p11 }
 0x32f   : > { %p1504_p0 = pnand %p1503_p13, %p1497_p8 }
 0x331   : > { %1507 = shalt.err (!%p1504_p0)
}
 0x332   : > { %1429 = dma.vmem_to_hbm [thread:$0]  (%p1630_p5), %s1252_s21, 32, %s1782_s24, %s1235_s25   ;;  %vm1228_vm0 = vcmask 257024  }
 0x333   : > { %s1353_s22 = sshll.u32 %s1653_s18, 2 }
 0x334   : > { %s303_s9 = scalar_lea.vmem %s1830_s6, %s1353_s22 }
 0x3ee   : > { %v893_v2 = vpop.f32.mrb[4].mxu1 }
 0x3ef   : > { %v1406_v3 = vpop.f32.mrb[5].mxu1 }
 0x3f8   : > { %v1223_v8 = vpop.f32.mrb[0].mxu0 }
 0x3f9   : > { %v1422_v1 = vadd.f32 %v1223_v8, %v893_v2  ;;  %v1421_v4 = vpop.f32.mrb[1].mxu0 }
 0x3fb   : > { %1229 = vst.msk [vmem:[%s303_s9] sm:$0xf] %vm1228_vm0, %v1422_v1 }
 0x3fc PF: > { %p1435_p1 = scmp.ge.s32.totalorder %s1542_s29, 2  ;;  %s1270_s12 = sand.u32 1, %s1530_s26  }
 0x3fd   : > { %s1271_s21 = scalar_lea.sflag [#allocation4], %s1270_s12 }
 0x3fe   : > { %p1432_p5 = pnand %p1435_p1, %p1634_p6 }
 0x400   : > { %1525 = dma.done.wait (!%p1432_p5), %s1271_s21, 32  }
 0x401   : > { %1527 = vsyncadd (!%p1432_p5), %s1271_s21, 4294967264  ;;  %p20_p2 = scmp.ge.s32.totalorder %s1617_s8, 4   ;;  %s1834_s26 = smov %s1534_s27 }
 0x402   : > { %s1835_s27 = smov %s1538_s28  ;;  %s1836_s28 = smov %s1628_s11 }
 0x403   : > { %s1837_s29 = smov %s1617_s8  ;;  %22 = sbr.rel (!%p20_p2) target bundleno = 6 (0x6), region = 94 }
 0x40a   :  { %1276 = vsyncpa [#allocation4], 1 }
 0x40b   :  { %1278 = vsyncpa [#allocation4 + $0x1], 1 }

// kernel: interformer_forward.3
= control target key start
LH: loop header
LB: loop body
LE: loop exit
PB: predicated region body
PF: predicated region fallthrough
CT: control target
= control target key end

     0   :  { %s1507_s26 = smov 0   ;;  %s1669_s0 = inlined_call_operand.vmem [shape: f32[2,3,8], index: 0, kind: input, shape index: {}]   ;;  %s1670_s1 = inlined_call_operand.vmem [shape: f32[3,3,32], index: 1, kind: input, shape index: {}]   ;;  %s1671_s2 = inlined_call_operand.vmem [shape: f32[3,32], index: 2, kind: input, shape index: {}]   ;;  %s1672_s3 = inlined_call_operand.vmem [shape: f32[1,32], index: 3, kind: input, shape index: {}]   ;;  %s1673_s4 = inlined_call_operand.<no memory space> [shape: f32[1,1], index: 4, kind: input, shape index: {}]   ;;  %s1674_s5 = inlined_call_operand.vmem [shape: f32[2,3,8], index: 5, kind: input, shape index: {}]   ;;  %s1675_s6 = inlined_call_operand.vmem [shape: f32[2,8,32], index: 6, kind: output, shape index: {0}]   ;;  %s1676_s7 = inlined_call_operand.vmem [shape: f32[2,3,8], index: 7, kind: output, shape index: {1}]  }
   0x1   :  { %v13_v0 = vstv %s1673_s4 }
   0x2   :  { %14 = vst [vmem:[#allocation2] sm:$0x1] %v13_v0 }
   0x3 LB: > { %s1348_s27 = sadd.s32 4294967295, %s1457_s26   ;;  %p1352_p0 = scmp.ge.s32.totalorder %s1457_s26, 1  ;;  %s1457_s26 = sphi %s1507_s26, %s20_s26  }
   0x4   : > { %p250_p1 = scmp.lt.s32.totalorder %s1457_s26, 3 }
   0x6   : > { %p251_p2 = pnand %p1352_p0, %p250_p1 }
   0x7   : > { %v313_v1 = vlaneseq (!%p251_p2)  ;;  %p288_p3 = scmp.lt.s32.totalorder (!%p251_p2), %s1348_s27, 1  ;;  %v1518_v2 = vld [vmem:[%s1670_s1] sm:$0x7] (!%p251_p2)  ;;  %v1459_v3 = vmov (!%p251_p2), 0.0   ;;  %vm1460_vm0 = vmmov (!%p251_p2), 0   ;;  %vm478_vm1 = vcmask (!%p251_p2), 256000  }
   0x8   : > { %254 = sbr.rel (%p251_p2) target bundleno = 1010 (0x3f2), region = 44  ;;  %1393 = vmatprep.subr.mxu1 (!%p251_p2), %v1459_v3  ;;  %1395 = vmatprep.mubr.msk.f32.mxu1 (!%p251_p2), %vm1460_vm0, %v1459_v3  ;;  %v1365_v4 = vld [vmem:[%s1672_s3] ss:$0 sm:$0xff] (!%p251_p2)  ;;  %v1532_v8 = vld [vmem:[%s1670_s1 + $0x4] sm:$0x7] (!%p251_p2)  ;;  %vm321_vm2 = vcmask (!%p251_p2), 64512  }
   0x9   : > { %v314_v5 = vshrl.u32 (!%p251_p2), %v313_v1, 7  ;;  %v316_v6 = vand.u32 (!%p251_p2), 127, %v313_v1  ;;  %v475_v7 = vmul.f32 (!%p251_p2), %v1365_v4, %v1518_v2  ;;  %1408 = vmatprep.subr.mxu0 (!%p251_p2), %v1459_v3  ;;  %1410 = vmatprep.mubr.msk.f32.mxu0 (!%p251_p2), %vm1460_vm0, %v1459_v3  ;;  %v476_v9 = vmul.f32 (!%p251_p2), %v1365_v4, %v1532_v8  ;;  %v1541_v10 = vld [vmem:[%s1670_s1 + $0x8] sm:$0x7] (!%p251_p2)  ;;  %v1546_v11 = vld [vmem:[%s1671_s2] sm:$0x7] (!%p251_p2) }
   0xa   : > { %v477_v15 = vmul.f32 (!%p251_p2), %v1365_v4, %v1541_v10  ;;  %v310_v16 = vld [vmem:[#allocation2] sm:$0x1] (!%p251_p2)  ;;  %v488_v17 = vmul.f32 (!%p251_p2), %v1365_v4, %v1546_v11  ;;  %v1461_v20 = vmov (!%p251_p2), 1.0   ;;  %vm509_vm5 = vcmask (!%p251_p2), 1041409  }
   0xb   : > { %v1357_v12 = vadd.s32 (!%p251_p2), 4294967294, %v316_v6  ;;  %v1361_v13 = vadd.s32 (!%p251_p2), 4294967295, %v316_v6  ;;  %v479_v14 = vsel (!%p251_p2), %vm478_vm1, %v475_v7, 0.0  ;;  %1428 = vpush (!%p251_p2), %v310_v16  ;;  %v482_v21 = vsel (!%p251_p2), %vm478_vm1, %v476_v9, 0.0 }
   0xc   : > { %480 = vadd.xlane.f32.xlu0 (!%p251_p2), %v479_v14  ;;  %v485_v19 = vsel (!%p251_p2), %vm478_vm1, %v477_v15, 0.0  ;;  %v489_v22 = vsel (!%p251_p2), %vm478_vm1, %v488_v17, 0.0  ;;  %v496_v24 = vsub.s32 (!%p251_p2), 0, %v314_v5  ;;  %v518_v26 = vsub.s32 (!%p251_p2), 1, %v314_v5 }
   0xd   : > { %vm318_vm3 = vcmp.eq.s32.totalorder (!%p251_p2), %v314_v5, %v1357_v12  ;;  %vm396_vm4 = vcmp.eq.s32.totalorder (!%p251_p2), %v314_v5, %v1361_v13  ;;  %486 = vadd.xlane.f32.xlu1 (!%p251_p2), %v485_v19  ;;  %v538_v28 = vsub.s32 (!%p251_p2), 2, %v314_v5  ;;  %vm511_vm6 = vcmask (!%p251_p2), 1042434  }
   0xe   : > { %1394 = vmatpush3.msk.msra.mxu1 (!%p251_p2), %vm318_vm3, %v1461_v20  ;;  %vm559_vm7 = vcmask (!%p251_p2), 59392   ;;  %vm843_vm3 = vcmask (!%p251_p2), 1042432  }
   0xf   : > { %s1678_s27 = smov (!%p288_p3, %s1348_s27), 1  ;;  %1398 = vmatprep.subr.mxu1 %v1459_v3  ;;  %1409 = vmatpush3.msk.msra.mxu0 %vm843_vm3, %v1546_v11 }
  0x10   : > { %s1549_s14 = sshll.u32 %s1678_s27, 2  ;;  %483 = vadd.xlane.f32.xlu0 %v482_v21  ;;  %v1462_v21 = vmov -1.0   ;;  %1413 = vmatprep.subr.mxu0 %v1459_v3  ;;  %s1355_s25 = sshll.u32 %s1678_s27, 3 }
  0x11   : > { %s291_s17 = scalar_lea.vmem %s1669_s0, %s1549_s14  ;;  %490 = vadd.xlane.f32.xlu1 %v489_v22  ;;  %s295_s21 = scalar_lea.vmem %s1674_s5, %s1549_s14 }
  0x12   : > { %v1558_v18 = vld [vmem:[%s291_s17] sm:$0x7]  ;;  %s303_s24 = scalar_lea.vmem %s1676_s7, %s1549_s14  ;;  %s299_s29 = scalar_lea.vmem %s1675_s6, %s1355_s25 }
  0x13   : > { %1396 = vmatmul.mubr.msk.f32.vlgmr.msra.gmra.mrb[0].mxu1 %vm321_vm2, %v1558_v18  ;;  %v312_v57 = vld [vmem:[%s295_s21] sm:$0x7] }
  0x14   : > { %1399 = vmatpush3.msk.msra.mxu1 %vm396_vm4, %v1461_v20  ;;  %1400 = vmatprep.mubr.msk.f32.mxu1 %vm1460_vm0, %v1459_v3  ;;  %vm839_vm4 = vcmask 23552  }
  0x15   : > { %1403 = vmatprep.subr.mxu1 %v1459_v3 }
  0x17   : > { %1401 = vmatmul.mubr.msk.f32.vlgmr.msra.gmra.mrb[2].mxu1 %vm321_vm2, %v1558_v18 }
  0x18   : > { %1405 = vmatprep.mubr.msk.f32.mxu1 %vm1460_vm0, %v1459_v3 }
  0x3c   : > { %s1429_s18 = spop %1428 }
  0x3d   : > { %v492_v37 = vstv %s1429_s18 }
  0x99   : > { %v481_v23 = vpop.xlane.xlu0 %480 }
  0x9a   : > { %v487_v27 = vpop.xlane.xlu1 %486  ;;  %v497_v29 = vrot.slane %v481_v23, %v496_v24  ;;  %v519_v31 = vrot.slane %v481_v23, %v518_v26  ;;  %v539_v33 = vrot.slane %v481_v23, %v538_v28  ;;  %v1463_v23 = vmov -0.5  }
  0x9b   : > { %v505_v32 = vrot.slane %v487_v27, %v496_v24  ;;  %v527_v39 = vrot.slane %v487_v27, %v518_v26  ;;  %v547_v40 = vrot.slane %v487_v27, %v538_v28 }
  0x9d   : > { %v484_v25 = vpop.xlane.xlu0 %483 }
  0x9e   : > { %v501_v30 = vrot.slane %v484_v25, %v496_v24  ;;  %v523_v34 = vrot.slane %v484_v25, %v518_v26  ;;  %v543_v35 = vrot.slane %v484_v25, %v538_v28  ;;  %v491_v38 = vpop.xlane.xlu1 %490 }
  0x9f   : > { %v493_v44 = vadd.f32 %v492_v37, %v491_v38 }
  0xa0   : > { %v510_v36 = vsel %vm509_vm5, %v501_v30, %v497_v29  ;;  %v551_v43 = vsel %vm509_vm5, %v543_v35, %v539_v33  ;;  %v531_v47 = vsel %vm509_vm5, %v523_v34, %v519_v31 }
  0xa1   : > { %v512_v42 = vsel %vm511_vm6, %v505_v32, %v510_v36  ;;  %v552_v48 = vsel %vm511_vm6, %v547_v40, %v551_v43  ;;  %v532_v50 = vsel %vm511_vm6, %v527_v39, %v531_v47 }
  0xa2   : > { %v554_v55 = vmul.f32 %v552_v48, %v1558_v18 }
  0xe6   : > { %v1574_v41 = vpop.f32.mrb[0].mxu1 }
  0xe7   : > { %v514_v45 = vmul.f32 %v512_v42, %v1574_v41  ;;  %v1397_v46 = vpop.f32.mrb[1].mxu1 }
  0xe9   : > { %v515_v51 = vadd.f32 %v514_v45, %v493_v44 }
  0xea   : > { %v1581_v49 = vpop.f32.mrb[2].mxu1 }
  0xeb   : > { %v534_v52 = vmul.f32 %v532_v50, %v1581_v49  ;;  %v1402_v53 = vpop.f32.mrb[3].mxu1 }
  0xed   : > { %v535_v54 = vadd.f32 %v534_v52, %v515_v51 }
  0xef   : > { %v555_v56 = vadd.f32 %v554_v55, %v535_v54 }
  0xf1   : > { %v1366_v58 = vclamps-f32 %v555_v56, 10.0 }
  0xf3   : > { %v558_v59 = vadd.f32 %v1366_v58, %v312_v57 }
  0xf5   : > { %v560_v60 = vsel %vm559_vm7, %v558_v59, -inf }
  0xf6   : > { %v561_v61 = vrot.slane %v560_v60, 4 }
  0xf8   : > { %v562_v62 = vmax.f32 %v560_v60, %v561_v61 }
  0xfa   : > { %v563_v63 = vrot.slane %v562_v62, 2 }
  0xfc   : > { %v564_v0 = vmax.f32 %v562_v62, %v563_v63 }
  0xfe   : > { %v565_v1 = vrot.slane %v564_v0, 1 }
 0x100   : > { %v566_v4 = vmax.f32 %v564_v0, %v565_v1 }
 0x102   : > { %v567_v5 = vsub.f32 %v558_v59, %v566_v4 }
 0x104   : > { %v1591_v6 = vmul.f32 0.5, %v567_v5 }
 0x106   : > { %v1367_v7 = vadd.f32 0.5, %v1591_v6 }
 0x108   : > { %v570_v9 = vmax.f32 %v1367_v7, 0.0 }
 0x10a   : > { %v571_v12 = vmul.f32 %v570_v9, %v570_v9 }
 0x10c   : > { %v572_v13 = vsel %vm559_vm7, %v571_v12, 0.0 }
 0x10d   : > { %v573_v14 = vrot.slane %v572_v13, 4 }
 0x10f   : > { %v574_v15 = vadd.f32 %v573_v14, %v572_v13 }
 0x111   : > { %v575_v16 = vrot.slane %v574_v15, 2 }
 0x113   : > { %v576_v17 = vadd.f32 %v575_v16, %v574_v15 }
 0x115   : > { %v577_v19 = vrot.slane %v576_v17, 1 }
 0x117   : > { %v578_v20 = vadd.f32 %v577_v19, %v576_v17 }
 0x119   : > { %vm579_vm8 = vcmp.ge.f32.partialorder %v578_v20, 1.0 }
 0x11a   : > { %v580_v22 = vsel %vm579_vm8, -0.5, %v1462_v21  ;;  %v581_v24 = vsel %vm579_vm8, 0.0, %v1463_v23 }
 0x11b   : > { %v582_v25 = vadd.f32 %v581_v24, %v580_v22 }
 0x11d   : > { %v583_v26 = vmul.f32 0.5, %v582_v25 }
 0x11f   : > { %v584_v27 = vsub.f32 %v1591_v6, %v583_v26 }
 0x121   : > { %v585_v28 = vmax.f32 %v584_v27, 0.0 }
 0x123   : > { %v586_v29 = vmul.f32 %v585_v28, %v585_v28 }
 0x125   : > { %v587_v30 = vsel %vm559_vm7, %v586_v29, 0.0 }
 0x126   : > { %v588_v31 = vrot.slane %v587_v30, 4 }
 0x128   : > { %v589_v32 = vadd.f32 %v588_v31, %v587_v30 }
 0x12a   : > { %v590_v33 = vrot.slane %v589_v32, 2 }
 0x12c   : > { %v591_v34 = vadd.f32 %v590_v33, %v589_v32 }
 0x12e   : > { %v592_v35 = vrot.slane %v591_v34, 1 }
 0x130   : > { %v593_v36 = vadd.f32 %v592_v35, %v591_v34 }
 0x132   : > { %vm594_vm9 = vcmp.ge.f32.partialorder %v593_v36, 1.0 }
 0x133   : > { %v595_v37 = vsel %vm594_vm9, %v583_v26, %v580_v22  ;;  %v596_v38 = vsel %vm594_vm9, %v581_v24, %v583_v26 }
 0x134   : > { %v597_v39 = vadd.f32 %v596_v38, %v595_v37 }
 0x136   : > { %v598_v40 = vmul.f32 0.5, %v597_v39 }
 0x138   : > { %v599_v42 = vsub.f32 %v1591_v6, %v598_v40 }
 0x13a   : > { %v600_v43 = vmax.f32 %v599_v42, 0.0 }
 0x13c   : > { %v601_v44 = vmul.f32 %v600_v43, %v600_v43 }
 0x13e   : > { %v602_v45 = vsel %vm559_vm7, %v601_v44, 0.0 }
 0x13f   : > { %v603_v46 = vrot.slane %v602_v45, 4 }
 0x141   : > { %v604_v47 = vadd.f32 %v603_v46, %v602_v45 }
 0x143   : > { %v605_v48 = vrot.slane %v604_v47, 2 }
 0x145   : > { %v606_v50 = vadd.f32 %v605_v48, %v604_v47 }
 0x147   : > { %v607_v51 = vrot.slane %v606_v50, 1 }
 0x149   : > { %v608_v52 = vadd.f32 %v607_v51, %v606_v50 }
 0x14b   : > { %vm609_vm10 = vcmp.ge.f32.partialorder %v608_v52, 1.0 }
 0x14c   : > { %v610_v53 = vsel %vm609_vm10, %v598_v40, %v595_v37  ;;  %v611_v54 = vsel %vm609_vm10, %v596_v38, %v598_v40 }
 0x14d   : > { %v612_v55 = vadd.f32 %v611_v54, %v610_v53 }
 0x14f   : > { %v613_v56 = vmul.f32 0.5, %v612_v55 }
 0x151   : > { %v614_v57 = vsub.f32 %v1591_v6, %v613_v56 }
 0x153   : > { %v615_v58 = vmax.f32 %v614_v57, 0.0 }
 0x155   : > { %v616_v59 = vmul.f32 %v615_v58, %v615_v58 }
 0x157   : > { %v617_v60 = vsel %vm559_vm7, %v616_v59, 0.0 }
 0x158   : > { %v618_v61 = vrot.slane %v617_v60, 4 }
 0x15a   : > { %v619_v62 = vadd.f32 %v618_v61, %v617_v60 }
 0x15c   : > { %v620_v63 = vrot.slane %v619_v62, 2 }
 0x15e   : > { %v621_v0 = vadd.f32 %v620_v63, %v619_v62 }
 0x160   : > { %v622_v1 = vrot.slane %v621_v0, 1 }
 0x162   : > { %v623_v4 = vadd.f32 %v622_v1, %v621_v0 }
 0x164   : > { %vm624_vm11 = vcmp.ge.f32.partialorder %v623_v4, 1.0 }
 0x165   : > { %v625_v5 = vsel %vm624_vm11, %v613_v56, %v610_v53  ;;  %v626_v7 = vsel %vm624_vm11, %v611_v54, %v613_v56 }
 0x166   : > { %v627_v9 = vadd.f32 %v626_v7, %v625_v5 }
 0x168   : > { %v628_v12 = vmul.f32 0.5, %v627_v9 }
 0x16a   : > { %v629_v13 = vsub.f32 %v1591_v6, %v628_v12 }
 0x16c   : > { %v630_v14 = vmax.f32 %v629_v13, 0.0 }
 0x16e   : > { %v631_v15 = vmul.f32 %v630_v14, %v630_v14 }
 0x170   : > { %v632_v16 = vsel %vm559_vm7, %v631_v15, 0.0 }
 0x171   : > { %v633_v17 = vrot.slane %v632_v16, 4 }
 0x173   : > { %v634_v19 = vadd.f32 %v633_v17, %v632_v16 }
 0x175   : > { %v635_v20 = vrot.slane %v634_v19, 2 }
 0x177   : > { %v636_v21 = vadd.f32 %v635_v20, %v634_v19 }
 0x179   : > { %v637_v22 = vrot.slane %v636_v21, 1 }
 0x17b   : > { %v638_v23 = vadd.f32 %v637_v22, %v636_v21 }
 0x17d   : > { %vm639_vm12 = vcmp.ge.f32.partialorder %v638_v23, 1.0 }
 0x17e   : > { %v640_v24 = vsel %vm639_vm12, %v628_v12, %v625_v5  ;;  %v641_v25 = vsel %vm639_vm12, %v626_v7, %v628_v12 }
 0x17f   : > { %v642_v26 = vadd.f32 %v641_v25, %v640_v24 }
 0x181   : > { %v643_v27 = vmul.f32 0.5, %v642_v26 }
 0x183   : > { %v644_v28 = vsub.f32 %v1591_v6, %v643_v27 }
 0x185   : > { %v645_v29 = vmax.f32 %v644_v28, 0.0 }
 0x187   : > { %v646_v30 = vmul.f32 %v645_v29, %v645_v29 }
 0x189   : > { %v647_v31 = vsel %vm559_vm7, %v646_v30, 0.0 }
 0x18a   : > { %v648_v32 = vrot.slane %v647_v31, 4 }
 0x18c   : > { %v649_v33 = vadd.f32 %v648_v32, %v647_v31 }
 0x18e   : > { %v650_v34 = vrot.slane %v649_v33, 2 }
 0x190   : > { %v651_v35 = vadd.f32 %v650_v34, %v649_v33 }
 0x192   : > { %v652_v36 = vrot.slane %v651_v35, 1 }
 0x194   : > { %v653_v37 = vadd.f32 %v652_v36, %v651_v35 }
 0x196   : > { %vm654_vm13 = vcmp.ge.f32.partialorder %v653_v37, 1.0 }
 0x197   : > { %v655_v38 = vsel %vm654_vm13, %v643_v27, %v640_v24  ;;  %v656_v39 = vsel %vm654_vm13, %v641_v25, %v643_v27 }
 0x198   : > { %v657_v40 = vadd.f32 %v656_v39, %v655_v38 }
 0x19a   : > { %v658_v42 = vmul.f32 0.5, %v657_v40 }
 0x19c   : > { %v659_v43 = vsub.f32 %v1591_v6, %v658_v42 }
 0x19e   : > { %v660_v44 = vmax.f32 %v659_v43, 0.0 }
 0x1a0   : > { %v661_v45 = vmul.f32 %v660_v44, %v660_v44 }
 0x1a2   : > { %v662_v46 = vsel %vm559_vm7, %v661_v45, 0.0 }
 0x1a3   : > { %v663_v47 = vrot.slane %v662_v46, 4 }
 0x1a5   : > { %v664_v48 = vadd.f32 %v663_v47, %v662_v46 }
 0x1a7   : > { %v665_v50 = vrot.slane %v664_v48, 2 }
 0x1a9   : > { %v666_v51 = vadd.f32 %v665_v50, %v664_v48 }
 0x1ab   : > { %v667_v52 = vrot.slane %v666_v51, 1 }
 0x1ad   : > { %v668_v53 = vadd.f32 %v667_v52, %v666_v51 }
 0x1af   : > { %vm669_vm14 = vcmp.ge.f32.partialorder %v668_v53, 1.0 }
 0x1b0   : > { %v670_v54 = vsel %vm669_vm14, %v658_v42, %v655_v38  ;;  %v671_v55 = vsel %vm669_vm14, %v656_v39, %v658_v42 }
 0x1b1   : > { %v672_v56 = vadd.f32 %v671_v55, %v670_v54 }
 0x1b3   : > { %v673_v57 = vmul.f32 0.5, %v672_v56 }
 0x1b5   : > { %v674_v58 = vsub.f32 %v1591_v6, %v673_v57 }
 0x1b7   : > { %v675_v59 = vmax.f32 %v674_v58, 0.0 }
 0x1b9   : > { %v676_v60 = vmul.f32 %v675_v59, %v675_v59 }
 0x1bb   : > { %v677_v61 = vsel %vm559_vm7, %v676_v60, 0.0 }
 0x1bc   : > { %v678_v62 = vrot.slane %v677_v61, 4 }
 0x1be   : > { %v679_v63 = vadd.f32 %v678_v62, %v677_v61 }
 0x1c0   : > { %v680_v0 = vrot.slane %v679_v63, 2 }
 0x1c2   : > { %v681_v1 = vadd.f32 %v680_v0, %v679_v63 }
 0x1c4   : > { %v682_v4 = vrot.slane %v681_v1, 1 }
 0x1c6   : > { %v683_v5 = vadd.f32 %v682_v4, %v681_v1 }
 0x1c8   : > { %vm684_vm15 = vcmp.ge.f32.partialorder %v683_v5, 1.0 }
 0x1c9   : > { %v685_v7 = vsel %vm684_vm15, %v673_v57, %v670_v54  ;;  %v686_v9 = vsel %vm684_vm15, %v671_v55, %v673_v57 }
 0x1ca   : > { %v687_v12 = vadd.f32 %v686_v9, %v685_v7 }
 0x1cc   : > { %v688_v13 = vmul.f32 0.5, %v687_v12 }
 0x1ce   : > { %v689_v14 = vsub.f32 %v1591_v6, %v688_v13 }
 0x1d0   : > { %v690_v15 = vmax.f32 %v689_v14, 0.0 }
 0x1d2   : > { %v691_v16 = vmul.f32 %v690_v15, %v690_v15 }
 0x1d4   : > { %v692_v17 = vsel %vm559_vm7, %v691_v16, 0.0 }
 0x1d5   : > { %v693_v19 = vrot.slane %v692_v17, 4 }
 0x1d7   : > { %v694_v20 = vadd.f32 %v693_v19, %v692_v17 }
 0x1d9   : > { %v695_v21 = vrot.slane %v694_v20, 2 }
 0x1db   : > { %v696_v22 = vadd.f32 %v695_v21, %v694_v20 }
 0x1dd   : > { %v697_v23 = vrot.slane %v696_v22, 1 }
 0x1df   : > { %v698_v24 = vadd.f32 %v697_v23, %v696_v22 }
 0x1e1   : > { %vm699_vm1 = vcmp.ge.f32.partialorder %v698_v24, 1.0 }
 0x1e2   : > { %v700_v25 = vsel %vm699_vm1, %v688_v13, %v685_v7  ;;  %v701_v26 = vsel %vm699_vm1, %v686_v9, %v688_v13 }
 0x1e3   : > { %v702_v27 = vadd.f32 %v701_v26, %v700_v25 }
 0x1e5   : > { %v703_v28 = vmul.f32 0.5, %v702_v27 }
 0x1e7   : > { %v704_v29 = vsub.f32 %v1591_v6, %v703_v28 }
 0x1e9   : > { %v705_v30 = vmax.f32 %v704_v29, 0.0 }
 0x1eb   : > { %v706_v31 = vmul.f32 %v705_v30, %v705_v30 }
 0x1ed   : > { %v707_v32 = vsel %vm559_vm7, %v706_v31, 0.0 }
 0x1ee   : > { %v708_v33 = vrot.slane %v707_v32, 4 }
 0x1f0   : > { %v709_v34 = vadd.f32 %v708_v33, %v707_v32 }
 0x1f2   : > { %v710_v35 = vrot.slane %v709_v34, 2 }
 0x1f4   : > { %v711_v36 = vadd.f32 %v710_v35, %v709_v34 }
 0x1f6   : > { %v712_v37 = vrot.slane %v711_v36, 1 }
 0x1f8   : > { %v713_v38 = vadd.f32 %v712_v37, %v711_v36 }
 0x1fa   : > { %vm714_vm2 = vcmp.ge.f32.partialorder %v713_v38, 1.0 }
 0x1fb   : > { %v715_v39 = vsel %vm714_vm2, %v703_v28, %v700_v25 }
 0x1fc   : > { %v716_v40 = vsub.f32 %v1591_v6, %v715_v39 }
 0x1fe   : > { %v717_v42 = vmax.f32 %v716_v40, 0.0 }
 0x200   : > { %v718_v43 = vmul.f32 %v717_v42, %v717_v42  ;;  %v726_v44 = vsel %vm559_vm7, %v717_v42, 0.0 }
 0x201   : > { %v727_v45 = vrot.slane %v726_v44, 4 }
 0x202   : > { %v719_v46 = vsel %vm559_vm7, %v718_v43, 0.0 }
 0x203   : > { %v720_v47 = vrot.slane %v719_v46, 4  ;;  %v728_v48 = vadd.f32 %v727_v45, %v726_v44 }
 0x205   : > { %v729_v50 = vrot.slane %v728_v48, 2  ;;  %v721_v51 = vadd.f32 %v720_v47, %v719_v46 }
 0x207   : > { %v730_v52 = vadd.f32 %v729_v50, %v728_v48  ;;  %v722_v54 = vrot.slane %v721_v51, 2 }
 0x209   : > { %v731_v53 = vrot.slane %v730_v52, 1  ;;  %v723_v57 = vadd.f32 %v722_v54, %v721_v51 }
 0x20b   : > { %v732_v55 = vadd.f32 %v731_v53, %v730_v52  ;;  %v724_v59 = vrot.slane %v723_v57, 1 }
 0x20d   : > { %v734_v56 = vmul.f32 2.0, %v732_v55  ;;  %v725_v60 = vadd.f32 %v724_v59, %v723_v57 }
 0x20f   : > { %v735_v58 = vadd.f32 1e-12, %v734_v56  ;;  %v1368_v61 = vadd.f32 -1.0, %v725_v60 }
 0x211   : > { %1443 = vrcp.f32 %v735_v58 }
 0x21b   : > { %v1444_v62 = vpop.eup %1443 }
 0x21c   : > { %v737_v63 = vmul.f32 %v1444_v62, %v1368_v61 }
 0x21e   : > { %v738_v0 = vadd.f32 %v737_v63, %v715_v39 }
 0x220   : > { %v739_v1 = vsub.f32 %v1591_v6, %v738_v0 }
 0x222   : > { %v740_v4 = vmax.f32 %v739_v1, 0.0 }
 0x224   : > { %v741_v5 = vmul.f32 %v740_v4, %v740_v4  ;;  %v749_v7 = vsel %vm559_vm7, %v740_v4, 0.0 }
 0x225   : > { %v750_v9 = vrot.slane %v749_v7, 4 }
 0x226   : > { %v742_v12 = vsel %vm559_vm7, %v741_v5, 0.0 }
 0x227   : > { %v743_v13 = vrot.slane %v742_v12, 4  ;;  %v751_v14 = vadd.f32 %v750_v9, %v749_v7  ;;  %v835_v9 = vrot.slane %v1532_v8, 7 }
 0x229   : > { %v752_v15 = vrot.slane %v751_v14, 2  ;;  %v744_v11 = vadd.f32 %v743_v13, %v742_v12  ;;  %v837_v12 = vrot.slane %v1541_v10, 6 }
 0x22b   : > { %v753_v16 = vadd.f32 %v752_v15, %v751_v14  ;;  %v745_v19 = vrot.slane %v744_v11, 2  ;;  %v836_v14 = vsel %vm509_vm5, %v835_v9, %v1518_v2 }
 0x22c   : > { %v838_v15 = vsel %vm511_vm6, %v837_v12, %v836_v14 }
 0x22d   : > { %v754_v17 = vrot.slane %v753_v16, 1  ;;  %v746_v22 = vadd.f32 %v745_v19, %v744_v11  ;;  %1404 = vmatpush3.msk.msra.mxu1 %vm843_vm3, %v838_v15  ;;  %v1059_v11 = vrot.slane %v1541_v10, 7 }
 0x22f   : > { %v755_v20 = vadd.f32 %v754_v17, %v753_v16  ;;  %v747_v24 = vrot.slane %v746_v22, 1  ;;  %v1171_v17 = vrot.slane %v1532_v8, 1 }
 0x231   : > { %v757_v21 = vmul.f32 2.0, %v755_v20  ;;  %v748_v25 = vadd.f32 %v747_v24, %v746_v22 }
 0x233   : > { %v758_v23 = vadd.f32 1e-12, %v757_v21  ;;  %v1369_v26 = vadd.f32 -1.0, %v748_v25 }
 0x235   : > { %1445 = vrcp.f32 %v758_v23 }
 0x23f   : > { %v1446_v27 = vpop.eup %1445 }
 0x240   : > { %v760_v28 = vmul.f32 %v1446_v27, %v1369_v26 }
 0x242   : > { %v761_v29 = vadd.f32 %v760_v28, %v738_v0 }
 0x244   : > { %v762_v30 = vsub.f32 %v1591_v6, %v761_v29 }
 0x246   : > { %v763_v31 = vmax.f32 %v762_v30, 0.0 }
 0x248   : > { %v764_v32 = vmul.f32 %v763_v31, %v763_v31  ;;  %v772_v33 = vsel %vm559_vm7, %v763_v31, 0.0 }
 0x249   : > { %v773_v34 = vrot.slane %v772_v33, 4 }
 0x24a   : > { %v765_v35 = vsel %vm559_vm7, %v764_v32, 0.0 }
 0x24b   : > { %v766_v36 = vrot.slane %v765_v35, 4  ;;  %v774_v37 = vadd.f32 %v773_v34, %v772_v33 }
 0x24d   : > { %v775_v38 = vrot.slane %v774_v37, 2  ;;  %v767_v39 = vadd.f32 %v766_v36, %v765_v35 }
 0x24f   : > { %v776_v40 = vadd.f32 %v775_v38, %v774_v37  ;;  %v768_v43 = vrot.slane %v767_v39, 2 }
 0x251   : > { %v777_v42 = vrot.slane %v776_v40, 1  ;;  %v769_v46 = vadd.f32 %v768_v43, %v767_v39 }
 0x253   : > { %v778_v44 = vadd.f32 %v777_v42, %v776_v40  ;;  %v770_v48 = vrot.slane %v769_v46, 1 }
 0x255   : > { %v780_v45 = vmul.f32 2.0, %v778_v44  ;;  %v771_v50 = vadd.f32 %v770_v48, %v769_v46 }
 0x257   : > { %v781_v47 = vadd.f32 1e-12, %v780_v45  ;;  %v1370_v51 = vadd.f32 -1.0, %v771_v50 }
 0x259   : > { %1447 = vrcp.f32 %v781_v47 }
 0x263   : > { %v1448_v52 = vpop.eup %1447 }
 0x264   : > { %v783_v53 = vmul.f32 %v1448_v52, %v1370_v51 }
 0x266   : > { %v784_v54 = vadd.f32 %v783_v53, %v761_v29 }
 0x268   : > { %v785_v55 = vsub.f32 %v1591_v6, %v784_v54 }
 0x26a   : > { %v786_v56 = vmax.f32 %v785_v55, 0.0 }
 0x26c   : > { %v787_v57 = vmul.f32 %v786_v56, %v786_v56 }
 0x26e   : > { %v788_v58 = vsel %vm559_vm7, %v787_v57, 0.0 }
 0x26f   : > { %v789_v59 = vrot.slane %v788_v58, 4 }
 0x271   : > { %v790_v60 = vadd.f32 %v789_v59, %v788_v58 }
 0x273   : > { %v791_v61 = vrot.slane %v790_v60, 2 }
 0x275   : > { %v792_v62 = vadd.f32 %v791_v61, %v790_v60 }
 0x277   : > { %v793_v63 = vrot.slane %v792_v62, 1 }
 0x279   : > { %v794_v0 = vadd.f32 %v793_v63, %v792_v62 }
 0x27b   : > { %v795_v1 = vadd.f32 1e-30, %v794_v0 }
 0x27d   : > { %1449 = vrcp.f32 %v795_v1 }
 0x287   : > { %v1450_v4 = vpop.eup %1449 }
 0x288   : > { %v797_v5 = vmul.f32 %v1450_v4, %v787_v57 }
 0x28a   : > { %916 = vxpose.xlu0.b32.start.end [1/1] (short) (narrow) %v797_v5, 8  ;;  %798 = vst.msk [vmem:[%s303_s24] sm:$0x7] %vm559_vm7, %v797_v5  ;;  %v1024_v6 = vmul.f32 %v797_v5, %v1581_v49  ;;  %v799_v7 = vmul.f32 %v797_v5, %v1574_v41  ;;  %v1137_v13 = vmul.f32 %v797_v5, %v1558_v18  ;;  %v1057_v49 = vrot.slane %v1518_v2, 1 }
 0x28b   : > { %v1170_v18 = vrot.slane %v1518_v2, 2 }
 0x28c   : > { %1025 = vxpose.xlu1.b32.start.end [1/1] (short) (narrow) %v1024_v6, 8  ;;  %v1058_v41 = vsel %vm509_vm5, %v1532_v8, %v1057_v49 }
 0x28d   : > { %v1060_v16 = vsel %vm511_vm6, %v1059_v11, %v1058_v41  ;;  %v1172_v20 = vsel %vm509_vm5, %v1171_v17, %v1170_v18  ;;  %vm1250_vm5 = vcmask 261120  }
 0x28e   : > { %800 = vxpose.xlu0.b32.start.end [1/1] (short) (narrow) %v799_v7, 8  ;;  %v1173_v2 = vsel %vm511_vm6, %v1541_v10, %v1172_v20 }
 0x292   : > { %1138 = vxpose.xlu0.b32.start.end [1/1] (short) (narrow) %v1137_v13, 8 }
 0x30a   : > { %v932_v19 = vpop.trf.xlu0 }
 0x30b   : > { %1411 = vmatmul.mubr.msk.f32.vlgmr.msra.gmra.mrb[0].mxu0 %vm839_vm4, %v932_v19 }
 0x30c   : > { %1414 = vmatpush3.msk.msra.mxu0 %vm843_vm3, %v1060_v16  ;;  %1415 = vmatprep.mubr.msk.f32.mxu0 %vm1460_vm0, %v1459_v3  ;;  %v1041_v22 = vpop.trf.xlu1 }
 0x30d   : > { %1418 = vmatprep.subr.mxu0 %v1459_v3 }
 0x30e   : > { %v816_v21 = vpop.trf.xlu0 }
 0x30f   : > { %1406 = vmatmul.mubr.msk.f32.vlgmr.msra.gmra.mrb[4].mxu1 %vm839_vm4, %v816_v21 }
 0x312   : > { %v1154_v8 = vpop.trf.xlu0 }
 0x313   : > { %1416 = vmatmul.mubr.msk.f32.vlgmr.msra.gmra.mrb[0].mxu0 %vm839_vm4, %v1041_v22 }
 0x314   : > { %1419 = vmatpush3.msk.msra.mxu0 %vm843_vm3, %v1173_v2  ;;  %1420 = vmatprep.mubr.msk.f32.mxu0 %vm1460_vm0, %v1459_v3 }
 0x31b   : > { %1421 = vmatmul.mubr.msk.f32.vlgmr.msra.gmra.mrb[0].mxu0 %vm839_vm4, %v1154_v8 }
 0x3e2   : > { %v912_v23 = vpop.f32.mrb[4].mxu1 }
 0x3e3   : > { %v1407_v24 = vpop.f32.mrb[5].mxu1 }
 0x3ee   : > { %v1245_v25 = vpop.f32.mrb[0].mxu0 }
 0x3ef   : > { %v1423_v10 = vadd.f32 %v1245_v25, %v912_v23  ;;  %v1422_v26 = vpop.f32.mrb[1].mxu0 }
 0x3f1   : > { %1251 = vst.msk [vmem:[%s299_s29] sm:$0xff] %vm1250_vm5, %v1423_v10 }
 0x3f2 PF: > { %s20_s26 = sadd.s32 1, %s1457_s26  }
 0x3f3   : > { %p17_p4 = scmp.ge.s32.totalorder %s20_s26, 4  }
 0x3f5   :  { %19 = sbr.rel (!%p17_p4) target bundleno = 3 (0x3), region = 89 }

// kernel: interformer_forward.5
= control target key start
LH: loop header
LB: loop body
LE: loop exit
PB: predicated region body
PF: predicated region fallthrough
CT: control target
= control target key end

     0   :  { %s5766_s29 = smov 0   ;;  %s5768_s30 = smov 0   ;;  %s9018_s0 = inlined_call_operand.vmem [shape: f32[2,16,32], index: 0, kind: input, shape index: {}]   ;;  %s9019_s1 = inlined_call_operand.vmem [shape: bf16[2,32,96], index: 1, kind: input, shape index: {}]   ;;  %s9020_s2 = inlined_call_operand.vmem [shape: f32[2,1,96], index: 2, kind: input, shape index: {}]   ;;  %s9021_s3 = inlined_call_operand.vmem [shape: bf16[2,8,32], index: 3, kind: input, shape index: {}]   ;;  %s9022_s4 = inlined_call_operand.vmem [shape: f32[2,1,32], index: 4, kind: input, shape index: {}]   ;;  %s9023_s5 = inlined_call_operand.vmem [shape: f32[2,2,32], index: 5, kind: input, shape index: {}]   ;;  %s9024_s6 = inlined_call_operand.vmem [shape: bf16[2,32,64], index: 6, kind: input, shape index: {}]   ;;  %s9025_s7 = inlined_call_operand.vmem [shape: f32[2,1,64], index: 7, kind: input, shape index: {}]   ;;  %s9026_s8 = inlined_call_operand.vmem [shape: bf16[2,64,32], index: 8, kind: input, shape index: {}]   ;;  %s9027_s9 = inlined_call_operand.vmem [shape: f32[2,1,32], index: 9, kind: input, shape index: {}]   ;;  %s9028_s10 = inlined_call_operand.vmem [shape: f32[2,2,32], index: 10, kind: input, shape index: {}]   ;;  %s9029_s11 = inlined_call_operand.vmem [shape: bf16[32,12], index: 11, kind: input, shape index: {}]   ;;  %s9030_s12 = inlined_call_operand.vmem [shape: f32[1,12], index: 12, kind: input, shape index: {}]   ;;  %s9031_s13 = inlined_call_operand.vmem [shape: bf16[2,2,16,16], index: 13, kind: output, shape index: {0}]   ;;  %s9032_s14 = inlined_call_operand.vmem [shape: f32[2,1,12], index: 14, kind: output, shape index: {1}]  }
   0x1   :  { %s5770_s15 = smov 0   ;;  %s5772_s16 = smov 0  }
   0x2   :  { %s5774_s17 = smov 0  }
   0x3 LB: > { %s4994_s18 = sadd.s32 4294967295, %s5678_s17   ;;  %s34_s19 = sadd.s32 1, %s5674_s16  ;;  %s5678_s17 = sphi %s5774_s17, %s25_s17   ;;  %s5674_s16 = sphi %s5772_s16, %s9448_s16   ;;  %s5670_s15 = sphi %s5770_s15, %s9447_s15   ;;  %s5666_s30 = sphi %s5768_s30, %s9446_s30   ;;  %s5662_s29 = sphi %s5766_s29, %s9445_s29  }
   0x4   : > { %p35_p0 = scmp.ge.s32.totalorder %s34_s19, 2  ;;  %s324_s20 = sadd.s32 1, %s5666_s30 }
   0x5   : > { %p334_p1 = scmp.ne.s32.totalorder %s5666_s30, %s5662_s29  ;;  %p335_p2 = scmp.eq.s32.totalorder %s4994_s18, 1 }
   0x6   : > { %s9450_s19 = smov (%p35_p0, %s34_s19), 0  ;;  %p4998_p4 = scmp.ge.s32.totalorder %s5678_s17, 1 }
   0x7   : > { %9168 = sst [smem:[#allocation4_spill]] %s9450_s19  ;;  %p5795_p3 = por %p335_p2, %p334_p1 }
   0x8   : > { %s320_s22 = ssub.s32 %s5674_s16, %s9450_s19  ;;  %p431_p5 = scmp.lt.s32.totalorder %s5678_s17, 3 }
   0x9   : > { %p322_p6 = scmp.eq.s32.totalorder %s320_s22, 0 }
   0xa   : > { %p432_p7 = pnand %p4998_p4, %p431_p5 }
   0xb   : > { %s5804_s23 = scalar_select %p322_p6, %s5666_s30, %s324_s20  }
   0xc   : > { %435 = sbr.rel (%p432_p7) target bundleno = 4964 (0x1364), region = 72 }
  0x13   : > { %s472_s24 = sand.u32 1, %s5662_s29   ;;  %p5000_p8 = scmp.ne.s32.totalorder %s5670_s15, 0 }
  0x14   : > { %s4999_s25 = sshll.u32 %s472_s24, 4  ;;  %v499_v0 = vld [vmem:[%s9018_s0] sm:$0xff] (!%p5000_p8)  ;;  %vm503_vm0 = vcmask (!%p5000_p8), 261120   ;;  %v500_v1 = vld [vmem:[%s9018_s0 + $0x8] sm:$0xff] (!%p5000_p8)  ;;  %v501_v2 = vld [vmem:[%s9018_s0 + $0x10] sm:$0xff] (!%p5000_p8)  ;;  %vm508_vm1 = vcmask (!%p5000_p8), 90112  }
  0x15   : > { %s5806_s26 = scalar_lea.vmem [#allocation3], %s4999_s25  ;;  %498 = sbr.rel (%p5000_p8) target bundleno = 28 (0x1c), region = 76  ;;  %504 = vst.msk [vmem:[#allocation2] sm:$0xff] (!%p5000_p8), %vm503_vm0, %v499_v0  ;;  %505 = vst.msk [vmem:[#allocation2 + $0x8] sm:$0xff] (!%p5000_p8), %vm503_vm0, %v500_v1  ;;  %v502_v3 = vld [vmem:[%s9018_s0 + $0x18] sm:$0xff] (!%p5000_p8)  ;;  %v5680_v4 = vmov (!%p5000_p8), 0.0  }
  0x16   : > { %506 = vst.msk [vmem:[#allocation2 + $0x10] sm:$0xff] (!%p5000_p8), %vm503_vm0, %v501_v2  ;;  %507 = vst.msk [vmem:[#allocation2 + $0x18] sm:$0xff] (!%p5000_p8), %vm503_vm0, %v502_v3 }
  0x17   : > { %509 = vst.msk [vmem:[%s9032_s14] sm:$0x1] (!%p5000_p8), %vm508_vm1, %v5680_v4  ;;  %510 = vst.msk [vmem:[%s9032_s14 + $0x1] sm:$0x1] (!%p5000_p8), %vm508_vm1, %v5680_v4 }
  0x1c PF: > { %s5144_s18 = sshll.u32 %s5670_s15, 4  ;;  %v511_v5 = vld [vmem:[#allocation2] sm:$0xff]  ;;  %v512_v6 = vld [vmem:[#allocation2 + $0x8] sm:$0xff]  ;;  %vm544_vm2 = vcmask 261120   ;;  %s524_s22 = scalar_lea.vmem %s9020_s2, %s5670_s15  ;;  %vm664_vm3 = vcmask 64512   ;;  %vm1384_vm7 = vcmask 130048  }
  0x1d   : > { %s519_s29 = scalar_lea.vmem %s9019_s1, %s5144_s18  ;;  %v515_v7 = vpack.c.bf16 %v512_v6, %v511_v5  ;;  %s5834_s27 = scalar_lea.vmem %s9024_s6, %s5144_s18  ;;  %v513_v10 = vld [vmem:[#allocation2 + $0x10] sm:$0xff]  ;;  %v514_v11 = vld [vmem:[#allocation2 + $0x18] sm:$0xff]  ;;  %v5003_v13 = vld [vmem:[%s524_s22] ss:$0 sm:$0xff] }
  0x1e   : > { %v5482_v8 = vld [vmem:[%s519_s29] sm:$0xff]   ;;  %v5483_v9 = vld [vmem:[%s519_s29 + $0x8] sm:$0xff]   ;;  %v516_v12 = vpack.c.bf16 %v514_v11, %v513_v10  ;;  %s5681_s18 = smov 120   ;;  %s5682_s20 = smov 112   ;;  %vm5943_vm4 = vmpackc.low %vm664_vm3, %vm664_vm3 }
  0x1f   : > { %5216 = vmatprep.mubr.msk.bf16.mxu1 %vm544_vm2, %v515_v7  ;;  %5212 = vmatprep.subr.bf16.mxu1 %v5482_v8  ;;  %s5683_s29 = smov 104   ;;  %s5684_s24 = smov 96  }
  0x20   : > { %5213 = vmatpush3.bf16.msra.mxu1 %v5482_v8  ;;  %s5687_s25 = smov 64   ;;  %s5112_s28 = sshll.u32 %s5670_s15, 2 }
  0x21   : > { %5214 = vmatprep.subr.bf16.mxu1 %v5483_v9  ;;  %p5132_p9 = scmp.ne.s32.totalorder %s5670_s15, 1 }
  0x24   : > { %5215 = vmatpush3.bf16.msra.mxu1 %v5483_v9 }
  0x27   : > { %5217 = vmatmul.mubr.msk.bf16.vlgmr.msra.gmra.mrb[0].mxu1 %vm544_vm2, %v516_v12 }
  0xfa   : > { %v5218_v14 = vpop.f32.mrb[0].mxu1 }
  0xfb   : > { %v5842_v15 = vadd.f32 %v5218_v14, %v5003_v13  ;;  %v585_v16 = vpop.f32.mrb[1].mxu1 }
  0xfc   : > { %v5844_v17 = vadd.f32 %v5003_v13, %v585_v16  ;;  %v5219_v18 = vpop.f32.mrb[2].mxu1 }
  0xfd   : > { %9170 = vst [vmem:[#allocation5_spill] sm:$0xff] %v5842_v15  ;;  %640 = vrot.lane.b32.xlu1 %v5842_v15, %s5681_s18  ;;  %v588_v19 = vpop.f32.mrb[3].mxu1  ;;  %v5849_v20 = vmul.f32 0.35355338, %v5842_v15  ;;  %v5856_v22 = vadd.f32 %v5219_v18, %v5003_v13 }
  0xfe   : > { %9171 = vst [vmem:[#allocation6_spill] sm:$0xff] %v5844_v17  ;;  %636 = vrot.lane.b32.xlu0 %v5844_v17, %s5681_s18  ;;  %v5854_v21 = vmul.f32 0.35355338, %v5844_v17  ;;  %v5860_v23 = vadd.f32 %v5003_v13, %v588_v19 }
  0xff   : > { %9172 = vst [vmem:[#allocation7_spill] sm:$0xff] %v5856_v22  ;;  %5231 = vmatprep.mubr.msk.f32.mxu0 %vm664_vm3, %v5849_v20  ;;  %v5437_v24 = vpack.i.bf16 %v5856_v22, %v5842_v15  ;;  %v603_v41 = vmul.f32 0.35355338, %v5856_v22 }
 0x100   : > { %9173 = vst [vmem:[#allocation8_spill] sm:$0xff] %v5860_v23  ;;  %5224 = vmatprep.mubr.msk.f32.mxu1 %vm664_vm3, %v5854_v21  ;;  %v5432_v25 = vpack.i.bf16 %v5860_v23, %v5844_v17  ;;  %v601_v34 = vmul.f32 0.35355338, %v5860_v23 }
 0x101   : > { %642 = vrot.lane.b32.xlu1 %v5856_v22, %s5681_s18 }
 0x102   : > { %638 = vrot.lane.b32.xlu0 %v5860_v23, %s5681_s18 }
 0x105   : > { %646 = vrot.lane.b32.xlu1 %v5860_v23, %s5682_s20 }
 0x106   : > { %644 = vrot.lane.b32.xlu0 %v5844_v17, %s5682_s20 }
 0x109   : > { %650 = vrot.lane.b32.xlu1 %v5856_v22, %s5682_s20 }
 0x10a   : > { %648 = vrot.lane.b32.xlu0 %v5842_v15, %s5682_s20 }
 0x10d   : > { %654 = vrot.lane.b32.xlu1 %v5860_v23, %s5683_s29 }
 0x10e   : > { %652 = vrot.lane.b32.xlu0 %v5844_v17, %s5683_s29 }
 0x111   : > { %658 = vrot.lane.b32.xlu1 %v5856_v22, %s5683_s29  ;;  %v9203_v22 = vmov -0.5  }
 0x112   : > { %656 = vrot.lane.b32.xlu0 %v5842_v15, %s5683_s29 }
 0x115   : > { %5438 = vrot.lane.b32.xlu1 %v5437_v24, %s5684_s24 }
 0x116   : > { %5433 = vrot.lane.b32.xlu0 %v5432_v25, %s5684_s24 }
 0x119   : > { %608 = vrot.lane.b32.xlu1 %v5854_v21, %s5681_s18 }
 0x16f   : > { %v5892_v26 = vpop.permute.xlu1 %640 }
 0x170   : > { %9174 = vst [vmem:[#allocation9_spill] sm:$0xff] %v5892_v26  ;;  %v5894_v27 = vpop.permute.xlu0 %636 }
 0x171   : > { %9175 = vst [vmem:[#allocation10_spill] sm:$0xff] %v5894_v27 }
 0x173   : > { %v5896_v28 = vpop.permute.xlu1 %642 }
 0x174   : > { %9176 = vst [vmem:[#allocation11_spill] sm:$0xff] %v5896_v28  ;;  %v5442_v29 = vpack.i.bf16 %v5896_v28, %v5892_v26  ;;  %v5900_v30 = vpop.permute.xlu0 %638 }
 0x175   : > { %9177 = vst [vmem:[#allocation12_spill] sm:$0xff] %v5900_v30  ;;  %v5447_v31 = vpack.i.bf16 %v5900_v30, %v5894_v27 }
 0x176   : > { %5443 = vrot.lane.b32.xlu1 %v5442_v29, %s5684_s24 }
 0x177   : > { %v5905_v32 = vpop.permute.xlu1 %646  ;;  %5448 = vrot.lane.b32.xlu0 %v5447_v31, %s5684_s24 }
 0x178   : > { %9178 = vst [vmem:[#allocation13_spill] sm:$0xff] %v5905_v32  ;;  %v5908_v33 = vpop.permute.xlu0 %644 }
 0x179   : > { %9179 = vst [vmem:[#allocation14_spill] sm:$0xff] %v5908_v33  ;;  %v5457_v37 = vpack.i.bf16 %v5905_v32, %v5908_v33 }
 0x17b   : > { %v5911_v35 = vpop.permute.xlu1 %650  ;;  %610 = vrot.lane.b32.xlu0 %v601_v34, %s5681_s18 }
 0x17c   : > { %9180 = vst [vmem:[#allocation15_spill] sm:$0xff] %v5911_v35  ;;  %v5914_v36 = vpop.permute.xlu0 %648 }
 0x17d   : > { %9181 = vst [vmem:[#allocation16_spill] sm:$0xff] %v5914_v36  ;;  %v5452_v38 = vpack.i.bf16 %v5911_v35, %v5914_v36 }
 0x17f   : > { %v5920_v39 = vpop.permute.xlu1 %654  ;;  %5458 = vrot.lane.b32.xlu0 %v5457_v37, %s5684_s24  ;;  %5453 = vrot.lane.b32.xlu1 %v5452_v38, %s5684_s24 }
 0x180   : > { %9182 = vst [vmem:[#allocation17_spill] sm:$0xff] %v5920_v39  ;;  %v5924_v40 = vpop.permute.xlu0 %652 }
 0x181   : > { %9183 = vst [vmem:[#allocation18_spill] sm:$0xff] %v5924_v40  ;;  %v5462_v44 = vpack.i.bf16 %v5920_v39, %v5924_v40 }
 0x183   : > { %v5927_v42 = vpop.permute.xlu1 %658  ;;  %612 = vrot.lane.b32.xlu0 %v5849_v20, %s5681_s18  ;;  %614 = vrot.lane.b32.xlu1 %v603_v41, %s5681_s18  ;;  %s4304_s18 = scalar_lea.vmem %s9021_s3, %s5112_s28 }
 0x184   : > { %9184 = vst [vmem:[#allocation19_spill] sm:$0xff] %v5927_v42  ;;  %v5932_v43 = vpop.permute.xlu0 %656 }
 0x185   : > { %9185 = vst [vmem:[#allocation20_spill] sm:$0xff] %v5932_v43  ;;  %v5467_v49 = vpack.i.bf16 %v5927_v42, %v5932_v43 }
 0x187   : > { %v5439_v45 = vpop.permute.xlu1 %5438  ;;  %5463 = vrot.lane.b32.xlu0 %v5462_v44, %s5684_s24  ;;  %616 = vrot.lane.b32.xlu1 %v5854_v21, %s5682_s20 }
 0x188   : > { %v5434_v46 = vpop.permute.xlu0 %5433  ;;  %v5441_v47 = vunpack.i.h.bf16 %v5439_v45  ;;  %v5440_v48 = vunpack.i.l.bf16 %v5439_v45 }
 0x189   : > { %v5436_v50 = vunpack.i.h.bf16 %v5434_v46  ;;  %v5435_v51 = vunpack.i.l.bf16 %v5434_v46 }
 0x18a   : > { %v5330_v53 = vpack.c.bf16 %v5441_v47, %v5440_v48 }
 0x18b   : > { %v5324_v54 = vpack.c.bf16 %v5436_v50, %v5435_v51  ;;  %618 = vrot.lane.b32.xlu0 %v601_v34, %s5682_s20  ;;  %5468 = vrot.lane.b32.xlu1 %v5467_v49, %s5684_s24  ;;  %v609_v55 = vpop.permute.xlu1 %608  ;;  %s4306_s24 = scalar_lea.vmem %s9022_s4, %s5670_s15 }
 0x18c   : > { %5332 = vmatprep.subr.msk.bf16.mxu0 %vm5943_vm4, %v5330_v53 }
 0x18d   : > { %5326 = vmatprep.subr.msk.bf16.mxu1 %vm5943_vm4, %v5324_v54  ;;  %5335 = vmatpush3.bf16.xpose.msk.msra.mxu0 %vm5943_vm4, %v5330_v53 }
 0x18e   : > { %5329 = vmatpush3.bf16.xpose.msk.msra.mxu1 %vm5943_vm4, %v5324_v54 }
 0x18f   : > { %620 = vrot.lane.b32.xlu0 %v5849_v20, %s5682_s20  ;;  %622 = vrot.lane.b32.xlu1 %v603_v41, %s5682_s20 }
 0x193   : > { %624 = vrot.lane.b32.xlu0 %v5854_v21, %s5683_s29  ;;  %626 = vrot.lane.b32.xlu1 %v601_v34, %s5683_s29 }
 0x194   : > { %5232 = vmatmul.mubr.msk.f32.vlgmr.msra.gmra.mrb[0].mxu0 %vm664_vm3, %v603_v41 }
 0x195   : > { %5225 = vmatmul.mubr.msk.f32.vlgmr.msra.gmra.mrb[4].mxu1 %vm664_vm3, %v601_v34 }
 0x196   : > { %5238 = vmatprep.mubr.msk.f32.mxu1 %vm664_vm3, %v609_v55 }
 0x197   : > { %628 = vrot.lane.b32.xlu0 %v5849_v20, %s5683_s29  ;;  %630 = vrot.lane.b32.xlu1 %v603_v41, %s5683_s29  ;;  %v1357_v41 = vlaneseq }
 0x199   : > { %v6004_v44 = vshrl.u32 %v1357_v41, 7  ;;  %v1361_v46 = vand.u32 127, %v1357_v41 }
 0x19b   : > { %9188 = vst [vmem:[#allocation21_spill] sm:$0xff] %v6004_v44  ;;  %v1359_v45 = vadd.s32 8, %v6004_v44  ;;  %vm6012_vm6 = vcmp.gt.s32.totalorder %v1361_v46, %v6004_v44 }
 0x19d   : > { %vm6007_vm5 = vcmp.gt.s32.totalorder %v1361_v46, %v1359_v45 }
 0x1e8   : > { %v5444_v56 = vpop.permute.xlu1 %5443 }
 0x1e9   : > { %v5446_v57 = vunpack.i.h.bf16 %v5444_v56  ;;  %v5445_v58 = vunpack.i.l.bf16 %v5444_v56  ;;  %v5449_v59 = vpop.permute.xlu0 %5448 }
 0x1ea   : > { %v5451_v60 = vunpack.i.h.bf16 %v5449_v59  ;;  %v5450_v61 = vunpack.i.l.bf16 %v5449_v59 }
 0x1eb   : > { %v5342_v62 = vpack.c.bf16 %v5446_v57, %v5445_v58 }
 0x1ec   : > { %v5336_v63 = vpack.c.bf16 %v5451_v60, %v5450_v61 }
 0x1ed   : > { %v611_v0 = vpop.permute.xlu0 %610  ;;  %5344 = vmatprep.subr.msk.bf16.mxu0 %vm5943_vm4, %v5342_v62 }
 0x1ee   : > { %5338 = vmatprep.subr.msk.bf16.mxu1 %vm5943_vm4, %v5336_v63  ;;  %5347 = vmatpush3.bf16.xpose.msk.msra.mxu0 %vm5943_vm4, %v5342_v62 }
 0x1ef   : > { %5341 = vmatpush3.bf16.xpose.msk.msra.mxu1 %vm5943_vm4, %v5336_v63 }
 0x1f1   : > { %v5459_v1 = vpop.permute.xlu0 %5458  ;;  %v5454_v2 = vpop.permute.xlu1 %5453 }
 0x1f2   : > { %v5461_v3 = vunpack.i.h.bf16 %v5459_v1  ;;  %v5460_v4 = vunpack.i.l.bf16 %v5459_v1  ;;  %v5456_v5 = vunpack.i.h.bf16 %v5454_v2  ;;  %v5455_v6 = vunpack.i.l.bf16 %v5454_v2 }
 0x1f4   : > { %v5348_v7 = vpack.c.bf16 %v5461_v3, %v5460_v4  ;;  %v5354_v8 = vpack.c.bf16 %v5456_v5, %v5455_v6 }
 0x1f5   : > { %v613_v9 = vpop.permute.xlu0 %612  ;;  %v615_v10 = vpop.permute.xlu1 %614 }
 0x1f6   : > { %5239 = vmatmul.mubr.msk.f32.vlgmr.msra.gmra.mrb[6].mxu1 %vm664_vm3, %v611_v0  ;;  %5245 = vmatprep.mubr.msk.f32.mxu0 %vm664_vm3, %v613_v9 }
 0x1f7   : > { %5350 = vmatprep.subr.msk.bf16.mxu1 %vm5943_vm4, %v5348_v7  ;;  %5356 = vmatprep.subr.msk.bf16.mxu0 %vm5943_vm4, %v5354_v8 }
 0x1f8   : > { %5246 = vmatmul.mubr.msk.f32.vlgmr.msra.gmra.mrb[2].mxu0 %vm664_vm3, %v615_v10  ;;  %5353 = vmatpush3.bf16.xpose.msk.msra.mxu1 %vm5943_vm4, %v5348_v7 }
 0x1f9   : > { %5359 = vmatpush3.bf16.xpose.msk.msra.mxu0 %vm5943_vm4, %v5354_v8  ;;  %v5464_v11 = vpop.permute.xlu0 %5463  ;;  %v617_v12 = vpop.permute.xlu1 %616 }
 0x1fa   : > { %v5466_v13 = vunpack.i.h.bf16 %v5464_v11  ;;  %v5465_v14 = vunpack.i.l.bf16 %v5464_v11  ;;  %5252 = vmatprep.mubr.msk.f32.mxu1 %vm664_vm3, %v617_v12 }
 0x1fc   : > { %v5360_v16 = vpack.c.bf16 %v5466_v13, %v5465_v14 }
 0x1fd   : > { %v619_v18 = vpop.permute.xlu0 %618  ;;  %v5469_v19 = vpop.permute.xlu1 %5468 }
 0x1fe   : > { %v5471_v20 = vunpack.i.h.bf16 %v5469_v19  ;;  %v5470_v21 = vunpack.i.l.bf16 %v5469_v19  ;;  %5362 = vmatprep.subr.msk.bf16.mxu1 %vm5943_vm4, %v5360_v16 }
 0x1ff   : > { %5253 = vmatmul.mubr.msk.f32.vlgmr.msra.gmra.mrb[8].mxu1 %vm664_vm3, %v619_v18 }
 0x200   : > { %v5366_v24 = vpack.c.bf16 %v5471_v20, %v5470_v21  ;;  %5365 = vmatpush3.bf16.xpose.msk.msra.mxu1 %vm5943_vm4, %v5360_v16 }
 0x201   : > { %v621_v25 = vpop.permute.xlu0 %620  ;;  %v623_v29 = vpop.permute.xlu1 %622 }
 0x202   : > { %5259 = vmatprep.mubr.msk.f32.mxu0 %vm664_vm3, %v621_v25  ;;  %5368 = vmatprep.subr.msk.bf16.mxu0 %vm5943_vm4, %v5366_v24 }
 0x203   : > { %5260 = vmatmul.mubr.msk.f32.vlgmr.msra.gmra.mrb[4].mxu0 %vm664_vm3, %v623_v29 }
 0x204   : > { %5371 = vmatpush3.bf16.xpose.msk.msra.mxu0 %vm5943_vm4, %v5366_v24 }
 0x205   : > { %v625_v31 = vpop.permute.xlu0 %624  ;;  %v627_v34 = vpop.permute.xlu1 %626 }
 0x206   : > { %5266 = vmatprep.mubr.msk.f32.mxu1 %vm664_vm3, %v625_v31 }
 0x207   : > { %5267 = vmatmul.mubr.msk.f32.vlgmr.msra.gmra.mrb[10].mxu1 %vm664_vm3, %v627_v34 }
 0x209   : > { %v629_v37 = vpop.permute.xlu0 %628  ;;  %v631_v38 = vpop.permute.xlu1 %630 }
 0x20a   : > { %5273 = vmatprep.mubr.msk.f32.mxu0 %vm664_vm3, %v629_v37 }
 0x20b   : > { %5274 = vmatmul.mubr.msk.f32.vlgmr.msra.gmra.mrb[6].mxu0 %vm664_vm3, %v631_v38 }
 0x267   : > { %v5233_v49 = vpop.f32.mrb[0].mxu0 }
 0x268   : > { %v6018_v50 = vsel %vm6007_vm5, -inf, %v5233_v49  ;;  %v5226_v51 = vpop.f32.mrb[4].mxu1  ;;  %v826_v52 = vpop.f32.mrb[1].mxu0 }
 0x269   : > { %v6022_v53 = vsel %vm6012_vm6, -inf, %v826_v52  ;;  %v739_v54 = vpop.f32.mrb[5].mxu1  ;;  %v1394_v55 = vsel %vm1384_vm7, %v6018_v50, -inf  ;;  %v6028_v56 = vsel %vm6007_vm5, -inf, %v5226_v51 }
 0x26a   : > { %1395 = vmax.xlane.f32.xlu0 %v1394_v55  ;;  %v1391_v57 = vsel %vm1384_vm7, %v6022_v53, -inf  ;;  %v1388_v58 = vsel %vm1384_vm7, %v6028_v56, -inf  ;;  %v6036_v59 = vsel %vm6012_vm6, -inf, %v739_v54 }
 0x26b   : > { %1392 = vmax.xlane.f32.xlu1 %v1391_v57  ;;  %v1385_v60 = vsel %vm1384_vm7, %v6036_v59, -inf }
 0x26e   : > { %1389 = vmax.xlane.f32.xlu0 %v1388_v58 }
 0x272   : > { %1386 = vmax.xlane.f32.xlu0 %v1385_v60 }
 0x2c9   : > { %v5240_v61 = vpop.f32.mrb[6].mxu1 }
 0x2ca   : > { %v6042_v62 = vsel %vm6007_vm5, -inf, %v5240_v61  ;;  %v913_v63 = vpop.f32.mrb[7].mxu1 }
 0x2cb   : > { %v5247_v0 = vpop.f32.mrb[2].mxu0  ;;  %v1400_v1 = vsel %vm1384_vm7, %v6042_v62, -inf  ;;  %v6058_v6 = vsel %vm6012_vm6, -inf, %v913_v63 }
 0x2cc   : > { %v6048_v2 = vsel %vm6007_vm5, -inf, %v5247_v0  ;;  %v1000_v3 = vpop.f32.mrb[3].mxu0  ;;  %1401 = vmax.xlane.f32.xlu0 %v1400_v1  ;;  %v1397_v8 = vsel %vm1384_vm7, %v6058_v6, -inf }
 0x2cd   : > { %v6052_v4 = vsel %vm6012_vm6, -inf, %v1000_v3  ;;  %v1406_v5 = vsel %vm1384_vm7, %v6048_v2, -inf }
 0x2ce   : > { %1407 = vmax.xlane.f32.xlu1 %v1406_v5  ;;  %v1403_v7 = vsel %vm1384_vm7, %v6052_v4, -inf }
 0x2d0   : > { %1404 = vmax.xlane.f32.xlu0 %v1403_v7 }
 0x2d2   : > { %1398 = vmax.xlane.f32.xlu1 %v1397_v8  ;;  %v5254_v9 = vpop.f32.mrb[8].mxu1 }
 0x2d3   : > { %v1087_v10 = vpop.f32.mrb[9].mxu1  ;;  %v6076_v18 = vsel %vm6007_vm5, -inf, %v5254_v9 }
 0x2d4   : > { %v6082_v20 = vsel %vm6012_vm6, -inf, %v1087_v10  ;;  %v1412_v25 = vsel %vm1384_vm7, %v6076_v18, -inf }
 0x2d5   : > { %v1409_v31 = vsel %vm1384_vm7, %v6082_v20, -inf }
 0x2d6   : > { %v5261_v11 = vpop.f32.mrb[4].mxu0 }
 0x2d7   : > { %v6066_v12 = vsel %vm6007_vm5, -inf, %v5261_v11  ;;  %v1174_v13 = vpop.f32.mrb[5].mxu0 }
 0x2d8   : > { %v6070_v14 = vsel %vm6012_vm6, -inf, %v1174_v13  ;;  %v1418_v16 = vsel %vm1384_vm7, %v6066_v12, -inf }
 0x2d9   : > { %1419 = vmax.xlane.f32.xlu0 %v1418_v16  ;;  %v1415_v19 = vsel %vm1384_vm7, %v6070_v14, -inf }
 0x2da   : > { %1416 = vmax.xlane.f32.xlu1 %v1415_v19  ;;  %v5268_v21 = vpop.f32.mrb[10].mxu1 }
 0x2db   : > { %v1261_v24 = vpop.f32.mrb[11].mxu1  ;;  %v6088_v29 = vsel %vm6007_vm5, -inf, %v5268_v21 }
 0x2dc   : > { %v6094_v34 = vsel %vm6012_vm6, -inf, %v1261_v24  ;;  %v1424_v41 = vsel %vm1384_vm7, %v6088_v29, -inf }
 0x2dd   : > { %1413 = vmax.xlane.f32.xlu0 %v1412_v25  ;;  %v1421_v46 = vsel %vm1384_vm7, %v6094_v34, -inf }
 0x2de   : > { %v5275_v37 = vpop.f32.mrb[6].mxu0  ;;  %1410 = vmax.xlane.f32.xlu1 %v1409_v31 }
 0x2df   : > { %v1348_v38 = vpop.f32.mrb[7].mxu0  ;;  %v6100_v45 = vsel %vm6007_vm5, -inf, %v5275_v37 }
 0x2e0   : > { %v6106_v49 = vsel %vm6012_vm6, -inf, %v1348_v38  ;;  %v1430_v51 = vsel %vm1384_vm7, %v6100_v45, -inf }
 0x2e1   : > { %1425 = vmax.xlane.f32.xlu0 %v1424_v41  ;;  %v1427_v52 = vsel %vm1384_vm7, %v6106_v49, -inf }
 0x2e2   : > { %1422 = vmax.xlane.f32.xlu1 %v1421_v46 }
 0x2e5   : > { %1431 = vmax.xlane.f32.xlu0 %v1430_v51 }
 0x2e6   : > { %1428 = vmax.xlane.f32.xlu1 %v1427_v52 }
 0x2f7   : > { %v1396_v47 = vpop.xlane.xlu0 %1395 }
 0x2f8   : > { %v1436_v54 = vsub.f32 %v6018_v50, %v1396_v47  ;;  %v1393_v55 = vpop.xlane.xlu1 %1392 }
 0x2f9   : > { %v1435_v57 = vsub.f32 %v6022_v53, %v1393_v55 }
 0x2fa   : > { %v6114_v58 = vmul.f32 0.5, %v1436_v54 }
 0x2fb   : > { %v6116_v48 = vmul.f32 0.5, %v1435_v57  ;;  %v1390_v60 = vpop.xlane.xlu0 %1389 }
 0x2fc   : > { %v1434_v61 = vsub.f32 %v6028_v56, %v1390_v60  ;;  %v5043_v63 = vadd.f32 0.5, %v6114_v58 }
 0x2fd   : > { %9193 = vst [vmem:[#allocation22_spill] sm:$0xff] %v6116_v48  ;;  %v5042_v3 = vadd.f32 0.5, %v6116_v48 }
 0x2fe   : > { %v6120_v0 = vmul.f32 0.5, %v1434_v61  ;;  %v1484_v1 = vmax.f32 %v5043_v63, 0.0 }
 0x2ff   : > { %v1387_v5 = vpop.xlane.xlu0 %1386  ;;  %v1483_v11 = vmax.f32 %v5042_v3, 0.0 }
 0x300   : > { %9194 = vst [vmem:[#allocation23_spill] sm:$0xff] %v6120_v0  ;;  %v1433_v50 = vsub.f32 %v6036_v59, %v1387_v5  ;;  %v1500_v7 = vmul.f32 %v1484_v1, %v1484_v1  ;;  %v5041_v53 = vadd.f32 0.5, %v6120_v0 }
 0x301   : > { %v1499_v19 = vmul.f32 %v1483_v11, %v1483_v11 }
 0x302   : > { %v6125_v8 = vmul.f32 0.5, %v1433_v50  ;;  %v1522_v9 = vsel %vm1384_vm7, %v1500_v7, 0.0  ;;  %v1482_v10 = vmax.f32 %v5041_v53, 0.0 }
 0x303   : > { %1523 = vadd.xlane.f32.xlu0 %v1522_v9  ;;  %v1519_v59 = vsel %vm1384_vm7, %v1499_v19, 0.0 }
 0x304   : > { %v1498_v56 = vmul.f32 %v1482_v10, %v1482_v10  ;;  %v5040_v13 = vadd.f32 0.5, %v6125_v8 }
 0x306   : > { %v1516_v16 = vsel %vm1384_vm7, %v1498_v56, 0.0  ;;  %v1481_v21 = vmax.f32 %v5040_v13, 0.0 }
 0x307   : > { %1517 = vadd.xlane.f32.xlu1 %v1516_v16 }
 0x308   : > { %v1497_v24 = vmul.f32 %v1481_v21, %v1481_v21 }
 0x30a   : > { %v1513_v25 = vsel %vm1384_vm7, %v1497_v24, 0.0 }
 0x30b   : > { %1520 = vadd.xlane.f32.xlu1 %v1519_v59 }
 0x30f   : > { %1514 = vadd.xlane.f32.xlu1 %v1513_v25 }
 0x359   : > { %v1402_v31 = vpop.xlane.xlu0 %1401 }
 0x35a   : > { %v1438_v37 = vsub.f32 %v6042_v62, %v1402_v31 }
 0x35b   : > { %v1408_v38 = vpop.xlane.xlu1 %1407 }
 0x35c   : > { %v6133_v41 = vmul.f32 0.5, %v1438_v37  ;;  %v1440_v46 = vsub.f32 %v6048_v2, %v1408_v38 }
 0x35d   : > { %v1405_v51 = vpop.xlane.xlu0 %1404 }
 0x35e   : > { %v6136_v52 = vmul.f32 0.5, %v1440_v46  ;;  %v1439_v47 = vsub.f32 %v6052_v4, %v1405_v51  ;;  %v5045_v54 = vadd.f32 0.5, %v6133_v41 }
 0x35f   : > { %v1399_v55 = vpop.xlane.xlu1 %1398 }
 0x360   : > { %v6140_v57 = vmul.f32 0.5, %v1439_v47  ;;  %v1437_v60 = vsub.f32 %v6058_v6, %v1399_v55  ;;  %v1486_v61 = vmax.f32 %v5045_v54, 0.0  ;;  %v5047_v62 = vadd.f32 0.5, %v6136_v52 }
 0x362   : > { %v6144_v63 = vmul.f32 0.5, %v1437_v60  ;;  %v1502_v1 = vmul.f32 %v1486_v61, %v1486_v61  ;;  %v1488_v3 = vmax.f32 %v5047_v62, 0.0  ;;  %v5046_v2 = vadd.f32 0.5, %v6140_v57 }
 0x364   : > { %v1528_v5 = vsel %vm1384_vm7, %v1502_v1, 0.0  ;;  %v1504_v50 = vmul.f32 %v1488_v3, %v1488_v3  ;;  %v1487_v4 = vmax.f32 %v5046_v2, 0.0  ;;  %v5044_v7 = vadd.f32 0.5, %v6144_v63 }
 0x365   : > { %1529 = vadd.xlane.f32.xlu0 %v1528_v5 }
 0x366   : > { %v1420_v53 = vpop.xlane.xlu0 %1419  ;;  %v1534_v9 = vsel %vm1384_vm7, %v1504_v50, 0.0  ;;  %v1503_v6 = vmul.f32 %v1487_v4, %v1487_v4  ;;  %v1485_v10 = vmax.f32 %v5044_v7, 0.0 }
 0x367   : > { %v1444_v11 = vsub.f32 %v6066_v12, %v1420_v53  ;;  %1535 = vadd.xlane.f32.xlu1 %v1534_v9  ;;  %v1417_v56 = vpop.xlane.xlu1 %1416 }
 0x368   : > { %v1443_v13 = vsub.f32 %v6070_v14, %v1417_v56  ;;  %v1531_v16 = vsel %vm1384_vm7, %v1503_v6, 0.0  ;;  %v1501_v19 = vmul.f32 %v1485_v10, %v1485_v10 }
 0x369   : > { %v6153_v21 = vmul.f32 0.5, %v1444_v11  ;;  %1532 = vadd.xlane.f32.xlu0 %v1531_v16 }
 0x36a   : > { %v6155_v59 = vmul.f32 0.5, %v1443_v13  ;;  %v1414_v24 = vpop.xlane.xlu0 %1413  ;;  %v1525_v38 = vsel %vm1384_vm7, %v1501_v19, 0.0 }
 0x36b   : > { %9195 = vst [vmem:[#allocation24_spill] sm:$0xff] %v6153_v21  ;;  %v1442_v25 = vsub.f32 %v6076_v18, %v1414_v24  ;;  %v1411_v31 = vpop.xlane.xlu1 %1410  ;;  %v5051_v37 = vadd.f32 0.5, %v6153_v21 }
 0x36c   : > { %9196 = vst [vmem:[#allocation25_spill] sm:$0xff] %v6155_v59  ;;  %v1441_v12 = vsub.f32 %v6082_v20, %v1411_v31  ;;  %v5050_v14 = vadd.f32 0.5, %v6155_v59 }
 0x36d   : > { %v6162_v46 = vmul.f32 0.5, %v1442_v25  ;;  %1526 = vadd.xlane.f32.xlu0 %v1525_v38  ;;  %v1492_v51 = vmax.f32 %v5051_v37, 0.0 }
 0x36e   : > { %v6164_v47 = vmul.f32 0.5, %v1441_v12  ;;  %v1426_v54 = vpop.xlane.xlu0 %1425  ;;  %v1491_v55 = vmax.f32 %v5050_v14, 0.0 }
 0x36f   : > { %9197 = vst [vmem:[#allocation26_spill] sm:$0xff] %v6162_v46  ;;  %v1446_v60 = vsub.f32 %v6088_v29, %v1426_v54  ;;  %v1423_v18 = vpop.xlane.xlu1 %1422  ;;  %v1508_v61 = vmul.f32 %v1492_v51, %v1492_v51  ;;  %v5049_v62 = vadd.f32 0.5, %v6162_v46 }
 0x370   : > { %9198 = vst [vmem:[#allocation27_spill] sm:$0xff] %v6164_v47  ;;  %v1445_v20 = vsub.f32 %v6094_v34, %v1423_v18  ;;  %v1507_v1 = vmul.f32 %v1491_v55, %v1491_v55  ;;  %v5048_v3 = vadd.f32 0.5, %v6164_v47 }
 0x371   : > { %v6170_v2 = vmul.f32 0.5, %v1446_v60  ;;  %v1546_v5 = vsel %vm1384_vm7, %v1508_v61, 0.0  ;;  %v1490_v50 = vmax.f32 %v5049_v62, 0.0 }
 0x372   : > { %v6173_v4 = vmul.f32 0.5, %v1445_v20  ;;  %1547 = vadd.xlane.f32.xlu0 %v1546_v5  ;;  %v1432_v7 = vpop.xlane.xlu0 %1431  ;;  %v1543_v29 = vsel %vm1384_vm7, %v1507_v1, 0.0  ;;  %v1489_v53 = vmax.f32 %v5048_v3, 0.0  ;;  %v9040_v1 = vmov -1.0  }
 0x373   : > { %9199 = vst [vmem:[#allocation28_spill] sm:$0xff] %v6170_v2  ;;  %v1448_v9 = vsub.f32 %v6100_v45, %v1432_v7  ;;  %1544 = vadd.xlane.f32.xlu1 %v1543_v29  ;;  %v1429_v6 = vpop.xlane.xlu1 %1428  ;;  %v1506_v34 = vmul.f32 %v1490_v50, %v1490_v50  ;;  %v5053_v10 = vadd.f32 0.5, %v6170_v2  ;;  %v9042_v5 = vmov -0.5  }
 0x374   : > { %9200 = vst [vmem:[#allocation29_spill] sm:$0xff] %v6173_v4  ;;  %v1447_v11 = vsub.f32 %v6106_v49, %v1429_v6  ;;  %v1505_v56 = vmul.f32 %v1489_v53, %v1489_v53  ;;  %v5052_v13 = vadd.f32 0.5, %v6173_v4 }
 0x375   : > { %v6180_v16 = vmul.f32 0.5, %v1448_v9  ;;  %v1540_v19 = vsel %vm1384_vm7, %v1506_v34, 0.0  ;;  %v1494_v24 = vmax.f32 %v5053_v10, 0.0 }
 0x376   : > { %v6183_v25 = vmul.f32 0.5, %v1447_v11  ;;  %1541 = vadd.xlane.f32.xlu0 %v1540_v19  ;;  %v1537_v45 = vsel %vm1384_vm7, %v1505_v56, 0.0  ;;  %v1493_v31 = vmax.f32 %v5052_v13, 0.0 }
 0x377   : > { %9201 = vst [vmem:[#allocation30_spill] sm:$0xff] %v6180_v16  ;;  %1538 = vadd.xlane.f32.xlu1 %v1537_v45  ;;  %v1510_v37 = vmul.f32 %v1494_v24, %v1494_v24  ;;  %v5055_v12 = vadd.f32 0.5, %v6180_v16 }
 0x378   : > { %v1509_v38 = vmul.f32 %v1493_v31, %v1493_v31  ;;  %v5054_v49 = vadd.f32 0.5, %v6183_v25 }
 0x379   : > { %v1552_v14 = vsel %vm1384_vm7, %v1510_v37, 0.0  ;;  %v1496_v51 = vmax.f32 %v5055_v12, 0.0 }
 0x37a   : > { %1553 = vadd.xlane.f32.xlu0 %v1552_v14  ;;  %v1549_v54 = vsel %vm1384_vm7, %v1509_v38, 0.0  ;;  %v1495_v55 = vmax.f32 %v5054_v49, 0.0 }
 0x37b   : > { %1550 = vadd.xlane.f32.xlu1 %v1549_v54  ;;  %v1512_v60 = vmul.f32 %v1496_v51, %v1496_v51 }
 0x37c   : > { %v1511_v18 = vmul.f32 %v1495_v55, %v1495_v55 }
 0x37d   : > { %v1558_v61 = vsel %vm1384_vm7, %v1512_v60, 0.0 }
 0x37e   : > { %1559 = vadd.xlane.f32.xlu0 %v1558_v61  ;;  %v1555_v62 = vsel %vm1384_vm7, %v1511_v18, 0.0 }
 0x37f   : > { %1556 = vadd.xlane.f32.xlu1 %v1555_v62 }
 0x390   : > { %v1524_v20 = vpop.xlane.xlu0 %1523 }
 0x391   : > { %vm1564_vm8 = vcmp.ge.f32.partialorder %v1524_v20, 1.0 }
 0x392   : > { %v6193_v3 = vsel %vm1564_vm8, -0.5, %v9040_v1  ;;  %v6196_v50 = vsel %vm1564_vm8, 0.0, %v9042_v5 }
 0x393   : > { %v1612_v7 = vadd.f32 %v6196_v50, %v6193_v3 }
 0x394   : > { %v1518_v29 = vpop.xlane.xlu1 %1517 }
 0x395   : > { %v6200_v53 = vmul.f32 0.5, %v1612_v7  ;;  %vm1562_vm9 = vcmp.ge.f32.partialorder %v1518_v29, 1.0 }
 0x396   : > { %v6203_v9 = vsel %vm1562_vm9, -0.5, %v9040_v1  ;;  %v6206_v6 = vsel %vm1562_vm9, 0.0, %v9042_v5 }
 0x397   : > { %v1610_v34 = vadd.f32 %v6206_v6, %v6203_v9  ;;  %v1644_v10 = vsub.f32 %v6114_v58, %v6200_v53 }
 0x398   : > { %v1521_v11 = vpop.xlane.xlu1 %1520 }
 0x399   : > { %v6212_v56 = vmul.f32 0.5, %v1610_v34  ;;  %vm1563_vm10 = vcmp.ge.f32.partialorder %v1521_v11, 1.0  ;;  %v1660_v13 = vmax.f32 %v1644_v10, 0.0 }
 0x39a   : > { %v6215_v19 = vsel %vm1563_vm10, -0.5, %v9040_v1  ;;  %v6218_v24 = vsel %vm1563_vm10, 0.0, %v9042_v5 }
 0x39b   : > { %v1611_v45 = vadd.f32 %v6218_v24, %v6215_v19  ;;  %v1676_v31 = vmul.f32 %v1660_v13, %v1660_v13  ;;  %v1642_v37 = vsub.f32 %v6120_v0, %v6212_v56 }
 0x39c   : > { %v1515_v12 = vpop.xlane.xlu1 %1514 }
 0x39d   : > { %v6224_v38 = vmul.f32 0.5, %v1611_v45  ;;  %vm1561_vm11 = vcmp.ge.f32.partialorder %v1515_v12, 1.0  ;;  %v1698_v49 = vsel %vm1384_vm7, %v1676_v31, 0.0  ;;  %v1658_v14 = vmax.f32 %v1642_v37, 0.0 }
 0x39e   : > { %v6228_v51 = vsel %vm1561_vm11, -0.5, %v9040_v1  ;;  %v6231_v54 = vsel %vm1561_vm11, 0.0, %v9042_v5  ;;  %1699 = vadd.xlane.f32.xlu0 %v1698_v49 }
 0x39f   : > { %v1609_v55 = vadd.f32 %v6231_v54, %v6228_v51  ;;  %v1674_v60 = vmul.f32 %v1658_v14, %v1658_v14  ;;  %v1643_v18 = vsub.f32 %v6116_v48, %v6224_v38 }
 0x3a1   : > { %v6237_v61 = vmul.f32 0.5, %v1609_v55  ;;  %v1692_v62 = vsel %vm1384_vm7, %v1674_v60, 0.0  ;;  %v1659_v20 = vmax.f32 %v1643_v18, 0.0 }
 0x3a2   : > { %1693 = vadd.xlane.f32.xlu1 %v1692_v62 }
 0x3a3   : > { %v1675_v7 = vmul.f32 %v1659_v20, %v1659_v20  ;;  %v1641_v29 = vsub.f32 %v6125_v8, %v6237_v61 }
 0x3a5   : > { %v1695_v34 = vsel %vm1384_vm7, %v1675_v7, 0.0  ;;  %v1657_v10 = vmax.f32 %v1641_v29, 0.0 }
 0x3a6   : > { %1696 = vadd.xlane.f32.xlu1 %v1695_v34 }
 0x3a7   : > { %v1673_v11 = vmul.f32 %v1657_v10, %v1657_v10 }
 0x3a9   : > { %v1689_v13 = vsel %vm1384_vm7, %v1673_v11, 0.0 }
 0x3aa   : > { %1690 = vadd.xlane.f32.xlu1 %v1689_v13 }
 0x3f2   : > { %v1530_v45 = vpop.xlane.xlu0 %1529 }
 0x3f3   : > { %vm1566_vm12 = vcmp.ge.f32.partialorder %v1530_v45, 1.0 }
 0x3f4   : > { %v6245_v31 = vsel %vm1566_vm12, -0.5, %v9040_v1  ;;  %v6248_v37 = vsel %vm1566_vm12, 0.0, %v9042_v5  ;;  %v1536_v12 = vpop.xlane.xlu1 %1535 }
 0x3f5   : > { %v1614_v49 = vadd.f32 %v6248_v37, %v6245_v31  ;;  %vm1568_vm13 = vcmp.ge.f32.partialorder %v1536_v12, 1.0 }
 0x3f6   : > { %v6253_v14 = vsel %vm1568_vm13, -0.5, %v9040_v1  ;;  %v6256_v55 = vsel %vm1568_vm13, 0.0, %v9042_v5  ;;  %v1533_v60 = vpop.xlane.xlu0 %1532 }
 0x3f7   : > { %v6258_v18 = vmul.f32 0.5, %v1614_v49  ;;  %v1616_v62 = vadd.f32 %v6256_v55, %v6253_v14  ;;  %vm1567_vm14 = vcmp.ge.f32.partialorder %v1533_v60, 1.0 }
 0x3f8   : > { %v6263_v20 = vsel %vm1567_vm14, -0.5, %v9040_v1  ;;  %v6266_v7 = vsel %vm1567_vm14, 0.0, %v9042_v5 }
 0x3f9   : > { %v6268_v29 = vmul.f32 0.5, %v1616_v62  ;;  %v1615_v34 = vadd.f32 %v6266_v7, %v6263_v20  ;;  %v1646_v10 = vsub.f32 %v6133_v41, %v6258_v18 }
 0x3fa   : > { %v1527_v11 = vpop.xlane.xlu0 %1526 }
 0x3fb   : > { %v6274_v13 = vmul.f32 0.5, %v1615_v34  ;;  %vm1565_vm15 = vcmp.ge.f32.partialorder %v1527_v11, 1.0  ;;  %v1662_v45 = vmax.f32 %v1646_v10, 0.0  ;;  %v1648_v12 = vsub.f32 %v6136_v52, %v6268_v29 }
 0x3fc   : > { %v6279_v49 = vsel %vm1565_vm15, -0.5, %v9040_v1  ;;  %v6282_v60 = vsel %vm1565_vm15, 0.0, %v9042_v5  ;;  %v9202_v5 = vmov -1.0  }
 0x3fd   : > { %v1613_v62 = vadd.f32 %v6282_v60, %v6279_v49  ;;  %v1678_v44 = vmul.f32 %v1662_v45, %v1662_v45  ;;  %v1664_v43 = vmax.f32 %v1648_v12, 0.0  ;;  %v1647_v34 = vsub.f32 %v6140_v57, %v6274_v13 }
 0x3ff   : > { %v6288_v42 = vmul.f32 0.5, %v1613_v62  ;;  %v1548_v10 = vpop.xlane.xlu0 %1547  ;;  %v1704_v11 = vsel %vm1384_vm7, %v1678_v44, 0.0  ;;  %v1680_v36 = vmul.f32 %v1664_v43, %v1664_v43  ;;  %v1663_v35 = vmax.f32 %v1647_v34, 0.0 }
 0x400   : > { %vm1572_vm0 = vcmp.ge.f32.partialorder %v1548_v10, 1.0  ;;  %1705 = vadd.xlane.f32.xlu0 %v1704_v11  ;;  %v1545_v1 = vpop.xlane.xlu1 %1544 }
 0x401   : > { %v6292_v28 = vsel %vm1572_vm0, -0.5, %v9202_v5  ;;  %v6295_v26 = vsel %vm1572_vm0, 0.0, %v9203_v22  ;;  %vm1571_vm1 = vcmp.ge.f32.partialorder %v1545_v1, 1.0  ;;  %v1710_v45 = vsel %vm1384_vm7, %v1680_v36, 0.0 }
 0x402   : > { %v1620_v12 = vadd.f32 %v6295_v26, %v6292_v28  ;;  %v6301_v62 = vsel %vm1571_vm1, -0.5, %v9202_v5  ;;  %v6304_v43 = vsel %vm1571_vm1, 0.0, %v9203_v22  ;;  %1711 = vadd.xlane.f32.xlu1 %v1710_v45  ;;  %v1679_v44 = vmul.f32 %v1663_v35, %v1663_v35 }
 0x403   : > { %v1619_v34 = vadd.f32 %v6304_v43, %v6301_v62  ;;  %v1542_v10 = vpop.xlane.xlu0 %1541  ;;  %v1645_v1 = vsub.f32 %v6144_v63, %v6288_v42 }
 0x404   : > { %v6310_v11 = vmul.f32 0.5, %v1620_v12  ;;  %vm1570_vm4 = vcmp.ge.f32.partialorder %v1542_v10, 1.0  ;;  %v1707_v36 = vsel %vm1384_vm7, %v1679_v44, 0.0  ;;  %v1539_v15 = vpop.xlane.xlu1 %1538 }
 0x405   : > { %v6313_v40 = vmul.f32 0.5, %v1619_v34  ;;  %v6316_v39 = vsel %vm1570_vm4, -0.5, %v9202_v5  ;;  %v6319_v35 = vsel %vm1570_vm4, 0.0, %v9203_v22  ;;  %1708 = vadd.xlane.f32.xlu0 %v1707_v36  ;;  %vm1569_vm5 = vcmp.ge.f32.partialorder %v1539_v15, 1.0 }
 0x406   : > { %9204 = vst [vmem:[#allocation31_spill] sm:$0xff] %v6319_v35  ;;  %v1618_v45 = vadd.f32 %v6319_v35, %v6316_v39  ;;  %v6324_v12 = vsel %vm1569_vm5, -0.5, %v9202_v5  ;;  %v6327_v10 = vsel %vm1569_vm5, 0.0, %v9203_v22  ;;  %v1661_v44 = vmax.f32 %v1645_v1, 0.0 }
 0x407   : > { %9205 = vst [vmem:[#allocation32_spill] sm:$0xff] %v6324_v12  ;;  %9206 = vst [vmem:[#allocation33_spill] sm:$0xff] %v6327_v10  ;;  %v1617_v34 = vadd.f32 %v6327_v10, %v6324_v12  ;;  %v1554_v33 = vpop.xlane.xlu0 %1553  ;;  %v1652_v32 = vsub.f32 %v6153_v21, %v6310_v11  ;;  %v1651_v15 = vsub.f32 %v6155_v59, %v6313_v40 }
 0x408   : > { %v6335_v36 = vmul.f32 0.5, %v1618_v45  ;;  %vm1574_vm6 = vcmp.ge.f32.partialorder %v1554_v33, 1.0  ;;  %v1677_v27 = vmul.f32 %v1661_v44, %v1661_v44  ;;  %v1551_v17 = vpop.xlane.xlu1 %1550 }
 0x409   : > { %v6337_v30 = vmul.f32 0.5, %v1617_v34  ;;  %v6340_v23 = vsel %vm1574_vm6, -0.5, %v9202_v5  ;;  %v6343_v1 = vsel %vm1574_vm6, 0.0, %v9203_v22  ;;  %vm1573_vm8 = vcmp.ge.f32.partialorder %v1551_v17, 1.0 }
 0x40a   : > { %9208 = vst [vmem:[#allocation35_spill] sm:$0xff] %v6340_v23  ;;  %9209 = vst [vmem:[#allocation36_spill] sm:$0xff] %v6343_v1  ;;  %v1622_v21 = vadd.f32 %v6343_v1, %v6340_v23  ;;  %v1701_v10 = vsel %vm1384_vm7, %v1677_v27, 0.0  ;;  %v6349_v45 = vsel %vm1573_vm8, -0.5, %v9202_v5  ;;  %v6352_v33 = vsel %vm1573_vm8, 0.0, %v9203_v22 }
 0x40b   : > { %9207 = vst [vmem:[#allocation34_spill] sm:$0xff] %v6337_v30  ;;  %9210 = vst [vmem:[#allocation37_spill] sm:$0xff] %v6349_v45  ;;  %1702 = vadd.xlane.f32.xlu0 %v1701_v10  ;;  %v1621_v44 = vadd.f32 %v6352_v33, %v6349_v45  ;;  %v1560_v34 = vpop.xlane.xlu0 %1559  ;;  %v1668_v59 = vmax.f32 %v1652_v32, 0.0  ;;  %v1667_v12 = vmax.f32 %v1651_v15, 0.0  ;;  %v1650_v17 = vsub.f32 %v6162_v46, %v6335_v36 }
 0x40c   : > { %9211 = vst [vmem:[#allocation38_spill] sm:$0xff] %v6352_v33  ;;  %v6358_v35 = vmul.f32 0.5, %v1622_v21  ;;  %vm1576_vm9 = vcmp.ge.f32.partialorder %v1560_v34, 1.0  ;;  %v1557_v27 = vpop.xlane.xlu1 %1556  ;;  %v1649_v1 = vsub.f32 %v6164_v47, %v6337_v30 }
 0x40d   : > { %v6362_v23 = vmul.f32 0.5, %v1621_v44  ;;  %v6365_v10 = vsel %vm1576_vm9, -0.5, %v9202_v5  ;;  %v6368_v33 = vsel %vm1576_vm9, 0.0, %v9203_v22  ;;  %vm1575_vm10 = vcmp.ge.f32.partialorder %v1557_v27, 1.0 }
 0x40e   : > { %9212 = vst [vmem:[#allocation39_spill] sm:$0xff] %v6365_v10  ;;  %9213 = vst [vmem:[#allocation40_spill] sm:$0xff] %v6368_v33  ;;  %v1624_v32 = vadd.f32 %v6368_v33, %v6365_v10  ;;  %v6373_v21 = vsel %vm1575_vm10, -0.5, %v9202_v5  ;;  %v6376_v15 = vsel %vm1575_vm10, 0.0, %v9203_v22  ;;  %v1684_v34 = vmul.f32 %v1668_v59, %v1668_v59 }
 0x40f   : > { %9214 = vst [vmem:[#allocation41_spill] sm:$0xff] %v6376_v15  ;;  %v1623_v44 = vadd.f32 %v6376_v15, %v6373_v21  ;;  %v1683_v47 = vmul.f32 %v1667_v12, %v1667_v12  ;;  %v1666_v46 = vmax.f32 %v1650_v17, 0.0  ;;  %v1665_v45 = vmax.f32 %v1649_v1, 0.0 }
 0x410   : > { %v6380_v30 = vmul.f32 0.5, %v1624_v32  ;;  %v1722_v27 = vsel %vm1384_vm7, %v1684_v34, 0.0  ;;  %v1654_v33 = vsub.f32 %v6170_v2, %v6358_v35  ;;  %v1653_v5 = vsub.f32 %v6173_v4, %v6362_v23 }
 0x411   : > { %v6387_v10 = vmul.f32 0.5, %v1623_v44  ;;  %1723 = vadd.xlane.f32.xlu0 %v1722_v27  ;;  %v1719_v22 = vsel %vm1384_vm7, %v1683_v47, 0.0  ;;  %v1682_v59 = vmul.f32 %v1666_v46, %v1666_v46  ;;  %v1681_v15 = vmul.f32 %v1665_v45, %v1665_v45 }
 0x412   : > { %1720 = vadd.xlane.f32.xlu1 %v1719_v22  ;;  %v1670_v12 = vmax.f32 %v1654_v33, 0.0  ;;  %v1669_v1 = vmax.f32 %v1653_v5, 0.0  ;;  %v1656_v17 = vsub.f32 %v6180_v16, %v6380_v30 }
 0x413   : > { %v1716_v32 = vsel %vm1384_vm7, %v1682_v59, 0.0  ;;  %v1713_v34 = vsel %vm1384_vm7, %v1681_v15, 0.0  ;;  %v1655_v4 = vsub.f32 %v6183_v25, %v6387_v10 }
 0x414   : > { %v1686_v44 = vmul.f32 %v1670_v12, %v1670_v12  ;;  %v1685_v2 = vmul.f32 %v1669_v1, %v1669_v1  ;;  %v1672_v27 = vmax.f32 %v1656_v17, 0.0 }
 0x415   : > { %1717 = vadd.xlane.f32.xlu0 %v1716_v32  ;;  %v1671_v47 = vmax.f32 %v1655_v4, 0.0 }
 0x416   : > { %1714 = vadd.xlane.f32.xlu1 %v1713_v34  ;;  %v1728_v46 = vsel %vm1384_vm7, %v1686_v44, 0.0  ;;  %v1688_v45 = vmul.f32 %v1672_v27, %v1672_v27  ;;  %v1725_v33 = vsel %vm1384_vm7, %v1685_v2, 0.0 }
 0x417   : > { %v1687_v5 = vmul.f32 %v1671_v47, %v1671_v47 }
 0x418   : > { %v1734_v22 = vsel %vm1384_vm7, %v1688_v45, 0.0 }
 0x419   : > { %1729 = vadd.xlane.f32.xlu0 %v1728_v46  ;;  %v1731_v15 = vsel %vm1384_vm7, %v1687_v5, 0.0 }
 0x41a   : > { %1726 = vadd.xlane.f32.xlu1 %v1725_v33 }
 0x41d   : > { %1735 = vadd.xlane.f32.xlu0 %v1734_v22 }
 0x41e   : > { %1732 = vadd.xlane.f32.xlu1 %v1731_v15 }
 0x42b   : > { %v1700_v59 = vpop.xlane.xlu0 %1699 }
 0x42c   : > { %vm1740_vm11 = vcmp.ge.f32.partialorder %v1700_v59, 1.0 }
 0x42d   : > { %v6402_v4 = vsel %vm1740_vm11, %v6200_v53, %v6193_v3  ;;  %v6406_v12 = vsel %vm1740_vm11, %v6196_v50, %v6200_v53 }
 0x42e   : > { %v1788_v2 = vadd.f32 %v6406_v12, %v6402_v4 }
 0x42f   : > { %v1694_v1 = vpop.xlane.xlu1 %1693 }
 0x430   : > { %v6410_v17 = vmul.f32 0.5, %v1788_v2  ;;  %vm1738_vm12 = vcmp.ge.f32.partialorder %v1694_v1, 1.0 }
 0x431   : > { %v6414_v32 = vsel %vm1738_vm12, %v6212_v56, %v6203_v9  ;;  %v6418_v34 = vsel %vm1738_vm12, %v6206_v6, %v6212_v56 }
 0x432   : > { %v1786_v3 = vadd.f32 %v6418_v34, %v6414_v32  ;;  %v1820_v50 = vsub.f32 %v6114_v58, %v6410_v17 }
 0x433   : > { %v1697_v53 = vpop.xlane.xlu1 %1696 }
 0x434   : > { %v6424_v44 = vmul.f32 0.5, %v1786_v3  ;;  %vm1739_vm13 = vcmp.ge.f32.partialorder %v1697_v53, 1.0  ;;  %v1836_v27 = vmax.f32 %v1820_v50, 0.0 }
 0x435   : > { %v6428_v47 = vsel %vm1739_vm13, %v6224_v38, %v6215_v19  ;;  %v6432_v9 = vsel %vm1739_vm13, %v6218_v24, %v6224_v38 }
 0x436   : > { %v1787_v6 = vadd.f32 %v6432_v9, %v6428_v47  ;;  %v1852_v56 = vmul.f32 %v1836_v27, %v1836_v27  ;;  %v1818_v46 = vsub.f32 %v6120_v0, %v6424_v44 }
 0x437   : > { %v1691_v45 = vpop.xlane.xlu1 %1690 }
 0x438   : > { %v6438_v33 = vmul.f32 0.5, %v1787_v6  ;;  %vm1737_vm14 = vcmp.ge.f32.partialorder %v1691_v45, 1.0  ;;  %v1874_v5 = vsel %vm1384_vm7, %v1852_v56, 0.0  ;;  %v1834_v22 = vmax.f32 %v1818_v46, 0.0 }
 0x439   : > { %v6443_v19 = vsel %vm1737_vm14, %v6237_v61, %v6228_v51  ;;  %v6447_v24 = vsel %vm1737_vm14, %v6231_v54, %v6237_v61  ;;  %1875 = vadd.xlane.f32.xlu0 %v1874_v5 }
 0x43a   : > { %v1785_v38 = vadd.f32 %v6447_v24, %v6443_v19  ;;  %v1850_v15 = vmul.f32 %v1834_v22, %v1834_v22  ;;  %v1819_v59 = vsub.f32 %v6116_v48, %v6438_v33 }
 0x43c   : > { %v6453_v2 = vmul.f32 0.5, %v1785_v38  ;;  %v1868_v1 = vsel %vm1384_vm7, %v1850_v15, 0.0  ;;  %v1835_v3 = vmax.f32 %v1819_v59, 0.0 }
 0x43d   : > { %1869 = vadd.xlane.f32.xlu1 %v1868_v1 }
 0x43e   : > { %v1851_v51 = vmul.f32 %v1835_v3, %v1835_v3  ;;  %v1817_v50 = vsub.f32 %v6125_v8, %v6453_v2 }
 0x440   : > { %v1871_v54 = vsel %vm1384_vm7, %v1851_v51, 0.0  ;;  %v1833_v61 = vmax.f32 %v1817_v50, 0.0 }
 0x441   : > { %1872 = vadd.xlane.f32.xlu1 %v1871_v54 }
 0x442   : > { %v1849_v53 = vmul.f32 %v1833_v61, %v1833_v61 }
 0x444   : > { %v1865_v27 = vsel %vm1384_vm7, %v1849_v53, 0.0 }
 0x445   : > { %1866 = vadd.xlane.f32.xlu1 %v1865_v27 }
 0x48d   : > { %v1706_v6 = vpop.xlane.xlu0 %1705 }
 0x48e   : > { %vm1742_vm15 = vcmp.ge.f32.partialorder %v1706_v6, 1.0 }
 0x48f   : > { %v6462_v56 = vsel %vm1742_vm15, %v6258_v18, %v6245_v31  ;;  %v6466_v46 = vsel %vm1742_vm15, %v6248_v37, %v6258_v18  ;;  %v1712_v45 = vpop.xlane.xlu1 %1711 }
 0x490   : > { %v1790_v5 = vadd.f32 %v6466_v46, %v6462_v56  ;;  %vm1744_vm0 = vcmp.ge.f32.partialorder %v1712_v45, 1.0 }
 0x491   : > { %v6472_v22 = vsel %vm1744_vm0, %v6268_v29, %v6253_v14  ;;  %v6476_v38 = vsel %vm1744_vm0, %v6256_v55, %v6268_v29 }
 0x492   : > { %v6478_v15 = vmul.f32 0.5, %v1790_v5  ;;  %v1792_v31 = vadd.f32 %v6476_v38, %v6472_v22  ;;  %v1709_v37 = vpop.xlane.xlu0 %1708 }
 0x493   : > { %vm1743_vm1 = vcmp.ge.f32.partialorder %v1709_v37, 1.0 }
 0x494   : > { %v6482_v18 = vmul.f32 0.5, %v1792_v31  ;;  %v6486_v59 = vsel %vm1743_vm1, %v6274_v13, %v6263_v20  ;;  %v6490_v14 = vsel %vm1743_vm1, %v6266_v7, %v6274_v13  ;;  %v1822_v55 = vsub.f32 %v6133_v41, %v6478_v15 }
 0x495   : > { %v1791_v29 = vadd.f32 %v6490_v14, %v6486_v59 }
 0x496   : > { %v1838_v1 = vmax.f32 %v1822_v55, 0.0  ;;  %v1824_v3 = vsub.f32 %v6136_v52, %v6482_v18 }
 0x497   : > { %v6498_v51 = vmul.f32 0.5, %v1791_v29 }
 0x498   : > { %v1703_v50 = vpop.xlane.xlu0 %1702  ;;  %v1854_v54 = vmul.f32 %v1838_v1, %v1838_v1  ;;  %v1840_v20 = vmax.f32 %v1824_v3, 0.0 }
 0x499   : > { %vm1741_vm4 = vcmp.ge.f32.partialorder %v1703_v50, 1.0  ;;  %v1823_v7 = vsub.f32 %v6140_v57, %v6498_v51 }
 0x49a   : > { %v6504_v13 = vsel %vm1741_vm4, %v6288_v42, %v6279_v49  ;;  %v6508_v61 = vsel %vm1741_vm4, %v6282_v60, %v6288_v42  ;;  %v1880_v53 = vsel %vm1384_vm7, %v1854_v54, 0.0  ;;  %v1856_v27 = vmul.f32 %v1840_v20, %v1840_v20 }
 0x49b   : > { %v1789_v6 = vadd.f32 %v6508_v61, %v6504_v13  ;;  %1881 = vadd.xlane.f32.xlu0 %v1880_v53  ;;  %v1839_v45 = vmax.f32 %v1823_v7, 0.0 }
 0x49c   : > { %v1886_v5 = vsel %vm1384_vm7, %v1856_v27, 0.0 }
 0x49d   : > { %v6514_v31 = vmul.f32 0.5, %v1789_v6  ;;  %1887 = vadd.xlane.f32.xlu1 %v1886_v5  ;;  %v1855_v37 = vmul.f32 %v1839_v45, %v1839_v45  ;;  %v9216_v6 = vld [vmem:[#allocation31_spill] sm:$0xff]  ;;  %v9218_v45 = vld [vmem:[#allocation32_spill] sm:$0xff]  ;;  %v9219_v5 = vld [vmem:[#allocation34_spill] sm:$0xff] }
 0x49e   : > { %v1724_v49 = vpop.xlane.xlu0 %1723 }
 0x49f   : > { %vm1748_vm5 = vcmp.ge.f32.partialorder %v1724_v49, 1.0  ;;  %v1721_v55 = vpop.xlane.xlu1 %1720  ;;  %v1883_v42 = vsel %vm1384_vm7, %v1855_v37, 0.0  ;;  %v1821_v60 = vsub.f32 %v6144_v63, %v6514_v31  ;;  %v9221_v49 = vld [vmem:[#allocation33_spill] sm:$0xff] }
 0x4a0   : > { %v6521_v29 = vsel %vm1748_vm5, %v6310_v11, %v6292_v28  ;;  %v6525_v1 = vsel %vm1748_vm5, %v6295_v26, %v6310_v11  ;;  %vm1747_vm6 = vcmp.ge.f32.partialorder %v1721_v55, 1.0  ;;  %1884 = vadd.xlane.f32.xlu0 %v1883_v42 }
 0x4a1   : > { %v1796_v3 = vadd.f32 %v6525_v1, %v6521_v29  ;;  %v6531_v50 = vsel %vm1747_vm6, %v6313_v40, %v6301_v62  ;;  %v6535_v54 = vsel %vm1747_vm6, %v6304_v43, %v6313_v40  ;;  %v1837_v20 = vmax.f32 %v1821_v60, 0.0 }
 0x4a2   : > { %v1795_v28 = vadd.f32 %v6535_v54, %v6531_v50  ;;  %v1718_v7 = vpop.xlane.xlu0 %1717 }
 0x4a3   : > { %v6539_v26 = vmul.f32 0.5, %v1796_v3  ;;  %vm1746_vm8 = vcmp.ge.f32.partialorder %v1718_v7, 1.0  ;;  %v1715_v11 = vpop.xlane.xlu1 %1714  ;;  %v1853_v53 = vmul.f32 %v1837_v20, %v1837_v20  ;;  %v9224_v20 = vld [vmem:[#allocation25_spill] sm:$0xff] }
 0x4a4   : > { %v6541_v27 = vmul.f32 0.5, %v1795_v28  ;;  %v6545_v62 = vsel %vm1746_vm8, %v6335_v36, %v6316_v39  ;;  %v6549_v40 = vsel %vm1746_vm8, %v9216_v6, %v6335_v36  ;;  %vm1745_vm9 = vcmp.ge.f32.partialorder %v1715_v11, 1.0  ;;  %v9223_v36 = vld [vmem:[#allocation24_spill] sm:$0xff] }
 0x4a5   : > { %9215 = vst [vmem:[#allocation42_spill] sm:$0xff] %v6545_v62  ;;  %9217 = vst [vmem:[#allocation31_spill] sm:$0xff] %v6549_v40  ;;  %v1794_v43 = vadd.f32 %v6549_v40, %v6545_v62  ;;  %v6555_v37 = vsel %vm1745_vm9, %v9219_v5, %v9218_v45  ;;  %v6559_v55 = vsel %vm1745_vm9, %v9221_v49, %v9219_v5  ;;  %v1877_v42 = vsel %vm1384_vm7, %v1853_v53, 0.0  ;;  %v9225_v45 = vld [vmem:[#allocation35_spill] sm:$0xff]  ;;  %v9227_v5 = vld [vmem:[#allocation36_spill] sm:$0xff] }
 0x4a6   : > { %9220 = vst [vmem:[#allocation32_spill] sm:$0xff] %v6555_v37  ;;  %9222 = vst [vmem:[#allocation34_spill] sm:$0xff] %v6559_v55  ;;  %v1793_v39 = vadd.f32 %v6559_v55, %v6555_v37  ;;  %v1730_v60 = vpop.xlane.xlu0 %1729  ;;  %1878 = vadd.xlane.f32.xlu0 %v1877_v42  ;;  %v1828_v3 = vsub.f32 %v9223_v36, %v6539_v26  ;;  %v1827_v28 = vsub.f32 %v9224_v20, %v6541_v27  ;;  %v9229_v55 = vld [vmem:[#allocation37_spill] sm:$0xff] }
 0x4a7   : > { %v6568_v7 = vmul.f32 0.5, %v1794_v43  ;;  %vm1750_vm10 = vcmp.ge.f32.partialorder %v1730_v60, 1.0  ;;  %v1727_v11 = vpop.xlane.xlu1 %1726  ;;  %v9231_v60 = vld [vmem:[#allocation38_spill] sm:$0xff] }
 0x4a8   : > { %v6570_v6 = vmul.f32 0.5, %v1793_v39  ;;  %v6574_v53 = vsel %vm1750_vm10, %v6358_v35, %v9225_v45  ;;  %v6578_v49 = vsel %vm1750_vm10, %v9227_v5, %v6358_v35  ;;  %vm1749_vm11 = vcmp.ge.f32.partialorder %v1727_v11, 1.0  ;;  %v9233_v35 = vld [vmem:[#allocation26_spill] sm:$0xff]  ;;  %v9234_v5 = vld [vmem:[#allocation27_spill] sm:$0xff] }
 0x4a9   : > { %9226 = vst [vmem:[#allocation33_spill] sm:$0xff] %v6574_v53  ;;  %9228 = vst [vmem:[#allocation35_spill] sm:$0xff] %v6578_v49  ;;  %v1798_v42 = vadd.f32 %v6578_v49, %v6574_v53  ;;  %v6584_v43 = vsel %vm1749_vm11, %v6362_v23, %v9229_v55  ;;  %v6588_v39 = vsel %vm1749_vm11, %v9231_v60, %v6362_v23  ;;  %v1844_v20 = vmax.f32 %v1828_v3, 0.0  ;;  %v9235_v23 = vld [vmem:[#allocation39_spill] sm:$0xff]  ;;  %v9237_v60 = vld [vmem:[#allocation40_spill] sm:$0xff] }
 0x4aa   : > { %9230 = vst [vmem:[#allocation36_spill] sm:$0xff] %v6584_v43  ;;  %9232 = vst [vmem:[#allocation37_spill] sm:$0xff] %v6588_v39  ;;  %v1797_v45 = vadd.f32 %v6588_v39, %v6584_v43  ;;  %v1736_v37 = vpop.xlane.xlu0 %1735  ;;  %v1843_v36 = vmax.f32 %v1827_v28, 0.0  ;;  %v1826_v11 = vsub.f32 %v9233_v35, %v6568_v7  ;;  %v1825_v49 = vsub.f32 %v9234_v5, %v6570_v6 }
 0x4ab   : > { %v6596_v53 = vmul.f32 0.5, %v1798_v42  ;;  %vm1752_vm12 = vcmp.ge.f32.partialorder %v1736_v37, 1.0  ;;  %v1733_v55 = vpop.xlane.xlu1 %1732  ;;  %v1860_v40 = vmul.f32 %v1844_v20, %v1844_v20  ;;  %v9239_v37 = vld [vmem:[#allocation41_spill] sm:$0xff] }
 0x4ac   : > { %v6598_v62 = vmul.f32 0.5, %v1797_v45  ;;  %v6602_v3 = vsel %vm1752_vm12, %v6380_v30, %v9235_v23  ;;  %v6606_v28 = vsel %vm1752_vm12, %v9237_v60, %v6380_v30  ;;  %vm1751_vm13 = vcmp.ge.f32.partialorder %v1733_v55, 1.0 }
 0x4ad   : > { %9236 = vst [vmem:[#allocation38_spill] sm:$0xff] %v6602_v3  ;;  %9238 = vst [vmem:[#allocation39_spill] sm:$0xff] %v6606_v28  ;;  %v1800_v35 = vadd.f32 %v6606_v28, %v6602_v3  ;;  %v6612_v42 = vsel %vm1751_vm13, %v6387_v10, %v6373_v21  ;;  %v6616_v20 = vsel %vm1751_vm13, %v9239_v37, %v6387_v10  ;;  %v1898_v45 = vsel %vm1384_vm7, %v1860_v40, 0.0  ;;  %v9241_v28 = vld [vmem:[#allocation28_spill] sm:$0xff]  ;;  %v9242_v21 = vld [vmem:[#allocation29_spill] sm:$0xff] }
 0x4ae   : > { %9240 = vst [vmem:[#allocation40_spill] sm:$0xff] %v6616_v20  ;;  %v1799_v23 = vadd.f32 %v6616_v20, %v6612_v42  ;;  %1899 = vadd.xlane.f32.xlu0 %v1898_v45  ;;  %v1859_v30 = vmul.f32 %v1843_v36, %v1843_v36  ;;  %v1842_v60 = vmax.f32 %v1826_v11, 0.0  ;;  %v1841_v55 = vmax.f32 %v1825_v49, 0.0 }
 0x4af   : > { %v6621_v5 = vmul.f32 0.5, %v1800_v35  ;;  %v1830_v3 = vsub.f32 %v9241_v28, %v6596_v53  ;;  %v1829_v39 = vsub.f32 %v9242_v21, %v6598_v62 }
 0x4b0   : > { %v6627_v43 = vmul.f32 0.5, %v1799_v23  ;;  %v1895_v10 = vsel %vm1384_vm7, %v1859_v30, 0.0  ;;  %v1858_v40 = vmul.f32 %v1842_v60, %v1842_v60  ;;  %v1857_v37 = vmul.f32 %v1841_v55, %v1841_v55 }
 0x4b1   : > { %1896 = vadd.xlane.f32.xlu1 %v1895_v10  ;;  %v1846_v20 = vmax.f32 %v1830_v3, 0.0  ;;  %v1845_v45 = vmax.f32 %v1829_v39, 0.0  ;;  %v1832_v36 = vsub.f32 %v6180_v16, %v6621_v5 }
 0x4b2   : > { %v1892_v49 = vsel %vm1384_vm7, %v1858_v40, 0.0  ;;  %v1889_v35 = vsel %vm1384_vm7, %v1857_v37, 0.0  ;;  %v1831_v11 = vsub.f32 %v6183_v25, %v6627_v43 }
 0x4b3   : > { %1893 = vadd.xlane.f32.xlu0 %v1892_v49  ;;  %v1862_v23 = vmul.f32 %v1846_v20, %v1846_v20  ;;  %v1861_v21 = vmul.f32 %v1845_v45, %v1845_v45  ;;  %v1848_v28 = vmax.f32 %v1832_v36, 0.0 }
 0x4b4   : > { %v1847_v30 = vmax.f32 %v1831_v11, 0.0 }
 0x4b5   : > { %1890 = vadd.xlane.f32.xlu1 %v1889_v35  ;;  %v1904_v60 = vsel %vm1384_vm7, %v1862_v23, 0.0  ;;  %v1864_v3 = vmul.f32 %v1848_v28, %v1848_v28  ;;  %v1901_v39 = vsel %vm1384_vm7, %v1861_v21, 0.0 }
 0x4b6   : > { %v1863_v55 = vmul.f32 %v1847_v30, %v1847_v30 }
 0x4b7   : > { %1905 = vadd.xlane.f32.xlu0 %v1904_v60  ;;  %v1910_v10 = vsel %vm1384_vm7, %v1864_v3, 0.0 }
 0x4b8   : > { %v1907_v40 = vsel %vm1384_vm7, %v1863_v55, 0.0 }
 0x4b9   : > { %1902 = vadd.xlane.f32.xlu1 %v1901_v39 }
 0x4bb   : > { %1911 = vadd.xlane.f32.xlu0 %v1910_v10 }
 0x4bd   : > { %1908 = vadd.xlane.f32.xlu1 %v1907_v40 }
 0x4c6   : > { %v1876_v37 = vpop.xlane.xlu0 %1875 }
 0x4c7   : > { %vm1916_vm14 = vcmp.ge.f32.partialorder %v1876_v37, 1.0 }
 0x4c8   : > { %v6642_v20 = vsel %vm1916_vm14, %v6410_v17, %v6402_v4  ;;  %v6646_v28 = vsel %vm1916_vm14, %v6406_v12, %v6410_v17 }
 0x4c9   : > { %v1964_v21 = vadd.f32 %v6646_v28, %v6642_v20 }
 0x4ca   : > { %v1870_v45 = vpop.xlane.xlu1 %1869 }
 0x4cb   : > { %v6650_v36 = vmul.f32 0.5, %v1964_v21  ;;  %vm1914_vm15 = vcmp.ge.f32.partialorder %v1870_v45, 1.0 }
 0x4cc   : > { %v6654_v49 = vsel %vm1914_vm15, %v6424_v44, %v6414_v32  ;;  %v6658_v35 = vsel %vm1914_vm15, %v6418_v34, %v6424_v44 }
 0x4cd   : > { %v1962_v4 = vadd.f32 %v6658_v35, %v6654_v49  ;;  %v1996_v12 = vsub.f32 %v6114_v58, %v6650_v36 }
 0x4ce   : > { %v1873_v17 = vpop.xlane.xlu1 %1872 }
 0x4cf   : > { %v6664_v11 = vmul.f32 0.5, %v1962_v4  ;;  %vm1915_vm0 = vcmp.ge.f32.partialorder %v1873_v17, 1.0  ;;  %v2012_v23 = vmax.f32 %v1996_v12, 0.0 }
 0x4d0   : > { %v6668_v30 = vsel %vm1915_vm0, %v6438_v33, %v6428_v47  ;;  %v6672_v32 = vsel %vm1915_vm0, %v6432_v9, %v6438_v33 }
 0x4d1   : > { %v1963_v34 = vadd.f32 %v6672_v32, %v6668_v30  ;;  %v2028_v44 = vmul.f32 %v2012_v23, %v2012_v23  ;;  %v1994_v60 = vsub.f32 %v6120_v0, %v6664_v11 }
 0x4d2   : > { %v1867_v3 = vpop.xlane.xlu1 %1866 }
 0x4d3   : > { %v6678_v39 = vmul.f32 0.5, %v1963_v34  ;;  %vm1913_vm1 = vcmp.ge.f32.partialorder %v1867_v3, 1.0  ;;  %v2050_v55 = vsel %vm1384_vm7, %v2028_v44, 0.0  ;;  %v2010_v10 = vmax.f32 %v1994_v60, 0.0 }
 0x4d4   : > { %v6683_v47 = vsel %vm1913_vm1, %v6453_v2, %v6443_v19  ;;  %v6687_v9 = vsel %vm1913_vm1, %v6447_v24, %v6453_v2  ;;  %2051 = vadd.xlane.f32.xlu0 %v2050_v55 }
 0x4d5   : > { %v1961_v33 = vadd.f32 %v6687_v9, %v6683_v47  ;;  %v2026_v40 = vmul.f32 %v2010_v10, %v2010_v10  ;;  %v1995_v37 = vsub.f32 %v6116_v48, %v6678_v39 }
 0x4d7   : > { %v6693_v21 = vmul.f32 0.5, %v1961_v33  ;;  %v2044_v45 = vsel %vm1384_vm7, %v2026_v40, 0.0  ;;  %v2011_v4 = vmax.f32 %v1995_v37, 0.0 }
 0x4d8   : > { %2045 = vadd.xlane.f32.xlu1 %v2044_v45 }
 0x4d9   : > { %v2027_v19 = vmul.f32 %v2011_v4, %v2011_v4  ;;  %v1993_v12 = vsub.f32 %v6125_v8, %v6693_v21 }
 0x4db   : > { %v2047_v24 = vsel %vm1384_vm7, %v2027_v19, 0.0  ;;  %v2009_v2 = vmax.f32 %v1993_v12, 0.0 }
 0x4dc   : > { %2048 = vadd.xlane.f32.xlu1 %v2047_v24 }
 0x4dd   : > { %v2025_v17 = vmul.f32 %v2009_v2, %v2009_v2 }
 0x4df   : > { %v2041_v23 = vsel %vm1384_vm7, %v2025_v17, 0.0 }
 0x4e0   : > { %2042 = vadd.xlane.f32.xlu1 %v2041_v23 }
 0x528   : > { %v1882_v34 = vpop.xlane.xlu0 %1881 }
 0x529   : > { %vm1918_vm4 = vcmp.ge.f32.partialorder %v1882_v34, 1.0 }
 0x52a   : > { %v6702_v44 = vsel %vm1918_vm4, %v6478_v15, %v6462_v56  ;;  %v6706_v60 = vsel %vm1918_vm4, %v6466_v46, %v6478_v15  ;;  %v1888_v3 = vpop.xlane.xlu1 %1887 }
 0x52b   : > { %v1966_v55 = vadd.f32 %v6706_v60, %v6702_v44  ;;  %vm1920_vm5 = vcmp.ge.f32.partialorder %v1888_v3, 1.0 }
 0x52c   : > { %v6712_v10 = vsel %vm1920_vm5, %v6482_v18, %v6472_v22  ;;  %v6716_v33 = vsel %vm1920_vm5, %v6476_v38, %v6482_v18 }
 0x52d   : > { %v6718_v40 = vmul.f32 0.5, %v1966_v55  ;;  %v1968_v56 = vadd.f32 %v6716_v33, %v6712_v10  ;;  %v1885_v46 = vpop.xlane.xlu0 %1884 }
 0x52e   : > { %vm1919_vm6 = vcmp.ge.f32.partialorder %v1885_v46, 1.0 }
 0x52f   : > { %v6722_v15 = vmul.f32 0.5, %v1968_v56  ;;  %v6726_v37 = vsel %vm1919_vm6, %v6498_v51, %v6486_v59  ;;  %v6730_v22 = vsel %vm1919_vm6, %v6490_v14, %v6498_v51  ;;  %v1998_v38 = vsub.f32 %v6133_v41, %v6718_v40 }
 0x530   : > { %v1967_v18 = vadd.f32 %v6730_v22, %v6726_v37 }
 0x531   : > { %v2014_v45 = vmax.f32 %v1998_v38, 0.0  ;;  %v2000_v4 = vsub.f32 %v6136_v52, %v6722_v15 }
 0x532   : > { %v6738_v19 = vmul.f32 0.5, %v1967_v18 }
 0x533   : > { %v1879_v12 = vpop.xlane.xlu0 %1878  ;;  %v2030_v24 = vmul.f32 %v2014_v45, %v2014_v45  ;;  %v2016_v59 = vmax.f32 %v2000_v4, 0.0 }
 0x534   : > { %vm1917_vm8 = vcmp.ge.f32.partialorder %v1879_v12, 1.0  ;;  %v1999_v14 = vsub.f32 %v6140_v57, %v6738_v19 }
 0x535   : > { %v6744_v51 = vsel %vm1917_vm8, %v6514_v31, %v6504_v13  ;;  %v6748_v2 = vsel %vm1917_vm8, %v6508_v61, %v6514_v31  ;;  %v2056_v17 = vsel %vm1384_vm7, %v2030_v24, 0.0  ;;  %v2032_v23 = vmul.f32 %v2016_v59, %v2016_v59 }
 0x536   : > { %v1965_v34 = vadd.f32 %v6748_v2, %v6744_v51  ;;  %2057 = vadd.xlane.f32.xlu0 %v2056_v17  ;;  %v2015_v3 = vmax.f32 %v1999_v14, 0.0 }
 0x537   : > { %v2062_v55 = vsel %vm1384_vm7, %v2032_v23, 0.0  ;;  %v9243_v23 = vld [vmem:[#allocation42_spill] sm:$0xff] }
 0x538   : > { %v6754_v56 = vmul.f32 0.5, %v1965_v34  ;;  %2063 = vadd.xlane.f32.xlu1 %v2062_v55  ;;  %v2031_v46 = vmul.f32 %v2015_v3, %v2015_v3  ;;  %v9244_v3 = vld [vmem:[#allocation31_spill] sm:$0xff] }
 0x53a   : > { %v2059_v13 = vsel %vm1384_vm7, %v2031_v46, 0.0  ;;  %v1997_v61 = vsub.f32 %v6144_v63, %v6754_v56 }
 0x53b   : > { %v1900_v31 = vpop.xlane.xlu0 %1899  ;;  %2060 = vadd.xlane.f32.xlu0 %v2059_v13 }
 0x53c   : > { %vm1924_vm9 = vcmp.ge.f32.partialorder %v1900_v31, 1.0  ;;  %v2013_v38 = vmax.f32 %v1997_v61, 0.0  ;;  %v9247_v61 = vld [vmem:[#allocation32_spill] sm:$0xff] }
 0x53d   : > { %v6761_v18 = vsel %vm1924_vm9, %v6539_v26, %v6521_v29  ;;  %v6765_v45 = vsel %vm1924_vm9, %v6525_v1, %v6539_v26 }
 0x53e   : > { %v1972_v4 = vadd.f32 %v6765_v45, %v6761_v18  ;;  %v1897_v12 = vpop.xlane.xlu1 %1896  ;;  %v2029_v24 = vmul.f32 %v2013_v38, %v2013_v38  ;;  %v9249_v38 = vld [vmem:[#allocation34_spill] sm:$0xff] }
 0x53f   : > { %vm1923_vm10 = vcmp.ge.f32.partialorder %v1897_v12, 1.0 }
 0x540   : > { %v6769_v59 = vmul.f32 0.5, %v1972_v4  ;;  %v6773_v14 = vsel %vm1923_vm10, %v6541_v27, %v6531_v50  ;;  %v6777_v29 = vsel %vm1923_vm10, %v6535_v54, %v6541_v27  ;;  %v1894_v17 = vpop.xlane.xlu0 %1893  ;;  %v2053_v1 = vsel %vm1384_vm7, %v2029_v24, 0.0  ;;  %v9246_v54 = vld [vmem:[#allocation24_spill] sm:$0xff] }
 0x541   : > { %v1971_v26 = vadd.f32 %v6777_v29, %v6773_v14  ;;  %vm1922_vm11 = vcmp.ge.f32.partialorder %v1894_v17, 1.0  ;;  %2054 = vadd.xlane.f32.xlu0 %v2053_v1  ;;  %v9252_v1 = vld [vmem:[#allocation25_spill] sm:$0xff] }
 0x542   : > { %v6784_v34 = vsel %vm1922_vm11, %v6568_v7, %v9243_v23  ;;  %v6788_v50 = vsel %vm1922_vm11, %v9244_v3, %v6568_v7  ;;  %v1891_v55 = vpop.xlane.xlu1 %1890  ;;  %v2004_v27 = vsub.f32 %v9246_v54, %v6769_v59  ;;  %v9253_v23 = vld [vmem:[#allocation33_spill] sm:$0xff] }
 0x543   : > { %9245 = vst [vmem:[#allocation41_spill] sm:$0xff] %v6788_v50  ;;  %v6792_v46 = vmul.f32 0.5, %v1971_v26  ;;  %v1970_v13 = vadd.f32 %v6788_v50, %v6784_v34  ;;  %vm1921_vm12 = vcmp.ge.f32.partialorder %v1891_v55, 1.0  ;;  %v9255_v55 = vld [vmem:[#allocation35_spill] sm:$0xff] }
 0x544   : > { %v6798_v31 = vsel %vm1921_vm12, %v6570_v6, %v9247_v61  ;;  %v6802_v4 = vsel %vm1921_vm12, %v9249_v38, %v6570_v6  ;;  %v1906_v7 = vpop.xlane.xlu0 %1905  ;;  %v2020_v12 = vmax.f32 %v2004_v27, 0.0 }
 0x545   : > { %9248 = vst [vmem:[#allocation42_spill] sm:$0xff] %v6798_v31  ;;  %9250 = vst [vmem:[#allocation31_spill] sm:$0xff] %v6802_v4  ;;  %v6804_v24 = vmul.f32 0.5, %v1970_v13  ;;  %v1969_v17 = vadd.f32 %v6802_v4, %v6798_v31  ;;  %vm1926_vm13 = vcmp.ge.f32.partialorder %v1906_v7, 1.0  ;;  %v2003_v26 = vsub.f32 %v9252_v1, %v6792_v46  ;;  %v9257_v4 = vld [vmem:[#allocation36_spill] sm:$0xff] }
 0x546   : > { %v6812_v3 = vsel %vm1926_vm13, %v6596_v53, %v9253_v23  ;;  %v6816_v61 = vsel %vm1926_vm13, %v9255_v55, %v6596_v53  ;;  %v1903_v6 = vpop.xlane.xlu1 %1902  ;;  %v2036_v38 = vmul.f32 %v2020_v12, %v2020_v12  ;;  %v9259_v23 = vld [vmem:[#allocation37_spill] sm:$0xff]  ;;  %v9261_v12 = vld [vmem:[#allocation26_spill] sm:$0xff] }
 0x547   : > { %9251 = vst [vmem:[#allocation24_spill] sm:$0xff] %v6804_v24  ;;  %9254 = vst [vmem:[#allocation32_spill] sm:$0xff] %v6812_v3  ;;  %v6818_v27 = vmul.f32 0.5, %v1969_v17  ;;  %v1974_v13 = vadd.f32 %v6816_v61, %v6812_v3  ;;  %vm1925_vm14 = vcmp.ge.f32.partialorder %v1903_v6, 1.0  ;;  %v2019_v7 = vmax.f32 %v2003_v26, 0.0 }
 0x548   : > { %9256 = vst [vmem:[#allocation34_spill] sm:$0xff] %v6816_v61  ;;  %v6824_v1 = vsel %vm1925_vm14, %v6598_v62, %v9257_v4  ;;  %v6828_v31 = vsel %vm1925_vm14, %v9259_v23, %v6598_v62  ;;  %v1912_v50 = vpop.xlane.xlu0 %1911  ;;  %v2074_v53 = vsel %vm1384_vm7, %v2036_v38, 0.0  ;;  %v2002_v17 = vsub.f32 %v9261_v12, %v6804_v24  ;;  %v9262_v4 = vld [vmem:[#allocation38_spill] sm:$0xff]  ;;  %v9264_v62 = vld [vmem:[#allocation39_spill] sm:$0xff] }
 0x549   : > { %9258 = vst [vmem:[#allocation33_spill] sm:$0xff] %v6824_v1  ;;  %9260 = vst [vmem:[#allocation35_spill] sm:$0xff] %v6828_v31  ;;  %v6833_v55 = vmul.f32 0.5, %v1974_v13  ;;  %v1973_v6 = vadd.f32 %v6828_v31, %v6824_v1  ;;  %vm1928_vm15 = vcmp.ge.f32.partialorder %v1912_v50, 1.0  ;;  %2075 = vadd.xlane.f32.xlu0 %v2074_v53  ;;  %v2035_v26 = vmul.f32 %v2019_v7, %v2019_v7  ;;  %v9266_v12 = vld [vmem:[#allocation27_spill] sm:$0xff] }
 0x54a   : > { %v6839_v61 = vsel %vm1928_vm15, %v6621_v5, %v9262_v4  ;;  %v6843_v23 = vsel %vm1928_vm15, %v9264_v62, %v6621_v5  ;;  %v1909_v38 = vpop.xlane.xlu1 %1908  ;;  %v2018_v3 = vmax.f32 %v2002_v17, 0.0  ;;  %v2001_v13 = vsub.f32 %v9266_v12, %v6818_v27  ;;  %v9267_v5 = vld [vmem:[#allocation40_spill] sm:$0xff] }
 0x54b   : > { %9263 = vst [vmem:[#allocation36_spill] sm:$0xff] %v6839_v61  ;;  %9265 = vst [vmem:[#allocation37_spill] sm:$0xff] %v6843_v23  ;;  %v6847_v24 = vmul.f32 0.5, %v1973_v6  ;;  %v1976_v50 = vadd.f32 %v6843_v23, %v6839_v61  ;;  %vm1927_vm0 = vcmp.ge.f32.partialorder %v1909_v38, 1.0  ;;  %v2071_v7 = vsel %vm1384_vm7, %v2035_v26, 0.0  ;;  %v9268_v38 = vld [vmem:[#allocation28_spill] sm:$0xff] }
 0x54c   : > { %v6854_v53 = vsel %vm1927_vm0, %v6627_v43, %v6612_v42  ;;  %v6858_v4 = vsel %vm1927_vm0, %v9267_v5, %v6627_v43  ;;  %2072 = vadd.xlane.f32.xlu1 %v2071_v7  ;;  %v2034_v17 = vmul.f32 %v2018_v3, %v2018_v3  ;;  %v2017_v62 = vmax.f32 %v2001_v13, 0.0  ;;  %v9269_v26 = vld [vmem:[#allocation29_spill] sm:$0xff] }
 0x54d   : > { %v6860_v12 = vmul.f32 0.5, %v1976_v50  ;;  %v1975_v6 = vadd.f32 %v6858_v4, %v6854_v53  ;;  %v2006_v23 = vsub.f32 %v9268_v38, %v6833_v55  ;;  %v2005_v61 = vsub.f32 %v9269_v26, %v6847_v24 }
 0x54e   : > { %v2068_v42 = vsel %vm1384_vm7, %v2034_v17, 0.0  ;;  %v2033_v31 = vmul.f32 %v2017_v62, %v2017_v62 }
 0x54f   : > { %v6869_v1 = vmul.f32 0.5, %v1975_v6  ;;  %2069 = vadd.xlane.f32.xlu0 %v2068_v42  ;;  %v2022_v43 = vmax.f32 %v2006_v23, 0.0  ;;  %v2021_v3 = vmax.f32 %v2005_v61, 0.0  ;;  %v2008_v13 = vsub.f32 %v6180_v16, %v6860_v12 }
 0x550   : > { %v2065_v50 = vsel %vm1384_vm7, %v2033_v31, 0.0 }
 0x551   : > { %2066 = vadd.xlane.f32.xlu1 %v2065_v50  ;;  %v2038_v7 = vmul.f32 %v2022_v43, %v2022_v43  ;;  %v2037_v5 = vmul.f32 %v2021_v3, %v2021_v3  ;;  %v2024_v38 = vmax.f32 %v2008_v13, 0.0  ;;  %v2007_v26 = vsub.f32 %v6183_v25, %v6869_v1 }
 0x553   : > { %v2080_v17 = vsel %vm1384_vm7, %v2038_v7, 0.0  ;;  %v2077_v62 = vsel %vm1384_vm7, %v2037_v5, 0.0  ;;  %v2040_v6 = vmul.f32 %v2024_v38, %v2024_v38  ;;  %v2023_v42 = vmax.f32 %v2007_v26, 0.0 }
 0x554   : > { %2081 = vadd.xlane.f32.xlu0 %v2080_v17 }
 0x555   : > { %2078 = vadd.xlane.f32.xlu1 %v2077_v62  ;;  %v2086_v61 = vsel %vm1384_vm7, %v2040_v6, 0.0  ;;  %v2039_v23 = vmul.f32 %v2023_v42, %v2023_v42 }
 0x557   : > { %v2083_v31 = vsel %vm1384_vm7, %v2039_v23, 0.0 }
 0x558   : > { %2087 = vadd.xlane.f32.xlu0 %v2086_v61 }
 0x559   : > { %2084 = vadd.xlane.f32.xlu1 %v2083_v31 }
 0x561   : > { %v2052_v43 = vpop.xlane.xlu0 %2051 }
 0x562   : > { %vm2092_vm1 = vcmp.ge.f32.partialorder %v2052_v43, 1.0 }
 0x563   : > { %v6882_v3 = vsel %vm2092_vm1, %v6650_v36, %v6642_v20  ;;  %v6886_v13 = vsel %vm2092_vm1, %v6646_v28, %v6650_v36 }
 0x564   : > { %v2140_v38 = vadd.f32 %v6886_v13, %v6882_v3 }
 0x565   : > { %v2046_v26 = vpop.xlane.xlu1 %2045 }
 0x566   : > { %v6890_v50 = vmul.f32 0.5, %v2140_v38  ;;  %vm2090_vm4 = vcmp.ge.f32.partialorder %v2046_v26, 1.0 }
 0x567   : > { %v6894_v7 = vsel %vm2090_vm4, %v6664_v11, %v6654_v49  ;;  %v6898_v5 = vsel %vm2090_vm4, %v6658_v35, %v6664_v11 }
 0x568   : > { %v2138_v20 = vadd.f32 %v6898_v5, %v6894_v7  ;;  %v2172_v28 = vsub.f32 %v6114_v58, %v6890_v50 }
 0x569   : > { %v2049_v36 = vpop.xlane.xlu1 %2048 }
 0x56a   : > { %v6904_v17 = vmul.f32 0.5, %v2138_v20  ;;  %vm2091_vm5 = vcmp.ge.f32.partialorder %v2049_v36, 1.0  ;;  %v2188_v62 = vmax.f32 %v2172_v28, 0.0 }
 0x56b   : > { %v6908_v6 = vsel %vm2091_vm5, %v6678_v39, %v6668_v30  ;;  %v6912_v49 = vsel %vm2091_vm5, %v6672_v32, %v6678_v39 }
 0x56c   : > { %v2139_v35 = vadd.f32 %v6912_v49, %v6908_v6  ;;  %v2204_v11 = vmul.f32 %v2188_v62, %v2188_v62  ;;  %v2170_v42 = vsub.f32 %v6120_v0, %v6904_v17 }
 0x56d   : > { %v2043_v61 = vpop.xlane.xlu1 %2042 }
 0x56e   : > { %v6918_v23 = vmul.f32 0.5, %v2139_v35  ;;  %vm2089_vm6 = vcmp.ge.f32.partialorder %v2043_v61, 1.0  ;;  %v2226_v31 = vsel %vm1384_vm7, %v2204_v11, 0.0  ;;  %v2186_v43 = vmax.f32 %v2170_v42, 0.0 }
 0x56f   : > { %v6923_v30 = vsel %vm2089_vm6, %v6693_v21, %v6683_v47  ;;  %v6927_v32 = vsel %vm2089_vm6, %v6687_v9, %v6693_v21  ;;  %2227 = vadd.xlane.f32.xlu0 %v2226_v31 }
 0x570   : > { %v2137_v39 = vadd.f32 %v6927_v32, %v6923_v30  ;;  %v2202_v38 = vmul.f32 %v2186_v43, %v2186_v43  ;;  %v2171_v26 = vsub.f32 %v6116_v48, %v6918_v23 }
 0x572   : > { %v6933_v20 = vmul.f32 0.5, %v2137_v39  ;;  %v2220_v28 = vsel %vm1384_vm7, %v2202_v38, 0.0  ;;  %v2187_v36 = vmax.f32 %v2171_v26, 0.0 }
 0x573   : > { %2221 = vadd.xlane.f32.xlu1 %v2220_v28 }
 0x574   : > { %v2203_v47 = vmul.f32 %v2187_v36, %v2187_v36  ;;  %v2169_v62 = vsub.f32 %v6125_v8, %v6933_v20 }
 0x576   : > { %v2223_v9 = vsel %vm1384_vm7, %v2203_v47, 0.0  ;;  %v2185_v21 = vmax.f32 %v2169_v62, 0.0 }
 0x577   : > { %2224 = vadd.xlane.f32.xlu1 %v2223_v9 }
 0x578   : > { %v2201_v35 = vmul.f32 %v2185_v21, %v2185_v21 }
 0x57a   : > { %v2217_v11 = vsel %vm1384_vm7, %v2201_v35, 0.0 }
 0x57b   : > { %2218 = vadd.xlane.f32.xlu1 %v2217_v11 }
 0x5c3   : > { %v2058_v42 = vpop.xlane.xlu0 %2057 }
 0x5c4   : > { %vm2094_vm8 = vcmp.ge.f32.partialorder %v2058_v42, 1.0 }
 0x5c5   : > { %v6942_v61 = vsel %vm2094_vm8, %v6718_v40, %v6702_v44  ;;  %v6946_v31 = vsel %vm2094_vm8, %v6706_v60, %v6718_v40  ;;  %v2064_v43 = vpop.xlane.xlu1 %2063 }
 0x5c6   : > { %v2142_v39 = vadd.f32 %v6946_v31, %v6942_v61  ;;  %vm2096_vm9 = vcmp.ge.f32.partialorder %v2064_v43, 1.0 }
 0x5c7   : > { %v6952_v38 = vsel %vm2096_vm9, %v6722_v15, %v6712_v10  ;;  %v6956_v26 = vsel %vm2096_vm9, %v6716_v33, %v6722_v15 }
 0x5c8   : > { %v6958_v28 = vmul.f32 0.5, %v2142_v39  ;;  %v2144_v44 = vadd.f32 %v6956_v26, %v6952_v38  ;;  %v2061_v60 = vpop.xlane.xlu0 %2060 }
 0x5c9   : > { %vm2095_vm10 = vcmp.ge.f32.partialorder %v2061_v60, 1.0 }
 0x5ca   : > { %v6962_v40 = vmul.f32 0.5, %v2144_v44  ;;  %v6966_v36 = vsel %vm2095_vm10, %v6738_v19, %v6726_v37  ;;  %v6970_v10 = vsel %vm2095_vm10, %v6730_v22, %v6738_v19  ;;  %v2174_v33 = vsub.f32 %v6133_v41, %v6958_v28 }
 0x5cb   : > { %v2143_v15 = vadd.f32 %v6970_v10, %v6966_v36 }
 0x5cc   : > { %v2190_v47 = vmax.f32 %v2174_v33, 0.0  ;;  %v2176_v62 = vsub.f32 %v6136_v52, %v6962_v40 }
 0x5cd   : > { %v6978_v9 = vmul.f32 0.5, %v2143_v15 }
 0x5ce   : > { %v2055_v21 = vpop.xlane.xlu0 %2054  ;;  %v2206_v35 = vmul.f32 %v2190_v47, %v2190_v47  ;;  %v2192_v37 = vmax.f32 %v2176_v62, 0.0 }
 0x5cf   : > { %vm2093_vm11 = vcmp.ge.f32.partialorder %v2055_v21, 1.0  ;;  %v2175_v22 = vsub.f32 %v6140_v57, %v6978_v9 }
 0x5d0   : > { %v6984_v19 = vsel %vm2093_vm11, %v6754_v56, %v6744_v51  ;;  %v6988_v11 = vsel %vm2093_vm11, %v6748_v2, %v6754_v56  ;;  %v2232_v42 = vsel %vm1384_vm7, %v2206_v35, 0.0  ;;  %v2208_v43 = vmul.f32 %v2192_v37, %v2192_v37 }
 0x5d1   : > { %v2141_v39 = vadd.f32 %v6988_v11, %v6984_v19  ;;  %2233 = vadd.xlane.f32.xlu0 %v2232_v42  ;;  %v2191_v44 = vmax.f32 %v2175_v22, 0.0 }
 0x5d2   : > { %v2238_v60 = vsel %vm1384_vm7, %v2208_v43, 0.0 }
 0x5d3   : > { %v6994_v33 = vmul.f32 0.5, %v2141_v39  ;;  %2239 = vadd.xlane.f32.xlu1 %v2238_v60  ;;  %v2207_v15 = vmul.f32 %v2191_v44, %v2191_v44 }
 0x5d5   : > { %v2235_v51 = vsel %vm1384_vm7, %v2207_v15, 0.0  ;;  %v2173_v2 = vsub.f32 %v6144_v63, %v6994_v33 }
 0x5d6   : > { %v2076_v56 = vpop.xlane.xlu0 %2075  ;;  %2236 = vadd.xlane.f32.xlu0 %v2235_v51 }
 0x5d7   : > { %vm2100_vm12 = vcmp.ge.f32.partialorder %v2076_v56, 1.0  ;;  %v2189_v47 = vmax.f32 %v2173_v2, 0.0 }
 0x5d8   : > { %v7001_v62 = vsel %vm2100_vm12, %v6769_v59, %v6761_v18  ;;  %v7005_v21 = vsel %vm2100_vm12, %v6765_v45, %v6769_v59 }
 0x5d9   : > { %v2148_v35 = vadd.f32 %v7005_v21, %v7001_v62  ;;  %v2073_v37 = vpop.xlane.xlu1 %2072  ;;  %v2205_v22 = vmul.f32 %v2189_v47, %v2189_v47  ;;  %v9274_v47 = vld [vmem:[#allocation42_spill] sm:$0xff] }
 0x5da   : > { %vm2099_vm13 = vcmp.ge.f32.partialorder %v2073_v37, 1.0  ;;  %v9276_v37 = vld [vmem:[#allocation31_spill] sm:$0xff] }
 0x5db   : > { %v7009_v42 = vmul.f32 0.5, %v2148_v35  ;;  %v7013_v43 = vsel %vm2099_vm13, %v6792_v46, %v6773_v14  ;;  %v7017_v18 = vsel %vm2099_vm13, %v6777_v29, %v6792_v46  ;;  %v2229_v39 = vsel %vm1384_vm7, %v2205_v22, 0.0  ;;  %v9270_v14 = vld [vmem:[#allocation24_spill] sm:$0xff]  ;;  %v9272_v29 = vld [vmem:[#allocation41_spill] sm:$0xff] }
 0x5dc   : > { %v2147_v45 = vadd.f32 %v7017_v18, %v7013_v43  ;;  %v2070_v59 = vpop.xlane.xlu0 %2069  ;;  %2230 = vadd.xlane.f32.xlu0 %v2229_v39 }
 0x5dd   : > { %vm2098_vm14 = vcmp.ge.f32.partialorder %v2070_v59, 1.0  ;;  %v2180_v44 = vsub.f32 %v9246_v54, %v7009_v42 }
 0x5de   : > { %v7024_v60 = vmul.f32 0.5, %v2147_v45  ;;  %v7028_v15 = vsel %vm2098_vm14, %v9270_v14, %v6784_v34  ;;  %v7032_v46 = vsel %vm2098_vm14, %v9272_v29, %v9270_v14  ;;  %v2067_v51 = vpop.xlane.xlu1 %2066  ;;  %v9278_v34 = vld [vmem:[#allocation25_spill] sm:$0xff] }
 0x5df   : > { %9271 = vst [vmem:[#allocation38_spill] sm:$0xff] %v7028_v15  ;;  %9273 = vst [vmem:[#allocation39_spill] sm:$0xff] %v7032_v46  ;;  %v2146_v2 = vadd.f32 %v7032_v46, %v7028_v15  ;;  %vm2097_vm15 = vcmp.ge.f32.partialorder %v2067_v51, 1.0  ;;  %v2196_v56 = vmax.f32 %v2180_v44, 0.0 }
 0x5e0   : > { %v7038_v35 = vsel %vm2097_vm15, %v6818_v27, %v9274_v47  ;;  %v7042_v22 = vsel %vm2097_vm15, %v9276_v37, %v6818_v27  ;;  %v2179_v39 = vsub.f32 %v9278_v34, %v7024_v60  ;;  %v9279_v47 = vld [vmem:[#allocation32_spill] sm:$0xff]  ;;  %v9281_v27 = vld [vmem:[#allocation34_spill] sm:$0xff]  ;;  %v9283_v34 = vld [vmem:[#allocation33_spill] sm:$0xff] }
 0x5e1   : > { %9275 = vst [vmem:[#allocation40_spill] sm:$0xff] %v7038_v35  ;;  %9277 = vst [vmem:[#allocation24_spill] sm:$0xff] %v7042_v22  ;;  %v7046_v45 = vmul.f32 0.5, %v2146_v2  ;;  %v2145_v59 = vadd.f32 %v7042_v22, %v7038_v35  ;;  %v2082_v14 = vpop.xlane.xlu0 %2081  ;;  %v2212_v29 = vmul.f32 %v2196_v56, %v2196_v56 }
 0x5e2   : > { %vm2102_vm0 = vcmp.ge.f32.partialorder %v2082_v14, 1.0  ;;  %v2079_v44 = vpop.xlane.xlu1 %2078  ;;  %v2195_v51 = vmax.f32 %v2179_v39, 0.0  ;;  %v9285_v39 = vld [vmem:[#allocation35_spill] sm:$0xff] }
 0x5e3   : > { %v7050_v46 = vmul.f32 0.5, %v2145_v59  ;;  %v7054_v15 = vsel %vm2102_vm0, %v6833_v55, %v9279_v47  ;;  %v7058_v37 = vsel %vm2102_vm0, %v9281_v27, %v6833_v55  ;;  %vm2101_vm1 = vcmp.ge.f32.partialorder %v2079_v44, 1.0  ;;  %v9287_v44 = vld [vmem:[#allocation26_spill] sm:$0xff] }
 0x5e4   : > { %9280 = vst [vmem:[#allocation41_spill] sm:$0xff] %v7054_v15  ;;  %9282 = vst [vmem:[#allocation42_spill] sm:$0xff] %v7058_v37  ;;  %v2150_v2 = vadd.f32 %v7058_v37, %v7054_v15  ;;  %v7064_v56 = vsel %vm2101_vm1, %v6847_v24, %v9283_v34  ;;  %v7068_v59 = vsel %vm2101_vm1, %v9285_v39, %v6847_v24  ;;  %v2250_v14 = vsel %vm1384_vm7, %v2212_v29, 0.0  ;;  %v9288_v37 = vld [vmem:[#allocation27_spill] sm:$0xff]  ;;  %v9289_v39 = vld [vmem:[#allocation36_spill] sm:$0xff] }
 0x5e5   : > { %9284 = vst [vmem:[#allocation31_spill] sm:$0xff] %v7064_v56  ;;  %9286 = vst [vmem:[#allocation32_spill] sm:$0xff] %v7068_v59  ;;  %v2149_v47 = vadd.f32 %v7068_v59, %v7064_v56  ;;  %v2088_v22 = vpop.xlane.xlu0 %2087  ;;  %2251 = vadd.xlane.f32.xlu0 %v2250_v14  ;;  %v2211_v55 = vmul.f32 %v2195_v51, %v2195_v51  ;;  %v2178_v27 = vsub.f32 %v9287_v44, %v7046_v45  ;;  %v9291_v59 = vld [vmem:[#allocation37_spill] sm:$0xff] }
 0x5e6   : > { %v2177_v15 = vsub.f32 %v9288_v37, %v7050_v46  ;;  %v7077_v34 = vmul.f32 0.5, %v2150_v2  ;;  %vm2104_vm4 = vcmp.ge.f32.partialorder %v2088_v22, 1.0  ;;  %v2085_v35 = vpop.xlane.xlu1 %2084 }
 0x5e7   : > { %v7079_v24 = vmul.f32 0.5, %v2149_v47  ;;  %v7083_v29 = vsel %vm2104_vm4, %v6860_v12, %v9289_v39  ;;  %v7087_v14 = vsel %vm2104_vm4, %v9291_v59, %v6860_v12  ;;  %vm2103_vm5 = vcmp.ge.f32.partialorder %v2085_v35, 1.0  ;;  %v9294_v35 = vld [vmem:[#allocation28_spill] sm:$0xff] }
 0x5e8   : > { %9290 = vst [vmem:[#allocation34_spill] sm:$0xff] %v7083_v29  ;;  %9292 = vst [vmem:[#allocation33_spill] sm:$0xff] %v7087_v14  ;;  %v2152_v51 = vadd.f32 %v7087_v14, %v7083_v29  ;;  %v7093_v2 = vsel %vm2103_vm5, %v6869_v1, %v6854_v53  ;;  %v7097_v22 = vsel %vm2103_vm5, %v6858_v4, %v6869_v1  ;;  %v2247_v47 = vsel %vm1384_vm7, %v2211_v55, 0.0  ;;  %v9295_v53 = vld [vmem:[#allocation29_spill] sm:$0xff] }
 0x5e9   : > { %9293 = vst [vmem:[#allocation35_spill] sm:$0xff] %v7097_v22  ;;  %v2151_v39 = vadd.f32 %v7097_v22, %v7093_v2  ;;  %2248 = vadd.xlane.f32.xlu1 %v2247_v47  ;;  %v2194_v12 = vmax.f32 %v2178_v27, 0.0  ;;  %v2193_v59 = vmax.f32 %v2177_v15, 0.0  ;;  %v2182_v37 = vsub.f32 %v9294_v35, %v7077_v34 }
 0x5ea   : > { %v7104_v14 = vmul.f32 0.5, %v2152_v51  ;;  %v2181_v29 = vsub.f32 %v9295_v53, %v7079_v24 }
 0x5eb   : > { %v7108_v44 = vmul.f32 0.5, %v2151_v39  ;;  %v2210_v1 = vmul.f32 %v2194_v12, %v2194_v12  ;;  %v2209_v4 = vmul.f32 %v2193_v59, %v2193_v59  ;;  %v2198_v56 = vmax.f32 %v2182_v37, 0.0 }
 0x5ec   : > { %v2197_v55 = vmax.f32 %v2181_v29, 0.0  ;;  %v2184_v22 = vsub.f32 %v6180_v16, %v7104_v14 }
 0x5ed   : > { %v2244_v27 = vsel %vm1384_vm7, %v2210_v1, 0.0  ;;  %v2241_v15 = vsel %vm1384_vm7, %v2209_v4, 0.0  ;;  %v2214_v47 = vmul.f32 %v2198_v56, %v2198_v56  ;;  %v2183_v51 = vsub.f32 %v6183_v25, %v7108_v44 }
 0x5ee   : > { %2245 = vadd.xlane.f32.xlu0 %v2244_v27  ;;  %2242 = vadd.xlane.f32.xlu1 %v2241_v15  ;;  %v2213_v53 = vmul.f32 %v2197_v55, %v2197_v55  ;;  %v2200_v39 = vmax.f32 %v2184_v22, 0.0 }
 0x5ef   : > { %v2256_v12 = vsel %vm1384_vm7, %v2214_v47, 0.0  ;;  %v2199_v59 = vmax.f32 %v2183_v51, 0.0 }
 0x5f0   : > { %v2253_v37 = vsel %vm1384_vm7, %v2213_v53, 0.0  ;;  %v2216_v29 = vmul.f32 %v2200_v39, %v2200_v39 }
 0x5f1   : > { %v2215_v35 = vmul.f32 %v2199_v59, %v2199_v59 }
 0x5f2   : > { %2257 = vadd.xlane.f32.xlu0 %v2256_v12  ;;  %2254 = vadd.xlane.f32.xlu1 %v2253_v37  ;;  %v2262_v1 = vsel %vm1384_vm7, %v2216_v29, 0.0 }
 0x5f3   : > { %v2259_v56 = vsel %vm1384_vm7, %v2215_v35, 0.0 }
 0x5f6   : > { %2263 = vadd.xlane.f32.xlu0 %v2262_v1  ;;  %2260 = vadd.xlane.f32.xlu1 %v2259_v56 }
 0x5fc   : > { %v2228_v4 = vpop.xlane.xlu0 %2227 }
 0x5fd   : > { %vm2268_vm6 = vcmp.ge.f32.partialorder %v2228_v4, 1.0 }
 0x5fe   : > { %v7122_v22 = vsel %vm2268_vm6, %v6890_v50, %v6882_v3  ;;  %v7126_v55 = vsel %vm2268_vm6, %v6886_v13, %v6890_v50 }
 0x5ff   : > { %v2316_v53 = vadd.f32 %v7126_v55, %v7122_v22 }
 0x600   : > { %v2222_v27 = vpop.xlane.xlu1 %2221 }
 0x601   : > { %v7130_v15 = vmul.f32 0.5, %v2316_v53  ;;  %vm2266_vm8 = vcmp.ge.f32.partialorder %v2222_v27, 1.0 }
 0x602   : > { %v7134_v35 = vsel %vm2266_vm8, %v6904_v17, %v6894_v7  ;;  %v7138_v47 = vsel %vm2266_vm8, %v6898_v5, %v6904_v17 }
 0x603   : > { %v2314_v3 = vadd.f32 %v7138_v47, %v7134_v35  ;;  %v2348_v13 = vsub.f32 %v6114_v58, %v7130_v15 }
 0x604   : > { %v2225_v50 = vpop.xlane.xlu1 %2224 }
 0x605   : > { %v7144_v51 = vmul.f32 0.5, %v2314_v3  ;;  %vm2267_vm9 = vcmp.ge.f32.partialorder %v2225_v50, 1.0  ;;  %v2364_v39 = vmax.f32 %v2348_v13, 0.0 }
 0x606   : > { %v7148_v12 = vsel %vm2267_vm9, %v6918_v23, %v6908_v6  ;;  %v7152_v7 = vsel %vm2267_vm9, %v6912_v49, %v6918_v23 }
 0x607   : > { %v2315_v5 = vadd.f32 %v7152_v7, %v7148_v12  ;;  %v2380_v17 = vmul.f32 %v2364_v39, %v2364_v39  ;;  %v2346_v59 = vsub.f32 %v6120_v0, %v7144_v51 }
 0x608   : > { %v2219_v37 = vpop.xlane.xlu1 %2218 }
 0x609   : > { %v7158_v29 = vmul.f32 0.5, %v2315_v5  ;;  %vm2265_vm10 = vcmp.ge.f32.partialorder %v2219_v37, 1.0  ;;  %v2402_v1 = vsel %vm1384_vm7, %v2380_v17, 0.0  ;;  %v2362_v56 = vmax.f32 %v2346_v59, 0.0 }
 0x60a   : > { %v7163_v6 = vsel %vm2265_vm10, %v6933_v20, %v6923_v30  ;;  %v7167_v49 = vsel %vm2265_vm10, %v6927_v32, %v6933_v20  ;;  %2403 = vadd.xlane.f32.xlu0 %v2402_v1 }
 0x60b   : > { %v2313_v23 = vadd.f32 %v7167_v49, %v7163_v6  ;;  %v2378_v4 = vmul.f32 %v2362_v56, %v2362_v56  ;;  %v2347_v53 = vsub.f32 %v6116_v48, %v7158_v29 }
 0x60d   : > { %v7173_v27 = vmul.f32 0.5, %v2313_v23  ;;  %v2396_v3 = vsel %vm1384_vm7, %v2378_v4, 0.0  ;;  %v2363_v13 = vmax.f32 %v2347_v53, 0.0 }
 0x60e   : > { %2397 = vadd.xlane.f32.xlu1 %v2396_v3 }
 0x60f   : > { %v2379_v30 = vmul.f32 %v2363_v13, %v2363_v13  ;;  %v2345_v50 = vsub.f32 %v6125_v8, %v7173_v27 }
 0x611   : > { %v2399_v32 = vsel %vm1384_vm7, %v2379_v30, 0.0  ;;  %v2361_v20 = vmax.f32 %v2345_v50, 0.0 }
 0x612   : > { %2400 = vadd.xlane.f32.xlu1 %v2399_v32 }
 0x613   : > { %v2377_v39 = vmul.f32 %v2361_v20, %v2361_v20 }
 0x615   : > { %v2393_v5 = vsel %vm1384_vm7, %v2377_v39, 0.0 }
 0x616   : > { %2394 = vadd.xlane.f32.xlu1 %v2393_v5 }
 0x65e   : > { %v2234_v17 = vpop.xlane.xlu0 %2233 }
 0x65f   : > { %vm2270_vm11 = vcmp.ge.f32.partialorder %v2234_v17, 1.0 }
 0x660   : > { %v7182_v59 = vsel %vm2270_vm11, %v6958_v28, %v6942_v61  ;;  %v7186_v37 = vsel %vm2270_vm11, %v6946_v31, %v6958_v28  ;;  %v2240_v1 = vpop.xlane.xlu1 %2239 }
 0x661   : > { %v2318_v56 = vadd.f32 %v7186_v37, %v7182_v59  ;;  %vm2272_vm12 = vcmp.ge.f32.partialorder %v2240_v1, 1.0 }
 0x662   : > { %v7192_v23 = vsel %vm2272_vm12, %v6962_v40, %v6952_v38  ;;  %v7196_v4 = vsel %vm2272_vm12, %v6956_v26, %v6962_v40 }
 0x663   : > { %v7198_v53 = vmul.f32 0.5, %v2318_v56  ;;  %v2320_v61 = vadd.f32 %v7196_v4, %v7192_v23  ;;  %v2237_v31 = vpop.xlane.xlu0 %2236 }
 0x664   : > { %vm2271_vm13 = vcmp.ge.f32.partialorder %v2237_v31, 1.0 }
 0x665   : > { %v7202_v28 = vmul.f32 0.5, %v2320_v61  ;;  %v7206_v3 = vsel %vm2271_vm13, %v6978_v9, %v6966_v36  ;;  %v7210_v38 = vsel %vm2271_vm13, %v6970_v10, %v6978_v9  ;;  %v2350_v26 = vsub.f32 %v6133_v41, %v7198_v53 }
 0x666   : > { %v2319_v40 = vadd.f32 %v7210_v38, %v7206_v3 }
 0x667   : > { %v2366_v13 = vmax.f32 %v2350_v26, 0.0  ;;  %v2352_v30 = vsub.f32 %v6136_v52, %v7202_v28 }
 0x668   : > { %v7218_v50 = vmul.f32 0.5, %v2319_v40 }
 0x669   : > { %v2231_v32 = vpop.xlane.xlu0 %2230  ;;  %v2382_v20 = vmul.f32 %v2366_v13, %v2366_v13  ;;  %v2368_v36 = vmax.f32 %v2352_v30, 0.0 }
 0x66a   : > { %vm2269_vm14 = vcmp.ge.f32.partialorder %v2231_v32, 1.0  ;;  %v2351_v10 = vsub.f32 %v6140_v57, %v7218_v50 }
 0x66b   : > { %v7224_v9 = vsel %vm2269_vm14, %v6994_v33, %v6984_v19  ;;  %v7228_v39 = vsel %vm2269_vm14, %v6988_v11, %v6994_v33  ;;  %v2408_v5 = vsel %vm1384_vm7, %v2382_v20, 0.0  ;;  %v2384_v17 = vmul.f32 %v2368_v36, %v2368_v36 }
 0x66c   : > { %v2317_v1 = vadd.f32 %v7228_v39, %v7224_v9  ;;  %2409 = vadd.xlane.f32.xlu0 %v2408_v5  ;;  %v2367_v56 = vmax.f32 %v2351_v10, 0.0 }
 0x66d   : > { %v2414_v61 = vsel %vm1384_vm7, %v2384_v17, 0.0 }
 0x66e   : > { %v7234_v31 = vmul.f32 0.5, %v2317_v1  ;;  %2415 = vadd.xlane.f32.xlu1 %v2414_v61  ;;  %v2383_v26 = vmul.f32 %v2367_v56, %v2367_v56 }
 0x670   : > { %v2411_v19 = vsel %vm1384_vm7, %v2383_v26, 0.0  ;;  %v2349_v11 = vsub.f32 %v6144_v63, %v7234_v31 }
 0x671   : > { %2412 = vadd.xlane.f32.xlu0 %v2411_v19  ;;  %v9296_v19 = vld [vmem:[#allocation38_spill] sm:$0xff] }
 0x672   : > { %v2252_v33 = vpop.xlane.xlu0 %2251  ;;  %v2365_v40 = vmax.f32 %v2349_v11, 0.0  ;;  %v9300_v11 = vld [vmem:[#allocation40_spill] sm:$0xff] }
 0x673   : > { %vm2276_vm15 = vcmp.ge.f32.partialorder %v2252_v33, 1.0 }
 0x674   : > { %v7241_v13 = vsel %vm2276_vm15, %v7009_v42, %v7001_v62  ;;  %v7245_v30 = vsel %vm2276_vm15, %v7005_v21, %v7009_v42  ;;  %v2381_v32 = vmul.f32 %v2365_v40, %v2365_v40  ;;  %v9302_v40 = vld [vmem:[#allocation24_spill] sm:$0xff] }
 0x675   : > { %v2324_v20 = vadd.f32 %v7245_v30, %v7241_v13 }
 0x676   : > { %v2249_v36 = vpop.xlane.xlu1 %2248  ;;  %v2405_v10 = vsel %vm1384_vm7, %v2381_v32, 0.0 }
 0x677   : > { %v7250_v5 = vmul.f32 0.5, %v2324_v20  ;;  %vm2275_vm0 = vcmp.ge.f32.partialorder %v2249_v36, 1.0  ;;  %2406 = vadd.xlane.f32.xlu0 %v2405_v10 }
 0x678   : > { %v7254_v17 = vsel %vm2275_vm0, %v7024_v60, %v7013_v43  ;;  %v7258_v62 = vsel %vm2275_vm0, %v7017_v18, %v7024_v60  ;;  %v9298_v18 = vld [vmem:[#allocation39_spill] sm:$0xff] }
 0x679   : > { %v2323_v21 = vadd.f32 %v7258_v62, %v7254_v17  ;;  %v2356_v42 = vsub.f32 %v9246_v54, %v7250_v5 }
 0x67b   : > { %v7264_v1 = vmul.f32 0.5, %v2323_v21  ;;  %v2246_v56 = vpop.xlane.xlu0 %2245  ;;  %v2243_v61 = vpop.xlane.xlu1 %2242  ;;  %v2372_v26 = vmax.f32 %v2356_v42, 0.0  ;;  %v9304_v21 = vld [vmem:[#allocation25_spill] sm:$0xff] }
 0x67c   : > { %vm2274_vm1 = vcmp.ge.f32.partialorder %v2246_v56, 1.0  ;;  %vm2273_vm4 = vcmp.ge.f32.partialorder %v2243_v61, 1.0 }
 0x67d   : > { %v7268_v43 = vsel %vm2274_vm1, %v7046_v45, %v9296_v19  ;;  %v7272_v60 = vsel %vm2274_vm1, %v9298_v18, %v7046_v45  ;;  %v7276_v33 = vsel %vm2273_vm4, %v7050_v46, %v9300_v11  ;;  %v7280_v32 = vsel %vm2273_vm4, %v9302_v40, %v7050_v46  ;;  %v9306_v46 = vld [vmem:[#allocation41_spill] sm:$0xff]  ;;  %v9308_v11 = vld [vmem:[#allocation42_spill] sm:$0xff] }
 0x67e   : > { %9297 = vst [vmem:[#allocation36_spill] sm:$0xff] %v7268_v43  ;;  %9299 = vst [vmem:[#allocation37_spill] sm:$0xff] %v7272_v60  ;;  %v2322_v20 = vadd.f32 %v7272_v60, %v7268_v43  ;;  %v2321_v36 = vadd.f32 %v7280_v32, %v7276_v33  ;;  %v2388_v10 = vmul.f32 %v2372_v26, %v2372_v26  ;;  %v9310_v26 = vld [vmem:[#allocation31_spill] sm:$0xff] }
 0x67f   : > { %9301 = vst [vmem:[#allocation38_spill] sm:$0xff] %v7276_v33  ;;  %9303 = vst [vmem:[#allocation39_spill] sm:$0xff] %v7280_v32  ;;  %v2355_v42 = vsub.f32 %v9304_v21, %v7264_v1  ;;  %v2258_v45 = vpop.xlane.xlu0 %2257  ;;  %v2255_v56 = vpop.xlane.xlu1 %2254  ;;  %v9312_v21 = vld [vmem:[#allocation32_spill] sm:$0xff]  ;;  %v9315_v60 = vld [vmem:[#allocation27_spill] sm:$0xff] }
 0x680   : > { %v7288_v61 = vmul.f32 0.5, %v2322_v20  ;;  %v7290_v19 = vmul.f32 0.5, %v2321_v36  ;;  %vm2278_vm5 = vcmp.ge.f32.partialorder %v2258_v45, 1.0  ;;  %vm2277_vm6 = vcmp.ge.f32.partialorder %v2255_v56, 1.0 }
 0x681   : > { %v7294_v18 = vsel %vm2278_vm5, %v7077_v34, %v9306_v46  ;;  %v7298_v40 = vsel %vm2278_vm5, %v9308_v11, %v7077_v34  ;;  %v7302_v32 = vsel %vm2277_vm6, %v7079_v24, %v9310_v26  ;;  %v7306_v20 = vsel %vm2277_vm6, %v9312_v21, %v7079_v24  ;;  %v9314_v11 = vld [vmem:[#allocation26_spill] sm:$0xff] }
 0x682   : > { %9305 = vst [vmem:[#allocation40_spill] sm:$0xff] %v7290_v19  ;;  %9307 = vst [vmem:[#allocation24_spill] sm:$0xff] %v7294_v18  ;;  %v2326_v36 = vadd.f32 %v7298_v40, %v7294_v18  ;;  %v2325_v45 = vadd.f32 %v7306_v20, %v7302_v32  ;;  %v2426_v56 = vsel %vm1384_vm7, %v2388_v10, 0.0  ;;  %v2371_v46 = vmax.f32 %v2355_v42, 0.0  ;;  %v9318_v10 = vld [vmem:[#allocation33_spill] sm:$0xff] }
 0x683   : > { %9309 = vst [vmem:[#allocation41_spill] sm:$0xff] %v7298_v40  ;;  %9311 = vst [vmem:[#allocation42_spill] sm:$0xff] %v7302_v32  ;;  %v2264_v33 = vpop.xlane.xlu0 %2263  ;;  %v2261_v34 = vpop.xlane.xlu1 %2260  ;;  %2427 = vadd.xlane.f32.xlu0 %v2426_v56  ;;  %v2354_v26 = vsub.f32 %v9314_v11, %v7288_v61  ;;  %v2353_v43 = vsub.f32 %v9315_v60, %v7290_v19  ;;  %v9316_v40 = vld [vmem:[#allocation34_spill] sm:$0xff]  ;;  %v9320_v60 = vld [vmem:[#allocation35_spill] sm:$0xff] }
 0x684   : > { %9313 = vst [vmem:[#allocation31_spill] sm:$0xff] %v7306_v20  ;;  %v7317_v24 = vmul.f32 0.5, %v2326_v36  ;;  %v7319_v21 = vmul.f32 0.5, %v2325_v45  ;;  %vm2280_vm8 = vcmp.ge.f32.partialorder %v2264_v33, 1.0  ;;  %vm2279_vm9 = vcmp.ge.f32.partialorder %v2261_v34, 1.0  ;;  %v9323_v11 = vld [vmem:[#allocation29_spill] sm:$0xff] }
 0x685   : > { %v7323_v20 = vsel %vm2280_vm8, %v7104_v14, %v9316_v40  ;;  %v7327_v42 = vsel %vm2280_vm8, %v9318_v10, %v7104_v14  ;;  %v7331_v56 = vsel %vm2279_vm9, %v7108_v44, %v7093_v2  ;;  %v7335_v36 = vsel %vm2279_vm9, %v9320_v60, %v7108_v44  ;;  %v9322_v14 = vld [vmem:[#allocation28_spill] sm:$0xff] }
 0x686   : > { %9317 = vst [vmem:[#allocation32_spill] sm:$0xff] %v7323_v20  ;;  %9319 = vst [vmem:[#allocation34_spill] sm:$0xff] %v7327_v42  ;;  %v2328_v33 = vadd.f32 %v7327_v42, %v7323_v20  ;;  %v2327_v45 = vadd.f32 %v7335_v36, %v7331_v56  ;;  %v2387_v40 = vmul.f32 %v2371_v46, %v2371_v46  ;;  %v2370_v34 = vmax.f32 %v2354_v26, 0.0 }
 0x687   : > { %9321 = vst [vmem:[#allocation33_spill] sm:$0xff] %v7335_v36  ;;  %v2369_v32 = vmax.f32 %v2353_v43, 0.0  ;;  %v2358_v10 = vsub.f32 %v9322_v14, %v7317_v24  ;;  %v2357_v2 = vsub.f32 %v9323_v11, %v7319_v21 }
 0x688   : > { %v7345_v18 = vmul.f32 0.5, %v2328_v33  ;;  %v7347_v19 = vmul.f32 0.5, %v2327_v45  ;;  %v2423_v44 = vsel %vm1384_vm7, %v2387_v40, 0.0  ;;  %v2386_v60 = vmul.f32 %v2370_v34, %v2370_v34 }
 0x689   : > { %2424 = vadd.xlane.f32.xlu1 %v2423_v44  ;;  %v2385_v42 = vmul.f32 %v2369_v32, %v2369_v32  ;;  %v2374_v20 = vmax.f32 %v2358_v10, 0.0  ;;  %v2373_v36 = vmax.f32 %v2357_v2, 0.0 }
 0x68a   : > { %v2420_v46 = vsel %vm1384_vm7, %v2386_v60, 0.0  ;;  %v2360_v43 = vsub.f32 %v6180_v16, %v7345_v18  ;;  %v2359_v26 = vsub.f32 %v6183_v25, %v7347_v19 }
 0x68b   : > { %2421 = vadd.xlane.f32.xlu0 %v2420_v46  ;;  %v2417_v33 = vsel %vm1384_vm7, %v2385_v42, 0.0  ;;  %v2390_v45 = vmul.f32 %v2374_v20, %v2374_v20  ;;  %v2389_v11 = vmul.f32 %v2373_v36, %v2373_v36 }
 0x68c   : > { %v2376_v14 = vmax.f32 %v2360_v43, 0.0  ;;  %v2375_v40 = vmax.f32 %v2359_v26, 0.0 }
 0x68d   : > { %2418 = vadd.xlane.f32.xlu1 %v2417_v33  ;;  %v2432_v32 = vsel %vm1384_vm7, %v2390_v45, 0.0  ;;  %v2429_v34 = vsel %vm1384_vm7, %v2389_v11, 0.0 }
 0x68e   : > { %v2392_v10 = vmul.f32 %v2376_v14, %v2376_v14  ;;  %v2391_v2 = vmul.f32 %v2375_v40, %v2375_v40 }
 0x68f   : > { %2433 = vadd.xlane.f32.xlu0 %v2432_v32 }
 0x690   : > { %v2438_v44 = vsel %vm1384_vm7, %v2392_v10, 0.0  ;;  %v2435_v60 = vsel %vm1384_vm7, %v2391_v2, 0.0 }
 0x691   : > { %2430 = vadd.xlane.f32.xlu1 %v2429_v34 }
 0x693   : > { %2439 = vadd.xlane.f32.xlu0 %v2438_v44 }
 0x695   : > { %2436 = vadd.xlane.f32.xlu1 %v2435_v60 }
 0x697   : > { %v2404_v42 = vpop.xlane.xlu0 %2403 }
 0x698   : > { %vm2444_vm10 = vcmp.ge.f32.partialorder %v2404_v42, 1.0 }
 0x699   : > { %v7362_v20 = vsel %vm2444_vm10, %v7130_v15, %v7122_v22  ;;  %v7366_v36 = vsel %vm2444_vm10, %v7126_v55, %v7130_v15 }
 0x69a   : > { %v2492_v11 = vadd.f32 %v7366_v36, %v7362_v20 }
 0x69b   : > { %v2398_v14 = vpop.xlane.xlu1 %2397 }
 0x69c   : > { %v7370_v46 = vmul.f32 0.5, %v2492_v11  ;;  %vm2442_vm11 = vcmp.ge.f32.partialorder %v2398_v14, 1.0 }
 0x69d   : > { %v7374_v43 = vsel %vm2442_vm11, %v7144_v51, %v7134_v35  ;;  %v7378_v26 = vsel %vm2442_vm11, %v7138_v47, %v7144_v51 }
 0x69e   : > { %v2490_v22 = vadd.f32 %v7378_v26, %v7374_v43  ;;  %v2524_v55 = vsub.f32 %v6114_v58, %v7370_v46 }
 0x69f   : > { %v2401_v15 = vpop.xlane.xlu1 %2400 }
 0x6a0   : > { %v7384_v33 = vmul.f32 0.5, %v2490_v22  ;;  %vm2443_vm12 = vcmp.ge.f32.partialorder %v2401_v15, 1.0  ;;  %v2540_v45 = vmax.f32 %v2524_v55, 0.0 }
 0x6a1   : > { %v7388_v40 = vsel %vm2443_vm12, %v7158_v29, %v7148_v12  ;;  %v7392_v35 = vsel %vm2443_vm12, %v7152_v7, %v7158_v29 }
 0x6a2   : > { %v2491_v47 = vadd.f32 %v7392_v35, %v7388_v40  ;;  %v2556_v51 = vmul.f32 %v2540_v45, %v2540_v45  ;;  %v2522_v32 = vsub.f32 %v6120_v0, %v7384_v33 }
 0x6a3   : > { %v2395_v34 = vpop.xlane.xlu1 %2394 }
 0x6a4   : > { %v7398_v10 = vmul.f32 0.5, %v2491_v47  ;;  %vm2441_vm13 = vcmp.ge.f32.partialorder %v2395_v34, 1.0  ;;  %v2578_v2 = vsel %vm1384_vm7, %v2556_v51, 0.0  ;;  %v2538_v44 = vmax.f32 %v2522_v32, 0.0 }
 0x6a5   : > { %v7403_v12 = vsel %vm2441_vm13, %v7173_v27, %v7163_v6  ;;  %v7407_v7 = vsel %vm2441_vm13, %v7167_v49, %v7173_v27  ;;  %2579 = vadd.xlane.f32.xlu0 %v2578_v2 }
 0x6a6   : > { %v2489_v29 = vadd.f32 %v7407_v7, %v7403_v12  ;;  %v2554_v60 = vmul.f32 %v2538_v44, %v2538_v44  ;;  %v2523_v42 = vsub.f32 %v6116_v48, %v7398_v10 }
 0x6a8   : > { %v7413_v11 = vmul.f32 0.5, %v2489_v29  ;;  %v2572_v14 = vsel %vm1384_vm7, %v2554_v60, 0.0  ;;  %v2539_v22 = vmax.f32 %v2523_v42, 0.0 }
 0x6a9   : > { %2573 = vadd.xlane.f32.xlu1 %v2572_v14 }
 0x6aa   : > { %v2555_v6 = vmul.f32 %v2539_v22, %v2539_v22  ;;  %v2521_v55 = vsub.f32 %v6125_v8, %v7413_v11 }
 0x6ac   : > { %v2575_v49 = vsel %vm1384_vm7, %v2555_v6, 0.0  ;;  %v2537_v27 = vmax.f32 %v2521_v55, 0.0 }
 0x6ad   : > { %2576 = vadd.xlane.f32.xlu1 %v2575_v49 }
 0x6ae   : > { %v2553_v15 = vmul.f32 %v2537_v27, %v2537_v27 }
 0x6b0   : > { %v2569_v45 = vsel %vm1384_vm7, %v2553_v15, 0.0 }
 0x6b1   : > { %2570 = vadd.xlane.f32.xlu1 %v2569_v45 }
 0x6f9   : > { %v2410_v47 = vpop.xlane.xlu0 %2409 }
 0x6fa   : > { %vm2446_vm14 = vcmp.ge.f32.partialorder %v2410_v47, 1.0 }
 0x6fb   : > { %v7422_v51 = vsel %vm2446_vm14, %v7198_v53, %v7182_v59  ;;  %v7426_v32 = vsel %vm2446_vm14, %v7186_v37, %v7198_v53  ;;  %v2416_v34 = vpop.xlane.xlu1 %2415 }
 0x6fc   : > { %v2494_v2 = vadd.f32 %v7426_v32, %v7422_v51  ;;  %vm2448_vm15 = vcmp.ge.f32.partialorder %v2416_v34, 1.0 }
 0x6fd   : > { %v7432_v44 = vsel %vm2448_vm15, %v7202_v28, %v7192_v23  ;;  %v7436_v29 = vsel %vm2448_vm15, %v7196_v4, %v7202_v28 }
 0x6fe   : > { %v7438_v60 = vmul.f32 0.5, %v2494_v2  ;;  %v2496_v59 = vadd.f32 %v7436_v29, %v7432_v44  ;;  %v2413_v37 = vpop.xlane.xlu0 %2412 }
 0x6ff   : > { %vm2447_vm0 = vcmp.ge.f32.partialorder %v2413_v37, 1.0 }
 0x700   : > { %v7442_v53 = vmul.f32 0.5, %v2496_v59  ;;  %v7446_v42 = vsel %vm2447_vm0, %v7218_v50, %v7206_v3  ;;  %v7450_v23 = vsel %vm2447_vm0, %v7210_v38, %v7218_v50  ;;  %v2526_v4 = vsub.f32 %v6133_v41, %v7438_v60 }
 0x701   : > { %v2495_v28 = vadd.f32 %v7450_v23, %v7446_v42 }
 0x702   : > { %v2542_v14 = vmax.f32 %v2526_v4, 0.0  ;;  %v2528_v22 = vsub.f32 %v6136_v52, %v7442_v53 }
 0x703   : > { %v7458_v6 = vmul.f32 0.5, %v2495_v28 }
 0x704   : > { %v2407_v55 = vpop.xlane.xlu0 %2406  ;;  %v2558_v49 = vmul.f32 %v2542_v14, %v2542_v14  ;;  %v2544_v3 = vmax.f32 %v2528_v22, 0.0 }
 0x705   : > { %vm2445_vm1 = vcmp.ge.f32.partialorder %v2407_v55, 1.0  ;;  %v2527_v38 = vsub.f32 %v6140_v57, %v7458_v6 }
 0x706   : > { %v7464_v50 = vsel %vm2445_vm1, %v7234_v31, %v7224_v9  ;;  %v7468_v27 = vsel %vm2445_vm1, %v7228_v39, %v7234_v31  ;;  %v2584_v15 = vsel %vm1384_vm7, %v2558_v49, 0.0  ;;  %v2560_v45 = vmul.f32 %v2544_v3, %v2544_v3 }
 0x707   : > { %v2493_v47 = vadd.f32 %v7468_v27, %v7464_v50  ;;  %2585 = vadd.xlane.f32.xlu0 %v2584_v15  ;;  %v2543_v34 = vmax.f32 %v2527_v38, 0.0 }
 0x708   : > { %v2590_v2 = vsel %vm1384_vm7, %v2560_v45, 0.0 }
 0x709   : > { %v7474_v59 = vmul.f32 0.5, %v2493_v47  ;;  %2591 = vadd.xlane.f32.xlu1 %v2590_v2  ;;  %v2559_v37 = vmul.f32 %v2543_v34, %v2543_v34  ;;  %v9324_v34 = vld [vmem:[#allocation36_spill] sm:$0xff] }
 0x70b   : > { %v2587_v9 = vsel %vm1384_vm7, %v2559_v37, 0.0  ;;  %v2525_v39 = vsub.f32 %v6144_v63, %v7474_v59  ;;  %v9325_v37 = vld [vmem:[#allocation37_spill] sm:$0xff] }
 0x70c   : > { %2588 = vadd.xlane.f32.xlu0 %v2587_v9 }
 0x70d   : > { %v2541_v31 = vmax.f32 %v2525_v39, 0.0 }
 0x70f   : > { %v2557_v4 = vmul.f32 %v2541_v31, %v2541_v31  ;;  %v9327_v31 = vld [vmem:[#allocation38_spill] sm:$0xff] }
 0x710   : > { %v2428_v28 = vpop.xlane.xlu0 %2427 }
 0x711   : > { %vm2452_vm4 = vcmp.ge.f32.partialorder %v2428_v28, 1.0  ;;  %v2581_v14 = vsel %vm1384_vm7, %v2557_v4, 0.0  ;;  %v9328_v4 = vld [vmem:[#allocation40_spill] sm:$0xff] }
 0x712   : > { %v7482_v22 = vsel %vm2452_vm4, %v7250_v5, %v7241_v13  ;;  %v7486_v55 = vsel %vm2452_vm4, %v7245_v30, %v7250_v5  ;;  %2582 = vadd.xlane.f32.xlu0 %v2581_v14  ;;  %v9330_v14 = vld [vmem:[#allocation39_spill] sm:$0xff] }
 0x713   : > { %v2500_v49 = vadd.f32 %v7486_v55, %v7482_v22 }
 0x715   : > { %v7490_v3 = vmul.f32 0.5, %v2500_v49 }
 0x716   : > { %v2425_v38 = vpop.xlane.xlu1 %2424 }
 0x717   : > { %vm2451_vm5 = vcmp.ge.f32.partialorder %v2425_v38, 1.0  ;;  %v2532_v15 = vsub.f32 %v9246_v54, %v7490_v3 }
 0x718   : > { %v7496_v45 = vsel %vm2451_vm5, %v7264_v1, %v7254_v17  ;;  %v7500_v13 = vsel %vm2451_vm5, %v7258_v62, %v7264_v1  ;;  %v2422_v30 = vpop.xlane.xlu0 %2421 }
 0x719   : > { %v2499_v5 = vadd.f32 %v7500_v13, %v7496_v45  ;;  %vm2450_vm6 = vcmp.ge.f32.partialorder %v2422_v30, 1.0  ;;  %v2548_v47 = vmax.f32 %v2532_v15, 0.0 }
 0x71a   : > { %v7506_v2 = vsel %vm2450_vm6, %v7288_v61, %v9324_v34  ;;  %v7510_v9 = vsel %vm2450_vm6, %v9325_v37, %v7288_v61  ;;  %v2419_v17 = vpop.xlane.xlu1 %2418  ;;  %v9334_v34 = vld [vmem:[#allocation41_spill] sm:$0xff] }
 0x71b   : > { %9326 = vst [vmem:[#allocation35_spill] sm:$0xff] %v7510_v9  ;;  %v7512_v39 = vmul.f32 0.5, %v2499_v5  ;;  %v2498_v62 = vadd.f32 %v7510_v9, %v7506_v2  ;;  %vm2449_vm8 = vcmp.ge.f32.partialorder %v2419_v17, 1.0  ;;  %v2564_v1 = vmul.f32 %v2548_v47, %v2548_v47  ;;  %v9332_v5 = vld [vmem:[#allocation24_spill] sm:$0xff] }
 0x71c   : > { %v7518_v28 = vsel %vm2449_vm8, %v9328_v4, %v9327_v31  ;;  %v7522_v49 = vsel %vm2449_vm8, %v9330_v14, %v9328_v4  ;;  %v2434_v38 = vpop.xlane.xlu0 %2433  ;;  %v9336_v31 = vld [vmem:[#allocation25_spill] sm:$0xff] }
 0x71d   : > { %9329 = vst [vmem:[#allocation36_spill] sm:$0xff] %v7518_v28  ;;  %9331 = vst [vmem:[#allocation37_spill] sm:$0xff] %v7522_v49  ;;  %v7524_v15 = vmul.f32 0.5, %v2498_v62  ;;  %v2497_v61 = vadd.f32 %v7522_v49, %v7518_v28  ;;  %vm2454_vm9 = vcmp.ge.f32.partialorder %v2434_v38, 1.0  ;;  %v2602_v30 = vsel %vm1384_vm7, %v2564_v1, 0.0  ;;  %v9337_v1 = vld [vmem:[#allocation26_spill] sm:$0xff] }
 0x71e   : > { %v7531_v47 = vsel %vm2454_vm9, %v7317_v24, %v9332_v5  ;;  %v7535_v37 = vsel %vm2454_vm9, %v9334_v34, %v7317_v24  ;;  %v2431_v17 = vpop.xlane.xlu1 %2430  ;;  %2603 = vadd.xlane.f32.xlu0 %v2602_v30  ;;  %v2531_v62 = vsub.f32 %v9336_v31, %v7512_v39  ;;  %v9338_v5 = vld [vmem:[#allocation42_spill] sm:$0xff]  ;;  %v9340_v24 = vld [vmem:[#allocation31_spill] sm:$0xff] }
 0x71f   : > { %9333 = vst [vmem:[#allocation38_spill] sm:$0xff] %v7531_v47  ;;  %9335 = vst [vmem:[#allocation40_spill] sm:$0xff] %v7535_v37  ;;  %v7539_v4 = vmul.f32 0.5, %v2497_v61  ;;  %v2502_v14 = vadd.f32 %v7535_v37, %v7531_v47  ;;  %vm2453_vm10 = vcmp.ge.f32.partialorder %v2431_v17, 1.0  ;;  %v2530_v38 = vsub.f32 %v9337_v1, %v7524_v15  ;;  %v9342_v37 = vld [vmem:[#allocation32_spill] sm:$0xff] }
 0x720   : > { %v7547_v49 = vsel %vm2453_vm10, %v7319_v21, %v9338_v5  ;;  %v7551_v34 = vsel %vm2453_vm10, %v9340_v24, %v7319_v21  ;;  %v2440_v30 = vpop.xlane.xlu0 %2439  ;;  %v2547_v28 = vmax.f32 %v2531_v62, 0.0  ;;  %v9344_v5 = vld [vmem:[#allocation34_spill] sm:$0xff]  ;;  %v9346_v24 = vld [vmem:[#allocation27_spill] sm:$0xff] }
 0x721   : > { %9339 = vst [vmem:[#allocation39_spill] sm:$0xff] %v7547_v49  ;;  %9341 = vst [vmem:[#allocation24_spill] sm:$0xff] %v7551_v34  ;;  %v7553_v31 = vmul.f32 0.5, %v2502_v14  ;;  %v2501_v61 = vadd.f32 %v7551_v34, %v7547_v49  ;;  %vm2456_vm11 = vcmp.ge.f32.partialorder %v2440_v30, 1.0  ;;  %v2546_v17 = vmax.f32 %v2530_v38, 0.0  ;;  %v9348_v30 = vld [vmem:[#allocation33_spill] sm:$0xff] }
 0x722   : > { %v7559_v47 = vsel %vm2456_vm11, %v7345_v18, %v9342_v37  ;;  %v7563_v1 = vsel %vm2456_vm11, %v9344_v5, %v7345_v18  ;;  %v2437_v9 = vpop.xlane.xlu1 %2436  ;;  %v2563_v21 = vmul.f32 %v2547_v28, %v2547_v28  ;;  %v2529_v62 = vsub.f32 %v9346_v24, %v7539_v4 }
 0x723   : > { %9343 = vst [vmem:[#allocation41_spill] sm:$0xff] %v7559_v47  ;;  %9345 = vst [vmem:[#allocation42_spill] sm:$0xff] %v7563_v1  ;;  %v7567_v14 = vmul.f32 0.5, %v2501_v61  ;;  %v2504_v34 = vadd.f32 %v7563_v1, %v7559_v47  ;;  %vm2455_vm12 = vcmp.ge.f32.partialorder %v2437_v9, 1.0  ;;  %v2562_v38 = vmul.f32 %v2546_v17, %v2546_v17  ;;  %v9350_v17 = vld [vmem:[#allocation28_spill] sm:$0xff]  ;;  %v9351_v47 = vld [vmem:[#allocation29_spill] sm:$0xff] }
 0x724   : > { %v7573_v37 = vsel %vm2455_vm12, %v7347_v19, %v7331_v56  ;;  %v7577_v18 = vsel %vm2455_vm12, %v9348_v30, %v7347_v19  ;;  %v2599_v28 = vsel %vm1384_vm7, %v2563_v21, 0.0  ;;  %v2545_v5 = vmax.f32 %v2529_v62, 0.0 }
 0x725   : > { %9347 = vst [vmem:[#allocation31_spill] sm:$0xff] %v7573_v37  ;;  %9349 = vst [vmem:[#allocation32_spill] sm:$0xff] %v7577_v18  ;;  %v7580_v49 = vmul.f32 0.5, %v2504_v34  ;;  %v2503_v61 = vadd.f32 %v7577_v18, %v7573_v37  ;;  %2600 = vadd.xlane.f32.xlu1 %v2599_v28  ;;  %v2596_v9 = vsel %vm1384_vm7, %v2562_v38, 0.0  ;;  %v2534_v1 = vsub.f32 %v9350_v17, %v7553_v31 }
 0x726   : > { %2597 = vadd.xlane.f32.xlu0 %v2596_v9  ;;  %v2561_v56 = vmul.f32 %v2545_v5, %v2545_v5  ;;  %v2533_v19 = vsub.f32 %v9351_v47, %v7567_v14 }
 0x727   : > { %v7589_v30 = vmul.f32 0.5, %v2503_v61  ;;  %v2550_v21 = vmax.f32 %v2534_v1, 0.0  ;;  %v2536_v34 = vsub.f32 %v6180_v16, %v7580_v49 }
 0x728   : > { %v2593_v62 = vsel %vm1384_vm7, %v2561_v56, 0.0  ;;  %v2549_v18 = vmax.f32 %v2533_v19, 0.0 }
 0x729   : > { %2594 = vadd.xlane.f32.xlu1 %v2593_v62  ;;  %v2566_v28 = vmul.f32 %v2550_v21, %v2550_v21  ;;  %v2552_v38 = vmax.f32 %v2536_v34, 0.0  ;;  %v2535_v17 = vsub.f32 %v6183_v25, %v7589_v30 }
 0x72a   : > { %v2565_v9 = vmul.f32 %v2549_v18, %v2549_v18 }
 0x72b   : > { %v2608_v5 = vsel %vm1384_vm7, %v2566_v28, 0.0  ;;  %v2568_v37 = vmul.f32 %v2552_v38, %v2552_v38  ;;  %v2551_v47 = vmax.f32 %v2535_v17, 0.0 }
 0x72c   : > { %2609 = vadd.xlane.f32.xlu0 %v2608_v5  ;;  %v2605_v1 = vsel %vm1384_vm7, %v2565_v9, 0.0 }
 0x72d   : > { %2606 = vadd.xlane.f32.xlu1 %v2605_v1  ;;  %v2614_v61 = vsel %vm1384_vm7, %v2568_v37, 0.0  ;;  %v2567_v16 = vmul.f32 %v2551_v47, %v2551_v47 }
 0x72f   : > { %v2611_v56 = vsel %vm1384_vm7, %v2567_v16, 0.0 }
 0x730   : > { %2615 = vadd.xlane.f32.xlu0 %v2614_v61 }
 0x731   : > { %2612 = vadd.xlane.f32.xlu1 %v2611_v56 }
 0x732   : > { %v2580_v19 = vpop.xlane.xlu0 %2579 }
 0x733   : > { %vm2620_vm13 = vcmp.ge.f32.partialorder %v2580_v19, 1.0 }
 0x734   : > { %v7602_v18 = vsel %vm2620_vm13, %v7370_v46, %v7362_v20  ;;  %v7606_v17 = vsel %vm2620_vm13, %v7366_v36, %v7370_v46 }
 0x735   : > { %v2668_v21 = vadd.f32 %v7606_v17, %v7602_v18 }
 0x736   : > { %v2574_v34 = vpop.xlane.xlu1 %2573 }
 0x737   : > { %v7610_v37 = vmul.f32 0.5, %v2668_v21  ;;  %vm2618_vm14 = vcmp.ge.f32.partialorder %v2574_v34, 1.0 }
 0x738   : > { %v7614_v16 = vsel %vm2618_vm14, %v7384_v33, %v7374_v43  ;;  %v7618_v47 = vsel %vm2618_vm14, %v7378_v26, %v7384_v33 }
 0x739   : > { %v2666_v20 = vadd.f32 %v7618_v47, %v7614_v16  ;;  %v2700_v36 = vsub.f32 %v6114_v58, %v7610_v37 }
 0x73a   : > { %v2577_v46 = vpop.xlane.xlu1 %2576 }
 0x73b   : > { %v7624_v62 = vmul.f32 0.5, %v2666_v20  ;;  %vm2619_vm15 = vcmp.ge.f32.partialorder %v2577_v46, 1.0  ;;  %v2716_v28 = vmax.f32 %v2700_v36, 0.0 }
 0x73c   : > { %v7628_v38 = vsel %vm2619_vm15, %v7398_v10, %v7388_v40  ;;  %v7632_v43 = vsel %vm2619_vm15, %v7392_v35, %v7398_v10 }
 0x73d   : > { %v2667_v26 = vadd.f32 %v7632_v43, %v7628_v38  ;;  %v2732_v33 = vmul.f32 %v2716_v28, %v2716_v28  ;;  %v2698_v9 = vsub.f32 %v6120_v0, %v7624_v62 }
 0x73e   : > { %v2571_v5 = vpop.xlane.xlu1 %2570 }
 0x73f   : > { %v7638_v1 = vmul.f32 0.5, %v2667_v26  ;;  %vm2617_vm0 = vcmp.ge.f32.partialorder %v2571_v5, 1.0  ;;  %v2754_v61 = vsel %vm1384_vm7, %v2732_v33, 0.0  ;;  %v2714_v56 = vmax.f32 %v2698_v9, 0.0 }
 0x740   : > { %v7643_v40 = vsel %vm2617_vm0, %v7413_v11, %v7403_v12  ;;  %v7647_v35 = vsel %vm2617_vm0, %v7407_v7, %v7413_v11  ;;  %2755 = vadd.xlane.f32.xlu0 %v2754_v61 }
 0x741   : > { %v2665_v10 = vadd.f32 %v7647_v35, %v7643_v40  ;;  %v2730_v19 = vmul.f32 %v2714_v56, %v2714_v56  ;;  %v2699_v21 = vsub.f32 %v6116_v48, %v7638_v1 }
 0x743   : > { %v7653_v34 = vmul.f32 0.5, %v2665_v10  ;;  %v2748_v20 = vsel %vm1384_vm7, %v2730_v19, 0.0  ;;  %v2715_v36 = vmax.f32 %v2699_v21, 0.0 }
 0x744   : > { %2749 = vadd.xlane.f32.xlu1 %v2748_v20 }
 0x745   : > { %v2731_v12 = vmul.f32 %v2715_v36, %v2715_v36  ;;  %v2697_v46 = vsub.f32 %v6125_v8, %v7653_v34 }
 0x747   : > { %v2751_v7 = vsel %vm1384_vm7, %v2731_v12, 0.0  ;;  %v2713_v11 = vmax.f32 %v2697_v46, 0.0 }
 0x748   : > { %2752 = vadd.xlane.f32.xlu1 %v2751_v7 }
 0x749   : > { %v2729_v28 = vmul.f32 %v2713_v11, %v2713_v11 }
 0x74b   : > { %v2745_v26 = vsel %vm1384_vm7, %v2729_v28, 0.0 }
 0x74c   : > { %2746 = vadd.xlane.f32.xlu1 %v2745_v26 }
 0x794   : > { %v2586_v33 = vpop.xlane.xlu0 %2585 }
 0x795   : > { %vm2622_vm1 = vcmp.ge.f32.partialorder %v2586_v33, 1.0 }
 0x796   : > { %v7662_v9 = vsel %vm2622_vm1, %v7438_v60, %v7422_v51  ;;  %v7666_v5 = vsel %vm2622_vm1, %v7426_v32, %v7438_v60  ;;  %v2592_v61 = vpop.xlane.xlu1 %2591 }
 0x797   : > { %v2670_v56 = vadd.f32 %v7666_v5, %v7662_v9  ;;  %vm2624_vm4 = vcmp.ge.f32.partialorder %v2592_v61, 1.0 }
 0x798   : > { %v7672_v10 = vsel %vm2624_vm4, %v7442_v53, %v7432_v44  ;;  %v7676_v19 = vsel %vm2624_vm4, %v7436_v29, %v7442_v53 }
 0x799   : > { %v7678_v21 = vmul.f32 0.5, %v2670_v56  ;;  %v2672_v51 = vadd.f32 %v7676_v19, %v7672_v10  ;;  %v2589_v32 = vpop.xlane.xlu0 %2588 }
 0x79a   : > { %vm2623_vm5 = vcmp.ge.f32.partialorder %v2589_v32, 1.0 }
 0x79b   : > { %v7682_v60 = vmul.f32 0.5, %v2672_v51  ;;  %v7686_v20 = vsel %vm2623_vm5, %v7458_v6, %v7446_v42  ;;  %v7690_v44 = vsel %vm2623_vm5, %v7450_v23, %v7458_v6  ;;  %v2702_v29 = vsub.f32 %v6133_v41, %v7678_v21 }
 0x79c   : > { %v2671_v53 = vadd.f32 %v7690_v44, %v7686_v20 }
 0x79d   : > { %v2718_v36 = vmax.f32 %v2702_v29, 0.0  ;;  %v2704_v12 = vsub.f32 %v6136_v52, %v7682_v60 }
 0x79e   : > { %v7698_v46 = vmul.f32 0.5, %v2671_v53 }
 0x79f   : > { %v2583_v7 = vpop.xlane.xlu0 %2582  ;;  %v2734_v11 = vmul.f32 %v2718_v36, %v2718_v36  ;;  %v2720_v42 = vmax.f32 %v2704_v12, 0.0 }
 0x7a0   : > { %vm2621_vm6 = vcmp.ge.f32.partialorder %v2583_v7, 1.0  ;;  %v2703_v23 = vsub.f32 %v6140_v57, %v7698_v46 }
 0x7a1   : > { %v7704_v6 = vsel %vm2621_vm6, %v7474_v59, %v7464_v50  ;;  %v7708_v28 = vsel %vm2621_vm6, %v7468_v27, %v7474_v59  ;;  %v2760_v26 = vsel %vm1384_vm7, %v2734_v11, 0.0  ;;  %v2736_v33 = vmul.f32 %v2720_v42, %v2720_v42 }
 0x7a2   : > { %v2669_v61 = vadd.f32 %v7708_v28, %v7704_v6  ;;  %2761 = vadd.xlane.f32.xlu0 %v2760_v26  ;;  %v2719_v56 = vmax.f32 %v2703_v23, 0.0 }
 0x7a3   : > { %v2766_v51 = vsel %vm1384_vm7, %v2736_v33, 0.0 }
 0x7a4   : > { %v7714_v32 = vmul.f32 0.5, %v2669_v61  ;;  %2767 = vadd.xlane.f32.xlu1 %v2766_v51  ;;  %v2735_v29 = vmul.f32 %v2719_v56, %v2719_v56 }
 0x7a6   : > { %v2763_v50 = vsel %vm1384_vm7, %v2735_v29, 0.0  ;;  %v2701_v27 = vsub.f32 %v6144_v63, %v7714_v32  ;;  %v9352_v29 = vld [vmem:[#allocation35_spill] sm:$0xff] }
 0x7a7   : > { %2764 = vadd.xlane.f32.xlu0 %v2763_v50 }
 0x7a8   : > { %v2717_v59 = vmax.f32 %v2701_v27, 0.0 }
 0x7aa   : > { %v2733_v53 = vmul.f32 %v2717_v59, %v2717_v59 }
 0x7ab   : > { %v2604_v36 = vpop.xlane.xlu0 %2603 }
 0x7ac   : > { %vm2628_vm8 = vcmp.ge.f32.partialorder %v2604_v36, 1.0  ;;  %v2757_v12 = vsel %vm1384_vm7, %v2733_v53, 0.0  ;;  %v9353_v53 = vld [vmem:[#allocation36_spill] sm:$0xff] }
 0x7ad   : > { %v7722_v7 = vsel %vm2628_vm8, %v7490_v3, %v7482_v22  ;;  %v7726_v11 = vsel %vm2628_vm8, %v7486_v55, %v7490_v3  ;;  %2758 = vadd.xlane.f32.xlu0 %v2757_v12 }
 0x7ae   : > { %v2676_v42 = vadd.f32 %v7726_v11, %v7722_v7 }
 0x7b0   : > { %v7730_v23 = vmul.f32 0.5, %v2676_v42 }
 0x7b2   : > { %v2601_v26 = vpop.xlane.xlu1 %2600  ;;  %v2708_v33 = vsub.f32 %v9246_v54, %v7730_v23 }
 0x7b3   : > { %vm2627_vm9 = vcmp.ge.f32.partialorder %v2601_v26, 1.0  ;;  %v2598_v61 = vpop.xlane.xlu0 %2597 }
 0x7b4   : > { %v7736_v22 = vsel %vm2627_vm9, %v7512_v39, %v7496_v45  ;;  %v7740_v55 = vsel %vm2627_vm9, %v7500_v13, %v7512_v39  ;;  %vm2626_vm10 = vcmp.ge.f32.partialorder %v2598_v61, 1.0  ;;  %v2724_v3 = vmax.f32 %v2708_v33, 0.0  ;;  %v9357_v33 = vld [vmem:[#allocation25_spill] sm:$0xff] }
 0x7b5   : > { %v2675_v56 = vadd.f32 %v7740_v55, %v7736_v22  ;;  %v7746_v51 = vsel %vm2626_vm10, %v7524_v15, %v7506_v2  ;;  %v7750_v50 = vsel %vm2626_vm10, %v9352_v29, %v7524_v15  ;;  %v9355_v2 = vld [vmem:[#allocation37_spill] sm:$0xff] }
 0x7b6   : > { %v2674_v45 = vadd.f32 %v7750_v50, %v7746_v51  ;;  %v2595_v27 = vpop.xlane.xlu1 %2594  ;;  %v2740_v59 = vmul.f32 %v2724_v3, %v2724_v3 }
 0x7b7   : > { %v7754_v13 = vmul.f32 0.5, %v2675_v56  ;;  %vm2625_vm11 = vcmp.ge.f32.partialorder %v2595_v27, 1.0  ;;  %v9358_v56 = vld [vmem:[#allocation26_spill] sm:$0xff] }
 0x7b8   : > { %v7756_v39 = vmul.f32 0.5, %v2674_v45  ;;  %v7760_v36 = vsel %vm2625_vm11, %v7539_v4, %v9353_v53  ;;  %v7764_v12 = vsel %vm2625_vm11, %v9355_v2, %v7539_v4  ;;  %v2778_v15 = vsel %vm1384_vm7, %v2740_v59, 0.0  ;;  %v9360_v27 = vld [vmem:[#allocation38_spill] sm:$0xff]  ;;  %v9362_v59 = vld [vmem:[#allocation40_spill] sm:$0xff] }
 0x7b9   : > { %9354 = vst [vmem:[#allocation34_spill] sm:$0xff] %v7760_v36  ;;  %9356 = vst [vmem:[#allocation33_spill] sm:$0xff] %v7764_v12  ;;  %v2673_v42 = vadd.f32 %v7764_v12, %v7760_v36  ;;  %v2610_v26 = vpop.xlane.xlu0 %2609  ;;  %2779 = vadd.xlane.f32.xlu0 %v2778_v15  ;;  %v2707_v61 = vsub.f32 %v9357_v33, %v7754_v13  ;;  %v9364_v15 = vld [vmem:[#allocation39_spill] sm:$0xff] }
 0x7ba   : > { %vm2630_vm12 = vcmp.ge.f32.partialorder %v2610_v26, 1.0  ;;  %v2607_v3 = vpop.xlane.xlu1 %2606  ;;  %v2706_v29 = vsub.f32 %v9358_v56, %v7756_v39  ;;  %v9366_v56 = vld [vmem:[#allocation24_spill] sm:$0xff] }
 0x7bb   : > { %v7773_v45 = vmul.f32 0.5, %v2673_v42  ;;  %v7777_v4 = vsel %vm2630_vm12, %v7553_v31, %v9360_v27  ;;  %v7781_v53 = vsel %vm2630_vm12, %v9362_v59, %v7553_v31  ;;  %vm2629_vm13 = vcmp.ge.f32.partialorder %v2607_v3, 1.0 }
 0x7bc   : > { %9361 = vst [vmem:[#allocation36_spill] sm:$0xff] %v7777_v4  ;;  %9363 = vst [vmem:[#allocation37_spill] sm:$0xff] %v7781_v53  ;;  %v2678_v2 = vadd.f32 %v7781_v53, %v7777_v4  ;;  %v7787_v26 = vsel %vm2629_vm13, %v7567_v14, %v9364_v15  ;;  %v7791_v42 = vsel %vm2629_vm13, %v9366_v56, %v7567_v14  ;;  %v2723_v33 = vmax.f32 %v2707_v61, 0.0  ;;  %v9368_v4 = vld [vmem:[#allocation41_spill] sm:$0xff]  ;;  %v9370_v61 = vld [vmem:[#allocation42_spill] sm:$0xff] }
 0x7bd   : > { %9359 = vst [vmem:[#allocation35_spill] sm:$0xff] %v7773_v45  ;;  %9365 = vst [vmem:[#allocation38_spill] sm:$0xff] %v7787_v26  ;;  %v2677_v27 = vadd.f32 %v7791_v42, %v7787_v26  ;;  %v2616_v12 = vpop.xlane.xlu0 %2615  ;;  %v2722_v36 = vmax.f32 %v2706_v29, 0.0  ;;  %v2705_v31 = vsub.f32 %v9346_v24, %v7773_v45  ;;  %v9372_v24 = vld [vmem:[#allocation31_spill] sm:$0xff] }
 0x7be   : > { %9367 = vst [vmem:[#allocation40_spill] sm:$0xff] %v7791_v42  ;;  %v7797_v3 = vmul.f32 0.5, %v2678_v2  ;;  %vm2632_vm14 = vcmp.ge.f32.partialorder %v2616_v12, 1.0  ;;  %v2613_v59 = vpop.xlane.xlu1 %2612  ;;  %v2739_v53 = vmul.f32 %v2723_v33, %v2723_v33  ;;  %v9374_v12 = vld [vmem:[#allocation32_spill] sm:$0xff] }
 0x7bf   : > { %v7799_v15 = vmul.f32 0.5, %v2677_v27  ;;  %v7803_v14 = vsel %vm2632_vm14, %v7580_v49, %v9368_v4  ;;  %v7807_v56 = vsel %vm2632_vm14, %v9370_v61, %v7580_v49  ;;  %vm2631_vm15 = vcmp.ge.f32.partialorder %v2613_v59, 1.0  ;;  %v9376_v59 = vld [vmem:[#allocation28_spill] sm:$0xff] }
 0x7c0   : > { %9369 = vst [vmem:[#allocation39_spill] sm:$0xff] %v7803_v14  ;;  %9371 = vst [vmem:[#allocation24_spill] sm:$0xff] %v7807_v56  ;;  %v2680_v29 = vadd.f32 %v7807_v56, %v7803_v14  ;;  %v7813_v2 = vsel %vm2631_vm15, %v7589_v30, %v9372_v24  ;;  %v7817_v33 = vsel %vm2631_vm15, %v9374_v12, %v7589_v30  ;;  %v2775_v27 = vsel %vm1384_vm7, %v2739_v53, 0.0  ;;  %v9377_v24 = vld [vmem:[#allocation29_spill] sm:$0xff] }
 0x7c1   : > { %9373 = vst [vmem:[#allocation41_spill] sm:$0xff] %v7813_v2  ;;  %9375 = vst [vmem:[#allocation42_spill] sm:$0xff] %v7817_v33  ;;  %v2679_v4 = vadd.f32 %v7817_v33, %v7813_v2  ;;  %2776 = vadd.xlane.f32.xlu1 %v2775_v27  ;;  %v2738_v49 = vmul.f32 %v2722_v36, %v2722_v36  ;;  %v2721_v61 = vmax.f32 %v2705_v31, 0.0  ;;  %v9378_v27 = vld [vmem:[#allocation30_spill] sm:$0xff] }
 0x7c2   : > { %v2710_v42 = vsub.f32 %v9376_v59, %v7797_v3  ;;  %v7824_v56 = vmul.f32 0.5, %v2680_v29  ;;  %v2709_v14 = vsub.f32 %v9377_v24, %v7799_v15 }
 0x7c3   : > { %v7828_v26 = vmul.f32 0.5, %v2679_v4  ;;  %v2772_v30 = vsel %vm1384_vm7, %v2738_v49, 0.0  ;;  %v2737_v12 = vmul.f32 %v2721_v61, %v2721_v61 }
 0x7c4   : > { %v2726_v53 = vmax.f32 %v2710_v42, 0.0  ;;  %2773 = vadd.xlane.f32.xlu0 %v2772_v30  ;;  %v2725_v45 = vmax.f32 %v2709_v14, 0.0  ;;  %v2712_v36 = vsub.f32 %v9378_v27, %v7824_v56 }
 0x7c5   : > { %v2769_v31 = vsel %vm1384_vm7, %v2737_v12, 0.0  ;;  %v2711_v29 = vsub.f32 %v6183_v25, %v7828_v26 }
 0x7c6   : > { %v2742_v33 = vmul.f32 %v2726_v53, %v2726_v53  ;;  %2770 = vadd.xlane.f32.xlu1 %v2769_v31  ;;  %v2741_v59 = vmul.f32 %v2725_v45, %v2725_v45  ;;  %v2728_v24 = vmax.f32 %v2712_v36, 0.0 }
 0x7c7   : > { %v2727_v2 = vmax.f32 %v2711_v29, 0.0 }
 0x7c8   : > { %v2784_v4 = vsel %vm1384_vm7, %v2742_v33, 0.0  ;;  %v2781_v42 = vsel %vm1384_vm7, %v2741_v59, 0.0  ;;  %v2744_v49 = vmul.f32 %v2728_v24, %v2728_v24 }
 0x7c9   : > { %2785 = vadd.xlane.f32.xlu0 %v2784_v4  ;;  %v2743_v14 = vmul.f32 %v2727_v2, %v2727_v2 }
 0x7ca   : > { %2782 = vadd.xlane.f32.xlu1 %v2781_v42  ;;  %v2790_v61 = vsel %vm1384_vm7, %v2744_v49, 0.0 }
 0x7cb   : > { %v2787_v30 = vsel %vm1384_vm7, %v2743_v14, 0.0 }
 0x7cd   : > { %2791 = vadd.xlane.f32.xlu0 %v2790_v61  ;;  %v2756_v12 = vpop.xlane.xlu0 %2755 }
 0x7ce   : > { %2788 = vadd.xlane.f32.xlu1 %v2787_v30  ;;  %vm2796_vm0 = vcmp.ge.f32.partialorder %v2756_v12, 1.0 }
 0x7cf   : > { %v7842_v45 = vsel %vm2796_vm0, %v7610_v37, %v7602_v18  ;;  %v7846_v33 = vsel %vm2796_vm0, %v7606_v17, %v7610_v37 }
 0x7d0   : > { %v2844_v2 = vadd.f32 %v7846_v33, %v7842_v45 }
 0x7d1   : > { %v2750_v59 = vpop.xlane.xlu1 %2749 }
 0x7d2   : > { %v7850_v24 = vmul.f32 0.5, %v2844_v2  ;;  %vm2794_vm1 = vcmp.ge.f32.partialorder %v2750_v59, 1.0 }
 0x7d3   : > { %v7854_v53 = vsel %vm2794_vm1, %v7624_v62, %v7614_v16  ;;  %v7858_v36 = vsel %vm2794_vm1, %v7618_v47, %v7624_v62 }
 0x7d4   : > { %v2842_v18 = vadd.f32 %v7858_v36, %v7854_v53  ;;  %v2876_v17 = vsub.f32 %v6114_v58, %v7850_v24 }
 0x7d5   : > { %v2753_v37 = vpop.xlane.xlu1 %2752 }
 0x7d6   : > { %v7864_v31 = vmul.f32 0.5, %v2842_v18  ;;  %vm2795_vm4 = vcmp.ge.f32.partialorder %v2753_v37, 1.0  ;;  %v2892_v29 = vmax.f32 %v2876_v17, 0.0 }
 0x7d7   : > { %v7868_v4 = vsel %vm2795_vm4, %v7638_v1, %v7628_v38  ;;  %v7872_v16 = vsel %vm2795_vm4, %v7632_v43, %v7638_v1 }
 0x7d8   : > { %v2843_v47 = vadd.f32 %v7872_v16, %v7868_v4  ;;  %v2908_v62 = vmul.f32 %v2892_v29, %v2892_v29  ;;  %v2874_v42 = vsub.f32 %v6120_v0, %v7864_v31 }
 0x7d9   : > { %v2747_v49 = vpop.xlane.xlu1 %2746 }
 0x7da   : > { %v7878_v14 = vmul.f32 0.5, %v2843_v47  ;;  %vm2793_vm5 = vcmp.ge.f32.partialorder %v2747_v49, 1.0  ;;  %v2930_v61 = vsel %vm1384_vm7, %v2908_v62, 0.0  ;;  %v2890_v30 = vmax.f32 %v2874_v42, 0.0 }
 0x7db   : > { %v7883_v38 = vsel %vm2793_vm5, %v7653_v34, %v7643_v40  ;;  %v7887_v43 = vsel %vm2793_vm5, %v7647_v35, %v7653_v34  ;;  %2931 = vadd.xlane.f32.xlu0 %v2930_v61 }
 0x7dc   : > { %v2841_v1 = vadd.f32 %v7887_v43, %v7883_v38  ;;  %v2906_v12 = vmul.f32 %v2890_v30, %v2890_v30  ;;  %v2875_v2 = vsub.f32 %v6116_v48, %v7878_v14 }
 0x7de   : > { %v7893_v59 = vmul.f32 0.5, %v2841_v1  ;;  %v2924_v18 = vsel %vm1384_vm7, %v2906_v12, 0.0  ;;  %v2891_v17 = vmax.f32 %v2875_v2, 0.0 }
 0x7df   : > { %2925 = vadd.xlane.f32.xlu1 %v2924_v18 }
 0x7e0   : > { %v2907_v40 = vmul.f32 %v2891_v17, %v2891_v17  ;;  %v2873_v37 = vsub.f32 %v6125_v8, %v7893_v59 }
 0x7e2   : > { %v2927_v35 = vsel %vm1384_vm7, %v2907_v40, 0.0  ;;  %v2889_v34 = vmax.f32 %v2873_v37, 0.0 }
 0x7e3   : > { %2928 = vadd.xlane.f32.xlu1 %v2927_v35 }
 0x7e4   : > { %v2905_v29 = vmul.f32 %v2889_v34, %v2889_v34 }
 0x7e6   : > { %v2921_v47 = vsel %vm1384_vm7, %v2905_v29, 0.0 }
 0x7e7   : > { %2922 = vadd.xlane.f32.xlu1 %v2921_v47 }
 0x82f   : > { %v2762_v62 = vpop.xlane.xlu0 %2761 }
 0x830   : > { %vm2798_vm6 = vcmp.ge.f32.partialorder %v2762_v62, 1.0 }
 0x831   : > { %v7902_v42 = vsel %vm2798_vm6, %v7678_v21, %v7662_v9  ;;  %v7906_v49 = vsel %vm2798_vm6, %v7666_v5, %v7678_v21  ;;  %v2768_v61 = vpop.xlane.xlu1 %2767 }
 0x832   : > { %v2846_v30 = vadd.f32 %v7906_v49, %v7902_v42  ;;  %vm2800_vm8 = vcmp.ge.f32.partialorder %v2768_v61, 1.0 }
 0x833   : > { %v7912_v1 = vsel %vm2800_vm8, %v7682_v60, %v7672_v10  ;;  %v7916_v12 = vsel %vm2800_vm8, %v7676_v19, %v7682_v60 }
 0x834   : > { %v7918_v2 = vmul.f32 0.5, %v2846_v30  ;;  %v2848_v9 = vadd.f32 %v7916_v12, %v7912_v1  ;;  %v2765_v5 = vpop.xlane.xlu0 %2764 }
 0x835   : > { %vm2799_vm9 = vcmp.ge.f32.partialorder %v2765_v5, 1.0 }
 0x836   : > { %v7922_v21 = vmul.f32 0.5, %v2848_v9  ;;  %v7926_v18 = vsel %vm2799_vm9, %v7698_v46, %v7686_v20  ;;  %v7930_v10 = vsel %vm2799_vm9, %v7690_v44, %v7698_v46  ;;  %v2878_v19 = vsub.f32 %v6133_v41, %v7918_v2 }
 0x837   : > { %v2847_v60 = vadd.f32 %v7930_v10, %v7926_v18 }
 0x838   : > { %v2894_v17 = vmax.f32 %v2878_v19, 0.0  ;;  %v2880_v40 = vsub.f32 %v6136_v52, %v7922_v21 }
 0x839   : > { %v7938_v37 = vmul.f32 0.5, %v2847_v60 }
 0x83a   : > { %v2759_v35 = vpop.xlane.xlu0 %2758  ;;  %v2910_v34 = vmul.f32 %v2894_v17, %v2894_v17  ;;  %v2896_v20 = vmax.f32 %v2880_v40, 0.0 }
 0x83b   : > { %vm2797_vm10 = vcmp.ge.f32.partialorder %v2759_v35, 1.0  ;;  %v2879_v44 = vsub.f32 %v6140_v57, %v7938_v37 }
 0x83c   : > { %v7944_v46 = vsel %vm2797_vm10, %v7714_v32, %v7704_v6  ;;  %v7948_v29 = vsel %vm2797_vm10, %v7708_v28, %v7714_v32  ;;  %v2936_v47 = vsel %vm1384_vm7, %v2910_v34, 0.0  ;;  %v2912_v62 = vmul.f32 %v2896_v20, %v2896_v20 }
 0x83d   : > { %v2845_v61 = vadd.f32 %v7948_v29, %v7944_v46  ;;  %2937 = vadd.xlane.f32.xlu0 %v2936_v47  ;;  %v2895_v30 = vmax.f32 %v2879_v44, 0.0 }
 0x83e   : > { %v2942_v9 = vsel %vm1384_vm7, %v2912_v62, 0.0 }
 0x83f   : > { %v7954_v5 = vmul.f32 0.5, %v2845_v61  ;;  %2943 = vadd.xlane.f32.xlu1 %v2942_v9  ;;  %v2911_v19 = vmul.f32 %v2895_v30, %v2895_v30 }
 0x841   : > { %v2939_v6 = vsel %vm1384_vm7, %v2911_v19, 0.0  ;;  %v2877_v28 = vsub.f32 %v6144_v63, %v7954_v5 }
 0x842   : > { %2940 = vadd.xlane.f32.xlu0 %v2939_v6 }
 0x843   : > { %v2893_v32 = vmax.f32 %v2877_v28, 0.0 }
 0x845   : > { %v2909_v60 = vmul.f32 %v2893_v32, %v2893_v32  ;;  %v9379_v32 = vld [vmem:[#allocation34_spill] sm:$0xff] }
 0x846   : > { %v2780_v17 = vpop.xlane.xlu0 %2779 }
 0x847   : > { %vm2804_vm11 = vcmp.ge.f32.partialorder %v2780_v17, 1.0  ;;  %v2933_v40 = vsel %vm1384_vm7, %v2909_v60, 0.0  ;;  %v9380_v60 = vld [vmem:[#allocation35_spill] sm:$0xff] }
 0x848   : > { %v7962_v35 = vsel %vm2804_vm11, %v7730_v23, %v7722_v7  ;;  %v7966_v34 = vsel %vm2804_vm11, %v7726_v11, %v7730_v23  ;;  %2934 = vadd.xlane.f32.xlu0 %v2933_v40  ;;  %v9382_v40 = vld [vmem:[#allocation33_spill] sm:$0xff] }
 0x849   : > { %v2852_v20 = vadd.f32 %v7966_v34, %v7962_v35 }
 0x84b   : > { %v7970_v44 = vmul.f32 0.5, %v2852_v20 }
 0x84d   : > { %v2884_v47 = vsub.f32 %v9246_v54, %v7970_v44 }
 0x84e   : > { %v2777_v62 = vpop.xlane.xlu1 %2776 }
 0x84f   : > { %vm2803_vm12 = vcmp.ge.f32.partialorder %v2777_v62, 1.0  ;;  %v2900_v61 = vmax.f32 %v2884_v47, 0.0 }
 0x850   : > { %v7976_v7 = vsel %vm2803_vm12, %v7754_v13, %v7736_v22  ;;  %v7980_v11 = vsel %vm2803_vm12, %v7740_v55, %v7754_v13 }
 0x851   : > { %v2851_v23 = vadd.f32 %v7980_v11, %v7976_v7  ;;  %v2774_v30 = vpop.xlane.xlu0 %2773  ;;  %v2916_v9 = vmul.f32 %v2900_v61, %v2900_v61  ;;  %v9385_v61 = vld [vmem:[#allocation36_spill] sm:$0xff] }
 0x852   : > { %vm2802_vm13 = vcmp.ge.f32.partialorder %v2774_v30, 1.0  ;;  %v9387_v30 = vld [vmem:[#allocation37_spill] sm:$0xff] }
 0x853   : > { %v7984_v19 = vmul.f32 0.5, %v2851_v23  ;;  %v7988_v6 = vsel %vm2802_vm13, %v7756_v39, %v7746_v51  ;;  %v7992_v22 = vsel %vm2802_vm13, %v7750_v50, %v7756_v39  ;;  %v2771_v28 = vpop.xlane.xlu1 %2770  ;;  %v2954_v55 = vsel %vm1384_vm7, %v2916_v9, 0.0  ;;  %v9384_v50 = vld [vmem:[#allocation25_spill] sm:$0xff] }
 0x854   : > { %v2850_v13 = vadd.f32 %v7992_v22, %v7988_v6  ;;  %vm2801_vm14 = vcmp.ge.f32.partialorder %v2771_v28, 1.0  ;;  %2955 = vadd.xlane.f32.xlu0 %v2954_v55 }
 0x855   : > { %v7999_v17 = vsel %vm2801_vm14, %v9380_v60, %v9379_v32  ;;  %v8003_v51 = vsel %vm2801_vm14, %v9382_v40, %v9380_v60  ;;  %v2883_v39 = vsub.f32 %v9384_v50, %v7984_v19  ;;  %v9390_v60 = vld [vmem:[#allocation26_spill] sm:$0xff] }
 0x856   : > { %9381 = vst [vmem:[#allocation31_spill] sm:$0xff] %v7999_v17  ;;  %9383 = vst [vmem:[#allocation32_spill] sm:$0xff] %v8003_v51  ;;  %v2786_v20 = vpop.xlane.xlu0 %2785  ;;  %v8007_v47 = vmul.f32 0.5, %v2850_v13  ;;  %v2849_v62 = vadd.f32 %v8003_v51, %v7999_v17 }
 0x857   : > { %vm2806_vm15 = vcmp.ge.f32.partialorder %v2786_v20, 1.0  ;;  %v2783_v28 = vpop.xlane.xlu1 %2782  ;;  %v2899_v55 = vmax.f32 %v2883_v39, 0.0  ;;  %v9391_v20 = vld [vmem:[#allocation38_spill] sm:$0xff] }
 0x858   : > { %v8013_v23 = vsel %vm2806_vm15, %v7797_v3, %v9385_v61  ;;  %v8017_v9 = vsel %vm2806_vm15, %v9387_v30, %v7797_v3  ;;  %v8019_v32 = vmul.f32 0.5, %v2849_v62  ;;  %vm2805_vm0 = vcmp.ge.f32.partialorder %v2783_v28, 1.0  ;;  %v9393_v61 = vld [vmem:[#allocation40_spill] sm:$0xff] }
 0x859   : > { %9386 = vst [vmem:[#allocation30_spill] sm:$0xff] %v8013_v23  ;;  %9388 = vst [vmem:[#allocation34_spill] sm:$0xff] %v8017_v9  ;;  %v2854_v13 = vadd.f32 %v8017_v9, %v8013_v23  ;;  %v2882_v40 = vsub.f32 %v9390_v60, %v8007_v47  ;;  %v8027_v51 = vsel %vm2805_vm0, %v7799_v15, %v9391_v20  ;;  %v9395_v9 = vld [vmem:[#allocation39_spill] sm:$0xff]  ;;  %v9397_v20 = vld [vmem:[#allocation24_spill] sm:$0xff] }
 0x85a   : > { %9389 = vst [vmem:[#allocation35_spill] sm:$0xff] %v8019_v32  ;;  %9392 = vst [vmem:[#allocation33_spill] sm:$0xff] %v8027_v51  ;;  %v8031_v17 = vsel %vm2805_vm0, %v9393_v61, %v7799_v15  ;;  %v2792_v3 = vpop.xlane.xlu0 %2791  ;;  %v2915_v30 = vmul.f32 %v2899_v55, %v2899_v55  ;;  %v9399_v55 = vld [vmem:[#allocation27_spill] sm:$0xff] }
 0x85b   : > { %9394 = vst [vmem:[#allocation36_spill] sm:$0xff] %v8031_v17  ;;  %v8033_v39 = vmul.f32 0.5, %v2854_v13  ;;  %v2853_v62 = vadd.f32 %v8031_v17, %v8027_v51  ;;  %vm2808_vm1 = vcmp.ge.f32.partialorder %v2792_v3, 1.0  ;;  %v2898_v28 = vmax.f32 %v2882_v40, 0.0  ;;  %v2789_v50 = vpop.xlane.xlu1 %2788  ;;  %v9403_v51 = vld [vmem:[#allocation28_spill] sm:$0xff] }
 0x85c   : > { %v8039_v60 = vsel %vm2808_vm1, %v7824_v56, %v9395_v9  ;;  %v8043_v23 = vsel %vm2808_vm1, %v9397_v20, %v7824_v56  ;;  %v2951_v15 = vsel %vm1384_vm7, %v2915_v30, 0.0  ;;  %v2881_v13 = vsub.f32 %v9399_v55, %v8019_v32  ;;  %v9400_v9 = vld [vmem:[#allocation41_spill] sm:$0xff]  ;;  %v9401_v56 = vld [vmem:[#allocation42_spill] sm:$0xff] }
 0x85d   : > { %9396 = vst [vmem:[#allocation37_spill] sm:$0xff] %v8039_v60  ;;  %9398 = vst [vmem:[#allocation38_spill] sm:$0xff] %v8043_v23  ;;  %v8048_v61 = vmul.f32 0.5, %v2853_v62  ;;  %v2856_v3 = vadd.f32 %v8043_v23, %v8039_v60  ;;  %vm2807_vm4 = vcmp.ge.f32.partialorder %v2789_v50, 1.0  ;;  %2952 = vadd.xlane.f32.xlu1 %v2951_v15  ;;  %v2914_v40 = vmul.f32 %v2898_v28, %v2898_v28  ;;  %v9404_v28 = vld [vmem:[#allocation29_spill] sm:$0xff] }
 0x85e   : > { %v8054_v17 = vsel %vm2807_vm4, %v7828_v26, %v9400_v9  ;;  %v8058_v20 = vsel %vm2807_vm4, %v9401_v56, %v7828_v26  ;;  %v2897_v30 = vmax.f32 %v2881_v13, 0.0  ;;  %v2886_v55 = vsub.f32 %v9403_v51, %v8033_v39 }
 0x85f   : > { %9402 = vst [vmem:[#allocation40_spill] sm:$0xff] %v8058_v20  ;;  %v8062_v62 = vmul.f32 0.5, %v2856_v3  ;;  %v2855_v23 = vadd.f32 %v8058_v20, %v8054_v17  ;;  %v2948_v50 = vsel %vm1384_vm7, %v2914_v40, 0.0  ;;  %v2885_v15 = vsub.f32 %v9404_v28, %v8048_v61 }
 0x860   : > { %2949 = vadd.xlane.f32.xlu0 %v2948_v50  ;;  %v2913_v9 = vmul.f32 %v2897_v30, %v2897_v30  ;;  %v2902_v60 = vmax.f32 %v2886_v55, 0.0 }
 0x861   : > { %v8069_v32 = vmul.f32 0.5, %v2855_v23  ;;  %v2901_v26 = vmax.f32 %v2885_v15, 0.0  ;;  %v2888_v13 = vsub.f32 %v9378_v27, %v8062_v62 }
 0x862   : > { %v2945_v3 = vsel %vm1384_vm7, %v2913_v9, 0.0  ;;  %v2918_v56 = vmul.f32 %v2902_v60, %v2902_v60 }
 0x863   : > { %2946 = vadd.xlane.f32.xlu1 %v2945_v3  ;;  %v2917_v51 = vmul.f32 %v2901_v26, %v2901_v26  ;;  %v2904_v20 = vmax.f32 %v2888_v13, 0.0  ;;  %v2887_v40 = vsub.f32 %v6183_v25, %v8069_v32 }
 0x864   : > { %v2960_v28 = vsel %vm1384_vm7, %v2918_v56, 0.0 }
 0x865   : > { %2961 = vadd.xlane.f32.xlu0 %v2960_v28  ;;  %v2957_v55 = vsel %vm1384_vm7, %v2917_v51, 0.0  ;;  %v2920_v23 = vmul.f32 %v2904_v20, %v2904_v20  ;;  %v2903_v30 = vmax.f32 %v2887_v40, 0.0 }
 0x867   : > { %2958 = vadd.xlane.f32.xlu1 %v2957_v55  ;;  %v2966_v50 = vsel %vm1384_vm7, %v2920_v23, 0.0  ;;  %v2919_v15 = vmul.f32 %v2903_v30, %v2903_v30 }
 0x868   : > { %v2932_v9 = vpop.xlane.xlu0 %2931 }
 0x869   : > { %2967 = vadd.xlane.f32.xlu0 %v2966_v50  ;;  %v2963_v60 = vsel %vm1384_vm7, %v2919_v15, 0.0  ;;  %vm2972_vm5 = vcmp.ge.f32.partialorder %v2932_v9, 1.0 }
 0x86a   : > { %v8082_v26 = vsel %vm2972_vm5, %v7850_v24, %v7842_v45  ;;  %v3004_v28 = vsel %vm2972_vm5, %v7846_v33, %v7850_v24 }
 0x86b   : > { %2964 = vadd.xlane.f32.xlu1 %v2963_v60  ;;  %v3020_v51 = vadd.f32 %v3004_v28, %v8082_v26 }
 0x86c   : > { %v2926_v20 = vpop.xlane.xlu1 %2925 }
 0x86d   : > { %v8087_v13 = vmul.f32 0.5, %v3020_v51  ;;  %vm2970_vm6 = vcmp.ge.f32.partialorder %v2926_v20, 1.0 }
 0x86e   : > { %v8091_v3 = vsel %vm2970_vm6, %v7864_v31, %v7854_v53  ;;  %v3002_v56 = vsel %vm2970_vm6, %v7858_v36, %v7864_v31 }
 0x86f   : > { %v3018_v40 = vadd.f32 %v3002_v56, %v8091_v3  ;;  %v3052_v45 = vsub.f32 %v6114_v58, %v8087_v13 }
 0x870   : > { %v2929_v55 = vpop.xlane.xlu1 %2928 }
 0x871   : > { %v8098_v33 = vmul.f32 0.5, %v3018_v40  ;;  %vm2971_vm8 = vcmp.ge.f32.partialorder %v2929_v55, 1.0  ;;  %v3068_v24 = vmax.f32 %v3052_v45, 0.0 }
 0x872   : > { %v8102_v23 = vsel %vm2971_vm8, %v7878_v14, %v7868_v4  ;;  %v3003_v53 = vsel %vm2971_vm8, %v7872_v16, %v7878_v14 }
 0x873   : > { %v3019_v30 = vadd.f32 %v3003_v53, %v8102_v23  ;;  %v3084_v36 = vmul.f32 %v3068_v24, %v3068_v24  ;;  %v3050_v31 = vsub.f32 %v6120_v0, %v8098_v33 }
 0x874   : > { %v2923_v50 = vpop.xlane.xlu1 %2922 }
 0x875   : > { %v8109_v15 = vmul.f32 0.5, %v3019_v30  ;;  %vm2969_vm9 = vcmp.ge.f32.partialorder %v2923_v50, 1.0  ;;  %v3106_v60 = vsel %vm1384_vm7, %v3084_v36, 0.0  ;;  %v3066_v9 = vmax.f32 %v3050_v31, 0.0 }
 0x876   : > { %v8114_v4 = vsel %vm2969_vm9, %v7893_v59, %v7883_v38  ;;  %v3001_v16 = vsel %vm2969_vm9, %v7887_v43, %v7893_v59  ;;  %3107 = vadd.xlane.f32.xlu0 %v3106_v60 }
 0x877   : > { %v3017_v14 = vadd.f32 %v3001_v16, %v8114_v4  ;;  %v3082_v28 = vmul.f32 %v3066_v9, %v3066_v9  ;;  %v3051_v51 = vsub.f32 %v6116_v48, %v8109_v15 }
 0x879   : > { %v8121_v20 = vmul.f32 0.5, %v3017_v14  ;;  %v3100_v56 = vsel %vm1384_vm7, %v3082_v28, 0.0  ;;  %v3067_v40 = vmax.f32 %v3051_v51, 0.0 }
 0x87a   : > { %3101 = vadd.xlane.f32.xlu1 %v3100_v56 }
 0x87b   : > { %v3083_v45 = vmul.f32 %v3067_v40, %v3067_v40  ;;  %v3049_v38 = vsub.f32 %v6125_v8, %v8121_v20 }
 0x87d   : > { %v3103_v55 = vsel %vm1384_vm7, %v3083_v45, 0.0  ;;  %v3065_v43 = vmax.f32 %v3049_v38, 0.0 }
 0x87e   : > { %3104 = vadd.xlane.f32.xlu1 %v3103_v55 }
 0x87f   : > { %v3081_v59 = vmul.f32 %v3065_v43, %v3065_v43 }
 0x881   : > { %v3097_v24 = vsel %vm1384_vm7, %v3081_v59, 0.0 }
 0x882   : > { %3098 = vadd.xlane.f32.xlu1 %v3097_v24 }
 0x8ca   : > { %v2938_v53 = vpop.xlane.xlu0 %2937 }
 0x8cb   : > { %vm2974_vm10 = vcmp.ge.f32.partialorder %v2938_v53, 1.0 }
 0x8cc   : > { %v8130_v30 = vsel %vm2974_vm10, %v7918_v2, %v7902_v42  ;;  %v3006_v36 = vsel %vm2974_vm10, %v7906_v49, %v7918_v2  ;;  %v2944_v31 = vpop.xlane.xlu1 %2943 }
 0x8cd   : > { %v3022_v50 = vadd.f32 %v3006_v36, %v8130_v30  ;;  %vm2976_vm11 = vcmp.ge.f32.partialorder %v2944_v31, 1.0 }
 0x8ce   : > { %v8137_v60 = vsel %vm2976_vm11, %v7922_v21, %v7912_v1  ;;  %v3008_v9 = vsel %vm2976_vm11, %v7916_v12, %v7922_v21 }
 0x8cf   : > { %v8141_v16 = vmul.f32 0.5, %v3022_v50  ;;  %v3024_v14 = vadd.f32 %v3008_v9, %v8137_v60  ;;  %v2941_v42 = vpop.xlane.xlu0 %2940 }
 0x8d0   : > { %vm2975_vm12 = vcmp.ge.f32.partialorder %v2941_v42, 1.0 }
 0x8d1   : > { %v8144_v28 = vmul.f32 0.5, %v3024_v14  ;;  %v8148_v49 = vsel %vm2975_vm12, %v7938_v37, %v7926_v18  ;;  %v3007_v2 = vsel %vm2975_vm12, %v7930_v10, %v7938_v37  ;;  %v3054_v1 = vsub.f32 %v6133_v41, %v8141_v16 }
 0x8d2   : > { %v3023_v12 = vadd.f32 %v3007_v2, %v8148_v49 }
 0x8d3   : > { %v3070_v21 = vmax.f32 %v3054_v1, 0.0  ;;  %v3056_v51 = vsub.f32 %v6136_v52, %v8144_v28 }
 0x8d4   : > { %v8157_v56 = vmul.f32 0.5, %v3023_v12 }
 0x8d5   : > { %v2935_v40 = vpop.xlane.xlu0 %2934  ;;  %v3086_v45 = vmul.f32 %v3070_v21, %v3070_v21  ;;  %v3072_v38 = vmax.f32 %v3056_v51, 0.0 }
 0x8d6   : > { %vm2973_vm13 = vcmp.ge.f32.partialorder %v2935_v40, 1.0  ;;  %v3055_v18 = vsub.f32 %v6140_v57, %v8157_v56 }
 0x8d7   : > { %v8163_v10 = vsel %vm2973_vm13, %v7954_v5, %v7944_v46  ;;  %v3005_v37 = vsel %vm2973_vm13, %v7948_v29, %v7954_v5  ;;  %v3112_v55 = vsel %vm1384_vm7, %v3086_v45, 0.0  ;;  %v3088_v43 = vmul.f32 %v3072_v38, %v3072_v38 }
 0x8d8   : > { %v3021_v59 = vadd.f32 %v3005_v37, %v8163_v10  ;;  %3113 = vadd.xlane.f32.xlu0 %v3112_v55  ;;  %v3071_v24 = vmax.f32 %v3055_v18, 0.0 }
 0x8d9   : > { %v3118_v53 = vsel %vm1384_vm7, %v3088_v43, 0.0 }
 0x8da   : > { %v8170_v36 = vmul.f32 0.5, %v3021_v59  ;;  %3119 = vadd.xlane.f32.xlu1 %v3118_v53  ;;  %v3087_v31 = vmul.f32 %v3071_v24, %v3071_v24  ;;  %v9406_v53 = vld [vmem:[#allocation31_spill] sm:$0xff] }
 0x8dc   : > { %v3115_v50 = vsel %vm1384_vm7, %v3087_v31, 0.0  ;;  %v3053_v46 = vsub.f32 %v6144_v63, %v8170_v36  ;;  %v9407_v31 = vld [vmem:[#allocation35_spill] sm:$0xff] }
 0x8dd   : > { %3116 = vadd.xlane.f32.xlu0 %v3115_v50 }
 0x8de   : > { %v3069_v29 = vmax.f32 %v3053_v46, 0.0 }
 0x8e0   : > { %v3085_v5 = vmul.f32 %v3069_v29, %v3069_v29 }
 0x8e1   : > { %v2956_v9 = vpop.xlane.xlu0 %2955 }
 0x8e2   : > { %vm2980_vm14 = vcmp.ge.f32.partialorder %v2956_v9, 1.0  ;;  %v3109_v14 = vsel %vm1384_vm7, %v3085_v5, 0.0  ;;  %v9409_v5 = vld [vmem:[#allocation30_spill] sm:$0xff] }
 0x8e3   : > { %v8178_v42 = vsel %vm2980_vm14, %v7970_v44, %v7962_v35  ;;  %v3012_v2 = vsel %vm2980_vm14, %v7966_v34, %v7970_v44  ;;  %3110 = vadd.xlane.f32.xlu0 %v3109_v14  ;;  %v9410_v14 = vld [vmem:[#allocation34_spill] sm:$0xff] }
 0x8e4   : > { %v3028_v1 = vadd.f32 %v3012_v2, %v8178_v42 }
 0x8e6   : > { %v8183_v12 = vmul.f32 0.5, %v3028_v1 }
 0x8e8   : > { %v3060_v21 = vsub.f32 %v9246_v54, %v8183_v12 }
 0x8ea   : > { %v2953_v51 = vpop.xlane.xlu1 %2952  ;;  %v3076_v40 = vmax.f32 %v3060_v21, 0.0  ;;  %v9411_v21 = vld [vmem:[#allocation26_spill] sm:$0xff] }
 0x8eb   : > { %vm2979_vm15 = vcmp.ge.f32.partialorder %v2953_v51, 1.0 }
 0x8ec   : > { %v8189_v45 = vsel %vm2979_vm15, %v7984_v19, %v7976_v7  ;;  %v3011_v35 = vsel %vm2979_vm15, %v7980_v11, %v7984_v19  ;;  %v3092_v38 = vmul.f32 %v3076_v40, %v3076_v40  ;;  %v9405_v11 = vld [vmem:[#allocation25_spill] sm:$0xff] }
 0x8ed   : > { %v3027_v34 = vadd.f32 %v3011_v35, %v8189_v45  ;;  %v2950_v44 = vpop.xlane.xlu0 %2949 }
 0x8ee   : > { %vm2978_vm0 = vcmp.ge.f32.partialorder %v2950_v44, 1.0  ;;  %v3130_v7 = vsel %vm1384_vm7, %v3092_v38, 0.0  ;;  %v9412_v44 = vld [vmem:[#allocation33_spill] sm:$0xff] }
 0x8ef   : > { %v8194_v18 = vmul.f32 0.5, %v3027_v34  ;;  %v8198_v37 = vsel %vm2978_vm0, %v8007_v47, %v7988_v6  ;;  %v3010_v55 = vsel %vm2978_vm0, %v7992_v22, %v8007_v47  ;;  %3131 = vadd.xlane.f32.xlu0 %v3130_v7  ;;  %v9408_v6 = vld [vmem:[#allocation32_spill] sm:$0xff] }
 0x8f0   : > { %v3026_v43 = vadd.f32 %v3010_v55, %v8198_v37  ;;  %v2947_v59 = vpop.xlane.xlu1 %2946  ;;  %v9413_v55 = vld [vmem:[#allocation36_spill] sm:$0xff] }
 0x8f1   : > { %vm2977_vm1 = vcmp.ge.f32.partialorder %v2947_v59, 1.0  ;;  %v3059_v19 = vsub.f32 %v9405_v11, %v8194_v18 }
 0x8f2   : > { %v8206_v24 = vmul.f32 0.5, %v3026_v43  ;;  %v8210_v50 = vsel %vm2977_vm1, %v9407_v31, %v9406_v53  ;;  %v3009_v46 = vsel %vm2977_vm1, %v9408_v6, %v9407_v31  ;;  %v2962_v22 = vpop.xlane.xlu0 %2961  ;;  %v9414_v31 = vld [vmem:[#allocation37_spill] sm:$0xff] }
 0x8f3   : > { %v3025_v47 = vadd.f32 %v3009_v46, %v8210_v50  ;;  %vm2982_vm4 = vcmp.ge.f32.partialorder %v2962_v22, 1.0  ;;  %v3075_v29 = vmax.f32 %v3059_v19, 0.0  ;;  %v9415_v46 = vld [vmem:[#allocation38_spill] sm:$0xff] }
 0x8f4   : > { %v8217_v9 = vsel %vm2982_vm4, %v8033_v39, %v9409_v5  ;;  %v3014_v2 = vsel %vm2982_vm4, %v9410_v14, %v8033_v39  ;;  %v2959_v1 = vpop.xlane.xlu1 %2958  ;;  %v3058_v51 = vsub.f32 %v9411_v21, %v8206_v24 }
 0x8f5   : > { %v8223_v40 = vmul.f32 0.5, %v3025_v47  ;;  %v3030_v35 = vadd.f32 %v3014_v2, %v8217_v9  ;;  %vm2981_vm5 = vcmp.ge.f32.partialorder %v2959_v1, 1.0  ;;  %v3091_v34 = vmul.f32 %v3075_v29, %v3075_v29  ;;  %v9417_v1 = vld [vmem:[#allocation28_spill] sm:$0xff] }
 0x8f6   : > { %v8228_v38 = vsel %vm2981_vm5, %v8048_v61, %v9412_v44  ;;  %v3013_v7 = vsel %vm2981_vm5, %v9413_v55, %v8048_v61  ;;  %v2968_v43 = vpop.xlane.xlu0 %2967  ;;  %v3074_v59 = vmax.f32 %v3058_v51, 0.0  ;;  %v9416_v61 = vld [vmem:[#allocation27_spill] sm:$0xff] }
 0x8f7   : > { %v8232_v39 = vmul.f32 0.5, %v3030_v35  ;;  %v3029_v19 = vadd.f32 %v3013_v7, %v8228_v38  ;;  %vm2984_vm6 = vcmp.ge.f32.partialorder %v2968_v43, 1.0  ;;  %v3127_v53 = vsel %vm1384_vm7, %v3091_v34, 0.0 }
 0x8f8   : > { %v8238_v6 = vsel %vm2984_vm6, %v8062_v62, %v9414_v31  ;;  %v3016_v22 = vsel %vm2984_vm6, %v9415_v46, %v8062_v62  ;;  %v2965_v47 = vpop.xlane.xlu1 %2964  ;;  %3128 = vadd.xlane.f32.xlu1 %v3127_v53  ;;  %v3090_v29 = vmul.f32 %v3074_v59, %v3074_v59  ;;  %v3057_v5 = vsub.f32 %v9416_v61, %v8223_v40  ;;  %v9418_v62 = vld [vmem:[#allocation40_spill] sm:$0xff] }
 0x8f9   : > { %v8244_v14 = vmul.f32 0.5, %v3029_v19  ;;  %v3032_v2 = vadd.f32 %v3016_v22, %v8238_v6  ;;  %vm2983_vm8 = vcmp.ge.f32.partialorder %v2965_v47, 1.0  ;;  %v3062_v51 = vsub.f32 %v9417_v1, %v8232_v39  ;;  %v9419_v19 = vld [vmem:[#allocation29_spill] sm:$0xff] }
 0x8fa   : > { %v8251_v35 = vsel %vm2983_vm8, %v8069_v32, %v8054_v17  ;;  %v3015_v34 = vsel %vm2983_vm8, %v9418_v62, %v8069_v32  ;;  %v3124_v44 = vsel %vm1384_vm7, %v3090_v29, 0.0  ;;  %v3073_v55 = vmax.f32 %v3057_v5, 0.0 }
 0x8fb   : > { %v8256_v7 = vmul.f32 0.5, %v3032_v2  ;;  %v3031_v43 = vadd.f32 %v3015_v34, %v8251_v35  ;;  %3125 = vadd.xlane.f32.xlu0 %v3124_v44  ;;  %v3078_v59 = vmax.f32 %v3062_v51, 0.0  ;;  %v3061_v53 = vsub.f32 %v9419_v19, %v8244_v14 }
 0x8fc   : > { %v3089_v31 = vmul.f32 %v3073_v55, %v3073_v55 }
 0x8fd   : > { %v8261_v46 = vmul.f32 0.5, %v3031_v43  ;;  %v3094_v17 = vmul.f32 %v3078_v59, %v3078_v59  ;;  %v3077_v22 = vmax.f32 %v3061_v53, 0.0  ;;  %v3064_v32 = vsub.f32 %v9378_v27, %v8256_v7 }
 0x8fe   : > { %v3121_v47 = vsel %vm1384_vm7, %v3089_v31, 0.0 }
 0x8ff   : > { %3122 = vadd.xlane.f32.xlu1 %v3121_v47  ;;  %v3136_v29 = vsel %vm1384_vm7, %v3094_v17, 0.0  ;;  %v3093_v5 = vmul.f32 %v3077_v22, %v3077_v22  ;;  %v3080_v2 = vmax.f32 %v3064_v32, 0.0  ;;  %v3063_v51 = vsub.f32 %v6183_v25, %v8261_v46 }
 0x900   : > { %3137 = vadd.xlane.f32.xlu0 %v3136_v29 }
 0x901   : > { %v3133_v62 = vsel %vm1384_vm7, %v3093_v5, 0.0  ;;  %v3096_v34 = vmul.f32 %v3080_v2, %v3080_v2  ;;  %v3079_v44 = vmax.f32 %v3063_v51, 0.0 }
 0x903   : > { %3134 = vadd.xlane.f32.xlu1 %v3133_v62  ;;  %v3142_v55 = vsel %vm1384_vm7, %v3096_v34, 0.0  ;;  %v3095_v43 = vmul.f32 %v3079_v44, %v3079_v44  ;;  %v3108_v59 = vpop.xlane.xlu0 %3107 }
 0x904   : > { %3143 = vadd.xlane.f32.xlu0 %v3142_v55  ;;  %vm3148_vm9 = vcmp.ge.f32.partialorder %v3108_v59, 1.0 }
 0x905   : > { %v3139_v53 = vsel %vm1384_vm7, %v3095_v43, 0.0  ;;  %v8274_v31 = vsel %vm3148_vm9, %v8087_v13, %v8082_v26 }
 0x906   : > { %v3180_v17 = vsub.f32 %v6114_v58, %v8274_v31 }
 0x907   : > { %3140 = vadd.xlane.f32.xlu1 %v3139_v53  ;;  %v3102_v22 = vpop.xlane.xlu1 %3101 }
 0x908   : > { %vm3146_vm10 = vcmp.ge.f32.partialorder %v3102_v22, 1.0  ;;  %v8278_v32 = vmax.f32 %v3180_v17, 0.0 }
 0x909   : > { %v8282_v47 = vsel %vm3146_vm10, %v8098_v33, %v8091_v3 }
 0x90a   : > { %v3282_v29 = vsel %vm1384_vm7, %v8278_v32, 0.0  ;;  %v3178_v5 = vsub.f32 %v6120_v0, %v8282_v47 }
 0x90b   : > { %3283 = vadd.xlane.f32.xlu0 %v3282_v29  ;;  %v3105_v26 = vpop.xlane.xlu1 %3104 }
 0x90c   : > { %vm3147_vm11 = vcmp.ge.f32.partialorder %v3105_v26, 1.0  ;;  %v3194_v13 = vmax.f32 %v3178_v5, 0.0 }
 0x90d   : > { %v8290_v2 = vsel %vm3147_vm11, %v8109_v15, %v8102_v23 }
 0x90e   : > { %v3276_v51 = vsel %vm1384_vm7, %v3194_v13, 0.0  ;;  %v3179_v3 = vsub.f32 %v6116_v48, %v8290_v2  ;;  %v3210_v43 = vmul.f32 %v3194_v13, %v3194_v13 }
 0x90f   : > { %3277 = vadd.xlane.f32.xlu1 %v3276_v51  ;;  %v3099_v33 = vpop.xlane.xlu1 %3098 }
 0x910   : > { %vm3145_vm12 = vcmp.ge.f32.partialorder %v3099_v33, 1.0  ;;  %v8295_v62 = vmax.f32 %v3179_v3, 0.0  ;;  %v3228_v59 = vsel %vm1384_vm7, %v3210_v43, 0.0 }
 0x911   : > { %v8299_v34 = vsel %vm3145_vm12, %v8121_v20, %v8114_v4  ;;  %vm4118_vm12 = vcmask 125952  }
 0x912   : > { %v3279_v44 = vsel %vm1384_vm7, %v8295_v62, 0.0  ;;  %v3177_v23 = vsub.f32 %v6125_v8, %v8299_v34 }
 0x913   : > { %3280 = vadd.xlane.f32.xlu1 %v3279_v44 }
 0x914   : > { %v3193_v15 = vmax.f32 %v3177_v23, 0.0 }
 0x916   : > { %v3273_v55 = vsel %vm1384_vm7, %v3193_v15, 0.0  ;;  %v3209_v53 = vmul.f32 %v3193_v15, %v3193_v15 }
 0x917   : > { %3274 = vadd.xlane.f32.xlu1 %v3273_v55 }
 0x918   : > { %v3225_v17 = vsel %vm1384_vm7, %v3209_v53, 0.0 }
 0x91b   : > { %3229 = vadd.xlane.f32.xlu1 %v3228_v59 }
 0x91f   : > { %3226 = vadd.xlane.f32.xlu1 %v3225_v17 }
 0x965   : > { %v3114_v4 = vpop.xlane.xlu0 %3113 }
 0x966   : > { %vm3150_vm13 = vcmp.ge.f32.partialorder %v3114_v4, 1.0 }
 0x967   : > { %v8310_v20 = vsel %vm3150_vm13, %v8141_v16, %v8130_v30  ;;  %v3120_v22 = vpop.xlane.xlu1 %3119  ;;  %vm4320_vm13 = vcmask 1043456  }
 0x968   : > { %vm3152_vm14 = vcmp.ge.f32.partialorder %v3120_v22, 1.0  ;;  %v3182_v29 = vsub.f32 %v6133_v41, %v8310_v20 }
 0x969   : > { %v8316_v5 = vsel %vm3152_vm14, %v8144_v28, %v8137_v60  ;;  %vm4738_vm14 = vcmask (!%p5132_p9), 1041409  }
 0x96a   : > { %v3117_v26 = vpop.xlane.xlu0 %3116  ;;  %v3198_v13 = vmax.f32 %v3182_v29, 0.0  ;;  %v3184_v51 = vsub.f32 %v6136_v52, %v8316_v5 }
 0x96b   : > { %vm3151_vm15 = vcmp.ge.f32.partialorder %v3117_v26, 1.0 }
 0x96c   : > { %v8322_v3 = vsel %vm3151_vm15, %v8157_v56, %v8148_v49  ;;  %v3288_v30 = vsel %vm1384_vm7, %v3198_v13, 0.0  ;;  %v8325_v16 = vmax.f32 %v3184_v51, 0.0  ;;  %v3214_v43 = vmul.f32 %v3198_v13, %v3198_v13 }
 0x96d   : > { %3289 = vadd.xlane.f32.xlu0 %v3288_v30  ;;  %v3183_v33 = vsub.f32 %v6140_v57, %v8322_v3  ;;  %vm4821_vm15 = vcmask (!%p5132_p9), 90112  }
 0x96e   : > { %v3294_v60 = vsel %vm1384_vm7, %v8325_v16, 0.0  ;;  %v3240_v59 = vsel %vm1384_vm7, %v3214_v43, 0.0 }
 0x96f   : > { %3295 = vadd.xlane.f32.xlu1 %v3294_v60  ;;  %v8331_v28 = vmax.f32 %v3183_v33, 0.0 }
 0x970   : > { %v3111_v44 = vpop.xlane.xlu0 %3110 }
 0x971   : > { %vm3149_vm0 = vcmp.ge.f32.partialorder %v3111_v44, 1.0  ;;  %v3291_v49 = vsel %vm1384_vm7, %v8331_v28, 0.0 }
 0x972   : > { %v8337_v56 = vsel %vm3149_vm0, %v8170_v36, %v8163_v10  ;;  %3292 = vadd.xlane.f32.xlu0 %v3291_v49 }
 0x973   : > { %v3181_v23 = vsub.f32 %v6144_v63, %v8337_v56 }
 0x975   : > { %v3197_v15 = vmax.f32 %v3181_v23, 0.0 }
 0x977   : > { %v3285_v55 = vsel %vm1384_vm7, %v3197_v15, 0.0  ;;  %v3213_v53 = vmul.f32 %v3197_v15, %v3197_v15 }
 0x978   : > { %3286 = vadd.xlane.f32.xlu0 %v3285_v55 }
 0x979   : > { %v3237_v10 = vsel %vm1384_vm7, %v3213_v53, 0.0 }
 0x97c   : > { %v3132_v17 = vpop.xlane.xlu0 %3131  ;;  %3241 = vadd.xlane.f32.xlu0 %v3240_v59 }
 0x97d   : > { %vm3156_vm1 = vcmp.ge.f32.partialorder %v3132_v17, 1.0 }
 0x97e   : > { %v8345_v4 = vsel %vm3156_vm1, %v8183_v12, %v8178_v42 }
 0x97f   : > { %v3188_v36 = vsub.f32 %v9246_v54, %v8345_v4 }
 0x980   : > { %3238 = vadd.xlane.f32.xlu0 %v3237_v10 }
 0x981   : > { %v8350_v22 = vmax.f32 %v3188_v36, 0.0 }
 0x983   : > { %v3306_v29 = vsel %vm1384_vm7, %v8350_v22, 0.0 }
 0x984   : > { %3307 = vadd.xlane.f32.xlu0 %v3306_v29 }
 0x985   : > { %v3129_v26 = vpop.xlane.xlu1 %3128 }
 0x986   : > { %vm3155_vm4 = vcmp.ge.f32.partialorder %v3129_v26, 1.0 }
 0x987   : > { %v8356_v13 = vsel %vm3155_vm4, %v8194_v18, %v8189_v45 }
 0x988   : > { %v3126_v42 = vpop.xlane.xlu0 %3125  ;;  %v3187_v12 = vsub.f32 %v9405_v11, %v8356_v13 }
 0x989   : > { %vm3154_vm5 = vcmp.ge.f32.partialorder %v3126_v42, 1.0 }
 0x98a   : > { %v8362_v51 = vsel %vm3154_vm5, %v8206_v24, %v8198_v37  ;;  %v8364_v30 = vmax.f32 %v3187_v12, 0.0 }
 0x98b   : > { %v3186_v33 = vsub.f32 %v9411_v21, %v8362_v51 }
 0x98c   : > { %v3123_v60 = vpop.xlane.xlu1 %3122  ;;  %v3303_v44 = vsel %vm1384_vm7, %v8364_v30, 0.0 }
 0x98d   : > { %vm3153_vm6 = vcmp.ge.f32.partialorder %v3123_v60, 1.0  ;;  %v3138_v45 = vpop.xlane.xlu0 %3137  ;;  %3304 = vadd.xlane.f32.xlu1 %v3303_v44  ;;  %v3202_v18 = vmax.f32 %v3186_v33, 0.0 }
 0x98e   : > { %v8372_v49 = vsel %vm3153_vm6, %v8223_v40, %v8210_v50  ;;  %vm3158_vm8 = vcmp.ge.f32.partialorder %v3138_v45, 1.0 }
 0x98f   : > { %v3185_v37 = vsub.f32 %v9416_v61, %v8372_v49  ;;  %v3300_v24 = vsel %vm1384_vm7, %v3202_v18, 0.0  ;;  %v3218_v23 = vmul.f32 %v3202_v18, %v3202_v18  ;;  %v8379_v55 = vsel %vm3158_vm8, %v8232_v39, %v8217_v9 }
 0x990   : > { %v3135_v15 = vpop.xlane.xlu1 %3134  ;;  %3301 = vadd.xlane.f32.xlu0 %v3300_v24  ;;  %v3190_v36 = vsub.f32 %v9417_v1, %v8379_v55 }
 0x991   : > { %vm3157_vm9 = vcmp.ge.f32.partialorder %v3135_v15, 1.0  ;;  %v3144_v43 = vpop.xlane.xlu0 %3143  ;;  %v3201_v59 = vmax.f32 %v3185_v37, 0.0  ;;  %v3252_v17 = vsel %vm1384_vm7, %v3218_v23, 0.0  ;;  %v3211_v37 = vmul.f32 %v8295_v62, %v8295_v62 }
 0x992   : > { %vm3160_vm10 = vcmp.ge.f32.partialorder %v3144_v43, 1.0  ;;  %v8389_v10 = vsel %vm3157_vm9, %v8244_v14, %v8228_v38  ;;  %v3206_v42 = vmax.f32 %v3190_v36, 0.0  ;;  %v3212_v23 = vmul.f32 %v8278_v32, %v8278_v32 }
 0x993   : > { %v8383_v50 = vsel %vm3160_vm10, %v8256_v7, %v8238_v6  ;;  %v3297_v40 = vsel %vm1384_vm7, %v3201_v59, 0.0  ;;  %v3217_v53 = vmul.f32 %v3201_v59, %v3201_v59  ;;  %v3189_v14 = vsub.f32 %v9419_v19, %v8389_v10 }
 0x994   : > { %3298 = vadd.xlane.f32.xlu1 %v3297_v40  ;;  %v3141_v9 = vpop.xlane.xlu1 %3140  ;;  %3253 = vadd.xlane.f32.xlu0 %v3252_v17  ;;  %v3192_v39 = vsub.f32 %v9378_v27, %v8383_v50  ;;  %v3216_v59 = vmul.f32 %v8325_v16, %v8325_v16  ;;  %v3234_v40 = vsel %vm1384_vm7, %v3212_v23, 0.0  ;;  %v3220_v62 = vmul.f32 %v8350_v22, %v8350_v22 }
 0x995   : > { %vm3159_vm11 = vcmp.ge.f32.partialorder %v3141_v9, 1.0  ;;  %v3249_v29 = vsel %vm1384_vm7, %v3217_v53, 0.0  ;;  %v3205_v60 = vmax.f32 %v3189_v14, 0.0  ;;  %v3219_v32 = vmul.f32 %v8364_v30, %v8364_v30 }
 0x996   : > { %v8397_v6 = vsel %vm3159_vm11, %v8261_v46, %v8251_v35  ;;  %v3208_v7 = vmax.f32 %v3192_v39, 0.0  ;;  %v3312_v35 = vsel %vm1384_vm7, %v3206_v42, 0.0  ;;  %v3215_v46 = vmul.f32 %v8331_v28, %v8331_v28 }
 0x997   : > { %v3191_v38 = vsub.f32 %v6183_v25, %v8397_v6  ;;  %v3309_v18 = vsel %vm1384_vm7, %v3205_v60, 0.0  ;;  %v3231_v28 = vsel %vm1384_vm7, %v3211_v37, 0.0  ;;  %v3246_v17 = vsel %vm1384_vm7, %v3216_v59, 0.0 }
 0x998   : > { %3250 = vadd.xlane.f32.xlu1 %v3249_v29  ;;  %v3318_v26 = vsel %vm1384_vm7, %v3208_v7, 0.0  ;;  %v3243_v24 = vsel %vm1384_vm7, %v3215_v46, 0.0  ;;  %v3258_v9 = vsel %vm1384_vm7, %v3220_v62, 0.0  ;;  %v3222_v39 = vmul.f32 %v3206_v42, %v3206_v42 }
 0x999   : > { %v3207_v12 = vmax.f32 %v3191_v38, 0.0  ;;  %3319 = vadd.xlane.f32.xlu0 %v3318_v26  ;;  %v3255_v29 = vsel %vm1384_vm7, %v3219_v32, 0.0  ;;  %v3221_v38 = vmul.f32 %v3205_v60, %v3205_v60  ;;  %v3224_v26 = vmul.f32 %v3208_v7, %v3208_v7 }
 0x99a   : > { %v3264_v22 = vsel %vm1384_vm7, %v3222_v39, 0.0 }
 0x99b   : > { %v3315_v33 = vsel %vm1384_vm7, %v3207_v12, 0.0  ;;  %v3223_v30 = vmul.f32 %v3207_v12, %v3207_v12  ;;  %v3270_v42 = vsel %vm1384_vm7, %v3224_v26, 0.0  ;;  %v3284_v12 = vpop.xlane.xlu0 %3283 }
 0x99c   : > { %3316 = vadd.xlane.f32.xlu1 %v3315_v33  ;;  %v3278_v44 = vpop.xlane.xlu1 %3277 }
 0x99d   : > { %3313 = vadd.xlane.f32.xlu0 %v3312_v35  ;;  %v3338_v45 = vmul.f32 2.0, %v3278_v44  ;;  %v3261_v35 = vsel %vm1384_vm7, %v3221_v38, 0.0  ;;  %v3267_v44 = vsel %vm1384_vm7, %v3223_v30, 0.0 }
 0x99f   : > { %v3354_v15 = vadd.f32 1e-12, %v3338_v45 }
 0x9a0   : > { %3310 = vadd.xlane.f32.xlu1 %v3309_v18  ;;  %v3281_v43 = vpop.xlane.xlu1 %3280 }
 0x9a1   : > { %3244 = vadd.xlane.f32.xlu0 %v3243_v24  ;;  %5490 = vrcp.f32 %v3354_v15 }
 0x9a4   : > { %3232 = vadd.xlane.f32.xlu1 %v3231_v28  ;;  %v3275_v53 = vpop.xlane.xlu1 %3274 }
 0x9a5   : > { %3235 = vadd.xlane.f32.xlu0 %v3234_v40  ;;  %v3337_v40 = vmul.f32 2.0, %v3275_v53 }
 0x9a7   : > { %v3353_v32 = vadd.f32 1e-12, %v3337_v40 }
 0x9a8   : > { %3247 = vadd.xlane.f32.xlu1 %v3246_v17  ;;  %v3230_v36 = vpop.xlane.xlu1 %3229 }
 0x9a9   : > { %3259 = vadd.xlane.f32.xlu0 %v3258_v9  ;;  %v5057_v16 = vadd.f32 -1.0, %v3230_v36  ;;  %v3340_v36 = vmul.f32 2.0, %v3284_v12  ;;  %5492 = vrcp.f32 %v3353_v32 }
 0x9ab   : > { %v5491_v14 = vpop.eup %5490  ;;  %v3356_v26 = vadd.f32 1e-12, %v3340_v36 }
 0x9ac   : > { %3256 = vadd.xlane.f32.xlu1 %v3255_v29  ;;  %v3386_v33 = vmul.f32 %v5491_v14, %v5057_v16  ;;  %v3227_v15 = vpop.xlane.xlu1 %3226  ;;  %v3339_v16 = vmul.f32 2.0, %v3281_v43 }
 0x9ad   : > { %3265 = vadd.xlane.f32.xlu0 %v3264_v22 }
 0x9ae   : > { %v8429_v46 = vadd.f32 %v3386_v33, %v8282_v47  ;;  %v3355_v33 = vadd.f32 1e-12, %v3339_v16 }
 0x9b0   : > { %9420 = vst [vmem:[#allocation39_spill] sm:$0xff] %v8429_v46  ;;  %3262 = vadd.xlane.f32.xlu1 %v3261_v35  ;;  %v3418_v60 = vsub.f32 %v6120_v0, %v8429_v46 }
 0x9b1   : > { %3271 = vadd.xlane.f32.xlu0 %v3270_v42 }
 0x9b2   : > { %v8435_v45 = vmax.f32 %v3418_v60, 0.0 }
 0x9b4   : > { %3268 = vadd.xlane.f32.xlu1 %v3267_v44  ;;  %v3516_v7 = vsel %vm1384_vm7, %v8435_v45, 0.0 }
 0x9b8   : > { %3517 = vadd.xlane.f32.xlu1 %v3516_v7  ;;  %v5493_v7 = vpop.eup %5492 }
 0x9fa   : > { %v3290_v18 = vpop.xlane.xlu0 %3289 }
 0x9fb   : > { %v3342_v62 = vmul.f32 2.0, %v3290_v18 }
 0x9fc   : > { %v3296_v28 = vpop.xlane.xlu1 %3295 }
 0x9fd   : > { %v3358_v39 = vadd.f32 1e-12, %v3342_v62  ;;  %v3344_v60 = vmul.f32 2.0, %v3296_v28 }
 0x9ff   : > { %v3293_v47 = vpop.xlane.xlu0 %3292  ;;  %5494 = vrcp.f32 %v3358_v39 }
 0xa00   : > { %v3343_v29 = vmul.f32 2.0, %v3293_v47  ;;  %5496 = vrcp.f32 %v3356_v26  ;;  %v5056_v47 = vadd.f32 -1.0, %v3227_v15 }
 0xa01   : > { %5498 = vrcp.f32 %v3355_v33 }
 0xa02   : > { %v3359_v35 = vadd.f32 1e-12, %v3343_v29  ;;  %v3385_v36 = vmul.f32 %v5493_v7, %v5056_v47 }
 0xa04   : > { %5500 = vrcp.f32 %v3359_v35  ;;  %v8448_v15 = vadd.f32 %v3385_v36, %v8299_v34 }
 0xa05   : > { %v3287_v37 = vpop.xlane.xlu0 %3286 }
 0xa06   : > { %v3341_v22 = vmul.f32 2.0, %v3287_v37  ;;  %v3360_v37 = vadd.f32 1e-12, %v3344_v60 }
 0xa08   : > { %v3357_v53 = vadd.f32 1e-12, %v3341_v22 }
 0xa09   : > { %v3242_v24 = vpop.xlane.xlu0 %3241  ;;  %v5495_v18 = vpop.eup %5494 }
 0xa0a   : > { %5502 = vrcp.f32 %v3357_v53  ;;  %v5061_v12 = vadd.f32 -1.0, %v3242_v24  ;;  %v5497_v29 = vpop.eup %5496 }
 0xa0b   : > { %5504 = vrcp.f32 %v3360_v37  ;;  %v5499_v33 = vpop.eup %5498 }
 0xa0c   : > { %v3390_v16 = vmul.f32 %v5495_v18, %v5061_v12 }
 0xa0d   : > { %v3239_v23 = vpop.xlane.xlu0 %3238 }
 0xa0e   : > { %v5501_v24 = vpop.eup %5500  ;;  %v5060_v18 = vadd.f32 -1.0, %v3239_v23 }
 0xa11   : > { %v3308_v59 = vpop.xlane.xlu0 %3307 }
 0xa12   : > { %v3348_v53 = vmul.f32 2.0, %v3308_v59 }
 0xa14   : > { %v5503_v60 = vpop.eup %5502  ;;  %v3364_v59 = vadd.f32 1e-12, %v3348_v53 }
 0xa1a   : > { %v3305_v17 = vpop.xlane.xlu1 %3304 }
 0xa1b   : > { %v3347_v40 = vmul.f32 2.0, %v3305_v17  ;;  %v8451_v17 = vadd.f32 %v3390_v16, %v8310_v20  ;;  %v3417_v20 = vsub.f32 %v6125_v8, %v8448_v15 }
 0xa1d   : > { %v3302_v9 = vpop.xlane.xlu0 %3301  ;;  %v3363_v22 = vadd.f32 1e-12, %v3347_v40 }
 0xa1e   : > { %v3346_v7 = vmul.f32 2.0, %v3302_v9 }
 0xa1f   : > { %5506 = vrcp.f32 %v3363_v22  ;;  %v5505_v22 = vpop.eup %5504 }
 0xa21   : > { %v3299_v38 = vpop.xlane.xlu1 %3298  ;;  %v8439_v14 = vpop.xlane.xlu0 %3253 }
 0xa22   : > { %v3345_v32 = vmul.f32 2.0, %v3299_v38 }
 0xa24   : > { %v3361_v35 = vadd.f32 1e-12, %v3345_v32 }
 0xa25   : > { %v8441_v30 = vpop.xlane.xlu1 %3250 }
 0xa26   : > { %v8443_v42 = vpop.xlane.xlu0 %3319  ;;  %5508 = vrcp.f32 %v3361_v35 }
 0xa27   : > { %5510 = vrcp.f32 %v3364_v59 }
 0xa29   : > { %v3317_v43 = vpop.xlane.xlu1 %3316 }
 0xa2a   : > { %v8445_v44 = vpop.xlane.xlu0 %3313  ;;  %v3351_v36 = vmul.f32 2.0, %v3317_v43 }
 0xa2d   : > { %v3311_v62 = vpop.xlane.xlu1 %3310 }
 0xa2e   : > { %v3245_v39 = vpop.xlane.xlu0 %3244 }
 0xa2f   : > { %v5062_v26 = vadd.f32 -1.0, %v3245_v39  ;;  %v3389_v39 = vmul.f32 %v5503_v60, %v5060_v18  ;;  %v5507_v18 = vpop.eup %5506 }
 0xa30   : > { %v5509_v59 = vpop.eup %5508 }
 0xa31   : > { %v3233_v28 = vpop.xlane.xlu1 %3232  ;;  %v3391_v37 = vmul.f32 %v5501_v24, %v5062_v26  ;;  %v3433_v26 = vmax.f32 %v3417_v20, 0.0  ;;  %v3367_v24 = vadd.f32 1e-12, %v3351_v36 }
 0xa32   : > { %v5058_v0 = vadd.f32 -1.0, %v3233_v28  ;;  %v3236_v46 = vpop.xlane.xlu0 %3235  ;;  %v8473_v28 = vadd.f32 %v3389_v39, %v8337_v56  ;;  %v5064_v39 = vadd.f32 -1.0, %v8441_v30 }
 0xa33   : > { %v5059_v38 = vadd.f32 -1.0, %v3236_v46  ;;  %v3362_v46 = vadd.f32 1e-12, %v3346_v7  ;;  %v8466_v16 = vadd.f32 %v3391_v37, %v8322_v3  ;;  %v3352_v7 = vmul.f32 2.0, %v8443_v42 }
 0xa34   : > { %v3387_v12 = vmul.f32 %v5499_v33, %v5058_v0  ;;  %v3422_v0 = vsub.f32 %v6133_v41, %v8451_v17  ;;  %v3513_v37 = vsel %vm1384_vm7, %v3433_v26, 0.0  ;;  %v3421_v42 = vsub.f32 %v6144_v63, %v8473_v28 }
 0xa35   : > { %v3248_v47 = vpop.xlane.xlu1 %3247  ;;  %v3388_v40 = vmul.f32 %v5497_v29, %v5059_v38  ;;  %5512 = vrcp.f32 %v3362_v46  ;;  %v3349_v38 = vmul.f32 2.0, %v3311_v62  ;;  %v3423_v56 = vsub.f32 %v6140_v57, %v8466_v16 }
 0xa36   : > { %v8454_v32 = vadd.f32 %v3387_v12, %v8290_v2  ;;  %v5063_v23 = vadd.f32 -1.0, %v3248_v47  ;;  %v3438_v35 = vmax.f32 %v3422_v0, 0.0  ;;  %v3260_v12 = vpop.xlane.xlu0 %3259  ;;  %5514 = vrcp.f32 %v3367_v24 }
 0xa37   : > { %v8457_v34 = vadd.f32 %v3388_v40, %v8274_v31  ;;  %v3450_v40 = vmul.f32 %v8435_v45, %v8435_v45  ;;  %v3365_v46 = vadd.f32 1e-12, %v3349_v38  ;;  %v3368_v36 = vadd.f32 1e-12, %v3352_v7 }
 0xa38   : > { %v3419_v9 = vsub.f32 %v6116_v48, %v8454_v32  ;;  %v3392_v43 = vmul.f32 %v5505_v22, %v5063_v23  ;;  %v3528_v62 = vsel %vm1384_vm7, %v3438_v35, 0.0  ;;  %v5067_v23 = vadd.f32 -1.0, %v3260_v12 }
 0xa39   : > { %v3257_v2 = vpop.xlane.xlu1 %3256  ;;  %v3420_v31 = vsub.f32 %v6114_v58, %v8457_v34  ;;  %v3350_v45 = vmul.f32 2.0, %v8445_v44  ;;  %v3468_v22 = vsel %vm1384_vm7, %v3450_v40, 0.0  ;;  %5516 = vrcp.f32 %v3365_v46 }
 0xa3a   : > { %v8470_v29 = vmax.f32 %v3419_v9, 0.0  ;;  %v5066_v53 = vadd.f32 -1.0, %v3257_v2  ;;  %v8490_v20 = vadd.f32 %v3392_v43, %v8316_v5  ;;  %v8494_v9 = vmax.f32 %v3423_v56, 0.0  ;;  %v3266_v5 = vpop.xlane.xlu0 %3265 }
 0xa3b   : > { %v8475_v33 = vmax.f32 %v3420_v31, 0.0  ;;  %v3393_v2 = vmul.f32 %v5509_v59, %v5064_v39  ;;  %v5511_v31 = vpop.eup %5510  ;;  %v3449_v43 = vmul.f32 %v3433_v26, %v3433_v26  ;;  %v3437_v38 = vmax.f32 %v3421_v42, 0.0 }
 0xa3c   : > { %v3519_v3 = vsel %vm1384_vm7, %v8470_v29, 0.0  ;;  %v3395_v0 = vmul.f32 %v5507_v18, %v5066_v53  ;;  %v3424_v53 = vsub.f32 %v6136_v52, %v8490_v20  ;;  %v3531_v44 = vsel %vm1384_vm7, %v8494_v9, 0.0 }
 0xa3d   : > { %3520 = vadd.xlane.f32.xlu1 %v3519_v3  ;;  %v3522_v60 = vsel %vm1384_vm7, %v8475_v33, 0.0  ;;  %v3263_v47 = vpop.xlane.xlu1 %3262  ;;  %v3396_v3 = vmul.f32 %v5511_v31, %v5067_v23  ;;  %5518 = vrcp.f32 %v3368_v36  ;;  %v3366_v56 = vadd.f32 1e-12, %v3350_v45 }
 0xa3e   : > { %3523 = vadd.xlane.f32.xlu0 %v3522_v60  ;;  %v8498_v30 = vadd.f32 %v3395_v0, %v8356_v13  ;;  %v8506_v13 = vadd.f32 %v3393_v2, %v8372_v49  ;;  %v5065_v26 = vadd.f32 -1.0, %v8439_v14  ;;  %v3465_v12 = vsel %vm1384_vm7, %v3449_v43, 0.0  ;;  %v3272_v49 = vpop.xlane.xlu0 %3271 }
 0xa3f   : > { %v5513_v60 = vpop.eup %5512  ;;  %v8510_v18 = vmax.f32 %v3424_v53, 0.0  ;;  %v3525_v59 = vsel %vm1384_vm7, %v3437_v38, 0.0  ;;  %v3454_v39 = vmul.f32 %v3438_v35, %v3438_v35  ;;  %5520 = vrcp.f32 %v3366_v56 }
 0xa40   : > { %v3394_v40 = vmul.f32 %v5513_v60, %v5065_v26  ;;  %v5515_v14 = vpop.eup %5514  ;;  %v3425_v0 = vsub.f32 %v9416_v61, %v8506_v13  ;;  %v3453_v42 = vmul.f32 %v3437_v38, %v3437_v38  ;;  %v5068_v46 = vadd.f32 -1.0, %v3263_v47 }
 0xa41   : > { %3514 = vadd.xlane.f32.xlu1 %v3513_v37  ;;  %v3269_v24 = vpop.xlane.xlu1 %3268  ;;  %v3427_v37 = vsub.f32 %v9405_v11, %v8498_v30  ;;  %v3534_v36 = vsel %vm1384_vm7, %v8510_v18, 0.0  ;;  %v5071_v2 = vadd.f32 -1.0, %v3272_v49  ;;  %v3480_v35 = vsel %vm1384_vm7, %v3454_v39, 0.0 }
 0xa42   : > { %3529 = vadd.xlane.f32.xlu0 %v3528_v62  ;;  %v5070_v7 = vadd.f32 -1.0, %v3269_v24  ;;  %v8515_v62 = vadd.f32 %v3396_v3, %v8345_v4  ;;  %v8523_v4 = vadd.f32 %v3394_v40, %v8362_v51  ;;  %v3477_v43 = vsel %vm1384_vm7, %v3453_v42, 0.0 }
 0xa43   : > { %v3443_v45 = vmax.f32 %v3427_v37, 0.0  ;;  %v3441_v51 = vmax.f32 %v3425_v0, 0.0 }
 0xa44   : > { %v3399_v23 = vmul.f32 %v5515_v14, %v5070_v7  ;;  %v3428_v31 = vsub.f32 %v9246_v54, %v8515_v62  ;;  %v3426_v56 = vsub.f32 %v9411_v21, %v8523_v4 }
 0xa45   : > { %3469 = vadd.xlane.f32.xlu1 %v3468_v22  ;;  %v5517_v22 = vpop.eup %5516  ;;  %v3543_v24 = vsel %vm1384_vm7, %v3443_v45, 0.0  ;;  %v3457_v37 = vmul.f32 %v3441_v51, %v3441_v51 }
 0xa46   : > { %3532 = vadd.xlane.f32.xlu0 %v3531_v44  ;;  %v3397_v53 = vmul.f32 %v5517_v22, %v5068_v46  ;;  %v8530_v3 = vadd.f32 %v3399_v23, %v8397_v6  ;;  %v5069_v44 = vadd.f32 -1.0, %v3266_v5  ;;  %v3444_v60 = vmax.f32 %v3428_v31, 0.0 }
 0xa47   : > { %v5519_v47 = vpop.eup %5518  ;;  %v3442_v39 = vmax.f32 %v3426_v56, 0.0  ;;  %v3489_v49 = vsel %vm1384_vm7, %v3457_v37, 0.0  ;;  %v3451_v22 = vmul.f32 %v8470_v29, %v8470_v29  ;;  %v3459_v29 = vmul.f32 %v3443_v45, %v3443_v45 }
 0xa48   : > { %v3400_v38 = vmul.f32 %v5519_v47, %v5071_v2  ;;  %v8536_v7 = vadd.f32 %v3397_v53, %v8389_v10  ;;  %v3431_v6 = vsub.f32 %v6183_v25, %v8530_v3 }
 0xa49   : > { %3466 = vadd.xlane.f32.xlu1 %v3465_v12  ;;  %v5521_v26 = vpop.eup %5520  ;;  %v3537_v12 = vsel %vm1384_vm7, %v3441_v51, 0.0  ;;  %v3540_v42 = vsel %vm1384_vm7, %v3442_v39, 0.0  ;;  %v3458_v46 = vmul.f32 %v3442_v39, %v3442_v39  ;;  %v3471_v53 = vsel %vm1384_vm7, %v3451_v22, 0.0 }
 0xa4a   : > { %3526 = vadd.xlane.f32.xlu0 %v3525_v59  ;;  %v3398_v40 = vmul.f32 %v5521_v26, %v5069_v44  ;;  %v8542_v5 = vadd.f32 %v3400_v38, %v8383_v50  ;;  %v3546_v59 = vsel %vm1384_vm7, %v3444_v60, 0.0  ;;  %v3447_v14 = vmax.f32 %v3431_v6, 0.0 }
 0xa4b   : > { %v3429_v10 = vsub.f32 %v9419_v19, %v8536_v7  ;;  %v3492_v2 = vsel %vm1384_vm7, %v3458_v46, 0.0  ;;  %v3455_v44 = vmul.f32 %v8494_v9, %v8494_v9  ;;  %v3452_v26 = vmul.f32 %v8475_v33, %v8475_v33 }
 0xa4c   : > { %v8549_v0 = vadd.f32 %v3398_v40, %v8379_v55  ;;  %v3432_v50 = vsub.f32 %v9378_v27, %v8542_v5  ;;  %v3555_v23 = vsel %vm1384_vm7, %v3447_v14, 0.0  ;;  %v3460_v6 = vmul.f32 %v3444_v60, %v3444_v60  ;;  %v3518_v60 = vpop.xlane.xlu1 %3517 }
 0xa4d   : > { %3535 = vadd.xlane.f32.xlu1 %v3534_v36  ;;  %v3445_v36 = vmax.f32 %v3429_v10, 0.0  ;;  %v3483_v56 = vsel %vm1384_vm7, %v3455_v44, 0.0  ;;  %v3474_v37 = vsel %vm1384_vm7, %v3452_v26, 0.0  ;;  %v3463_v40 = vmul.f32 %v3447_v14, %v3447_v14 }
 0xa4e   : > { %3481 = vadd.xlane.f32.xlu0 %v3480_v35  ;;  %v3448_v35 = vmax.f32 %v3432_v50, 0.0  ;;  %v3430_v31 = vsub.f32 %v9417_v1, %v8549_v0  ;;  %v3498_v45 = vsel %vm1384_vm7, %v3460_v6, 0.0 }
 0xa4f   : > { %v3549_v55 = vsel %vm1384_vm7, %v3445_v36, 0.0  ;;  %v3507_v39 = vsel %vm1384_vm7, %v3463_v40, 0.0 }
 0xa50   : > { %v3446_v47 = vmax.f32 %v3430_v31, 0.0 }
 0xa51   : > { %3544 = vadd.xlane.f32.xlu1 %v3543_v24  ;;  %v3456_v24 = vmul.f32 %v8510_v18, %v8510_v18  ;;  %v3461_v18 = vmul.f32 %v3445_v36, %v3445_v36 }
 0xa52   : > { %3478 = vadd.xlane.f32.xlu0 %v3477_v43  ;;  %v3558_v43 = vsel %vm1384_vm7, %v3448_v35, 0.0  ;;  %v3552_v51 = vsel %vm1384_vm7, %v3446_v47, 0.0 }
 0xa53   : > { %v3486_v38 = vsel %vm1384_vm7, %v3456_v24, 0.0  ;;  %v3501_v9 = vsel %vm1384_vm7, %v3461_v18, 0.0 }
 0xa55   : > { %3538 = vadd.xlane.f32.xlu1 %v3537_v12  ;;  %v3495_v12 = vsel %vm1384_vm7, %v3459_v29, 0.0 }
 0xa56   : > { %3547 = vadd.xlane.f32.xlu0 %v3546_v59  ;;  %v3462_v59 = vmul.f32 %v3446_v47, %v3446_v47 }
 0xa58   : > { %v3504_v33 = vsel %vm1384_vm7, %v3462_v59, 0.0 }
 0xa59   : > { %3490 = vadd.xlane.f32.xlu1 %v3489_v49  ;;  %v3464_v49 = vmul.f32 %v3448_v35, %v3448_v35 }
 0xa5a   : > { %3541 = vadd.xlane.f32.xlu0 %v3540_v42  ;;  %v3578_v42 = vmul.f32 2.0, %v3518_v60 }
 0xa5b   : > { %v3510_v10 = vsel %vm1384_vm7, %v3464_v49, 0.0 }
 0xa5c   : > { %v3594_v46 = vadd.f32 1e-12, %v3578_v42 }
 0xa5d   : > { %3556 = vadd.xlane.f32.xlu1 %v3555_v23 }
 0xa5e   : > { %3493 = vadd.xlane.f32.xlu0 %v3492_v2  ;;  %5522 = vrcp.f32 %v3594_v46 }
 0xa61   : > { %3550 = vadd.xlane.f32.xlu1 %v3549_v55 }
 0xa62   : > { %3559 = vadd.xlane.f32.xlu0 %v3558_v43 }
 0xa65   : > { %3472 = vadd.xlane.f32.xlu1 %v3471_v53  ;;  %v9421_v53 = vld [vmem:[#allocation39_spill] sm:$0xff] }
 0xa66   : > { %3553 = vadd.xlane.f32.xlu0 %v3552_v51  ;;  %v9422_v51 = vld [vmem:[#allocation23_spill] sm:$0xff] }
 0xa68   : > { %v5523_v22 = vpop.eup %5522 }
 0xa69   : > { %3487 = vadd.xlane.f32.xlu1 %v3486_v38 }
 0xa6a   : > { %3484 = vadd.xlane.f32.xlu0 %v3483_v56 }
 0xa6d   : > { %3496 = vadd.xlane.f32.xlu1 %v3495_v12 }
 0xa6e   : > { %3475 = vadd.xlane.f32.xlu0 %v3474_v37 }
 0xa71   : > { %3502 = vadd.xlane.f32.xlu1 %v3501_v9 }
 0xa72   : > { %3499 = vadd.xlane.f32.xlu0 %v3498_v45 }
 0xa75   : > { %3508 = vadd.xlane.f32.xlu1 %v3507_v39 }
 0xa76   : > { %3505 = vadd.xlane.f32.xlu0 %v3504_v33 }
 0xa7a   : > { %3511 = vadd.xlane.f32.xlu0 %v3510_v10 }
 0xaca   : > { %v3521_v14 = vpop.xlane.xlu1 %3520 }
 0xacb   : > { %v3524_v50 = vpop.xlane.xlu0 %3523  ;;  %v3579_v9 = vmul.f32 2.0, %v3521_v14 }
 0xacc   : > { %v3580_v60 = vmul.f32 2.0, %v3524_v50 }
 0xacd   : > { %v3595_v39 = vadd.f32 1e-12, %v3579_v9 }
 0xace   : > { %v3515_v23 = vpop.xlane.xlu1 %3514  ;;  %v3596_v14 = vadd.f32 1e-12, %v3580_v60 }
 0xacf   : > { %v3530_v36 = vpop.xlane.xlu0 %3529  ;;  %v3577_v29 = vmul.f32 2.0, %v3515_v23 }
 0xad0   : > { %v3582_v45 = vmul.f32 2.0, %v3530_v36 }
 0xad1   : > { %v3593_v37 = vadd.f32 1e-12, %v3577_v29 }
 0xad2   : > { %v3470_v2 = vpop.xlane.xlu1 %3469  ;;  %v3598_v49 = vadd.f32 1e-12, %v3582_v45 }
 0xad3   : > { %v5073_v31 = vadd.f32 -1.0, %v3470_v2  ;;  %v3533_v55 = vpop.xlane.xlu0 %3532  ;;  %5524 = vrcp.f32 %v3593_v37 }
 0xad4   : > { %5526 = vrcp.f32 %v3595_v39  ;;  %v3583_v23 = vmul.f32 2.0, %v3533_v55 }
 0xad5   : > { %v3626_v43 = vmul.f32 %v5523_v22, %v5073_v31  ;;  %5528 = vrcp.f32 %v3598_v49 }
 0xad6   : > { %v3467_v47 = vpop.xlane.xlu1 %3466  ;;  %v3599_v29 = vadd.f32 1e-12, %v3583_v23  ;;  %5530 = vrcp.f32 %v3596_v14 }
 0xad7   : > { %v8580_v35 = vadd.f32 %v3626_v43, %v9421_v53  ;;  %v3527_v24 = vpop.xlane.xlu0 %3526  ;;  %v5072_v43 = vadd.f32 -1.0, %v3467_v47 }
 0xad8   : > { %v3581_v31 = vmul.f32 2.0, %v3527_v24 }
 0xad9   : > { %v3658_v44 = vsub.f32 %v9422_v51, %v8580_v35 }
 0xada   : > { %v3536_v38 = vpop.xlane.xlu1 %3535  ;;  %v3597_v50 = vadd.f32 1e-12, %v3581_v31 }
 0xadb   : > { %v8584_v56 = vmax.f32 %v3658_v44, 0.0  ;;  %v3482_v26 = vpop.xlane.xlu0 %3481  ;;  %v3584_v42 = vmul.f32 2.0, %v3536_v38 }
 0xadd   : > { %v3756_v12 = vsel %vm1384_vm7, %v8584_v56, 0.0  ;;  %v5525_v22 = vpop.eup %5524  ;;  %v3600_v53 = vadd.f32 1e-12, %v3584_v42 }
 0xade   : > { %3757 = vadd.xlane.f32.xlu1 %v3756_v12  ;;  %v3545_v18 = vpop.xlane.xlu1 %3544  ;;  %v3625_v9 = vmul.f32 %v5525_v22, %v5072_v43  ;;  %v5527_v49 = vpop.eup %5526 }
 0xadf   : > { %v8588_v6 = vpop.xlane.xlu0 %3478  ;;  %v3587_v36 = vmul.f32 2.0, %v3545_v18  ;;  %5532 = vrcp.f32 %v3600_v53  ;;  %v5077_v18 = vadd.f32 -1.0, %v3482_v26 }
 0xae0   : > { %5534 = vrcp.f32 %v3599_v29  ;;  %v8599_v47 = vadd.f32 %v3625_v9, %v8448_v15 }
 0xae1   : > { %v3603_v38 = vadd.f32 1e-12, %v3587_v36  ;;  %5536 = vrcp.f32 %v3597_v50 }
 0xae2   : > { %v3539_v40 = vpop.xlane.xlu1 %3538  ;;  %v3657_v14 = vsub.f32 %v6125_v8, %v8599_v47 }
 0xae3   : > { %v3548_v59 = vpop.xlane.xlu0 %3547  ;;  %v3585_v12 = vmul.f32 2.0, %v3539_v40  ;;  %v5529_v40 = vpop.eup %5528  ;;  %5538 = vrcp.f32 %v3603_v38 }
 0xae4   : > { %v3630_v22 = vmul.f32 %v5529_v40, %v5077_v18  ;;  %v5531_v29 = vpop.eup %5530 }
 0xae5   : > { %v3601_v55 = vadd.f32 1e-12, %v3585_v12  ;;  %v3588_v12 = vmul.f32 2.0, %v3548_v59 }
 0xae6   : > { %v8590_v33 = vpop.xlane.xlu1 %3490 }
 0xae7   : > { %v3542_v10 = vpop.xlane.xlu0 %3541  ;;  %5540 = vrcp.f32 %v3601_v55 }
 0xae9   : > { %v5533_v38 = vpop.eup %5532 }
 0xaea   : > { %v3557_v46 = vpop.xlane.xlu1 %3556 }
 0xaeb   : > { %v8592_v2 = vpop.xlane.xlu0 %3493  ;;  %v3591_v53 = vmul.f32 2.0, %v3557_v46 }
 0xaee   : > { %v3551_v44 = vpop.xlane.xlu1 %3550 }
 0xaef   : > { %v8594_v37 = vpop.xlane.xlu0 %3559 }
 0xaf2   : > { %v3473_v45 = vpop.xlane.xlu1 %3472 }
 0xaf3   : > { %v5074_v39 = vadd.f32 -1.0, %v3473_v45  ;;  %v8596_v24 = vpop.xlane.xlu0 %3553  ;;  %v3673_v45 = vmax.f32 %v3657_v14, 0.0 }
 0xaf5   : > { %v3627_v60 = vmul.f32 %v5527_v49, %v5074_v39  ;;  %v5535_v39 = vpop.eup %5534  ;;  %v3586_v49 = vmul.f32 2.0, %v3542_v10  ;;  %v5080_v10 = vadd.f32 -1.0, %v8590_v33 }
 0xaf6   : > { %v3488_v42 = vpop.xlane.xlu1 %3487 }
 0xaf7   : > { %v8602_v23 = vadd.f32 %v3627_v60, %v8454_v32  ;;  %v3485_v31 = vpop.xlane.xlu0 %3484  ;;  %v5079_v43 = vadd.f32 -1.0, %v3488_v42  ;;  %v8611_v32 = vadd.f32 %v3630_v22, %v8451_v17  ;;  %v5537_v60 = vpop.eup %5536  ;;  %v3607_v42 = vadd.f32 1e-12, %v3591_v53 }
 0xaf8   : > { %v5078_v26 = vadd.f32 -1.0, %v3485_v31  ;;  %v3589_v31 = vmul.f32 2.0, %v3551_v44  ;;  %v3690_v17 = vmul.f32 %v8584_v56, %v8584_v56  ;;  %v5539_v22 = vpop.eup %5538 }
 0xaf9   : > { %9423 = vst [vmem:[#allocation24_spill] sm:$0xff] %v8602_v23  ;;  %v3659_v15 = vsub.f32 %v6116_v48, %v8602_v23  ;;  %v3632_v18 = vmul.f32 %v5533_v38, %v5079_v43  ;;  %v5076_v48 = vadd.f32 -1.0, %v8588_v6  ;;  %v3604_v23 = vadd.f32 1e-12, %v3588_v12  ;;  %v5541_v53 = vpop.eup %5540 }
 0xafa   : > { %v3497_v36 = vpop.xlane.xlu1 %3496  ;;  %v3631_v59 = vmul.f32 %v5535_v39, %v5078_v26  ;;  %v3753_v43 = vsel %vm1384_vm7, %v3673_v45, 0.0  ;;  %v3662_v44 = vsub.f32 %v6133_v41, %v8611_v32  ;;  %5542 = vrcp.f32 %v3607_v42 }
 0xafb   : > { %v8608_v9 = vmax.f32 %v3659_v15, 0.0  ;;  %v3476_v50 = vpop.xlane.xlu0 %3475  ;;  %v5082_v40 = vadd.f32 -1.0, %v3497_v36  ;;  %v3629_v26 = vmul.f32 %v5537_v60, %v5076_v48  ;;  %v8626_v6 = vadd.f32 %v3632_v18, %v8490_v20 }
 0xafc   : > { %v5075_v55 = vadd.f32 -1.0, %v3476_v50  ;;  %v3605_v56 = vadd.f32 1e-12, %v3589_v31  ;;  %v8629_v33 = vadd.f32 %v3631_v59, %v8466_v16  ;;  %5544 = vrcp.f32 %v3604_v23 }
 0xafd   : > { %v3759_v46 = vsel %vm1384_vm7, %v8608_v9, 0.0  ;;  %v3635_v12 = vmul.f32 %v5539_v22, %v5082_v40  ;;  %v3633_v50 = vmul.f32 %v5541_v53, %v5080_v10  ;;  %v3708_v38 = vsel %vm1384_vm7, %v3690_v17, 0.0 }
 0xafe   : > { %3760 = vadd.xlane.f32.xlu1 %v3759_v46  ;;  %v3628_v15 = vmul.f32 %v5531_v29, %v5075_v55  ;;  %v3503_v14 = vpop.xlane.xlu1 %3502  ;;  %v3602_v29 = vadd.f32 1e-12, %v3586_v49  ;;  %v3678_v48 = vmax.f32 %v3662_v44, 0.0  ;;  %v3689_v39 = vmul.f32 %v3673_v45, %v3673_v45 }
 0xaff   : > { %v8637_v20 = vadd.f32 %v3635_v12, %v8498_v30  ;;  %v3664_v16 = vsub.f32 %v6136_v52, %v8626_v6  ;;  %v8642_v49 = vadd.f32 %v3629_v26, %v8473_v28  ;;  %v3663_v40 = vsub.f32 %v6140_v57, %v8629_v33  ;;  %v3500_v30 = vpop.xlane.xlu0 %3499 }
 0xb00   : > { %v8621_v36 = vadd.f32 %v3628_v15, %v8457_v34  ;;  %5546 = vrcp.f32 %v3602_v29  ;;  %v3592_v46 = vmul.f32 2.0, %v8594_v37  ;;  %v8650_v45 = vadd.f32 %v3633_v50, %v8506_v13 }
 0xb01   : > { %5548 = vrcp.f32 %v3605_v56  ;;  %v3705_v28 = vsel %vm1384_vm7, %v3689_v39, 0.0  ;;  %v8653_v42 = vmax.f32 %v3664_v16, 0.0  ;;  %v3667_v31 = vsub.f32 %v9405_v11, %v8637_v20 }
 0xb02   : > { %3754 = vadd.xlane.f32.xlu1 %v3753_v43  ;;  %v3660_v34 = vsub.f32 %v6114_v58, %v8621_v36  ;;  %v3509_v18 = vpop.xlane.xlu1 %3508  ;;  %v5083_v59 = vadd.f32 -1.0, %v3500_v30  ;;  %v3768_v15 = vsel %vm1384_vm7, %v3678_v48, 0.0  ;;  %v8658_v17 = vmax.f32 %v3663_v40, 0.0 }
 0xb03   : > { %v5086_v60 = vadd.f32 -1.0, %v3509_v18  ;;  %v3661_v37 = vsub.f32 %v6144_v63, %v8642_v49  ;;  %v3608_v22 = vadd.f32 1e-12, %v3592_v46  ;;  %v3590_v13 = vmul.f32 2.0, %v8596_v24  ;;  %v3506_v29 = vpop.xlane.xlu0 %3505 }
 0xb04   : > { %v8634_v55 = vmax.f32 %v3660_v34, 0.0  ;;  %v5543_v10 = vpop.eup %5542  ;;  %v3665_v43 = vsub.f32 %v9416_v61, %v8650_v45  ;;  %v5084_v53 = vadd.f32 -1.0, %v3503_v14  ;;  %v3774_v12 = vsel %vm1384_vm7, %v8653_v42, 0.0 }
 0xb05   : > { %v3639_v26 = vmul.f32 %v5543_v10, %v5086_v60  ;;  %v8667_v56 = vmax.f32 %v3667_v31, 0.0  ;;  %v3771_v50 = vsel %vm1384_vm7, %v8658_v17, 0.0  ;;  %v3677_v24 = vmax.f32 %v3661_v37, 0.0 }
 0xb06   : > { %3709 = vadd.xlane.f32.xlu1 %v3708_v38  ;;  %v3762_v23 = vsel %vm1384_vm7, %v8634_v55, 0.0  ;;  %v5545_v44 = vpop.eup %5544  ;;  %5550 = vrcp.f32 %v3608_v22  ;;  %v3606_v39 = vadd.f32 1e-12, %v3590_v13  ;;  %v5081_v14 = vadd.f32 -1.0, %v8592_v2 }
 0xb07   : > { %3763 = vadd.xlane.f32.xlu0 %v3762_v23  ;;  %v3636_v34 = vmul.f32 %v5545_v44, %v5083_v59  ;;  %v8673_v23 = vadd.f32 %v3639_v26, %v8530_v3  ;;  %v3783_v40 = vsel %vm1384_vm7, %v8667_v56, 0.0  ;;  %v3681_v46 = vmax.f32 %v3665_v43, 0.0  ;;  %v3512_v59 = vpop.xlane.xlu0 %3511 }
 0xb08   : > { %v3694_v31 = vmul.f32 %v3678_v48, %v3678_v48  ;;  %5552 = vrcp.f32 %v3606_v39  ;;  %v3693_v2 = vmul.f32 %v3677_v24, %v3677_v24  ;;  %v5087_v13 = vadd.f32 -1.0, %v3512_v59 }
 0xb09   : > { %v8678_v60 = vadd.f32 %v3636_v34, %v8515_v62  ;;  %v3777_v3 = vsel %vm1384_vm7, %v3681_v46, 0.0  ;;  %v3697_v37 = vmul.f32 %v3681_v46, %v3681_v46  ;;  %v3671_v22 = vsub.f32 %v6183_v25, %v8673_v23 }
 0xb0a   : > { %3706 = vadd.xlane.f32.xlu1 %v3705_v28  ;;  %v5547_v38 = vpop.eup %5546  ;;  %v3765_v28 = vsel %vm1384_vm7, %v3677_v24, 0.0  ;;  %v3720_v48 = vsel %vm1384_vm7, %v3694_v31, 0.0  ;;  %v3717_v26 = vsel %vm1384_vm7, %v3693_v2, 0.0  ;;  %v3691_v46 = vmul.f32 %v8608_v9, %v8608_v9 }
 0xb0b   : > { %3769 = vadd.xlane.f32.xlu0 %v3768_v15  ;;  %v5549_v16 = vpop.eup %5548  ;;  %v3634_v30 = vmul.f32 %v5547_v38, %v5081_v14  ;;  %v3668_v10 = vsub.f32 %v9246_v54, %v8678_v60  ;;  %v3687_v44 = vmax.f32 %v3671_v22, 0.0  ;;  %v3696_v2 = vmul.f32 %v8653_v42, %v8653_v42 }
 0xb0c   : > { %v3637_v18 = vmul.f32 %v5549_v16, %v5084_v53  ;;  %v3711_v59 = vsel %vm1384_vm7, %v3691_v46, 0.0  ;;  %v3699_v22 = vmul.f32 %v8667_v56, %v8667_v56 }
 0xb0d   : > { %v8688_v62 = vadd.f32 %v3634_v30, %v8523_v4  ;;  %v3684_v34 = vmax.f32 %v3668_v10, 0.0  ;;  %v3795_v38 = vsel %vm1384_vm7, %v3687_v44, 0.0 }
 0xb0e   : > { %3775 = vadd.xlane.f32.xlu1 %v3774_v12  ;;  %v8682_v15 = vadd.f32 %v3637_v18, %v8536_v7  ;;  %v3729_v7 = vsel %vm1384_vm7, %v3697_v37, 0.0  ;;  %v5085_v12 = vadd.f32 -1.0, %v3506_v29  ;;  %v3726_v37 = vsel %vm1384_vm7, %v3696_v2, 0.0 }
 0xb0f   : > { %3772 = vadd.xlane.f32.xlu0 %v3771_v50  ;;  %v3666_v50 = vsub.f32 %v9411_v21, %v8688_v62  ;;  %v3786_v18 = vsel %vm1384_vm7, %v3684_v34, 0.0  ;;  %v3735_v42 = vsel %vm1384_vm7, %v3699_v22, 0.0 }
 0xb10   : > { %v5551_v43 = vpop.eup %5550  ;;  %v3669_v53 = vsub.f32 %v9419_v19, %v8682_v15 }
 0xb11   : > { %v3640_v4 = vmul.f32 %v5551_v43, %v5087_v13 }
 0xb12   : > { %3784 = vadd.xlane.f32.xlu1 %v3783_v40  ;;  %v5553_v24 = vpop.eup %5552  ;;  %v3685_v39 = vmax.f32 %v3669_v53, 0.0  ;;  %v3682_v40 = vmax.f32 %v3666_v50, 0.0 }
 0xb13   : > { %3766 = vadd.xlane.f32.xlu0 %v3765_v28  ;;  %v3638_v16 = vmul.f32 %v5553_v24, %v5085_v12  ;;  %v8701_v14 = vadd.f32 %v3640_v4, %v8542_v5  ;;  %v3692_v12 = vmul.f32 %v8634_v55, %v8634_v55  ;;  %v3700_v24 = vmul.f32 %v3684_v34, %v3684_v34 }
 0xb14   : > { %v3789_v29 = vsel %vm1384_vm7, %v3685_v39, 0.0  ;;  %v3780_v28 = vsel %vm1384_vm7, %v3682_v40, 0.0  ;;  %v3698_v31 = vmul.f32 %v3682_v40, %v3682_v40  ;;  %v3701_v10 = vmul.f32 %v3685_v39, %v3685_v39 }
 0xb15   : > { %v8708_v30 = vadd.f32 %v3638_v16, %v8549_v0  ;;  %v3672_v5 = vsub.f32 %v9378_v27, %v8701_v14  ;;  %v3714_v50 = vsel %vm1384_vm7, %v3692_v12, 0.0 }
 0xb16   : > { %3778 = vadd.xlane.f32.xlu1 %v3777_v3  ;;  %v3732_v3 = vsel %vm1384_vm7, %v3698_v31, 0.0  ;;  %v3741_v53 = vsel %vm1384_vm7, %v3701_v10, 0.0 }
 0xb17   : > { %3721 = vadd.xlane.f32.xlu0 %v3720_v48  ;;  %v3688_v9 = vmax.f32 %v3672_v5, 0.0  ;;  %v3670_v0 = vsub.f32 %v9417_v1, %v8708_v30 }
 0xb19   : > { %v3798_v13 = vsel %vm1384_vm7, %v3688_v9, 0.0  ;;  %v3686_v48 = vmax.f32 %v3670_v0, 0.0  ;;  %v3704_v39 = vmul.f32 %v3688_v9, %v3688_v9 }
 0xb1a   : > { %3730 = vadd.xlane.f32.xlu1 %v3729_v7  ;;  %v3695_v7 = vmul.f32 %v8658_v17, %v8658_v17  ;;  %v3738_v17 = vsel %vm1384_vm7, %v3700_v24, 0.0 }
 0xb1b   : > { %3718 = vadd.xlane.f32.xlu0 %v3717_v26  ;;  %v3792_v43 = vsel %vm1384_vm7, %v3686_v48, 0.0  ;;  %v3703_v26 = vmul.f32 %v3687_v44, %v3687_v44  ;;  %v3750_v16 = vsel %vm1384_vm7, %v3704_v39, 0.0 }
 0xb1c   : > { %v3723_v56 = vsel %vm1384_vm7, %v3695_v7, 0.0 }
 0xb1d   : > { %v3747_v4 = vsel %vm1384_vm7, %v3703_v26, 0.0 }
 0xb1e   : > { %3796 = vadd.xlane.f32.xlu1 %v3795_v38  ;;  %v3702_v38 = vmul.f32 %v3686_v48, %v3686_v48 }
 0xb1f   : > { %3787 = vadd.xlane.f32.xlu0 %v3786_v18 }
 0xb20   : > { %v3744_v44 = vsel %vm1384_vm7, %v3702_v38, 0.0 }
 0xb22   : > { %3790 = vadd.xlane.f32.xlu1 %v3789_v29 }
 0xb23   : > { %3781 = vadd.xlane.f32.xlu0 %v3780_v28 }
 0xb26   : > { %3712 = vadd.xlane.f32.xlu1 %v3711_v59 }
 0xb27   : > { %3733 = vadd.xlane.f32.xlu0 %v3732_v3 }
 0xb2a   : > { %3727 = vadd.xlane.f32.xlu1 %v3726_v37 }
 0xb2b   : > { %3799 = vadd.xlane.f32.xlu0 %v3798_v13 }
 0xb2e   : > { %3736 = vadd.xlane.f32.xlu1 %v3735_v42 }
 0xb2f   : > { %3793 = vadd.xlane.f32.xlu0 %v3792_v43 }
 0xb32   : > { %3742 = vadd.xlane.f32.xlu1 %v3741_v53 }
 0xb33   : > { %3724 = vadd.xlane.f32.xlu0 %v3723_v56 }
 0xb36   : > { %3748 = vadd.xlane.f32.xlu1 %v3747_v4 }
 0xb37   : > { %3715 = vadd.xlane.f32.xlu0 %v3714_v50 }
 0xb3b   : > { %3739 = vadd.xlane.f32.xlu0 %v3738_v17 }
 0xb3f   : > { %3745 = vadd.xlane.f32.xlu0 %v3744_v44 }
 0xb43   : > { %3751 = vadd.xlane.f32.xlu0 %v3750_v16 }
 0xb6b   : > { %v3758_v55 = vpop.xlane.xlu1 %3757 }
 0xb6c   : > { %v3818_v18 = vmul.f32 2.0, %v3758_v55 }
 0xb6e   : > { %v3834_v40 = vadd.f32 1e-12, %v3818_v18 }
 0xb70   : > { %5554 = vrcp.f32 %v3834_v40 }
 0xb7a   : > { %v5555_v5 = vpop.eup %5554 }
 0xb8b   : > { %v3761_v29 = vpop.xlane.xlu1 %3760 }
 0xb8c   : > { %v3819_v26 = vmul.f32 2.0, %v3761_v29 }
 0xb8e   : > { %v3835_v4 = vadd.f32 1e-12, %v3819_v26 }
 0xb8f   : > { %v3755_v46 = vpop.xlane.xlu1 %3754 }
 0xb90   : > { %v3817_v9 = vmul.f32 2.0, %v3755_v46 }
 0xb92   : > { %v3833_v42 = vadd.f32 1e-12, %v3817_v9 }
 0xb93   : > { %v3710_v28 = vpop.xlane.xlu1 %3709 }
 0xb94   : > { %v5089_v34 = vadd.f32 -1.0, %v3710_v28  ;;  %v3764_v31 = vpop.xlane.xlu0 %3763  ;;  %5556 = vrcp.f32 %v3833_v42 }
 0xb95   : > { %5558 = vrcp.f32 %v3835_v4  ;;  %v3820_v42 = vmul.f32 2.0, %v3764_v31 }
 0xb96   : > { %v3866_v59 = vmul.f32 %v5555_v5, %v5089_v34 }
 0xb97   : > { %v3707_v2 = vpop.xlane.xlu1 %3706 }
 0xb98   : > { %v3882_v3 = vadd.f32 %v3866_v59, %v8580_v35  ;;  %v3770_v0 = vpop.xlane.xlu0 %3769  ;;  %v5088_v40 = vadd.f32 -1.0, %v3707_v2 }
 0xb99   : > { %v3822_v17 = vmul.f32 2.0, %v3770_v0 }
 0xb9a   : > { %v3898_v37 = vsub.f32 %v9422_v51, %v3882_v3 }
 0xb9b   : > { %v3776_v22 = vpop.xlane.xlu1 %3775  ;;  %v3838_v46 = vadd.f32 1e-12, %v3822_v17  ;;  %v3836_v17 = vadd.f32 1e-12, %v3820_v42 }
 0xb9c   : > { %v3914_v13 = vmax.f32 %v3898_v37, 0.0  ;;  %v3773_v48 = vpop.xlane.xlu0 %3772  ;;  %v3824_v50 = vmul.f32 2.0, %v3776_v22 }
 0xb9d   : > { %v3823_v34 = vmul.f32 2.0, %v3773_v48 }
 0xb9e   : > { %v8738_v10 = vmul.f32 %v3914_v13, %v3914_v13  ;;  %v3840_v44 = vadd.f32 1e-12, %v3824_v50  ;;  %v5557_v55 = vpop.eup %5556 }
 0xb9f   : > { %v3785_v43 = vpop.xlane.xlu1 %3784  ;;  %v3865_v29 = vmul.f32 %v5557_v55, %v5088_v40  ;;  %v3839_v37 = vadd.f32 1e-12, %v3823_v34  ;;  %v5559_v26 = vpop.eup %5558 }
 0xba0   : > { %v3948_v7 = vsel %vm1384_vm7, %v8738_v10, 0.0  ;;  %v3767_v53 = vpop.xlane.xlu0 %3766  ;;  %v3827_v39 = vmul.f32 2.0, %v3785_v43 }
 0xba1   : > { %3949 = vadd.xlane.f32.xlu1 %v3948_v7  ;;  %v3821_v59 = vmul.f32 2.0, %v3767_v53  ;;  %v3881_v0 = vadd.f32 %v3865_v29, %v8599_v47  ;;  %v9424_v47 = vld [vmem:[#allocation24_spill] sm:$0xff]  ;;  %v9425_v29 = vld [vmem:[#allocation22_spill] sm:$0xff] }
 0xba2   : > { %v3843_v28 = vadd.f32 1e-12, %v3827_v39 }
 0xba3   : > { %v3779_v56 = vpop.xlane.xlu1 %3778  ;;  %v3837_v43 = vadd.f32 1e-12, %v3821_v59  ;;  %v3897_v4 = vsub.f32 %v6125_v8, %v3881_v0 }
 0xba4   : > { %v3722_v35 = vpop.xlane.xlu0 %3721  ;;  %v3825_v12 = vmul.f32 2.0, %v3779_v56 }
 0xba5   : > { %v5093_v55 = vadd.f32 -1.0, %v3722_v35  ;;  %v3913_v8 = vmax.f32 %v3897_v4, 0.0 }
 0xba6   : > { %v3841_v38 = vadd.f32 1e-12, %v3825_v12 }
 0xba7   : > { %v3731_v51 = vpop.xlane.xlu1 %3730 }
 0xba8   : > { %v8742_v24 = vpop.xlane.xlu0 %3718  ;;  %5560 = vrcp.f32 %v3841_v38 }
 0xba9   : > { %5562 = vrcp.f32 %v3840_v44 }
 0xbaa   : > { %5564 = vrcp.f32 %v3838_v46 }
 0xbab   : > { %v3797_v16 = vpop.xlane.xlu1 %3796  ;;  %5566 = vrcp.f32 %v3843_v28 }
 0xbac   : > { %v3788_v18 = vpop.xlane.xlu0 %3787  ;;  %v3831_v22 = vmul.f32 2.0, %v3797_v16  ;;  %5568 = vrcp.f32 %v3839_v37  ;;  %v5096_v16 = vadd.f32 -1.0, %v3731_v51 }
 0xbad   : > { %5570 = vrcp.f32 %v3837_v43  ;;  %v3828_v40 = vmul.f32 2.0, %v3788_v18 }
 0xbae   : > { %v3847_v48 = vadd.f32 1e-12, %v3831_v22 }
 0xbaf   : > { %v3791_v5 = vpop.xlane.xlu1 %3790  ;;  %v3844_v51 = vadd.f32 1e-12, %v3828_v40 }
 0xbb0   : > { %v3782_v3 = vpop.xlane.xlu0 %3781  ;;  %v3829_v9 = vmul.f32 2.0, %v3791_v5 }
 0xbb1   : > { %v3826_v5 = vmul.f32 2.0, %v3782_v3 }
 0xbb2   : > { %v3845_v56 = vadd.f32 1e-12, %v3829_v9  ;;  %v5561_v50 = vpop.eup %5560 }
 0xbb3   : > { %v3713_v13 = vpop.xlane.xlu1 %3712  ;;  %v5563_v31 = vpop.eup %5562  ;;  %v3873_v34 = vmul.f32 %v5561_v50, %v5096_v16  ;;  %v3842_v3 = vadd.f32 1e-12, %v3826_v5 }
 0xbb4   : > { %v5090_v2 = vadd.f32 -1.0, %v3713_v13  ;;  %v8745_v7 = vpop.xlane.xlu0 %3733  ;;  %5572 = vrcp.f32 %v3845_v56  ;;  %v5565_v9 = vpop.eup %5564 }
 0xbb5   : > { %5574 = vrcp.f32 %v3847_v48  ;;  %v5567_v42 = vpop.eup %5566 }
 0xbb6   : > { %v3867_v12 = vmul.f32 %v5559_v26, %v5090_v2  ;;  %5576 = vrcp.f32 %v3836_v17  ;;  %v3889_v2 = vadd.f32 %v3873_v34, %v8650_v45  ;;  %v3870_v26 = vmul.f32 %v5565_v9, %v5093_v55  ;;  %v5569_v50 = vpop.eup %5568 }
 0xbb7   : > { %v3728_v53 = vpop.xlane.xlu1 %3727  ;;  %5578 = vrcp.f32 %v3844_v51 }
 0xbb8   : > { %v3883_v38 = vadd.f32 %v3867_v12, %v9424_v47  ;;  %v5095_v44 = vadd.f32 -1.0, %v3728_v53  ;;  %v3800_v39 = vpop.xlane.xlu0 %3799  ;;  %v8755_v12 = vmul.f32 %v3913_v8, %v3913_v8  ;;  %5580 = vrcp.f32 %v3842_v3 }
 0xbb9   : > { %v3905_v55 = vsub.f32 %v9416_v61, %v3889_v2  ;;  %v3832_v9 = vmul.f32 2.0, %v3800_v39 }
 0xbba   : > { %v3872_v46 = vmul.f32 %v5563_v31, %v5095_v44  ;;  %v3899_v28 = vsub.f32 %v9425_v29, %v3883_v38  ;;  %v5571_v38 = vpop.eup %5570  ;;  %v3886_v31 = vadd.f32 %v3870_v26, %v8611_v32 }
 0xbbb   : > { %v3737_v59 = vpop.xlane.xlu1 %3736 }
 0xbbc   : > { %v3888_v0 = vadd.f32 %v3872_v46, %v8626_v6  ;;  %v5098_v37 = vadd.f32 -1.0, %v3737_v59  ;;  %v3915_v22 = vmax.f32 %v3899_v28, 0.0  ;;  %v3794_v13 = vpop.xlane.xlu0 %3793  ;;  %v5092_v59 = vadd.f32 -1.0, %v8742_v24 }
 0xbbd   : > { %v3902_v61 = vsub.f32 %v6133_v41, %v3886_v31 }
 0xbbe   : > { %v3875_v43 = vmul.f32 %v5567_v42, %v5098_v37  ;;  %v8751_v35 = vmul.f32 %v3915_v22, %v3915_v22  ;;  %v3904_v18 = vsub.f32 %v6136_v52, %v3888_v0  ;;  %v3830_v52 = vmul.f32 2.0, %v3794_v13  ;;  %v5573_v44 = vpop.eup %5572 }
 0xbbf   : > { %v3743_v56 = vpop.xlane.xlu1 %3742  ;;  %v5575_v5 = vpop.eup %5574  ;;  %v3869_v22 = vmul.f32 %v5571_v38, %v5092_v59  ;;  %v3921_v42 = vmax.f32 %v3905_v55, 0.0 }
 0xbc0   : > { %v3891_v48 = vadd.f32 %v3875_v43, %v8637_v20  ;;  %v5100_v6 = vadd.f32 -1.0, %v3743_v56  ;;  %v3951_v53 = vsel %vm1384_vm7, %v8751_v35, 0.0  ;;  %v3725_v4 = vpop.xlane.xlu0 %3724  ;;  %v3920_v47 = vmax.f32 %v3904_v18, 0.0  ;;  %v5577_v32 = vpop.eup %5576 }
 0xbc1   : > { %3952 = vadd.xlane.f32.xlu1 %v3951_v53  ;;  %v5094_v17 = vadd.f32 -1.0, %v3725_v4  ;;  %v3945_v20 = vsel %vm1384_vm7, %v8755_v12, 0.0  ;;  %v3846_v37 = vadd.f32 1e-12, %v3830_v52  ;;  %v3848_v56 = vadd.f32 1e-12, %v3832_v9 }
 0xbc2   : > { %v3907_v45 = vsub.f32 %v9405_v11, %v3891_v48  ;;  %v3877_v40 = vmul.f32 %v5573_v44, %v5100_v6  ;;  %v8765_v29 = vmul.f32 %v3920_v47, %v3920_v47  ;;  %v3918_v48 = vmax.f32 %v3902_v61, 0.0  ;;  %v5579_v6 = vpop.eup %5578 }
 0xbc3   : > { %v3749_v16 = vpop.xlane.xlu1 %3748  ;;  %v3871_v11 = vmul.f32 %v5569_v50, %v5094_v17  ;;  %5582 = vrcp.f32 %v3846_v37  ;;  %v8782_v4 = vmul.f32 %v3921_v42, %v3921_v42  ;;  %v5581_v17 = vpop.eup %5580 }
 0xbc4   : > { %v5102_v46 = vadd.f32 -1.0, %v3749_v16  ;;  %v3716_v28 = vpop.xlane.xlu0 %3715  ;;  %v3923_v34 = vmax.f32 %v3907_v45, 0.0  ;;  %v3893_v51 = vadd.f32 %v3877_v40, %v8682_v15  ;;  %v3966_v18 = vsel %vm1384_vm7, %v8765_v29, 0.0 }
 0xbc5   : > { %3946 = vadd.xlane.f32.xlu1 %v3945_v20  ;;  %v5091_v8 = vadd.f32 -1.0, %v3716_v28  ;;  %v3887_v26 = vadd.f32 %v3871_v11, %v8629_v33  ;;  %v3885_v15 = vadd.f32 %v3869_v22, %v8642_v49  ;;  %v5097_v49 = vadd.f32 -1.0, %v8745_v7 }
 0xbc6   : > { %v3879_v0 = vmul.f32 %v5575_v5, %v5102_v46  ;;  %v8773_v24 = vmul.f32 %v3923_v34, %v3923_v34  ;;  %5584 = vrcp.f32 %v3848_v56  ;;  %v8789_v52 = vmul.f32 %v3918_v48, %v3918_v48 }
 0xbc7   : > { %v3868_v13 = vmul.f32 %v5577_v32, %v5091_v8  ;;  %v3901_v45 = vsub.f32 %v6144_v63, %v3885_v15  ;;  %v3874_v44 = vmul.f32 %v5581_v17, %v5097_v49  ;;  %v3969_v31 = vsel %vm1384_vm7, %v8782_v4, 0.0 }
 0xbc8   : > { %v3895_v43 = vadd.f32 %v3879_v0, %v8673_v23  ;;  %v3740_v2 = vpop.xlane.xlu0 %3739  ;;  %v3975_v53 = vsel %vm1384_vm7, %v8773_v24, 0.0  ;;  %v3960_v63 = vsel %vm1384_vm7, %v8789_v52, 0.0 }
 0xbc9   : > { %3967 = vadd.xlane.f32.xlu1 %v3966_v18  ;;  %v3884_v39 = vadd.f32 %v3868_v13, %v8621_v36  ;;  %v5099_v3 = vadd.f32 -1.0, %v3740_v2  ;;  %v3909_v36 = vsub.f32 %v9419_v19, %v3893_v51  ;;  %v3890_v28 = vadd.f32 %v3874_v44, %v8688_v62  ;;  %v9426_v51 = vld [vmem:[#allocation8_spill] sm:$0xff]  ;;  %v9428_v18 = vld [vmem:[#allocation6_spill] sm:$0xff] }
 0xbca   : > { %v3911_v41 = vsub.f32 %v6183_v25, %v3895_v43  ;;  %v3903_v25 = vsub.f32 %v6140_v57, %v3887_v26  ;;  %v9427_v43 = vld [vmem:[#allocation12_spill] sm:$0xff]  ;;  %v9429_v2 = vld [vmem:[#allocation10_spill] sm:$0xff] }
 0xbcb   : > { %v3900_v23 = vsub.f32 %v6114_v58, %v3884_v39  ;;  %v3876_v47 = vmul.f32 %v5579_v6, %v5099_v3  ;;  %v3925_v16 = vmax.f32 %v3909_v36, 0.0  ;;  %v3906_v62 = vsub.f32 %v9411_v21, %v3890_v28  ;;  %v9432_v6 = vld [vmem:[#allocation17_spill] sm:$0xff] }
 0xbcc   : > { %v3746_v33 = vpop.xlane.xlu0 %3745  ;;  %v3927_v50 = vmax.f32 %v3911_v41, 0.0  ;;  %v3919_v55 = vmax.f32 %v3903_v25, 0.0  ;;  %v4078_v26 = vadd.f32 %v9429_v2, %v9428_v18  ;;  %v9430_v41 = vld [vmem:[#allocation13_spill] sm:$0xff] }
 0xbcd   : > { %3976 = vadd.xlane.f32.xlu1 %v3975_v53  ;;  %v3916_v38 = vmax.f32 %v3900_v23, 0.0  ;;  %v3892_v20 = vadd.f32 %v3876_v47, %v8678_v60  ;;  %v5101_v57 = vadd.f32 -1.0, %v3746_v33  ;;  %v5583_v46 = vpop.eup %5582  ;;  %v8804_v5 = vmul.f32 %v3925_v16, %v3925_v16  ;;  %v9431_v23 = vld [vmem:[#allocation14_spill] sm:$0xff] }
 0xbce   : > { %v8794_v19 = vmul.f32 %v3927_v50, %v3927_v50  ;;  %v3917_v60 = vmax.f32 %v3901_v45, 0.0  ;;  %v8806_v8 = vmul.f32 %v3919_v55, %v3919_v55  ;;  %v4086_v48 = vadd.f32 %v4078_v26, %v9431_v23  ;;  %v9433_v33 = vld [vmem:[#allocation18_spill] sm:$0xff]  ;;  %v9436_v55 = vld [vmem:[#allocation7_spill] sm:$0xff] }
 0xbcf   : > { %v8787_v58 = vmul.f32 %v3916_v38, %v3916_v38  ;;  %v3878_v59 = vmul.f32 %v5583_v46, %v5101_v57  ;;  %v3908_v32 = vsub.f32 %v9246_v54, %v3892_v20  ;;  %v3981_v0 = vsel %vm1384_vm7, %v8804_v5, 0.0  ;;  %v9434_v20 = vld [vmem:[#allocation5_spill] sm:$0xff]  ;;  %v9438_v46 = vld [vmem:[#allocation15_spill] sm:$0xff] }
 0xbd0   : > { %v3752_v40 = vpop.xlane.xlu0 %3751  ;;  %v3987_v34 = vsel %vm1384_vm7, %v8794_v19, 0.0  ;;  %v5585_v9 = vpop.eup %5584  ;;  %v8811_v37 = vmul.f32 %v3917_v60, %v3917_v60  ;;  %v3963_v42 = vsel %vm1384_vm7, %v8806_v8, 0.0  ;;  %v4079_v54 = vadd.f32 %v9427_v43, %v9426_v51  ;;  %v9435_v57 = vld [vmem:[#allocation9_spill] sm:$0xff] }
 0xbd1   : > { %3970 = vadd.xlane.f32.xlu1 %v3969_v31  ;;  %v3954_v7 = vsel %vm1384_vm7, %v8787_v58, 0.0  ;;  %v5103_v11 = vadd.f32 -1.0, %v3752_v40  ;;  %v3894_v22 = vadd.f32 %v3878_v59, %v8708_v30  ;;  %v3924_v61 = vmax.f32 %v3908_v32, 0.0  ;;  %v9437_v40 = vld [vmem:[#allocation11_spill] sm:$0xff]  ;;  %v9441_v32 = vld [vmem:[#allocation20_spill] sm:$0xff] }
 0xbd2   : > { %3955 = vadd.xlane.f32.xlu0 %v3954_v7  ;;  %v3957_v39 = vsel %vm1384_vm7, %v8811_v37, 0.0  ;;  %v3922_v30 = vmax.f32 %v3906_v62, 0.0  ;;  %v4087_v15 = vadd.f32 %v4079_v54, %v9430_v41  ;;  %v4094_v50 = vadd.f32 %v4086_v48, %v9433_v33  ;;  %v9440_v59 = vld [vmem:[#allocation19_spill] sm:$0xff] }
 0xbd3   : > { %v3880_v13 = vmul.f32 %v5585_v9, %v5103_v11  ;;  %v8824_v3 = vmul.f32 %v3924_v61, %v3924_v61  ;;  %v3910_v56 = vsub.f32 %v9417_v1, %v3894_v22  ;;  %v4080_v7 = vadd.f32 %v9435_v57, %v9434_v20 }
 0xbd4   : > { %v4095_v53 = vadd.f32 %v4087_v15, %v9432_v6  ;;  %v8833_v17 = vmul.f32 %v3922_v30, %v3922_v30  ;;  %v4098_v1 = vmul.f32 0.25, %v4094_v50 }
 0xbd5   : > { %3988 = vadd.xlane.f32.xlu1 %v3987_v34  ;;  %v3896_v21 = vadd.f32 %v3880_v13, %v8701_v14  ;;  %v3978_v36 = vsel %vm1384_vm7, %v8824_v3, 0.0  ;;  %v3926_v14 = vmax.f32 %v3910_v56, 0.0  ;;  %v9439_v34 = vld [vmem:[#allocation16_spill] sm:$0xff] }
 0xbd6   : > { %3961 = vadd.xlane.f32.xlu0 %v3960_v63  ;;  %v4099_v38 = vmul.f32 0.25, %v4095_v53  ;;  %v3972_v25 = vsel %vm1384_vm7, %v8833_v17, 0.0  ;;  %v4081_v63 = vadd.f32 %v9437_v40, %v9436_v55  ;;  %v4088_v60 = vadd.f32 %v4080_v7, %v9439_v34 }
 0xbd7   : > { %v3912_v47 = vsub.f32 %v9378_v27, %v3896_v21  ;;  %v8838_v49 = vmul.f32 %v3926_v14, %v3926_v14 }
 0xbd8   : > { %v5472_v44 = vpack.i.bf16 %v4099_v38, %v4098_v1  ;;  %v4089_v28 = vadd.f32 %v4081_v63, %v9438_v46  ;;  %v4096_v9 = vadd.f32 %v4088_v60, %v9441_v32 }
 0xbd9   : > { %3982 = vadd.xlane.f32.xlu1 %v3981_v0  ;;  %v3928_v45 = vmax.f32 %v3912_v47, 0.0  ;;  %v3984_v31 = vsel %vm1384_vm7, %v8838_v49, 0.0 }
 0xbda   : > { %3964 = vadd.xlane.f32.xlu0 %v3963_v42  ;;  %v4097_v11 = vadd.f32 %v4089_v28, %v9440_v59  ;;  %v4100_v62 = vmul.f32 0.25, %v4096_v9 }
 0xbdb   : > { %v8842_v16 = vmul.f32 %v3928_v45, %v3928_v45 }
 0xbdc   : > { %v4101_v0 = vmul.f32 0.25, %v4097_v11 }
 0xbdd   : > { %v3990_v27 = vsel %vm1384_vm7, %v8842_v16, 0.0 }
 0xbde   : > { %3958 = vadd.xlane.f32.xlu0 %v3957_v39  ;;  %v5477_v22 = vpack.i.bf16 %v4101_v0, %v4100_v62 }
 0xbe2   : > { %3979 = vadd.xlane.f32.xlu0 %v3978_v36 }
 0xbe6   : > { %3973 = vadd.xlane.f32.xlu0 %v3972_v25 }
 0xbea   : > { %5473 = vrot.lane.b32.xlu1 %v5472_v44, %s5687_s25  ;;  %3985 = vadd.xlane.f32.xlu0 %v3984_v31 }
 0xbee   : > { %3991 = vadd.xlane.f32.xlu0 %v3990_v27 }
 0xc04   : > { %5478 = vrot.lane.b32.xlu0 %v5477_v22, %s5687_s25  ;;  %s5116_s25 = sshll.u32 %s5670_s15, 1 }
 0xc05   : > { %s4637_s22 = scalar_lea.vmem %s9028_s10, %s5116_s25  ;;  %s4374_s19 = scalar_lea.vmem %s9023_s5, %s5116_s25 }
 0xc2e   : > { %v3950_v13 = vpop.xlane.xlu1 %3949 }
 0xc2f   : > { %v3994_v1 = vadd.f32 1e-30, %v3950_v13 }
 0xc4e   : > { %v3953_v42 = vpop.xlane.xlu1 %3952 }
 0xc4f   : > { %v3995_v2 = vadd.f32 1e-30, %v3953_v42 }
 0xc51   : > { %5586 = vrcp.f32 %v3995_v2 }
 0xc52   : > { %v3947_v61 = vpop.xlane.xlu1 %3946 }
 0xc53   : > { %v3993_v39 = vadd.f32 1e-30, %v3947_v61 }
 0xc55   : > { %5588 = vrcp.f32 %v3993_v39 }
 0xc56   : > { %v3968_v51 = vpop.xlane.xlu1 %3967 }
 0xc57   : > { %v4000_v25 = vadd.f32 1e-30, %v3968_v51 }
 0xc5a   : > { %v3977_v43 = vpop.xlane.xlu1 %3976 }
 0xc5b   : > { %v4003_v30 = vadd.f32 1e-30, %v3977_v43  ;;  %v5587_v44 = vpop.eup %5586 }
 0xc5c   : > { %v4027_v55 = vmul.f32 %v5587_v44, %v8751_v35 }
 0xc5d   : > { %5590 = vrcp.f32 %v4003_v30 }
 0xc5e   : > { %v3971_v54 = vpop.xlane.xlu1 %3970  ;;  %v4055_v35 = vsel %vm1384_vm7, %v4027_v55, 0.0 }
 0xc5f   : > { %v3956_v18 = vpop.xlane.xlu0 %3955  ;;  %v4001_v23 = vadd.f32 1e-30, %v3971_v54  ;;  %v5589_v27 = vpop.eup %5588 }
 0xc60   : > { %v3996_v31 = vadd.f32 1e-30, %v3956_v18  ;;  %v4025_v11 = vmul.f32 %v5589_v27, %v8755_v12 }
 0xc62   : > { %v3989_v26 = vpop.xlane.xlu1 %3988 }
 0xc63   : > { %v3962_v21 = vpop.xlane.xlu0 %3961  ;;  %v4007_v56 = vadd.f32 1e-30, %v3989_v26 }
 0xc64   : > { %v3998_v14 = vadd.f32 1e-30, %v3962_v21 }
 0xc65   : > { %5592 = vrcp.f32 %v4007_v56 }
 0xc66   : > { %v3983_v41 = vpop.xlane.xlu1 %3982 }
 0xc67   : > { %v3965_v15 = vpop.xlane.xlu0 %3964  ;;  %v4005_v6 = vadd.f32 1e-30, %v3983_v41  ;;  %v5591_v57 = vpop.eup %5590 }
 0xc68   : > { %v3999_v48 = vadd.f32 1e-30, %v3965_v15  ;;  %v4035_v28 = vmul.f32 %v5591_v57, %v8773_v24 }
 0xc6a   : > { %v5474_v53 = vpop.permute.xlu1 %5473  ;;  %5594 = vrcp.f32 %v3999_v48  ;;  %v4058_v42 = vsel %vm1384_vm7, %v4035_v28, 0.0 }
 0xc6b   : > { %v5476_v33 = vunpack.i.h.bf16 %v5474_v53  ;;  %v5475_v50 = vunpack.i.l.bf16 %v5474_v53  ;;  %v3959_v36 = vpop.xlane.xlu0 %3958  ;;  %5596 = vrcp.f32 %v4001_v23 }
 0xc6c   : > { %v3997_v47 = vadd.f32 1e-30, %v3959_v36  ;;  %5598 = vrcp.f32 %v4005_v6 }
 0xc6d   : > { %v5372_v38 = vpack.c.bf16 %v5476_v33, %v5475_v50 }
 0xc6e   : > { %5600 = vrcp.f32 %v3997_v47 }
 0xc6f   : > { %5373 = vmatprep.subr.bf16.mxu1 %v5372_v38  ;;  %v3980_v45 = vpop.xlane.xlu0 %3979  ;;  %5602 = vrcp.f32 %v3998_v14  ;;  %v5593_v7 = vpop.eup %5592 }
 0xc70   : > { %5375 = vmatpush3.bf16.msra.mxu1 %v5372_v38  ;;  %v4004_v20 = vadd.f32 1e-30, %v3980_v45  ;;  %5604 = vrcp.f32 %v3994_v1  ;;  %v4039_v9 = vmul.f32 %v5593_v7, %v8794_v19  ;;  %v4041_v19 = vsel %vm1384_vm7, %v4025_v11, 0.0 }
 0xc71   : > { %5606 = vrcp.f32 %v4000_v25 }
 0xc72   : > { %5608 = vrcp.f32 %v3996_v31  ;;  %v4060_v18 = vsel %vm1384_vm7, %v4039_v9, 0.0 }
 0xc73   : > { %v3974_v40 = vpop.xlane.xlu0 %3973  ;;  %5610 = vrcp.f32 %v4004_v20 }
 0xc74   : > { %v5595_v63 = vpop.eup %5594  ;;  %v4002_v46 = vadd.f32 1e-30, %v3974_v40 }
 0xc75   : > { %v4031_v34 = vmul.f32 %v5595_v63, %v8806_v8  ;;  %v5597_v60 = vpop.eup %5596 }
 0xc76   : > { %5612 = vrcp.f32 %v4002_v46  ;;  %v5599_v59 = vpop.eup %5598  ;;  %v4033_v24 = vmul.f32 %v5597_v60, %v8782_v4 }
 0xc77   : > { %v3986_v32 = vpop.xlane.xlu0 %3985  ;;  %v4056_v0 = vsel %vm1384_vm7, %v4031_v34, 0.0  ;;  %v4037_v43 = vmul.f32 %v5599_v59, %v8804_v5 }
 0xc78   : > { %v5601_v62 = vpop.eup %5600  ;;  %v4006_v22 = vadd.f32 1e-30, %v3986_v32  ;;  %v4057_v13 = vadd.f32 %v4056_v0, %v4055_v35  ;;  %v4044_v30 = vsel %vm1384_vm7, %v4033_v24, 0.0 }
 0xc79   : > { %v4029_v8 = vmul.f32 %v5601_v62, %v8811_v37  ;;  %v5603_v61 = vpop.eup %5602  ;;  %v4046_v6 = vsel %vm1384_vm7, %v4037_v43, 0.0 }
 0xc7a   : > { %5614 = vrcp.f32 %v4006_v22  ;;  %v4059_v51 = vadd.f32 %v4058_v42, %v4057_v13  ;;  %v5605_v2 = vpop.eup %5604  ;;  %v4030_v37 = vmul.f32 %v5603_v61, %v8789_v52  ;;  %v5113_v42 = vld [vmem:[%s4306_s24] ss:$0 sm:$0xff] }
 0xc7b   : > { %v3992_v12 = vpop.xlane.xlu0 %3991  ;;  %v4042_v54 = vsel %vm1384_vm7, %v4029_v8, 0.0  ;;  %v5607_v21 = vpop.eup %5606  ;;  %v4026_v23 = vmul.f32 %v5605_v2, %v8738_v10 }
 0xc7c   : > { %v4008_v26 = vadd.f32 1e-30, %v3992_v12  ;;  %v4043_v39 = vadd.f32 %v4042_v54, %v4041_v19  ;;  %v4061_v4 = vadd.f32 %v4060_v18, %v4059_v51  ;;  %v5609_v56 = vpop.eup %5608  ;;  %v4049_v47 = vsel %vm1384_vm7, %v4030_v37, 0.0  ;;  %v5634_v18 = vld [vmem:[#allocation2] sm:$0xff]  ;;  %v5636_v37 = vld [vmem:[#allocation2 + $0x8] sm:$0xff] }
 0xc7d   : > { %v5611_v5 = vpop.eup %5610  ;;  %v4028_v52 = vmul.f32 %v5609_v56, %v8787_v58  ;;  %v4048_v10 = vsel %vm1384_vm7, %v4026_v23, 0.0  ;;  %v4032_v45 = vmul.f32 %v5607_v21, %v8765_v29 }
 0xc7e   : > { %5616 = vrcp.f32 %v4008_v26  ;;  %v4045_v41 = vadd.f32 %v4044_v30, %v4043_v39  ;;  %v4072_v15 = vmul.f32 0.25, %v4061_v4  ;;  %v4036_v44 = vmul.f32 %v5611_v5, %v8824_v3  ;;  %v5635_v4 = vld [vmem:[#allocation2 + $0x10] sm:$0xff] }
 0xc7f   : > { %v5479_v48 = vpop.permute.xlu0 %5478  ;;  %v4050_v20 = vadd.f32 %v4049_v47, %v4048_v10  ;;  %v4063_v29 = vsel %vm1384_vm7, %v4032_v45, 0.0 }
 0xc80   : > { %v5613_v53 = vpop.eup %5612  ;;  %v5481_v33 = vunpack.i.h.bf16 %v5479_v48  ;;  %v5480_v50 = vunpack.i.l.bf16 %v5479_v48  ;;  %v4047_v36 = vadd.f32 %v4046_v6, %v4045_v41  ;;  %v5147_v14 = vpack.c.bf16 %v4072_v15, %v4072_v15  ;;  %v5637_v41 = vld [vmem:[#allocation2 + $0x18] sm:$0xff] }
 0xc81   : > { %v4034_v38 = vmul.f32 %v5613_v53, %v8833_v17  ;;  %v4062_v17 = vsel %vm1384_vm7, %v4028_v52, 0.0  ;;  %v4065_v3 = vsel %vm1384_vm7, %v4036_v44, 0.0 }
 0xc82   : > { %v5376_v1 = vpack.c.bf16 %v5481_v33, %v5480_v50  ;;  %v4070_v25 = vmul.f32 0.25, %v4047_v36  ;;  %4121 = vst.msk [vmem:[%s5806_s26 + $0x8] sm:$0xf] %vm4118_vm12, %v5147_v14  ;;  %v4064_v63 = vadd.f32 %v4063_v29, %v4062_v17  ;;  %v5485_v29 = vld [vmem:[%s5834_s27 + $0x8] sm:$0xff]  }
 0xc83   : > { %v4051_v31 = vsel %vm1384_vm7, %v4034_v38, 0.0 }
 0xc84   : > { %v5615_v27 = vpop.eup %5614  ;;  %v5145_v58 = vpack.c.bf16 %v4070_v25, %v4070_v25  ;;  %5280 = vmatprep.mubr.msk.f32.mxu1 %vm1384_vm7, %v4070_v25  ;;  %5377 = vmatprep.subr.bf16.mxu1 %v5376_v1  ;;  %v4052_v7 = vadd.f32 %v4051_v31, %v4050_v20  ;;  %v4066_v60 = vadd.f32 %v4065_v3, %v4064_v63  ;;  %v9442_v3 = vld [vmem:[#allocation21_spill] sm:$0xff] }
 0xc85   : > { %v4038_v57 = vmul.f32 %v5615_v27, %v8838_v49 }
 0xc86   : > { %4119 = vst.msk [vmem:[%s5806_s26] sm:$0xf] %vm4118_vm12, %v5145_v58 }
 0xc87   : > { %v4053_v55 = vsel %vm1384_vm7, %v4038_v57, 0.0 }
 0xc88   : > { %v5617_v40 = vpop.eup %5616  ;;  %v4054_v46 = vadd.f32 %v4053_v55, %v4052_v7  ;;  %v5484_v7 = vld [vmem:[%s5834_s27] sm:$0xff]   ;;  %v4443_v55 = vsub.s32 1, %v9442_v3 }
 0xc89   : > { %v4040_v28 = vmul.f32 %v5617_v40, %v8842_v16  ;;  %v4305_v16 = vld [vmem:[%s4304_s18] sm:$0xf]  ;;  %s5150_s18 = sshll.u32 %s5670_s15, 5 }
 0xc8a   : > { %v4071_v34 = vmul.f32 0.25, %v4054_v46  ;;  %5380 = vmatprep.subr.msk.bf16.mxu0 %vm4320_vm13, %v4305_v16  ;;  %v4322_v35 = vsel %vm4320_vm13, %v4305_v16, 0  ;;  %v8925_v40 = vld [vmem:[%s4637_s22] sm:$0x3]  ;;  %s8934_s29 = scalar_lea.vmem %s9026_s8, %s5150_s18  ;;  %s4457_s18 = scalar_lea.vmem %s9025_s7, %s5670_s15 }
 0xc8b   : > { %v4067_v49 = vsel %vm1384_vm7, %v4040_v28, 0.0  ;;  %5291 = vmatpush3.bf16.msra.mxu0 %v4322_v35  ;;  %v8928_v63 = vrot.slane %v8925_v40, %v4443_v55  ;;  %v5486_v46 = vld [vmem:[%s8934_s29] sm:$0xff]   ;;  %v5487_v28 = vld [vmem:[%s8934_s29 + $0x8] sm:$0xff]  }
 0xc8c   : > { %v5146_v59 = vpack.c.bf16 %v4071_v34, %v4071_v34  ;;  %5281 = vmatmul.mubr.msk.f32.vlgmr.msra.gmra.mrb[12].mxu1 %vm1384_vm7, %v4071_v34  ;;  %v4068_v11 = vadd.f32 %v4067_v49, %v4066_v60  ;;  %5304 = vmatprep.subr.bf16.mxu0 %v5486_v46 }
 0xc8d   : > { %5379 = vmatpush3.bf16.msra.mxu1 %v5376_v1  ;;  %5287 = vmatprep.mubr.msk.f32.mxu1 %vm1384_vm7, %v4072_v15 }
 0xc8e   : > { %4120 = vst.msk [vmem:[%s5806_s26 + $0x4] sm:$0xf] %vm4118_vm12, %v5146_v59  ;;  %v4073_v32 = vmul.f32 0.25, %v4068_v11  ;;  %5296 = vmatprep.subr.bf16.mxu1 %v5484_v7 }
 0xc90   : > { %v5148_v9 = vpack.c.bf16 %v4073_v32, %v4073_v32  ;;  %5288 = vmatmul.mubr.msk.f32.vlgmr.msra.gmra.mrb[14].mxu1 %vm1384_vm7, %v4073_v32  ;;  %vm5689_vm7 = vmmov (!%p5132_p9), 0  }
 0xc91   : > { %5297 = vmatpush3.bf16.msra.mxu1 %v5484_v7 }
 0xc92   : > { %4122 = vst.msk [vmem:[%s5806_s26 + $0xc] sm:$0xf] %vm4118_vm12, %v5148_v9  ;;  %5298 = vmatprep.subr.bf16.mxu1 %v5485_v29 }
 0xc95   : > { %5299 = vmatpush3.bf16.msra.mxu1 %v5485_v29 }
 0xd5f   : > { %v5282_v0 = vpop.f32.mrb[12].mxu1 }
 0xd60   : > { %v4203_v62 = vpop.f32.mrb[13].mxu1 }
 0xd61   : > { %v4301_v22 = vpack.c.bf16 %v5282_v0, %v4203_v62 }
 0xd63   : > { %v5289_v13 = vpop.f32.mrb[14].mxu1  ;;  %5292 = vmatprep.mubr.msk.bf16.mxu0 %vm664_vm3, %v4301_v22 }
 0xd64   : > { %v4292_v24 = vpop.f32.mrb[15].mxu1 }
 0xd65   : > { %v4302_v8 = vpack.c.bf16 %v5289_v13, %v4292_v24  ;;  %v4435_v13 = vsub.s32 0, %v9442_v3  ;;  %v4375_v24 = vld [vmem:[%s4374_s19] sm:$0x3] }
 0xd67   : > { %5293 = vmatmul.mubr.msk.bf16.vlgmr.msra.gmra.mrb[8].mxu0 %vm664_vm3, %v4302_v8  ;;  %v4436_v8 = vrot.slane %v4375_v24, %v4435_v13  ;;  %vm4581_vm3 = vcmask 523264  }
 0xd68   : > { %5305 = vmatpush3.bf16.msra.mxu0 %v5486_v46 }
 0xd69   : > { %5306 = vmatprep.subr.bf16.mxu0 %v5487_v28 }
 0xd6c   : > { %5307 = vmatpush3.bf16.msra.mxu0 %v5487_v28 }
 0xe3a   : > { %v5294_v61 = vpop.f32.mrb[8].mxu0 }
 0xe3b   : > { %v4358_v51 = vpop.f32.mrb[9].mxu0  ;;  %v4367_v12 = vadd.f32 %v5294_v61, %v5113_v42 }
 0xe3c   : > { %v4359_v43 = vadd.f32 %v5113_v42, %v4358_v51  ;;  %v5295_v19 = vpop.f32.mrb[10].mxu0 }
 0xe3d   : > { %v4361_v54 = vpop.f32.mrb[11].mxu0  ;;  %v4370_v26 = vadd.f32 %v5295_v19, %v5113_v42  ;;  %v4378_v21 = vadd.f32 %v5635_v4, %v4367_v12  ;;  %v4444_v19 = vrot.slane %v4375_v24, %v4443_v55 }
 0xe3e   : > { %v4376_v2 = vadd.f32 %v5634_v18, %v4359_v43  ;;  %v4362_v39 = vadd.f32 %v5113_v42, %v4361_v54 }
 0xe3f   : > { %v4379_v15 = vadd.f32 %v5637_v41, %v4370_v26  ;;  %v4386_v23 = vsel %vm544_vm2, %v4378_v21, 0.0 }
 0xe40   : > { %v4377_v30 = vadd.f32 %v5636_v37, %v4362_v39  ;;  %v4380_v56 = vsel %vm544_vm2, %v4376_v2, 0.0 }
 0xe41   : > { %4381 = vadd.xlane.f32.xlu1 %v4380_v56  ;;  %v4389_v48 = vsel %vm544_vm2, %v4379_v15, 0.0 }
 0xe42   : > { %v4383_v5 = vsel %vm544_vm2, %v4377_v30, 0.0 }
 0xe43   : > { %4384 = vadd.xlane.f32.xlu0 %v4383_v5 }
 0xe45   : > { %4387 = vadd.xlane.f32.xlu1 %v4386_v23  ;;  %v5488_v23 = vld [vmem:[%s8934_s29 + $0x10] sm:$0xff]  }
 0xe46   : > { %5308 = vmatprep.subr.bf16.mxu0 %v5488_v23 }
 0xe47   : > { %4390 = vadd.xlane.f32.xlu0 %v4389_v48  ;;  %v5489_v48 = vld [vmem:[%s8934_s29 + $0x18] sm:$0xff]   ;;  %5309 = vmatpush3.bf16.msra.mxu0 %v5488_v23  ;;  %s4549_s29 = scalar_lea.vmem %s9027_s9, %s5670_s15 }
 0xe48   : > { %5310 = vmatprep.subr.bf16.mxu0 %v5489_v48 }
 0xe4b   : > { %5311 = vmatpush3.bf16.msra.mxu0 %v5489_v48 }
 0xece   : > { %v4382_v6 = vpop.xlane.xlu1 %4381 }
 0xecf   : > { %v4393_v53 = vmul.f32 0.03125, %v4382_v6  ;;  %v5118_v6 = vld [vmem:[%s4457_s18] ss:$0 sm:$0xff] }
 0xed0   : > { %v4385_v33 = vpop.xlane.xlu0 %4384 }
 0xed1   : > { %v4397_v50 = vsub.f32 %v4376_v2, %v4393_v53  ;;  %v4394_v36 = vmul.f32 0.03125, %v4385_v33 }
 0xed2   : > { %v4388_v14 = vpop.xlane.xlu1 %4387 }
 0xed3   : > { %v4398_v52 = vsub.f32 %v4377_v30, %v4394_v36  ;;  %v4395_v47 = vmul.f32 0.03125, %v4388_v14  ;;  %v4401_v38 = vmul.f32 %v4397_v50, %v4397_v50 }
 0xed4   : > { %v4391_v1 = vpop.xlane.xlu0 %4390 }
 0xed5   : > { %v4399_v25 = vsub.f32 %v4378_v21, %v4395_v47  ;;  %v4396_v10 = vmul.f32 0.03125, %v4391_v1  ;;  %v4405_v45 = vsel %vm544_vm2, %v4401_v38, 0.0  ;;  %v4402_v44 = vmul.f32 %v4398_v52, %v4398_v52 }
 0xed6   : > { %4406 = vadd.xlane.f32.xlu1 %v4405_v45 }
 0xed7   : > { %v4400_v31 = vsub.f32 %v4379_v15, %v4396_v10  ;;  %v4408_v27 = vsel %vm544_vm2, %v4402_v44, 0.0  ;;  %v4403_v20 = vmul.f32 %v4399_v25, %v4399_v25 }
 0xed8   : > { %4409 = vadd.xlane.f32.xlu0 %v4408_v27  ;;  %v5125_v27 = vld [vmem:[%s4549_s29] ss:$0 sm:$0xff] }
 0xed9   : > { %v4411_v58 = vsel %vm544_vm2, %v4403_v20, 0.0  ;;  %v4404_v17 = vmul.f32 %v4400_v31, %v4400_v31 }
 0xeda   : > { %4412 = vadd.xlane.f32.xlu1 %v4411_v58 }
 0xedb   : > { %v4414_v57 = vsel %vm544_vm2, %v4404_v17, 0.0 }
 0xedc   : > { %4415 = vadd.xlane.f32.xlu0 %v4414_v57 }
 0xf63   : > { %v4407_v34 = vpop.xlane.xlu1 %4406 }
 0xf64   : > { %v4417_v60 = vmul.f32 0.03125, %v4407_v34 }
 0xf65   : > { %v4410_v49 = vpop.xlane.xlu0 %4409 }
 0xf66   : > { %v4421_v59 = vadd.f32 1e-05, %v4417_v60  ;;  %v4418_v11 = vmul.f32 0.03125, %v4410_v49 }
 0xf67   : > { %v4413_v32 = vpop.xlane.xlu1 %4412 }
 0xf68   : > { %5618 = vrsqrt.f32 %v4421_v59  ;;  %v4422_v9 = vadd.f32 1e-05, %v4418_v11  ;;  %v4419_v16 = vmul.f32 0.03125, %v4413_v32 }
 0xf69   : > { %v4416_v35 = vpop.xlane.xlu0 %4415 }
 0xf6a   : > { %5620 = vrsqrt.f32 %v4422_v9  ;;  %v4423_v0 = vadd.f32 1e-05, %v4419_v16  ;;  %v4420_v62 = vmul.f32 0.03125, %v4416_v35 }
 0xf6c   : > { %5622 = vrsqrt.f32 %v4423_v0  ;;  %v4424_v22 = vadd.f32 1e-05, %v4420_v62 }
 0xf6e   : > { %5624 = vrsqrt.f32 %v4424_v22 }
 0xf72   : > { %v5619_v42 = vpop.eup %5618 }
 0xf73   : > { %v4429_v61 = vmul.f32 %v5619_v42, %v4397_v50 }
 0xf74   : > { %v5621_v51 = vpop.eup %5620 }
 0xf75   : > { %v4430_v12 = vmul.f32 %v5621_v51, %v4398_v52  ;;  %v4437_v43 = vmul.f32 %v4436_v8, %v4429_v61 }
 0xf76   : > { %v5623_v54 = vpop.eup %5622 }
 0xf77   : > { %v4431_v18 = vmul.f32 %v5623_v54, %v4399_v25  ;;  %v4438_v2 = vmul.f32 %v4436_v8, %v4430_v12  ;;  %v4445_v21 = vadd.f32 %v4444_v19, %v4437_v43 }
 0xf78   : > { %v5625_v26 = vpop.eup %5624 }
 0xf79   : > { %v4439_v39 = vmul.f32 %v4436_v8, %v4431_v18  ;;  %v4432_v4 = vmul.f32 %v5625_v26, %v4400_v31  ;;  %v4446_v37 = vadd.f32 %v4444_v19, %v4438_v2 }
 0xf7b   : > { %v4440_v30 = vmul.f32 %v4436_v8, %v4432_v4  ;;  %v4449_v56 = vpack.c.bf16 %v4446_v37, %v4445_v21  ;;  %v4447_v41 = vadd.f32 %v4444_v19, %v4439_v39 }
 0xf7d   : > { %5300 = vmatprep.mubr.msk.bf16.mxu1 %vm544_vm2, %v4449_v56  ;;  %v4448_v15 = vadd.f32 %v4444_v19, %v4440_v30 }
 0xf7f   : > { %v4450_v5 = vpack.c.bf16 %v4448_v15, %v4447_v41 }
 0xf81   : > { %5301 = vmatmul.mubr.msk.bf16.vlgmr.msra.gmra.mrb[16].mxu1 %vm544_vm2, %v4450_v5 }
0x1054   : > { %v5302_v53 = vpop.f32.mrb[16].mxu1 }
0x1055   : > { %v4526_v33 = vadd.f32 %v5302_v53, %v5118_v6  ;;  %v4517_v50 = vpop.f32.mrb[17].mxu1 }
0x1056   : > { %v4518_v36 = vadd.f32 %v5118_v6, %v4517_v50  ;;  %v5303_v14 = vpop.f32.mrb[18].mxu1 }
0x1057   : > { %v4529_v52 = vadd.f32 %v5303_v14, %v5118_v6  ;;  %v4520_v47 = vpop.f32.mrb[19].mxu1  ;;  %v4534_v1 = vmax.f32 %v4526_v33, 0.0 }
0x1058   : > { %v4521_v38 = vadd.f32 %v5118_v6, %v4520_v47  ;;  %v4532_v10 = vmax.f32 %v4518_v36, 0.0  ;;  %v4698_v36 = vrot.slane %v8925_v40, %v4435_v13 }
0x1059   : > { %v4535_v25 = vmax.f32 %v4529_v52, 0.0 }
0x105a   : > { %v4533_v45 = vmax.f32 %v4521_v38, 0.0 }
0x105b   : > { %v4537_v44 = vpack.c.bf16 %v4535_v25, %v4534_v1 }
0x105c   : > { %v4536_v31 = vpack.c.bf16 %v4533_v45, %v4532_v10 }
0x105e   : > { %5312 = vmatprep.mubr.msk.bf16.mxu0 %vm4581_vm3, %v4536_v31 }
0x105f   : > { %5313 = vmatmul.mubr.msk.bf16.vlgmr.msra.gmra.mrb[12].mxu0 %vm4581_vm3, %v4537_v44 }
0x1132   : > { %v5314_v20 = vpop.f32.mrb[12].mxu0 }
0x1133   : > { %v4622_v58 = vpop.f32.mrb[13].mxu0  ;;  %v4631_v17 = vadd.f32 %v5314_v20, %v5125_v27 }
0x1134   : > { %v4623_v57 = vadd.f32 %v5125_v27, %v4622_v58  ;;  %v5315_v7 = vpop.f32.mrb[14].mxu0 }
0x1135   : > { %v4625_v29 = vpop.f32.mrb[15].mxu0  ;;  %v4634_v46 = vadd.f32 %v5315_v7, %v5125_v27  ;;  %v4641_v34 = vadd.f32 %v4631_v17, %v4447_v41  ;;  %v5638_v17 = vld [vmem:[%s9029_s11] sm:$0xff] (!%p5132_p9)  }
0x1136   : > { %v4639_v55 = vadd.f32 %v4623_v57, %v4445_v21  ;;  %v4626_v28 = vadd.f32 %v5125_v27, %v4625_v29  ;;  %v5688_v29 = vmov (!%p5132_p9), 0.0  }
0x1137   : > { %v4642_v59 = vadd.f32 %v4634_v46, %v4448_v15  ;;  %v4649_v32 = vsel %vm544_vm2, %v4641_v34, 0.0  ;;  %5316 = vmatprep.subr.bf16.mxu0 (!%p5132_p9), %v5688_v29  ;;  %5320 = vmatprep.mubr.msk.bf16.mxu0 (!%p5132_p9), %vm5689_vm7, %v5688_v29 }
0x1138   : > { %v4640_v60 = vadd.f32 %v4626_v28, %v4446_v37  ;;  %v4643_v49 = vsel %vm544_vm2, %v4639_v55, 0.0  ;;  %5317 = vmatpush3.bf16.msra.mxu0 (!%p5132_p9), %v5638_v17 }
0x1139   : > { %4644 = vadd.xlane.f32.xlu1 %v4643_v49  ;;  %v4652_v9 = vsel %vm544_vm2, %v4642_v59, 0.0  ;;  %5318 = vmatprep.subr.bf16.mxu0 (!%p5132_p9), %v5688_v29 }
0x113a   : > { %v4646_v11 = vsel %vm544_vm2, %v4640_v60, 0.0 }
0x113b   : > { %4647 = vadd.xlane.f32.xlu0 %v4646_v11 }
0x113d   : > { %4650 = vadd.xlane.f32.xlu1 %v4649_v32 }
0x113f   : > { %4653 = vadd.xlane.f32.xlu0 %v4652_v9  ;;  %v5133_v9 = vld [vmem:[%s9030_s12] ss:$0 sm:$0xff] (!%p5132_p9) }
0x11c6   : > { %v4645_v16 = vpop.xlane.xlu1 %4644 }
0x11c7   : > { %v4655_v35 = vmul.f32 0.03125, %v4645_v16  ;;  %v9443_v16 = vld [vmem:[#allocation21_spill] sm:$0xff] (!%p5132_p9) }
0x11c8   : > { %v4648_v0 = vpop.xlane.xlu0 %4647 }
0x11c9   : > { %v4659_v62 = vsub.f32 %v4639_v55, %v4655_v35  ;;  %v4656_v22 = vmul.f32 0.03125, %v4648_v0  ;;  %v5639_v55 = vld [vmem:[%s9029_s11 + $0x8] sm:$0xff] (!%p5132_p9)  }
0x11ca   : > { %v4651_v24 = vpop.xlane.xlu1 %4650  ;;  %5319 = vmatpush3.bf16.msra.mxu0 (!%p5132_p9), %v5639_v55 }
0x11cb   : > { %v4660_v8 = vsub.f32 %v4640_v60, %v4656_v22  ;;  %v4657_v42 = vmul.f32 0.03125, %v4651_v24  ;;  %v4663_v61 = vmul.f32 %v4659_v62, %v4659_v62 }
0x11cc   : > { %v4654_v51 = vpop.xlane.xlu0 %4653 }
0x11cd   : > { %v4661_v12 = vsub.f32 %v4641_v34, %v4657_v42  ;;  %v4658_v43 = vmul.f32 0.03125, %v4654_v51  ;;  %v4667_v19 = vsel %vm544_vm2, %v4663_v61, 0.0  ;;  %v4664_v54 = vmul.f32 %v4660_v8, %v4660_v8 }
0x11ce   : > { %4668 = vadd.xlane.f32.xlu1 %v4667_v19 }
0x11cf   : > { %v4662_v18 = vsub.f32 %v4642_v59, %v4658_v43  ;;  %v4670_v2 = vsel %vm544_vm2, %v4664_v54, 0.0  ;;  %v4665_v26 = vmul.f32 %v4661_v12, %v4661_v12  ;;  %v5690_v59 = vmov (!%p5132_p9), 1966171168  }
0x11d0   : > { %4671 = vadd.xlane.f32.xlu0 %v4670_v2  ;;  %v4798_v11 = vunpack.c.l.s4 (!%p5132_p9), %v5690_v59 }
0x11d1   : > { %v4673_v39 = vsel %vm544_vm2, %v4665_v26, 0.0  ;;  %v4666_v4 = vmul.f32 %v4662_v18, %v4662_v18 }
0x11d2   : > { %4674 = vadd.xlane.f32.xlu1 %v4673_v39  ;;  %v4799_v32 = vunpack.c.0.s8 (!%p5132_p9), %v4798_v11 }
0x11d3   : > { %v4676_v21 = vsel %vm544_vm2, %v4666_v4, 0.0 }
0x11d4   : > { %4677 = vadd.xlane.f32.xlu0 %v4676_v21  ;;  %v4802_v35 = vsub.s32 (!%p5132_p9), %v4799_v32, %v9443_v16 }
0x125b   : > { %v4669_v37 = vpop.xlane.xlu1 %4668 }
0x125c   : > { %v4679_v30 = vmul.f32 0.03125, %v4669_v37 }
0x125d   : > { %v4672_v56 = vpop.xlane.xlu0 %4671 }
0x125e   : > { %v4683_v41 = vadd.f32 1e-05, %v4679_v30  ;;  %v4680_v15 = vmul.f32 0.03125, %v4672_v56 }
0x125f   : > { %v4675_v5 = vpop.xlane.xlu1 %4674 }
0x1260   : > { %5626 = vrsqrt.f32 %v4683_v41  ;;  %v4684_v23 = vadd.f32 1e-05, %v4680_v15  ;;  %v4681_v48 = vmul.f32 0.03125, %v4675_v5 }
0x1261   : > { %v4678_v6 = vpop.xlane.xlu0 %4677 }
0x1262   : > { %5628 = vrsqrt.f32 %v4684_v23  ;;  %v4685_v53 = vadd.f32 1e-05, %v4681_v48  ;;  %v4682_v33 = vmul.f32 0.03125, %v4678_v6 }
0x1264   : > { %5630 = vrsqrt.f32 %v4685_v53  ;;  %v4686_v50 = vadd.f32 1e-05, %v4682_v33 }
0x1266   : > { %5632 = vrsqrt.f32 %v4686_v50 }
0x126a   : > { %v5627_v14 = vpop.eup %5626 }
0x126b   : > { %v4691_v52 = vmul.f32 %v5627_v14, %v4659_v62 }
0x126c   : > { %v5629_v47 = vpop.eup %5628 }
0x126d   : > { %v4699_v38 = vmul.f32 %v4698_v36, %v4691_v52  ;;  %v4692_v1 = vmul.f32 %v5629_v47, %v4660_v8 }
0x126e   : > { %v5631_v25 = vpop.eup %5630 }
0x126f   : > { %v4707_v10 = vadd.f32 %v8928_v63, %v4699_v38  ;;  %v4700_v45 = vmul.f32 %v4698_v36, %v4692_v1  ;;  %v4693_v44 = vmul.f32 %v5631_v25, %v4661_v12 }
0x1270   : > { %v5633_v31 = vpop.eup %5632 }
0x1271   : > { %4711 = vst.msk [vmem:[#allocation2] sm:$0xff] %vm544_vm2, %v4707_v10  ;;  %v4708_v27 = vadd.f32 %v8928_v63, %v4700_v45  ;;  %v4701_v20 = vmul.f32 %v4698_v36, %v4693_v44  ;;  %v4694_v58 = vmul.f32 %v5633_v31, %v4662_v18  ;;  %4718 = sbr.rel (%p5132_p9) target bundleno = 4957 (0x135d), region = 80 }
0x1273   : > { %4712 = vst.msk [vmem:[#allocation2 + $0x8] sm:$0xff] %vm544_vm2, %v4708_v27  ;;  %v4709_v3 = vadd.f32 %v8928_v63, %v4701_v20  ;;  %v4702_v40 = vmul.f32 %v4698_v36, %v4694_v58  ;;  %v4719_v57 = vpack.c.bf16 (!%p5132_p9), %v4708_v27, %v4708_v27 }
0x1275   : > { %4713 = vst.msk [vmem:[#allocation2 + $0x10] sm:$0xff] %vm544_vm2, %v4709_v3  ;;  %v4710_v13 = vadd.f32 %v8928_v63, %v4702_v40  ;;  %v4734_v63 = vunpack.c.l.b16 (!%p5132_p9), %v4719_v57 }
0x1277   : > { %4714 = vst.msk [vmem:[#allocation2 + $0x18] sm:$0xff] %vm544_vm2, %v4710_v13  ;;  %v4720_v7 = vpack.c.bf16 (!%p5132_p9), %v4710_v13, %v4710_v13  ;;  %v4736_v28 = vrot.slane (!%p5132_p9), %v4734_v63, 3 }
0x1279   : > { %v4735_v46 = vunpack.c.l.b16 %v4720_v7 }
0x127b   : > { %v4737_v34 = vrot.slane %v4735_v46, 2 }
0x127d   : > { %v4739_v60 = vsel %vm4738_vm14, %v4737_v34, %v4736_v28 }
0x127e   : > { %v4740_v49 = vpack.c.b16 %v4739_v60, %v4739_v60 }
0x1280   : > { %5321 = vmatmul.mubr.msk.bf16.vlgmr.msra.gmra.mrb[0].mxu0 %vm544_vm2, %v4740_v49 }
0x1353   : > { %v4790_v0 = vpop.f32.mrb[0].mxu0 }
0x1354   : > { %v4791_v62 = vadd.f32 %v5133_v9, %v4790_v0  ;;  %v5322_v22 = vpop.f32.mrb[1].mxu0 }
0x1355   : > { %v4793_v24 = vpop.f32.mrb[2].mxu0 }
0x1356   : > { %v4803_v8 = vrot.slane %v4791_v62, %v4802_v35  ;;  %v5323_v42 = vpop.f32.mrb[3].mxu0 }
0x1358   : > { %v4804_v61 = vcombine.high %v4803_v8, %v4803_v8  ;;  %v4811_v51 = vrot.slane %v4803_v8, %v4802_v35 }
0x135a   : > { %v4818_v12 = vrot.slane %v4804_v61, %v4802_v35  ;;  %4822 = vst.msk [vmem:[%s9032_s14] sm:$0x1] %vm4821_vm15, %v4811_v51 }
0x135c   : > { %4823 = vst.msk [vmem:[%s9032_s14 + $0x1] sm:$0x1] %vm4821_vm15, %v4818_v12 }
0x135d PF: > { %4834 = sbr.rel (!%p5795_p3) target bundleno = 4964 (0x1364), region = 84  ;;  %s5151_s28 = sshll.u32 (%p5795_p3), %s5670_s15, 3  ;;  %v4856_v43 = vld [vmem:[%s5806_s26] sm:$0xff] (%p5795_p3)   ;;  %v4860_v19 = vld [vmem:[%s5806_s26 + $0x8] sm:$0xff] (%p5795_p3)  }
0x135e   : > { %s4840_s22 = scalar_lea.vmem (%p5795_p3), %s9031_s13, %s5151_s28 }
0x135f   : > { %4857 = vst [vmem:[%s4840_s22] sm:$0xff] (%p5795_p3), %v4856_v43   ;;  %4861 = vst [vmem:[%s4840_s22 + $0x10] sm:$0xff] (%p5795_p3), %v4860_v19  }
0x1364 PF: > { %s25_s17 = sadd.s32 1, %s5678_s17   ;;  %s9444_s21 = sld [smem:[#allocation4_spill]] }
0x1365   : > { %p22_p10 = scmp.ge.s32.totalorder %s25_s17, 4   ;;  %s9445_s29 = smov %s5666_s30 }
0x1366   : > { %s9446_s30 = smov %s5804_s23  ;;  %s9447_s15 = smov %s5674_s16 }
0x1367   :  { %24 = sbr.rel (!%p22_p10) target bundleno = 3 (0x3), region = 173 }
0x136a   : > { %s9448_s16 = smov %s9444_s21 }

</bundles_post_ra>
